<compile_context>
chip_gen: v6e
topology: v6e:2x2x1
jax: 0.10.0
libtpu: 0.0.40
codegen_flags: <defaults>
</compile_context>

<pallas_src>
import functools
import numpy as np

import jax
import jax.numpy as jnp
from jax import lax
from jax.experimental import pallas as pl
from jax.experimental.pallas import tpu as pltpu


# ----------------------------------------------------------------------------
# Hyper-parameters (small, synthetic) -- static Python, never passed through jit
# ----------------------------------------------------------------------------
HP = dict(
    vocab_size=20,
    max_seq_len=32,
    encoder_hidden=32,
    encoder_layers=2,
    encoder_heads=2,
    decoder_hidden=32,
    decoder_layers=2,
    decoder_heads=2,
    fft_filter=64,
    fft_kernel=(9, 1),
    variance_filter=32,
    variance_kernel=3,
    n_bins=16,
    n_mels=8,
    postnet_dim=32,
    postnet_kernel=5,
    postnet_layers=5,
    spker_embed_dim=32,   # must equal encoder_hidden (SpeakerIntegrator adds it)
    spker_embed_std=0.01,
    n_spkers=1,
)

MXU_DTYPE = jnp.bfloat16   # matmul operand dtype; accumulation & elementwise f32
LN_EPS = 1e-5
VEC_W = 128                # lane width of packed small-vector slabs


# ----------------------------------------------------------------------------
# In-kernel helpers (traced inside Pallas kernels)
# ----------------------------------------------------------------------------
def _mm(a, b):
    """MXU matmul: bf16 operands, f32 accumulation (astype is a no-op on bf16)."""
    return jnp.dot(a.astype(MXU_DTYPE), b.astype(MXU_DTYPE),
                   preferred_element_type=jnp.float32)


def _mm_nt(a, b):
    """a @ b.T (contract last dims of both) without an explicit transpose."""
    return lax.dot_general(a.astype(MXU_DTYPE), b.astype(MXU_DTYPE),
                           (((1,), (1,)), ((), ())),
                           preferred_element_type=jnp.float32)


def _layernorm(x, g, b, eps=LN_EPS):
    mean = jnp.mean(x, axis=-1, keepdims=True)
    var = jnp.mean(jnp.square(x - mean), axis=-1, keepdims=True)
    return (x - mean) * lax.rsqrt(var + eps) * g + b


def _conv1d_im2col(x, w, b, pad_ref, *, relu=False, tanh=False):
    """Same-padded 1D conv on a (T, Cin) tile via ONE im2col matmul.

    w: (K*Cin, Cout) bf16 (tap-major im2col layout), b: (1, Cout) f32.
    Zero padding lives in a VMEM scratch ref (pad_ref: (T+K-1, Cin)); the
    im2col matrix is built by lane-concatenating K shifted reads of it.
    Numerically identical to torch Conv1d (cross-correlation).
    """
    T, cin = x.shape
    k = w.shape[0] // cin
    pad = (k - 1) // 2
    pad_ref[...] = jnp.zeros(pad_ref.shape, pad_ref.dtype)
    pad_ref[pad:pad + T, :] = x
    cols = jnp.concatenate([pad_ref[j:j + T, :] for j in range(k)], axis=1)
    y = _mm(cols, w) + b                     # (T, Cout), f32
    if relu:
        y = jnp.maximum(y, 0.0)
    if tanh:
        y = jnp.tanh(y)
    return y


def _fft_stack(x, neg, keep, wqkv_ref, wo_ref, w1_ref, w2_ref, vec_ref, pad_ref,
               *, n_layers, n_head):
    """Run `n_layers` FFT blocks (MHA + post-LN + conv-FFN + post-LN) on (T, D).

    vec_ref: (L, 8, 128) f32 slab; rows per layer:
      0 bqkv(3D) 1 bo(D) 2 ln1_g 3 ln1_b 4 b1(F) 5 b2(D) 6 ln2_g 7 ln2_b
    """
    T, D = x.shape
    H = n_head
    Dh = D // H
    F = w1_ref.shape[-1]
    for l in range(n_layers):                       # static unroll over layers
        # ---- multi-head self attention (fused QKV, heads handled in-kernel) --
        qkv = _mm(x, wqkv_ref[l]) + vec_ref[l, 0:1, :3 * D]   # (T, 3D)
        heads = []
        for h in range(H):                          # static unroll over heads
            q = qkv[:, h * Dh:(h + 1) * Dh]
            k = qkv[:, D + h * Dh:D + (h + 1) * Dh]
            v = qkv[:, 2 * D + h * Dh:2 * D + (h + 1) * Dh]
            s = _mm_nt(q, k) + neg                  # (T, T); scale folded in Wq
            s = s - jnp.max(s, axis=-1, keepdims=True)
            p = jnp.exp(s)
            p = p * pl.reciprocal(jnp.sum(p, axis=-1, keepdims=True), approx=True)
            heads.append(_mm(p, v))                 # (T, Dh)
        ctx = jnp.concatenate(heads, axis=1)        # (T, D) -- one Wo matmul
        attn = _mm(ctx, wo_ref[l]) + vec_ref[l, 1:2, :D]
        x1 = _layernorm(attn + x, vec_ref[l, 2:3, :D], vec_ref[l, 3:4, :D]) * keep

        # ---- position-wise FFN: conv(K) -> relu -> conv(1) -> +res -> LN ----
        y = _conv1d_im2col(x1, w1_ref[l], vec_ref[l, 4:5, :F], pad_ref, relu=True)
        y = _mm(y, w2_ref[l]) + vec_ref[l, 5:6, :D]           # second conv K==1
        x = _layernorm(y + x1, vec_ref[l, 6:7, :D], vec_ref[l, 7:8, :D]) * keep
    return x


def _variance_predictor(x, keep, w1, w2, wl, vec, pad1_ref, pad2_ref):
    """conv->relu->LN->conv->relu->LN->linear->mask.   vec rows:
    0 b1, 1 g1, 2 be1, 3 b2, 4 g2, 5 be2, 6 bl."""
    F = w1.shape[-1]
    y = _conv1d_im2col(x, w1, vec[0:1, :F], pad1_ref, relu=True)
    y = _layernorm(y, vec[1:2, :F], vec[2:3, :F])
    y = _conv1d_im2col(y, w2, vec[3:4, :F], pad2_ref, relu=True)
    y = _layernorm(y, vec[4:5, :F], vec[5:6, :F])
    y = _mm(y, wl) + vec[6:7, :1]                   # (T, 1)
    return y * keep


# ----------------------------------------------------------------------------
# Fused Pallas kernels (one pallas_call each; grid=(B,))
# ----------------------------------------------------------------------------
def _encoder_kernel(x_ref, mrow_ref, mcol_ref, spk_ref,
                    wqkv_ref, wo_ref, w1_ref, w2_ref, vec_ref,
                    dw1_ref, dw2_ref, dwl_ref, dvec_ref,
                    xo_ref, dur_ref,
                    fft_pad, vp_pad1, vp_pad2,
                    *, n_layers, n_head):
    """Whole encoder stack + SpeakerIntegrator + duration predictor."""
    x = x_ref[0].astype(jnp.float32)                # (T, D)
    neg = mrow_ref[0] * (-1e9)                      # (1, T) bias on padded keys
    keep = 1.0 - mcol_ref[0]                        # (T, 1) zero padded frames
    x = _fft_stack(x, neg, keep, wqkv_ref, wo_ref, w1_ref, w2_ref, vec_ref,
                   fft_pad, n_layers=n_layers, n_head=n_head)
    x = x + spk_ref[0]                              # SpeakerIntegrator (no mask)
    xo_ref[0] = x.astype(xo_ref.dtype)
    logd = _variance_predictor(x, keep, dw1_ref[...], dw2_ref[...], dwl_ref[...],
                               dvec_ref[...], vp_pad1, vp_pad2)
    dur_ref[0] = logd.astype(dur_ref.dtype)


def _pitch_energy_kernel(x_ref, mcol_ref,
                         w1_ref, w2_ref, wl_ref, vec_ref,
                         o_ref, pad1, pad2):
    """Pitch & energy variance predictors fused (one output slab (T, 2))."""
    x = x_ref[0].astype(jnp.float32)
    keep = 1.0 - mcol_ref[0]
    outs = []
    for i in range(2):                              # 0 = pitch, 1 = energy
        outs.append(_variance_predictor(x, keep, w1_ref[i], w2_ref[i],
                                        wl_ref[i], vec_ref[i], pad1, pad2))
    o_ref[0] = jnp.concatenate(outs, axis=1).astype(o_ref.dtype)


def _decoder_mel_kernel(x_ref, mrow_ref, mcol_ref,
                        wqkv_ref, wo_ref, w1_ref, w2_ref, vec_ref,
                        tw_ref, hvec_ref, *rest, n_layers, n_head, n_post):
    """Whole decoder stack + to_mel + PostNet (eval BN folded) + residual + mask.

    hvec rows: 0 to_mel bias, 1..n_post postnet conv biases.
    Output slab: concat([mel, mel_postnet], lane axis) -> (T, 2*n_mels).
    """
    pn_w = rest[:n_post]
    o_ref = rest[n_post]
    fft_pad = rest[n_post + 1]
    pn_pad_a = rest[n_post + 2]      # (T+K-1, n_mels)
    pn_pad_b = rest[n_post + 3]      # (T+K-1, postnet_dim)

    x = x_ref[0].astype(jnp.float32)
    neg = mrow_ref[0] * (-1e9)
    keep = 1.0 - mcol_ref[0]
    x = _fft_stack(x, neg, keep, wqkv_ref, wo_ref, w1_ref, w2_ref, vec_ref,
                   fft_pad, n_layers=n_layers, n_head=n_head)

    n_mels = tw_ref.shape[1]
    mel = _mm(x, tw_ref[...]) + hvec_ref[0:1, :n_mels]        # (T, n_mels)
    y = mel
    for i in range(n_post):                        # static unroll over layers
        w = pn_w[i][...]
        cout = w.shape[1]
        pad_ref = pn_pad_a if y.shape[1] == pn_pad_a.shape[1] else pn_pad_b
        y = _conv1d_im2col(y, w, hvec_ref[i + 1:i + 2, :cout], pad_ref,
                           tanh=(i < n_post - 1))
    post = y + mel
    o_ref[0] = (jnp.concatenate([mel, post], axis=1) * keep).astype(o_ref.dtype)


# ----------------------------------------------------------------------------
# pallas_call wrappers
# ----------------------------------------------------------------------------
def _full_spec(a):
    n = a.ndim
    return pl.BlockSpec(a.shape, lambda *_: (0,) * n)


def _batch_spec(shape):
    n = len(shape)
    return pl.BlockSpec((1,) + tuple(shape[1:]), lambda i: (i,) + (0,) * (n - 1))


def encoder_and_duration(x, mrow, mcol, spk, enc_p, dur_p, *, n_head):
    B, T, D = x.shape
    fft_k = HP["fft_kernel"][0]
    var_k = HP["variance_kernel"]
    fv = dur_p["w1"].shape[-1]
    n_layers = enc_p["wqkv"].shape[0]
    weights = [enc_p["wqkv"], enc_p["wo"], enc_p["w1"], enc_p["w2"], enc_p["vec"],
               dur_p["w1"], dur_p["w2"], dur_p["wl"], dur_p["vec"]]
    out, logd = pl.pallas_call(
        functools.partial(_encoder_kernel, n_layers=n_layers, n_head=n_head),
        out_shape=(jax.ShapeDtypeStruct((B, T, D), jnp.float32),
                   jax.ShapeDtypeStruct((B, T, 1), jnp.float32)),
        grid=(B,),
        in_specs=[_batch_spec(x.shape), _batch_spec(mrow.shape),
                  _batch_spec(mcol.shape), _batch_spec(spk.shape)]
                 + [_full_spec(w) for w in weights],
        out_specs=(_batch_spec((B, T, D)), _batch_spec((B, T, 1))),
        scratch_shapes=[pltpu.VMEM((T + fft_k - 1, D), jnp.float32),
                        pltpu.VMEM((T + var_k - 1, D), jnp.float32),
                        pltpu.VMEM((T + var_k - 1, fv), jnp.float32)],
        compiler_params=pltpu.CompilerParams(dimension_semantics=("parallel",)),
    )(x, mrow, mcol, spk, *weights)
    return out, logd[..., 0]


def pitch_energy(x, mcol, pe_p):
    B, T, D = x.shape
    var_k = HP["variance_kernel"]
    fv = pe_p["w1"].shape[-1]
    weights = [pe_p["w1"], pe_p["w2"], pe_p["wl"], pe_p["vec"]]
    out = pl.pallas_call(
        _pitch_energy_kernel,
        out_shape=jax.ShapeDtypeStruct((B, T, 2), jnp.float32),
        grid=(B,),
        in_specs=[_batch_spec(x.shape), _batch_spec(mcol.shape)]
                 + [_full_spec(w) for w in weights],
        out_specs=_batch_spec((B, T, 2)),
        scratch_shapes=[pltpu.VMEM((T + var_k - 1, D), jnp.float32),
                        pltpu.VMEM((T + var_k - 1, fv), jnp.float32)],
        compiler_params=pltpu.CompilerParams(dimension_semantics=("parallel",)),
    )(x, mcol, *weights)
    return out[..., 0], out[..., 1]


def decoder_mel_postnet(x, mrow, mcol, dec_p, to_mel_w, hvec, pn_ws, *, n_head):
    B, T, D = x.shape
    fft_k = HP["fft_kernel"][0]
    pk = HP["postnet_kernel"]
    n_mels = to_mel_w.shape[1]
    pdim = pn_ws[0].shape[1]
    n_layers = dec_p["wqkv"].shape[0]
    n_post = len(pn_ws)
    weights = [dec_p["wqkv"], dec_p["wo"], dec_p["w1"], dec_p["w2"], dec_p["vec"],
               to_mel_w, hvec] + list(pn_ws)
    out = pl.pallas_call(
        functools.partial(_decoder_mel_kernel, n_layers=n_layers,
                          n_head=n_head, n_post=n_post),
        out_shape=jax.ShapeDtypeStruct((B, T, 2 * n_mels), jnp.float32),
        grid=(B,),
        in_specs=[_batch_spec(x.shape), _batch_spec(mrow.shape),
                  _batch_spec(mcol.shape)] + [_full_spec(w) for w in weights],
        out_specs=_batch_spec((B, T, 2 * n_mels)),
        scratch_shapes=[pltpu.VMEM((T + fft_k - 1, D), jnp.float32),
                        pltpu.VMEM((T + pk - 1, n_mels), jnp.float32),
                        pltpu.VMEM((T + pk - 1, pdim), jnp.float32)],
        compiler_params=pltpu.CompilerParams(dimension_semantics=("parallel",)),
    )(x, mrow, mcol, *weights)
    return out[..., :n_mels], out[..., n_mels:]


# ----------------------------------------------------------------------------
# Model composition (plain-JAX glue around the 3 fused kernels)
# ----------------------------------------------------------------------------
def get_mask_from_lengths(lengths, max_len):
    ids = jnp.arange(max_len)
    return (ids[None, :] >= lengths[:, None]).astype(jnp.float32)  # 1.0 = pad


def length_regulator(x, durations, max_mel_len):
    # TODO(synk): data-dependent duration expansion (gather) stays in plain JAX;
    # no clean static-index Pallas equivalent.
    cum = jnp.cumsum(durations, axis=1)                     # (B, T)
    mel_len = cum[:, -1]
    pos = jnp.arange(max_mel_len)                           # (M,)
    idx = jnp.sum(pos[None, :, None] >= cum[:, None, :], axis=-1)   # (B, M)
    idx = jnp.clip(idx, 0, x.shape[1] - 1)
    expanded = jnp.take_along_axis(x, idx[:, :, None], axis=1)
    valid = (pos[None, :] < mel_len[:, None]).astype(x.dtype)
    return expanded * valid[:, :, None], mel_len


def fastspeech2_forward(params, spker_ids, text_seq, text_len, d_gt, p_gt, e_gt,
                        mel_len, max_text_len, max_mel_len):
    text_mask = get_mask_from_lengths(text_len, max_text_len)   # (B, Tt)
    mel_mask = get_mask_from_lengths(mel_len, max_mel_len)      # (B, Tm)
    t_mrow = text_mask[:, None, :]
    t_mcol = text_mask[:, :, None]
    m_mrow = mel_mask[:, None, :]
    m_mcol = mel_mask[:, :, None]

    spker_embed = params["spker_embeds"][spker_ids]             # (B, D)
    spk3 = spker_embed[:, None, :]                              # (B, 1, D)

    # TODO(synk): embedding gather + positional-encoding add stay in plain JAX.
    x = params["word_emb"][text_seq] + params["pos_enc"][:text_seq.shape[1]][None]

    # Kernel 1: encoder stack + speaker add + duration predictor (teacher forced).
    enc_out, d_pred = encoder_and_duration(
        x, t_mrow, t_mcol, spk3, params["encoder"], params["duration"],
        n_head=HP["encoder_heads"])

    lr_out, _ = length_regulator(enc_out, d_gt, max_mel_len)

    # Kernel 2: pitch + energy predictors on the expanded sequence.
    p_pred, e_pred = pitch_energy(lr_out, m_mcol, params["pitch_energy"])

    # searchsorted(side='left') matches torch.bucketize(right=False).
    pitch_emb = params["pitch_emb"][jnp.searchsorted(params["pitch_bins"], p_gt,
                                                     side="left")]
    energy_emb = params["energy_emb"][jnp.searchsorted(params["energy_bins"], e_gt,
                                                       side="left")]
    va_out = lr_out + pitch_emb + energy_emb

    # Second SpeakerIntegrator + decoder positional encoding (plain JAX adds).
    dec_in = va_out + spker_embed[:, None, :] + params["pos_enc"][:max_mel_len][None]

    # Kernel 3: decoder stack + to_mel + PostNet + residual + mask.
    mel, mel_post = decoder_mel_postnet(
        dec_in, m_mrow, m_mcol, params["decoder"], params["to_mel_w"],
        params["head_vec"], params["postnet_ws"], n_head=HP["decoder_heads"])

    pred = (mel, mel_post, d_pred, p_pred, e_pred)
    return pred, text_mask, mel_mask, mel_len


# ----------------------------------------------------------------------------
# Deterministic parameter initialization (fused/packed layouts, arrays only)
# ----------------------------------------------------------------------------
def _rnd(key, shape, std=0.02):
    return jax.random.normal(key, shape, jnp.float32) * std


def _pack_rows(vectors, n_rows=8, width=VEC_W):
    """Pack a list of small 1D vectors into one (n_rows, 128) f32 slab."""
    out = np.zeros((n_rows, width), np.float32)
    for i, v in enumerate(vectors):
        v = np.asarray(v, np.float32).reshape(-1)
        out[i, :v.shape[0]] = v
    return out


def sinusoid_table(n_pos, d):
    pos = np.arange(n_pos)[:, None].astype(np.float64)
    i = np.arange(d)[None, :]
    angle = pos / np.power(10000.0, 2.0 * (i // 2) / d)
    table = np.zeros((n_pos, d), np.float64)
    table[:, 0::2] = np.sin(angle[:, 0::2])
    table[:, 1::2] = np.cos(angle[:, 1::2])
    return jnp.asarray(table, jnp.float32)


def init_fft_stack(key, n_layers, d, h, dff, kernels):
    """Per-kind stacked weights for a stack of FFT blocks (bf16 matrices)."""
    k1, k2 = kernels
    assert k2 == 1, "second FFN conv must have kernel size 1"
    scale = 1.0 / float(np.sqrt(d // h))
    wqkv, wo, w1, w2, vec = [], [], [], [], []
    for lk in jax.random.split(key, n_layers):
        ks = jax.random.split(lk, 6)
        wq = _rnd(ks[0], (d, d)) * scale            # fold 1/sqrt(d_k) into Wq
        wk = _rnd(ks[1], (d, d))
        wv = _rnd(ks[2], (d, d))
        wqkv.append(jnp.concatenate([wq, wk, wv], axis=1))        # (d, 3d)
        wo.append(_rnd(ks[3], (d, d)))
        w1.append(_rnd(ks[4], (k1, d, dff)).reshape(k1 * d, dff))  # im2col layout
        w2.append(_rnd(ks[5], (k2, dff, d)).reshape(dff, d))
        vec.append(_pack_rows([
            np.zeros(3 * d), np.zeros(d),           # bqkv, bo
            np.ones(d), np.zeros(d),                # ln1 gamma / beta
            np.zeros(dff), np.zeros(d),             # b1, b2
            np.ones(d), np.zeros(d)]))              # ln2 gamma / beta
    return dict(
        wqkv=jnp.stack(wqkv).astype(MXU_DTYPE),
        wo=jnp.stack(wo).astype(MXU_DTYPE),
        w1=jnp.stack(w1).astype(MXU_DTYPE),
        w2=jnp.stack(w2).astype(MXU_DTYPE),
        vec=jnp.asarray(np.stack(vec), jnp.float32))


def init_predictor(key, d, f, k):
    ks = jax.random.split(key, 3)
    vec = _pack_rows([np.zeros(f), np.ones(f), np.zeros(f),   # b1, g1, be1
                      np.zeros(f), np.ones(f), np.zeros(f),   # b2, g2, be2
                      np.zeros(1)])                           # bl
    return dict(
        w1=_rnd(ks[0], (k, d, f)).reshape(k * d, f).astype(MXU_DTYPE),
        w2=_rnd(ks[1], (k, f, f)).reshape(k * f, f).astype(MXU_DTYPE),
        wl=_rnd(ks[2], (f, 1)).astype(MXU_DTYPE),
        vec=jnp.asarray(vec, jnp.float32))


def stack_predictors(ps):
    return dict(w1=jnp.stack([p["w1"] for p in ps]),
                w2=jnp.stack([p["w2"] for p in ps]),
                wl=jnp.stack([p["wl"] for p in ps]),
                vec=jnp.stack([p["vec"] for p in ps]))


def init_postnet(key, n_mels, pdim, k, n_layers):
    chans = [n_mels] + [pdim] * (n_layers - 1) + [n_mels]
    ks = jax.random.split(key, n_layers)
    eps = 1e-5
    bn_scale = 1.0 / float(np.sqrt(1.0 + eps))   # eval BN folded: g=1,b=0,m=0,v=1
    ws, bs = [], []
    for i in range(n_layers):
        w = _rnd(ks[i], (k, chans[i], chans[i + 1])) * bn_scale
        ws.append(w.reshape(k * chans[i], chans[i + 1]).astype(MXU_DTYPE))
        bs.append(np.zeros(chans[i + 1], np.float32))
    return ws, bs


def init_params(key, hp):
    ks = jax.random.split(key, 12)
    d = hp["encoder_hidden"]
    pos_enc = sinusoid_table(hp["max_seq_len"], d)

    enc = init_fft_stack(ks[0], hp["encoder_layers"], d, hp["encoder_heads"],
                         hp["fft_filter"], hp["fft_kernel"])
    dec = init_fft_stack(ks[1], hp["decoder_layers"], hp["decoder_hidden"],
                         hp["decoder_heads"], hp["fft_filter"], hp["fft_kernel"])

    word_emb = _rnd(ks[2], (hp["vocab_size"], d))
    spker_embeds = (jax.random.normal(ks[3], (hp["n_spkers"], hp["spker_embed_dim"]),
                                      jnp.float32) * hp["spker_embed_std"])

    dur_p = init_predictor(ks[4], d, hp["variance_filter"], hp["variance_kernel"])
    pitch_p = init_predictor(ks[5], d, hp["variance_filter"], hp["variance_kernel"])
    energy_p = init_predictor(ks[6], d, hp["variance_filter"], hp["variance_kernel"])

    pn_ws, pn_bs = init_postnet(ks[10], hp["n_mels"], hp["postnet_dim"],
                                hp["postnet_kernel"], hp["postnet_layers"])
    head_vec = _pack_rows([np.zeros(hp["n_mels"])] + pn_bs)   # to_mel_b + pn biases

    return dict(
        spker_embeds=spker_embeds,
        word_emb=word_emb,
        pos_enc=pos_enc,
        encoder=enc,
        decoder=dec,
        duration=dur_p,
        pitch_energy=stack_predictors([pitch_p, energy_p]),
        pitch_bins=jnp.linspace(0.0, 1.0, hp["n_bins"] - 1),
        energy_bins=jnp.linspace(0.0, 1.0, hp["n_bins"] - 1),
        pitch_emb=_rnd(ks[7], (hp["n_bins"], d)),
        energy_emb=_rnd(ks[8], (hp["n_bins"], d)),
        to_mel_w=_rnd(ks[9], (hp["decoder_hidden"], hp["n_mels"])).astype(MXU_DTYPE),
        head_vec=jnp.asarray(head_vec, jnp.float32),
        postnet_ws=tuple(pn_ws),
    )


# ----------------------------------------------------------------------------
# Main
# ----------------------------------------------------------------------------
if __name__ == "__main__":
    key = jax.random.PRNGKey(0)
    k_param, k_txt, k_pitch, k_energy = jax.random.split(key, 4)

    params = init_params(k_param, HP)

    B = 2
    T_TEXT = 8
    T_MEL = 16

    spker_ids = jnp.zeros((B,), jnp.int32)
    text_seq = jax.random.randint(k_txt, (B, T_TEXT), 1, HP["vocab_size"]).astype(jnp.int32)
    text_len = jnp.array([8, 6], jnp.int32)
    d_gt = jnp.array([[2, 2, 2, 2, 2, 2, 2, 2],
                      [3, 3, 2, 2, 2, 2, 0, 0]], jnp.int32)     # sums: 16, 14
    mel_len = jnp.sum(d_gt, axis=1)
    p_gt = jax.random.uniform(k_pitch, (B, T_MEL), jnp.float32)
    e_gt = jax.random.uniform(k_energy, (B, T_MEL), jnp.float32)

    fwd = jax.jit(fastspeech2_forward,
                  static_argnames=("max_text_len", "max_mel_len"))
    (pred, text_mask, mel_mask, mel_len_out) = fwd(
        params, spker_ids, text_seq, text_len, d_gt, p_gt, e_gt, mel_len,
        max_text_len=T_TEXT, max_mel_len=T_MEL)

    mel, mel_post, d_pred, p_pred, e_pred = pred
    jax.block_until_ready(mel_post)
    assert mel.shape == (B, T_MEL, HP["n_mels"])
    assert mel_post.shape == (B, T_MEL, HP["n_mels"])
    assert d_pred.shape == (B, T_TEXT)
    assert p_pred.shape == (B, T_MEL)
    assert e_pred.shape == (B, T_MEL)
    assert bool(jnp.all(jnp.isfinite(mel_post)))
    assert bool(jnp.all(jnp.isfinite(mel)))
    print("KERNEL_OK")
</pallas_src>

<mosaic_0001>
module attributes {stable_mosaic.version = 11 : i64} {
  func.func @_encoder_kernel(%arg0: i32, %arg1: memref<1x8x32xf32, #tpu.memory_space<vmem>>, %arg2: memref<1x1x8xf32, #tpu.memory_space<vmem>>, %arg3: memref<1x8x1xf32, #tpu.memory_space<vmem>>, %arg4: memref<1x1x32xf32, #tpu.memory_space<vmem>>, %arg5: memref<2x32x96xbf16, #tpu.memory_space<vmem>>, %arg6: memref<2x32x32xbf16, #tpu.memory_space<vmem>>, %arg7: memref<2x288x64xbf16, #tpu.memory_space<vmem>>, %arg8: memref<2x64x32xbf16, #tpu.memory_space<vmem>>, %arg9: memref<2x8x128xf32, #tpu.memory_space<vmem>>, %arg10: memref<96x32xbf16, #tpu.memory_space<vmem>>, %arg11: memref<96x32xbf16, #tpu.memory_space<vmem>>, %arg12: memref<32x1xbf16, #tpu.memory_space<vmem>>, %arg13: memref<8x128xf32, #tpu.memory_space<vmem>>, %arg14: memref<1x8x32xf32, #tpu.memory_space<vmem>>, %arg15: memref<1x8x1xf32, #tpu.memory_space<vmem>>, %arg16: memref<16x32xf32, #tpu.memory_space<vmem>>, %arg17: memref<10x32xf32, #tpu.memory_space<vmem>>, %arg18: memref<10x32xf32, #tpu.memory_space<vmem>>) attributes {dimension_semantics = [#tpu.dimension_semantics<parallel>], iteration_bounds = array<i64: 2>, scalar_prefetch = 0 : i64, scratch_operands = 3 : i64, tpu.core_type = #tpu.core_type<tc>, window_params = [{transform_indices = @transform_0, window_bounds = array<i64: 1, 8, 32>}, {transform_indices = @transform_1, window_bounds = array<i64: 1, 1, 8>}, {transform_indices = @transform_2, window_bounds = array<i64: 1, 8, 1>}, {transform_indices = @transform_3, window_bounds = array<i64: 1, 1, 32>}, {pipeline_mode = #tpu.pipeline_mode<synchronous>, transform_indices = @transform_4, window_bounds = array<i64: 2, 32, 96>}, {pipeline_mode = #tpu.pipeline_mode<synchronous>, transform_indices = @transform_5, window_bounds = array<i64: 2, 32, 32>}, {pipeline_mode = #tpu.pipeline_mode<synchronous>, transform_indices = @transform_6, window_bounds = array<i64: 2, 288, 64>}, {pipeline_mode = #tpu.pipeline_mode<synchronous>, transform_indices = @transform_7, window_bounds = array<i64: 2, 64, 32>}, {pipeline_mode = #tpu.pipeline_mode<synchronous>, transform_indices = @transform_8, window_bounds = array<i64: 2, 8, 128>}, {pipeline_mode = #tpu.pipeline_mode<synchronous>, transform_indices = @transform_9, window_bounds = array<i64: 96, 32>}, {pipeline_mode = #tpu.pipeline_mode<synchronous>, transform_indices = @transform_10, window_bounds = array<i64: 96, 32>}, {pipeline_mode = #tpu.pipeline_mode<synchronous>, transform_indices = @transform_11, window_bounds = array<i64: 32, 1>}, {pipeline_mode = #tpu.pipeline_mode<synchronous>, transform_indices = @transform_12, window_bounds = array<i64: 8, 128>}, {transform_indices = @transform_13, window_bounds = array<i64: 1, 8, 32>}, {transform_indices = @transform_14, window_bounds = array<i64: 1, 8, 1>}]} {
    %c0 = arith.constant 0 : index
    %c0_0 = arith.constant 0 : index
    %c0_1 = arith.constant 0 : index
    %0 = vector.load %arg1[%c0, %c0_0, %c0_1] : memref<1x8x32xf32, #tpu.memory_space<vmem>>, vector<1x8x32xf32>
    %1 = vector.shape_cast %0 : vector<1x8x32xf32> to vector<8x32xf32>
    %c0_2 = arith.constant 0 : index
    %c0_3 = arith.constant 0 : index
    %c0_4 = arith.constant 0 : index
    %2 = vector.load %arg2[%c0_2, %c0_3, %c0_4] : memref<1x1x8xf32, #tpu.memory_space<vmem>>, vector<1x1x8xf32>
    %3 = vector.shape_cast %2 : vector<1x1x8xf32> to vector<1x8xf32>
    %cst = arith.constant -1.000000e+09 : f32
    %4 = vector.broadcast %cst : f32 to vector<1x8xf32>
    %5 = arith.mulf %3, %4 : vector<1x8xf32>
    %c0_5 = arith.constant 0 : index
    %c0_6 = arith.constant 0 : index
    %c0_7 = arith.constant 0 : index
    %6 = vector.load %arg3[%c0_5, %c0_6, %c0_7] : memref<1x8x1xf32, #tpu.memory_space<vmem>>, vector<1x8x1xf32>
    %7 = vector.shape_cast %6 : vector<1x8x1xf32> to vector<8x1xf32>
    %cst_8 = arith.constant 1.000000e+00 : f32
    %8 = vector.broadcast %cst_8 : f32 to vector<8x1xf32>
    %9 = arith.subf %8, %7 : vector<8x1xf32>
    %c0_9 = arith.constant 0 : index
    %c0_10 = arith.constant 0 : index
    %c0_11 = arith.constant 0 : index
    %10 = vector.load %arg5[%c0_9, %c0_10, %c0_11] : memref<2x32x96xbf16, #tpu.memory_space<vmem>>, vector<1x32x96xbf16>
    %11 = vector.shape_cast %10 : vector<1x32x96xbf16> to vector<32x96xbf16>
    %12 = arith.truncf %1 : vector<8x32xf32> to vector<8x32xbf16>
    %cst_12 = arith.constant dense<0.000000e+00> : vector<8x96xf32>
    %13 = tpu.matmul %12, %11, %cst_12 {dimension_numbers = #tpu.dot_dimension_numbers<[1], [0], [0], [1], [0, 0, 1, 1], [], []>} : vector<8x32xbf16>, vector<32x96xbf16>, vector<8x96xf32> -> vector<8x96xf32>
    %c0_13 = arith.constant 0 : index
    %c0_14 = arith.constant 0 : index
    %c0_15 = arith.constant 0 : index
    %14 = vector.load %arg9[%c0_13, %c0_14, %c0_15] : memref<2x8x128xf32, #tpu.memory_space<vmem>>, vector<1x1x96xf32>
    %15 = vector.shape_cast %14 : vector<1x1x96xf32> to vector<1x96xf32>
    %16 = vector.broadcast %15 : vector<1x96xf32> to vector<8x96xf32>
    %17 = arith.addf %13, %16 : vector<8x96xf32>
    %18 = vector.extract_strided_slice %17 {offsets = [0, 0], sizes = [8, 16], strides = [1, 1]} : vector<8x96xf32> to vector<8x16xf32>
    %19 = vector.extract_strided_slice %17 {offsets = [0, 32], sizes = [8, 16], strides = [1, 1]} : vector<8x96xf32> to vector<8x16xf32>
    %20 = vector.extract_strided_slice %17 {offsets = [0, 64], sizes = [8, 16], strides = [1, 1]} : vector<8x96xf32> to vector<8x16xf32>
    %21 = arith.truncf %18 : vector<8x16xf32> to vector<8x16xbf16>
    %22 = arith.truncf %19 : vector<8x16xf32> to vector<8x16xbf16>
    %cst_16 = arith.constant dense<0.000000e+00> : vector<8x8xf32>
    %23 = tpu.matmul %21, %22, %cst_16 {dimension_numbers = #tpu.dot_dimension_numbers<[1], [1], [0], [0], [0, 0, 1, 0], [], []>} : vector<8x16xbf16>, vector<8x16xbf16>, vector<8x8xf32> -> vector<8x8xf32>
    %24 = vector.broadcast %5 : vector<1x8xf32> to vector<8x8xf32>
    %25 = arith.addf %23, %24 : vector<8x8xf32>
    %cst_17 = arith.constant dense<0xFF800000> : vector<8xf32>
    %26 = vector.multi_reduction <maximumf>, %25, %cst_17 [1] : vector<8x8xf32> to vector<8xf32>
    %27 = vector.shape_cast %26 : vector<8xf32> to vector<8x1xf32>
    %28 = vector.broadcast %27 : vector<8x1xf32> to vector<8x8xf32>
    %29 = arith.subf %25, %28 : vector<8x8xf32>
    %30 = math.exp %29 : vector<8x8xf32>
    %cst_18 = arith.constant dense<0.000000e+00> : vector<8xf32>
    %31 = vector.multi_reduction <add>, %30, %cst_18 [1] : vector<8x8xf32> to vector<8xf32>
    %32 = vector.shape_cast %31 : vector<8xf32> to vector<8x1xf32>
    %33 = tpu.reciprocal %32 {approx = true} : vector<8x1xf32> -> vector<8x1xf32>
    %34 = vector.broadcast %33 : vector<8x1xf32> to vector<8x8xf32>
    %35 = arith.mulf %30, %34 : vector<8x8xf32>
    %36 = arith.truncf %35 : vector<8x8xf32> to vector<8x8xbf16>
    %37 = arith.truncf %20 : vector<8x16xf32> to vector<8x16xbf16>
    %cst_19 = arith.constant dense<0.000000e+00> : vector<8x16xf32>
    %38 = tpu.matmul %36, %37, %cst_19 {dimension_numbers = #tpu.dot_dimension_numbers<[1], [0], [0], [1], [0, 0, 1, 1], [], []>} : vector<8x8xbf16>, vector<8x16xbf16>, vector<8x16xf32> -> vector<8x16xf32>
    %39 = vector.extract_strided_slice %17 {offsets = [0, 16], sizes = [8, 16], strides = [1, 1]} : vector<8x96xf32> to vector<8x16xf32>
    %40 = vector.extract_strided_slice %17 {offsets = [0, 48], sizes = [8, 16], strides = [1, 1]} : vector<8x96xf32> to vector<8x16xf32>
    %41 = vector.extract_strided_slice %17 {offsets = [0, 80], sizes = [8, 16], strides = [1, 1]} : vector<8x96xf32> to vector<8x16xf32>
    %42 = arith.truncf %39 : vector<8x16xf32> to vector<8x16xbf16>
    %43 = arith.truncf %40 : vector<8x16xf32> to vector<8x16xbf16>
    %cst_20 = arith.constant dense<0.000000e+00> : vector<8x8xf32>
    %44 = tpu.matmul %42, %43, %cst_20 {dimension_numbers = #tpu.dot_dimension_numbers<[1], [1], [0], [0], [0, 0, 1, 0], [], []>} : vector<8x16xbf16>, vector<8x16xbf16>, vector<8x8xf32> -> vector<8x8xf32>
    %45 = vector.broadcast %5 : vector<1x8xf32> to vector<8x8xf32>
    %46 = arith.addf %44, %45 : vector<8x8xf32>
    %cst_21 = arith.constant dense<0xFF800000> : vector<8xf32>
    %47 = vector.multi_reduction <maximumf>, %46, %cst_21 [1] : vector<8x8xf32> to vector<8xf32>
    %48 = vector.shape_cast %47 : vector<8xf32> to vector<8x1xf32>
    %49 = vector.broadcast %48 : vector<8x1xf32> to vector<8x8xf32>
    %50 = arith.subf %46, %49 : vector<8x8xf32>
    %51 = math.exp %50 : vector<8x8xf32>
    %cst_22 = arith.constant dense<0.000000e+00> : vector<8xf32>
    %52 = vector.multi_reduction <add>, %51, %cst_22 [1] : vector<8x8xf32> to vector<8xf32>
    %53 = vector.shape_cast %52 : vector<8xf32> to vector<8x1xf32>
    %54 = tpu.reciprocal %53 {approx = true} : vector<8x1xf32> -> vector<8x1xf32>
    %55 = vector.broadcast %54 : vector<8x1xf32> to vector<8x8xf32>
    %56 = arith.mulf %51, %55 : vector<8x8xf32>
    %57 = arith.truncf %56 : vector<8x8xf32> to vector<8x8xbf16>
    %58 = arith.truncf %41 : vector<8x16xf32> to vector<8x16xbf16>
    %cst_23 = arith.constant dense<0.000000e+00> : vector<8x16xf32>
    %59 = tpu.matmul %57, %58, %cst_23 {dimension_numbers = #tpu.dot_dimension_numbers<[1], [0], [0], [1], [0, 0, 1, 1], [], []>} : vector<8x8xbf16>, vector<8x16xbf16>, vector<8x16xf32> -> vector<8x16xf32>
    %60 = tpu.concatenate %38, %59 in 1 : vector<8x16xf32>, vector<8x16xf32> -> vector<8x32xf32>
    %c0_24 = arith.constant 0 : index
    %c0_25 = arith.constant 0 : index
    %c0_26 = arith.constant 0 : index
    %61 = vector.load %arg6[%c0_24, %c0_25, %c0_26] : memref<2x32x32xbf16, #tpu.memory_space<vmem>>, vector<1x32x32xbf16>
    %62 = vector.shape_cast %61 : vector<1x32x32xbf16> to vector<32x32xbf16>
    %63 = arith.truncf %60 : vector<8x32xf32> to vector<8x32xbf16>
    %cst_27 = arith.constant dense<0.000000e+00> : vector<8x32xf32>
    %64 = tpu.matmul %63, %62, %cst_27 {dimension_numbers = #tpu.dot_dimension_numbers<[1], [0], [0], [1], [0, 0, 1, 1], [], []>} : vector<8x32xbf16>, vector<32x32xbf16>, vector<8x32xf32> -> vector<8x32xf32>
    %c0_28 = arith.constant 0 : index
    %c1 = arith.constant 1 : index
    %c0_29 = arith.constant 0 : index
    %65 = vector.load %arg9[%c0_28, %c1, %c0_29] : memref<2x8x128xf32, #tpu.memory_space<vmem>>, vector<1x1x32xf32>
    %66 = vector.shape_cast %65 : vector<1x1x32xf32> to vector<1x32xf32>
    %67 = vector.broadcast %66 : vector<1x32xf32> to vector<8x32xf32>
    %68 = arith.addf %64, %67 : vector<8x32xf32>
    %69 = arith.addf %68, %1 : vector<8x32xf32>
    %c0_30 = arith.constant 0 : index
    %c2 = arith.constant 2 : index
    %c0_31 = arith.constant 0 : index
    %70 = vector.load %arg9[%c0_30, %c2, %c0_31] : memref<2x8x128xf32, #tpu.memory_space<vmem>>, vector<1x1x32xf32>
    %71 = vector.shape_cast %70 : vector<1x1x32xf32> to vector<1x32xf32>
    %c0_32 = arith.constant 0 : index
    %c3 = arith.constant 3 : index
    %c0_33 = arith.constant 0 : index
    %72 = vector.load %arg9[%c0_32, %c3, %c0_33] : memref<2x8x128xf32, #tpu.memory_space<vmem>>, vector<1x1x32xf32>
    %73 = vector.shape_cast %72 : vector<1x1x32xf32> to vector<1x32xf32>
    %cst_34 = arith.constant dense<0.000000e+00> : vector<8xf32>
    %74 = vector.multi_reduction <add>, %69, %cst_34 [1] : vector<8x32xf32> to vector<8xf32>
    %75 = vector.shape_cast %74 : vector<8xf32> to vector<8x1xf32>
    %cst_35 = arith.constant 3.200000e+01 : f32
    %76 = vector.broadcast %cst_35 : f32 to vector<8x1xf32>
    %77 = arith.divf %75, %76 : vector<8x1xf32>
    %78 = vector.broadcast %77 : vector<8x1xf32> to vector<8x32xf32>
    %79 = arith.subf %69, %78 : vector<8x32xf32>
    %80 = arith.mulf %79, %79 : vector<8x32xf32>
    %cst_36 = arith.constant dense<0.000000e+00> : vector<8xf32>
    %81 = vector.multi_reduction <add>, %80, %cst_36 [1] : vector<8x32xf32> to vector<8xf32>
    %82 = vector.shape_cast %81 : vector<8xf32> to vector<8x1xf32>
    %cst_37 = arith.constant 3.200000e+01 : f32
    %83 = vector.broadcast %cst_37 : f32 to vector<8x1xf32>
    %84 = arith.divf %82, %83 : vector<8x1xf32>
    %85 = vector.broadcast %77 : vector<8x1xf32> to vector<8x32xf32>
    %86 = arith.subf %69, %85 : vector<8x32xf32>
    %cst_38 = arith.constant 9.99999974E-6 : f32
    %87 = vector.broadcast %cst_38 : f32 to vector<8x1xf32>
    %88 = arith.addf %84, %87 : vector<8x1xf32>
    %89 = math.rsqrt %88 : vector<8x1xf32>
    %90 = vector.broadcast %89 : vector<8x1xf32> to vector<8x32xf32>
    %91 = arith.mulf %86, %90 : vector<8x32xf32>
    %92 = vector.broadcast %71 : vector<1x32xf32> to vector<8x32xf32>
    %93 = arith.mulf %91, %92 : vector<8x32xf32>
    %94 = vector.broadcast %73 : vector<1x32xf32> to vector<8x32xf32>
    %95 = arith.addf %93, %94 : vector<8x32xf32>
    %96 = vector.broadcast %9 : vector<8x1xf32> to vector<8x32xf32>
    %97 = arith.mulf %95, %96 : vector<8x32xf32>
    %c0_39 = arith.constant 0 : index
    %c0_40 = arith.constant 0 : index
    %c0_41 = arith.constant 0 : index
    %98 = vector.load %arg7[%c0_39, %c0_40, %c0_41] : memref<2x288x64xbf16, #tpu.memory_space<vmem>>, vector<1x288x64xbf16>
    %99 = vector.shape_cast %98 : vector<1x288x64xbf16> to vector<288x64xbf16>
    %c0_42 = arith.constant 0 : index
    %c4 = arith.constant 4 : index
    %c0_43 = arith.constant 0 : index
    %100 = vector.load %arg9[%c0_42, %c4, %c0_43] : memref<2x8x128xf32, #tpu.memory_space<vmem>>, vector<1x1x64xf32>
    %101 = vector.shape_cast %100 : vector<1x1x64xf32> to vector<1x64xf32>
    %cst_44 = arith.constant 0.000000e+00 : f32
    %102 = vector.broadcast %cst_44 : f32 to vector<16x32xf32>
    %c0_45 = arith.constant 0 : index
    %c0_46 = arith.constant 0 : index
    %103 = vector.load %arg16[%c0_45, %c0_46] : memref<16x32xf32, #tpu.memory_space<vmem>>, vector<16x32xf32>
    tpu.vector_store %arg16[%c0_45, %c0_46], %102 {strides = array<i32>} : memref<16x32xf32, #tpu.memory_space<vmem>>, vector<16x32xf32>,
    %c4_47 = arith.constant 4 : index
    %c0_48 = arith.constant 0 : index
    %104 = vector.load %arg16[%c4_47, %c0_48] : memref<16x32xf32, #tpu.memory_space<vmem>>, vector<8x32xf32>
    tpu.vector_store %arg16[%c4_47, %c0_48], %97 {strides = array<i32>} : memref<16x32xf32, #tpu.memory_space<vmem>>, vector<8x32xf32>,
    %c0_49 = arith.constant 0 : index
    %c0_50 = arith.constant 0 : index
    %105 = vector.load %arg16[%c0_49, %c0_50] : memref<16x32xf32, #tpu.memory_space<vmem>>, vector<8x32xf32>
    %c1_51 = arith.constant 1 : index
    %c0_52 = arith.constant 0 : index
    %106 = vector.load %arg16[%c1_51, %c0_52] : memref<16x32xf32, #tpu.memory_space<vmem>>, vector<8x32xf32>
    %c2_53 = arith.constant 2 : index
    %c0_54 = arith.constant 0 : index
    %107 = vector.load %arg16[%c2_53, %c0_54] : memref<16x32xf32, #tpu.memory_space<vmem>>, vector<8x32xf32>
    %c3_55 = arith.constant 3 : index
    %c0_56 = arith.constant 0 : index
    %108 = vector.load %arg16[%c3_55, %c0_56] : memref<16x32xf32, #tpu.memory_space<vmem>>, vector<8x32xf32>
    %c4_57 = arith.constant 4 : index
    %c0_58 = arith.constant 0 : index
    %109 = vector.load %arg16[%c4_57, %c0_58] : memref<16x32xf32, #tpu.memory_space<vmem>>, vector<8x32xf32>
    %c5 = arith.constant 5 : index
    %c0_59 = arith.constant 0 : index
    %110 = vector.load %arg16[%c5, %c0_59] : memref<16x32xf32, #tpu.memory_space<vmem>>, vector<8x32xf32>
    %c6 = arith.constant 6 : index
    %c0_60 = arith.constant 0 : index
    %111 = vector.load %arg16[%c6, %c0_60] : memref<16x32xf32, #tpu.memory_space<vmem>>, vector<8x32xf32>
    %c7 = arith.constant 7 : index
    %c0_61 = arith.constant 0 : index
    %112 = vector.load %arg16[%c7, %c0_61] : memref<16x32xf32, #tpu.memory_space<vmem>>, vector<8x32xf32>
    %c8 = arith.constant 8 : index
    %c0_62 = arith.constant 0 : index
    %113 = vector.load %arg16[%c8, %c0_62] : memref<16x32xf32, #tpu.memory_space<vmem>>, vector<8x32xf32>
    %114 = tpu.concatenate %105, %106, %107, %108, %109, %110, %111, %112, %113 in 1 : vector<8x32xf32>, vector<8x32xf32>, vector<8x32xf32>, vector<8x32xf32>, vector<8x32xf32>, vector<8x32xf32>, vector<8x32xf32>, vector<8x32xf32>, vector<8x32xf32> -> vector<8x288xf32>
    %115 = arith.truncf %114 : vector<8x288xf32> to vector<8x288xbf16>
    %cst_63 = arith.constant dense<0.000000e+00> : vector<8x64xf32>
    %116 = tpu.matmul %115, %99, %cst_63 {dimension_numbers = #tpu.dot_dimension_numbers<[1], [0], [0], [1], [0, 0, 1, 1], [], []>} : vector<8x288xbf16>, vector<288x64xbf16>, vector<8x64xf32> -> vector<8x64xf32>
    %117 = vector.broadcast %101 : vector<1x64xf32> to vector<8x64xf32>
    %118 = arith.addf %116, %117 : vector<8x64xf32>
    %cst_64 = arith.constant 0.000000e+00 : f32
    %119 = vector.broadcast %cst_64 : f32 to vector<8x64xf32>
    %120 = arith.maximumf %118, %119 : vector<8x64xf32>
    %c0_65 = arith.constant 0 : index
    %c0_66 = arith.constant 0 : index
    %c0_67 = arith.constant 0 : index
    %121 = vector.load %arg8[%c0_65, %c0_66, %c0_67] : memref<2x64x32xbf16, #tpu.memory_space<vmem>>, vector<1x64x32xbf16>
    %122 = vector.shape_cast %121 : vector<1x64x32xbf16> to vector<64x32xbf16>
    %123 = arith.truncf %120 : vector<8x64xf32> to vector<8x64xbf16>
    %cst_68 = arith.constant dense<0.000000e+00> : vector<8x32xf32>
    %124 = tpu.matmul %123, %122, %cst_68 {dimension_numbers = #tpu.dot_dimension_numbers<[1], [0], [0], [1], [0, 0, 1, 1], [], []>} : vector<8x64xbf16>, vector<64x32xbf16>, vector<8x32xf32> -> vector<8x32xf32>
    %c0_69 = arith.constant 0 : index
    %c5_70 = arith.constant 5 : index
    %c0_71 = arith.constant 0 : index
    %125 = vector.load %arg9[%c0_69, %c5_70, %c0_71] : memref<2x8x128xf32, #tpu.memory_space<vmem>>, vector<1x1x32xf32>
    %126 = vector.shape_cast %125 : vector<1x1x32xf32> to vector<1x32xf32>
    %127 = vector.broadcast %126 : vector<1x32xf32> to vector<8x32xf32>
    %128 = arith.addf %124, %127 : vector<8x32xf32>
    %129 = arith.addf %128, %97 : vector<8x32xf32>
    %c0_72 = arith.constant 0 : index
    %c6_73 = arith.constant 6 : index
    %c0_74 = arith.constant 0 : index
    %130 = vector.load %arg9[%c0_72, %c6_73, %c0_74] : memref<2x8x128xf32, #tpu.memory_space<vmem>>, vector<1x1x32xf32>
    %131 = vector.shape_cast %130 : vector<1x1x32xf32> to vector<1x32xf32>
    %c0_75 = arith.constant 0 : index
    %c7_76 = arith.constant 7 : index
    %c0_77 = arith.constant 0 : index
    %132 = vector.load %arg9[%c0_75, %c7_76, %c0_77] : memref<2x8x128xf32, #tpu.memory_space<vmem>>, vector<1x1x32xf32>
    %133 = vector.shape_cast %132 : vector<1x1x32xf32> to vector<1x32xf32>
    %cst_78 = arith.constant dense<0.000000e+00> : vector<8xf32>
    %134 = vector.multi_reduction <add>, %129, %cst_78 [1] : vector<8x32xf32> to vector<8xf32>
    %135 = vector.shape_cast %134 : vector<8xf32> to vector<8x1xf32>
    %cst_79 = arith.constant 3.200000e+01 : f32
    %136 = vector.broadcast %cst_79 : f32 to vector<8x1xf32>
    %137 = arith.divf %135, %136 : vector<8x1xf32>
    %138 = vector.broadcast %137 : vector<8x1xf32> to vector<8x32xf32>
    %139 = arith.subf %129, %138 : vector<8x32xf32>
    %140 = arith.mulf %139, %139 : vector<8x32xf32>
    %cst_80 = arith.constant dense<0.000000e+00> : vector<8xf32>
    %141 = vector.multi_reduction <add>, %140, %cst_80 [1] : vector<8x32xf32> to vector<8xf32>
    %142 = vector.shape_cast %141 : vector<8xf32> to vector<8x1xf32>
    %cst_81 = arith.constant 3.200000e+01 : f32
    %143 = vector.broadcast %cst_81 : f32 to vector<8x1xf32>
    %144 = arith.divf %142, %143 : vector<8x1xf32>
    %145 = vector.broadcast %137 : vector<8x1xf32> to vector<8x32xf32>
    %146 = arith.subf %129, %145 : vector<8x32xf32>
    %cst_82 = arith.constant 9.99999974E-6 : f32
    %147 = vector.broadcast %cst_82 : f32 to vector<8x1xf32>
    %148 = arith.addf %144, %147 : vector<8x1xf32>
    %149 = math.rsqrt %148 : vector<8x1xf32>
    %150 = vector.broadcast %149 : vector<8x1xf32> to vector<8x32xf32>
    %151 = arith.mulf %146, %150 : vector<8x32xf32>
    %152 = vector.broadcast %131 : vector<1x32xf32> to vector<8x32xf32>
    %153 = arith.mulf %151, %152 : vector<8x32xf32>
    %154 = vector.broadcast %133 : vector<1x32xf32> to vector<8x32xf32>
    %155 = arith.addf %153, %154 : vector<8x32xf32>
    %156 = vector.broadcast %9 : vector<8x1xf32> to vector<8x32xf32>
    %157 = arith.mulf %155, %156 : vector<8x32xf32>
    %c1_83 = arith.constant 1 : index
    %c0_84 = arith.constant 0 : index
    %c0_85 = arith.constant 0 : index
    %158 = vector.load %arg5[%c1_83, %c0_84, %c0_85] : memref<2x32x96xbf16, #tpu.memory_space<vmem>>, vector<1x32x96xbf16>
    %159 = vector.shape_cast %158 : vector<1x32x96xbf16> to vector<32x96xbf16>
    %160 = arith.truncf %157 : vector<8x32xf32> to vector<8x32xbf16>
    %cst_86 = arith.constant dense<0.000000e+00> : vector<8x96xf32>
    %161 = tpu.matmul %160, %159, %cst_86 {dimension_numbers = #tpu.dot_dimension_numbers<[1], [0], [0], [1], [0, 0, 1, 1], [], []>} : vector<8x32xbf16>, vector<32x96xbf16>, vector<8x96xf32> -> vector<8x96xf32>
    %c1_87 = arith.constant 1 : index
    %c0_88 = arith.constant 0 : index
    %c0_89 = arith.constant 0 : index
    %162 = vector.load %arg9[%c1_87, %c0_88, %c0_89] : memref<2x8x128xf32, #tpu.memory_space<vmem>>, vector<1x1x96xf32>
    %163 = vector.shape_cast %162 : vector<1x1x96xf32> to vector<1x96xf32>
    %164 = vector.broadcast %163 : vector<1x96xf32> to vector<8x96xf32>
    %165 = arith.addf %161, %164 : vector<8x96xf32>
    %166 = vector.extract_strided_slice %165 {offsets = [0, 0], sizes = [8, 16], strides = [1, 1]} : vector<8x96xf32> to vector<8x16xf32>
    %167 = vector.extract_strided_slice %165 {offsets = [0, 32], sizes = [8, 16], strides = [1, 1]} : vector<8x96xf32> to vector<8x16xf32>
    %168 = vector.extract_strided_slice %165 {offsets = [0, 64], sizes = [8, 16], strides = [1, 1]} : vector<8x96xf32> to vector<8x16xf32>
    %169 = arith.truncf %166 : vector<8x16xf32> to vector<8x16xbf16>
    %170 = arith.truncf %167 : vector<8x16xf32> to vector<8x16xbf16>
    %cst_90 = arith.constant dense<0.000000e+00> : vector<8x8xf32>
    %171 = tpu.matmul %169, %170, %cst_90 {dimension_numbers = #tpu.dot_dimension_numbers<[1], [1], [0], [0], [0, 0, 1, 0], [], []>} : vector<8x16xbf16>, vector<8x16xbf16>, vector<8x8xf32> -> vector<8x8xf32>
    %172 = vector.broadcast %5 : vector<1x8xf32> to vector<8x8xf32>
    %173 = arith.addf %171, %172 : vector<8x8xf32>
    %cst_91 = arith.constant dense<0xFF800000> : vector<8xf32>
    %174 = vector.multi_reduction <maximumf>, %173, %cst_91 [1] : vector<8x8xf32> to vector<8xf32>
    %175 = vector.shape_cast %174 : vector<8xf32> to vector<8x1xf32>
    %176 = vector.broadcast %175 : vector<8x1xf32> to vector<8x8xf32>
    %177 = arith.subf %173, %176 : vector<8x8xf32>
    %178 = math.exp %177 : vector<8x8xf32>
    %cst_92 = arith.constant dense<0.000000e+00> : vector<8xf32>
    %179 = vector.multi_reduction <add>, %178, %cst_92 [1] : vector<8x8xf32> to vector<8xf32>
    %180 = vector.shape_cast %179 : vector<8xf32> to vector<8x1xf32>
    %181 = tpu.reciprocal %180 {approx = true} : vector<8x1xf32> -> vector<8x1xf32>
    %182 = vector.broadcast %181 : vector<8x1xf32> to vector<8x8xf32>
    %183 = arith.mulf %178, %182 : vector<8x8xf32>
    %184 = arith.truncf %183 : vector<8x8xf32> to vector<8x8xbf16>
    %185 = arith.truncf %168 : vector<8x16xf32> to vector<8x16xbf16>
    %cst_93 = arith.constant dense<0.000000e+00> : vector<8x16xf32>
    %186 = tpu.matmul %184, %185, %cst_93 {dimension_numbers = #tpu.dot_dimension_numbers<[1], [0], [0], [1], [0, 0, 1, 1], [], []>} : vector<8x8xbf16>, vector<8x16xbf16>, vector<8x16xf32> -> vector<8x16xf32>
    %187 = vector.extract_strided_slice %165 {offsets = [0, 16], sizes = [8, 16], strides = [1, 1]} : vector<8x96xf32> to vector<8x16xf32>
    %188 = vector.extract_strided_slice %165 {offsets = [0, 48], sizes = [8, 16], strides = [1, 1]} : vector<8x96xf32> to vector<8x16xf32>
    %189 = vector.extract_strided_slice %165 {offsets = [0, 80], sizes = [8, 16], strides = [1, 1]} : vector<8x96xf32> to vector<8x16xf32>
    %190 = arith.truncf %187 : vector<8x16xf32> to vector<8x16xbf16>
    %191 = arith.truncf %188 : vector<8x16xf32> to vector<8x16xbf16>
    %cst_94 = arith.constant dense<0.000000e+00> : vector<8x8xf32>
    %192 = tpu.matmul %190, %191, %cst_94 {dimension_numbers = #tpu.dot_dimension_numbers<[1], [1], [0], [0], [0, 0, 1, 0], [], []>} : vector<8x16xbf16>, vector<8x16xbf16>, vector<8x8xf32> -> vector<8x8xf32>
    %193 = vector.broadcast %5 : vector<1x8xf32> to vector<8x8xf32>
    %194 = arith.addf %192, %193 : vector<8x8xf32>
    %cst_95 = arith.constant dense<0xFF800000> : vector<8xf32>
    %195 = vector.multi_reduction <maximumf>, %194, %cst_95 [1] : vector<8x8xf32> to vector<8xf32>
    %196 = vector.shape_cast %195 : vector<8xf32> to vector<8x1xf32>
    %197 = vector.broadcast %196 : vector<8x1xf32> to vector<8x8xf32>
    %198 = arith.subf %194, %197 : vector<8x8xf32>
    %199 = math.exp %198 : vector<8x8xf32>
    %cst_96 = arith.constant dense<0.000000e+00> : vector<8xf32>
    %200 = vector.multi_reduction <add>, %199, %cst_96 [1] : vector<8x8xf32> to vector<8xf32>
    %201 = vector.shape_cast %200 : vector<8xf32> to vector<8x1xf32>
    %202 = tpu.reciprocal %201 {approx = true} : vector<8x1xf32> -> vector<8x1xf32>
    %203 = vector.broadcast %202 : vector<8x1xf32> to vector<8x8xf32>
    %204 = arith.mulf %199, %203 : vector<8x8xf32>
    %205 = arith.truncf %204 : vector<8x8xf32> to vector<8x8xbf16>
    %206 = arith.truncf %189 : vector<8x16xf32> to vector<8x16xbf16>
    %cst_97 = arith.constant dense<0.000000e+00> : vector<8x16xf32>
    %207 = tpu.matmul %205, %206, %cst_97 {dimension_numbers = #tpu.dot_dimension_numbers<[1], [0], [0], [1], [0, 0, 1, 1], [], []>} : vector<8x8xbf16>, vector<8x16xbf16>, vector<8x16xf32> -> vector<8x16xf32>
    %208 = tpu.concatenate %186, %207 in 1 : vector<8x16xf32>, vector<8x16xf32> -> vector<8x32xf32>
    %c1_98 = arith.constant 1 : index
    %c0_99 = arith.constant 0 : index
    %c0_100 = arith.constant 0 : index
    %209 = vector.load %arg6[%c1_98, %c0_99, %c0_100] : memref<2x32x32xbf16, #tpu.memory_space<vmem>>, vector<1x32x32xbf16>
    %210 = vector.shape_cast %209 : vector<1x32x32xbf16> to vector<32x32xbf16>
    %211 = arith.truncf %208 : vector<8x32xf32> to vector<8x32xbf16>
    %cst_101 = arith.constant dense<0.000000e+00> : vector<8x32xf32>
    %212 = tpu.matmul %211, %210, %cst_101 {dimension_numbers = #tpu.dot_dimension_numbers<[1], [0], [0], [1], [0, 0, 1, 1], [], []>} : vector<8x32xbf16>, vector<32x32xbf16>, vector<8x32xf32> -> vector<8x32xf32>
    %c1_102 = arith.constant 1 : index
    %c1_103 = arith.constant 1 : index
    %c0_104 = arith.constant 0 : index
    %213 = vector.load %arg9[%c1_102, %c1_103, %c0_104] : memref<2x8x128xf32, #tpu.memory_space<vmem>>, vector<1x1x32xf32>
    %214 = vector.shape_cast %213 : vector<1x1x32xf32> to vector<1x32xf32>
    %215 = vector.broadcast %214 : vector<1x32xf32> to vector<8x32xf32>
    %216 = arith.addf %212, %215 : vector<8x32xf32>
    %217 = arith.addf %216, %157 : vector<8x32xf32>
    %c1_105 = arith.constant 1 : index
    %c2_106 = arith.constant 2 : index
    %c0_107 = arith.constant 0 : index
    %218 = vector.load %arg9[%c1_105, %c2_106, %c0_107] : memref<2x8x128xf32, #tpu.memory_space<vmem>>, vector<1x1x32xf32>
    %219 = vector.shape_cast %218 : vector<1x1x32xf32> to vector<1x32xf32>
    %c1_108 = arith.constant 1 : index
    %c3_109 = arith.constant 3 : index
    %c0_110 = arith.constant 0 : index
    %220 = vector.load %arg9[%c1_108, %c3_109, %c0_110] : memref<2x8x128xf32, #tpu.memory_space<vmem>>, vector<1x1x32xf32>
    %221 = vector.shape_cast %220 : vector<1x1x32xf32> to vector<1x32xf32>
    %cst_111 = arith.constant dense<0.000000e+00> : vector<8xf32>
    %222 = vector.multi_reduction <add>, %217, %cst_111 [1] : vector<8x32xf32> to vector<8xf32>
    %223 = vector.shape_cast %222 : vector<8xf32> to vector<8x1xf32>
    %cst_112 = arith.constant 3.200000e+01 : f32
    %224 = vector.broadcast %cst_112 : f32 to vector<8x1xf32>
    %225 = arith.divf %223, %224 : vector<8x1xf32>
    %226 = vector.broadcast %225 : vector<8x1xf32> to vector<8x32xf32>
    %227 = arith.subf %217, %226 : vector<8x32xf32>
    %228 = arith.mulf %227, %227 : vector<8x32xf32>
    %cst_113 = arith.constant dense<0.000000e+00> : vector<8xf32>
    %229 = vector.multi_reduction <add>, %228, %cst_113 [1] : vector<8x32xf32> to vector<8xf32>
    %230 = vector.shape_cast %229 : vector<8xf32> to vector<8x1xf32>
    %cst_114 = arith.constant 3.200000e+01 : f32
    %231 = vector.broadcast %cst_114 : f32 to vector<8x1xf32>
    %232 = arith.divf %230, %231 : vector<8x1xf32>
    %233 = vector.broadcast %225 : vector<8x1xf32> to vector<8x32xf32>
    %234 = arith.subf %217, %233 : vector<8x32xf32>
    %cst_115 = arith.constant 9.99999974E-6 : f32
    %235 = vector.broadcast %cst_115 : f32 to vector<8x1xf32>
    %236 = arith.addf %232, %235 : vector<8x1xf32>
    %237 = math.rsqrt %236 : vector<8x1xf32>
    %238 = vector.broadcast %237 : vector<8x1xf32> to vector<8x32xf32>
    %239 = arith.mulf %234, %238 : vector<8x32xf32>
    %240 = vector.broadcast %219 : vector<1x32xf32> to vector<8x32xf32>
    %241 = arith.mulf %239, %240 : vector<8x32xf32>
    %242 = vector.broadcast %221 : vector<1x32xf32> to vector<8x32xf32>
    %243 = arith.addf %241, %242 : vector<8x32xf32>
    %244 = vector.broadcast %9 : vector<8x1xf32> to vector<8x32xf32>
    %245 = arith.mulf %243, %244 : vector<8x32xf32>
    %c1_116 = arith.constant 1 : index
    %c0_117 = arith.constant 0 : index
    %c0_118 = arith.constant 0 : index
    %246 = vector.load %arg7[%c1_116, %c0_117, %c0_118] : memref<2x288x64xbf16, #tpu.memory_space<vmem>>, vector<1x288x64xbf16>
    %247 = vector.shape_cast %246 : vector<1x288x64xbf16> to vector<288x64xbf16>
    %c1_119 = arith.constant 1 : index
    %c4_120 = arith.constant 4 : index
    %c0_121 = arith.constant 0 : index
    %248 = vector.load %arg9[%c1_119, %c4_120, %c0_121] : memref<2x8x128xf32, #tpu.memory_space<vmem>>, vector<1x1x64xf32>
    %249 = vector.shape_cast %248 : vector<1x1x64xf32> to vector<1x64xf32>
    %cst_122 = arith.constant 0.000000e+00 : f32
    %250 = vector.broadcast %cst_122 : f32 to vector<16x32xf32>
    %c0_123 = arith.constant 0 : index
    %c0_124 = arith.constant 0 : index
    %251 = vector.load %arg16[%c0_123, %c0_124] : memref<16x32xf32, #tpu.memory_space<vmem>>, vector<16x32xf32>
    tpu.vector_store %arg16[%c0_123, %c0_124], %250 {strides = array<i32>} : memref<16x32xf32, #tpu.memory_space<vmem>>, vector<16x32xf32>,
    %c4_125 = arith.constant 4 : index
    %c0_126 = arith.constant 0 : index
    %252 = vector.load %arg16[%c4_125, %c0_126] : memref<16x32xf32, #tpu.memory_space<vmem>>, vector<8x32xf32>
    tpu.vector_store %arg16[%c4_125, %c0_126], %245 {strides = array<i32>} : memref<16x32xf32, #tpu.memory_space<vmem>>, vector<8x32xf32>,
    %c0_127 = arith.constant 0 : index
    %c0_128 = arith.constant 0 : index
    %253 = vector.load %arg16[%c0_127, %c0_128] : memref<16x32xf32, #tpu.memory_space<vmem>>, vector<8x32xf32>
    %c1_129 = arith.constant 1 : index
    %c0_130 = arith.constant 0 : index
    %254 = vector.load %arg16[%c1_129, %c0_130] : memref<16x32xf32, #tpu.memory_space<vmem>>, vector<8x32xf32>
    %c2_131 = arith.constant 2 : index
    %c0_132 = arith.constant 0 : index
    %255 = vector.load %arg16[%c2_131, %c0_132] : memref<16x32xf32, #tpu.memory_space<vmem>>, vector<8x32xf32>
    %c3_133 = arith.constant 3 : index
    %c0_134 = arith.constant 0 : index
    %256 = vector.load %arg16[%c3_133, %c0_134] : memref<16x32xf32, #tpu.memory_space<vmem>>, vector<8x32xf32>
    %c4_135 = arith.constant 4 : index
    %c0_136 = arith.constant 0 : index
    %257 = vector.load %arg16[%c4_135, %c0_136] : memref<16x32xf32, #tpu.memory_space<vmem>>, vector<8x32xf32>
    %c5_137 = arith.constant 5 : index
    %c0_138 = arith.constant 0 : index
    %258 = vector.load %arg16[%c5_137, %c0_138] : memref<16x32xf32, #tpu.memory_space<vmem>>, vector<8x32xf32>
    %c6_139 = arith.constant 6 : index
    %c0_140 = arith.constant 0 : index
    %259 = vector.load %arg16[%c6_139, %c0_140] : memref<16x32xf32, #tpu.memory_space<vmem>>, vector<8x32xf32>
    %c7_141 = arith.constant 7 : index
    %c0_142 = arith.constant 0 : index
    %260 = vector.load %arg16[%c7_141, %c0_142] : memref<16x32xf32, #tpu.memory_space<vmem>>, vector<8x32xf32>
    %c8_143 = arith.constant 8 : index
    %c0_144 = arith.constant 0 : index
    %261 = vector.load %arg16[%c8_143, %c0_144] : memref<16x32xf32, #tpu.memory_space<vmem>>, vector<8x32xf32>
    %262 = tpu.concatenate %253, %254, %255, %256, %257, %258, %259, %260, %261 in 1 : vector<8x32xf32>, vector<8x32xf32>, vector<8x32xf32>, vector<8x32xf32>, vector<8x32xf32>, vector<8x32xf32>, vector<8x32xf32>, vector<8x32xf32>, vector<8x32xf32> -> vector<8x288xf32>
    %263 = arith.truncf %262 : vector<8x288xf32> to vector<8x288xbf16>
    %cst_145 = arith.constant dense<0.000000e+00> : vector<8x64xf32>
    %264 = tpu.matmul %263, %247, %cst_145 {dimension_numbers = #tpu.dot_dimension_numbers<[1], [0], [0], [1], [0, 0, 1, 1], [], []>} : vector<8x288xbf16>, vector<288x64xbf16>, vector<8x64xf32> -> vector<8x64xf32>
    %265 = vector.broadcast %249 : vector<1x64xf32> to vector<8x64xf32>
    %266 = arith.addf %264, %265 : vector<8x64xf32>
    %cst_146 = arith.constant 0.000000e+00 : f32
    %267 = vector.broadcast %cst_146 : f32 to vector<8x64xf32>
    %268 = arith.maximumf %266, %267 : vector<8x64xf32>
    %c1_147 = arith.constant 1 : index
    %c0_148 = arith.constant 0 : index
    %c0_149 = arith.constant 0 : index
    %269 = vector.load %arg8[%c1_147, %c0_148, %c0_149] : memref<2x64x32xbf16, #tpu.memory_space<vmem>>, vector<1x64x32xbf16>
    %270 = vector.shape_cast %269 : vector<1x64x32xbf16> to vector<64x32xbf16>
    %271 = arith.truncf %268 : vector<8x64xf32> to vector<8x64xbf16>
    %cst_150 = arith.constant dense<0.000000e+00> : vector<8x32xf32>
    %272 = tpu.matmul %271, %270, %cst_150 {dimension_numbers = #tpu.dot_dimension_numbers<[1], [0], [0], [1], [0, 0, 1, 1], [], []>} : vector<8x64xbf16>, vector<64x32xbf16>, vector<8x32xf32> -> vector<8x32xf32>
    %c1_151 = arith.constant 1 : index
    %c5_152 = arith.constant 5 : index
    %c0_153 = arith.constant 0 : index
    %273 = vector.load %arg9[%c1_151, %c5_152, %c0_153] : memref<2x8x128xf32, #tpu.memory_space<vmem>>, vector<1x1x32xf32>
    %274 = vector.shape_cast %273 : vector<1x1x32xf32> to vector<1x32xf32>
    %275 = vector.broadcast %274 : vector<1x32xf32> to vector<8x32xf32>
    %276 = arith.addf %272, %275 : vector<8x32xf32>
    %277 = arith.addf %276, %245 : vector<8x32xf32>
    %c1_154 = arith.constant 1 : index
    %c6_155 = arith.constant 6 : index
    %c0_156 = arith.constant 0 : index
    %278 = vector.load %arg9[%c1_154, %c6_155, %c0_156] : memref<2x8x128xf32, #tpu.memory_space<vmem>>, vector<1x1x32xf32>
    %279 = vector.shape_cast %278 : vector<1x1x32xf32> to vector<1x32xf32>
    %c1_157 = arith.constant 1 : index
    %c7_158 = arith.constant 7 : index
    %c0_159 = arith.constant 0 : index
    %280 = vector.load %arg9[%c1_157, %c7_158, %c0_159] : memref<2x8x128xf32, #tpu.memory_space<vmem>>, vector<1x1x32xf32>
    %281 = vector.shape_cast %280 : vector<1x1x32xf32> to vector<1x32xf32>
    %cst_160 = arith.constant dense<0.000000e+00> : vector<8xf32>
    %282 = vector.multi_reduction <add>, %277, %cst_160 [1] : vector<8x32xf32> to vector<8xf32>
    %283 = vector.shape_cast %282 : vector<8xf32> to vector<8x1xf32>
    %cst_161 = arith.constant 3.200000e+01 : f32
    %284 = vector.broadcast %cst_161 : f32 to vector<8x1xf32>
    %285 = arith.divf %283, %284 : vector<8x1xf32>
    %286 = vector.broadcast %285 : vector<8x1xf32> to vector<8x32xf32>
    %287 = arith.subf %277, %286 : vector<8x32xf32>
    %288 = arith.mulf %287, %287 : vector<8x32xf32>
    %cst_162 = arith.constant dense<0.000000e+00> : vector<8xf32>
    %289 = vector.multi_reduction <add>, %288, %cst_162 [1] : vector<8x32xf32> to vector<8xf32>
    %290 = vector.shape_cast %289 : vector<8xf32> to vector<8x1xf32>
    %cst_163 = arith.constant 3.200000e+01 : f32
    %291 = vector.broadcast %cst_163 : f32 to vector<8x1xf32>
    %292 = arith.divf %290, %291 : vector<8x1xf32>
    %293 = vector.broadcast %285 : vector<8x1xf32> to vector<8x32xf32>
    %294 = arith.subf %277, %293 : vector<8x32xf32>
    %cst_164 = arith.constant 9.99999974E-6 : f32
    %295 = vector.broadcast %cst_164 : f32 to vector<8x1xf32>
    %296 = arith.addf %292, %295 : vector<8x1xf32>
    %297 = math.rsqrt %296 : vector<8x1xf32>
    %298 = vector.broadcast %297 : vector<8x1xf32> to vector<8x32xf32>
    %299 = arith.mulf %294, %298 : vector<8x32xf32>
    %300 = vector.broadcast %279 : vector<1x32xf32> to vector<8x32xf32>
    %301 = arith.mulf %299, %300 : vector<8x32xf32>
    %302 = vector.broadcast %281 : vector<1x32xf32> to vector<8x32xf32>
    %303 = arith.addf %301, %302 : vector<8x32xf32>
    %304 = vector.broadcast %9 : vector<8x1xf32> to vector<8x32xf32>
    %305 = arith.mulf %303, %304 : vector<8x32xf32>
    %c0_165 = arith.constant 0 : index
    %c0_166 = arith.constant 0 : index
    %c0_167 = arith.constant 0 : index
    %306 = vector.load %arg4[%c0_165, %c0_166, %c0_167] : memref<1x1x32xf32, #tpu.memory_space<vmem>>, vector<1x1x32xf32>
    %307 = vector.shape_cast %306 : vector<1x1x32xf32> to vector<1x32xf32>
    %308 = vector.broadcast %307 : vector<1x32xf32> to vector<8x32xf32>
    %309 = arith.addf %305, %308 : vector<8x32xf32>
    %c0_168 = arith.constant 0 : index
    %c0_169 = arith.constant 0 : index
    %c0_170 = arith.constant 0 : index
    %310 = vector.load %arg14[%c0_168, %c0_169, %c0_170] : memref<1x8x32xf32, #tpu.memory_space<vmem>>, vector<1x8x32xf32>
    %311 = vector.shape_cast %310 : vector<1x8x32xf32> to vector<8x32xf32>
    %312 = vector.shape_cast %309 : vector<8x32xf32> to vector<1x8x32xf32>
    tpu.vector_store %arg14[%c0_168, %c0_169, %c0_170], %312 {strides = array<i32>} : memref<1x8x32xf32, #tpu.memory_space<vmem>>, vector<1x8x32xf32>,
    %c0_171 = arith.constant 0 : index
    %c0_172 = arith.constant 0 : index
    %313 = vector.load %arg10[%c0_171, %c0_172] : memref<96x32xbf16, #tpu.memory_space<vmem>>, vector<96x32xbf16>
    %c0_173 = arith.constant 0 : index
    %c0_174 = arith.constant 0 : index
    %314 = vector.load %arg11[%c0_173, %c0_174] : memref<96x32xbf16, #tpu.memory_space<vmem>>, vector<96x32xbf16>
    %c0_175 = arith.constant 0 : index
    %c0_176 = arith.constant 0 : index
    %315 = vector.load %arg12[%c0_175, %c0_176] : memref<32x1xbf16, #tpu.memory_space<vmem>>, vector<32x1xbf16>
    %c0_177 = arith.constant 0 : index
    %c0_178 = arith.constant 0 : index
    %316 = vector.load %arg13[%c0_177, %c0_178] : memref<8x128xf32, #tpu.memory_space<vmem>>, vector<8x128xf32>
    %317 = vector.extract_strided_slice %316 {offsets = [0, 0], sizes = [1, 32], strides = [1, 1]} : vector<8x128xf32> to vector<1x32xf32>
    %cst_179 = arith.constant 0.000000e+00 : f32
    %318 = vector.broadcast %cst_179 : f32 to vector<10x32xf32>
    %c0_180 = arith.constant 0 : index
    %c0_181 = arith.constant 0 : index
    %319 = vector.load %arg17[%c0_180, %c0_181] : memref<10x32xf32, #tpu.memory_space<vmem>>, vector<10x32xf32>
    tpu.vector_store %arg17[%c0_180, %c0_181], %318 {strides = array<i32>} : memref<10x32xf32, #tpu.memory_space<vmem>>, vector<10x32xf32>,
    %c1_182 = arith.constant 1 : index
    %c0_183 = arith.constant 0 : index
    %320 = vector.load %arg17[%c1_182, %c0_183] : memref<10x32xf32, #tpu.memory_space<vmem>>, vector<8x32xf32>
    tpu.vector_store %arg17[%c1_182, %c0_183], %309 {strides = array<i32>} : memref<10x32xf32, #tpu.memory_space<vmem>>, vector<8x32xf32>,
    %c0_184 = arith.constant 0 : index
    %c0_185 = arith.constant 0 : index
    %321 = vector.load %arg17[%c0_184, %c0_185] : memref<10x32xf32, #tpu.memory_space<vmem>>, vector<8x32xf32>
    %c1_186 = arith.constant 1 : index
    %c0_187 = arith.constant 0 : index
    %322 = vector.load %arg17[%c1_186, %c0_187] : memref<10x32xf32, #tpu.memory_space<vmem>>, vector<8x32xf32>
    %c2_188 = arith.constant 2 : index
    %c0_189 = arith.constant 0 : index
    %323 = vector.load %arg17[%c2_188, %c0_189] : memref<10x32xf32, #tpu.memory_space<vmem>>, vector<8x32xf32>
    %324 = tpu.concatenate %321, %322, %323 in 1 : vector<8x32xf32>, vector<8x32xf32>, vector<8x32xf32> -> vector<8x96xf32>
    %325 = arith.truncf %324 : vector<8x96xf32> to vector<8x96xbf16>
    %cst_190 = arith.constant dense<0.000000e+00> : vector<8x32xf32>
    %326 = tpu.matmul %325, %313, %cst_190 {dimension_numbers = #tpu.dot_dimension_numbers<[1], [0], [0], [1], [0, 0, 1, 1], [], []>} : vector<8x96xbf16>, vector<96x32xbf16>, vector<8x32xf32> -> vector<8x32xf32>
    %327 = vector.broadcast %317 : vector<1x32xf32> to vector<8x32xf32>
    %328 = arith.addf %326, %327 : vector<8x32xf32>
    %cst_191 = arith.constant 0.000000e+00 : f32
    %329 = vector.broadcast %cst_191 : f32 to vector<8x32xf32>
    %330 = arith.maximumf %328, %329 : vector<8x32xf32>
    %331 = vector.extract_strided_slice %316 {offsets = [1, 0], sizes = [1, 32], strides = [1, 1]} : vector<8x128xf32> to vector<1x32xf32>
    %332 = vector.extract_strided_slice %316 {offsets = [2, 0], sizes = [1, 32], strides = [1, 1]} : vector<8x128xf32> to vector<1x32xf32>
    %cst_192 = arith.constant dense<0.000000e+00> : vector<8xf32>
    %333 = vector.multi_reduction <add>, %330, %cst_192 [1] : vector<8x32xf32> to vector<8xf32>
    %334 = vector.shape_cast %333 : vector<8xf32> to vector<8x1xf32>
    %cst_193 = arith.constant 3.200000e+01 : f32
    %335 = vector.broadcast %cst_193 : f32 to vector<8x1xf32>
    %336 = arith.divf %334, %335 : vector<8x1xf32>
    %337 = vector.broadcast %336 : vector<8x1xf32> to vector<8x32xf32>
    %338 = arith.subf %330, %337 : vector<8x32xf32>
    %339 = arith.mulf %338, %338 : vector<8x32xf32>
    %cst_194 = arith.constant dense<0.000000e+00> : vector<8xf32>
    %340 = vector.multi_reduction <add>, %339, %cst_194 [1] : vector<8x32xf32> to vector<8xf32>
    %341 = vector.shape_cast %340 : vector<8xf32> to vector<8x1xf32>
    %cst_195 = arith.constant 3.200000e+01 : f32
    %342 = vector.broadcast %cst_195 : f32 to vector<8x1xf32>
    %343 = arith.divf %341, %342 : vector<8x1xf32>
    %344 = vector.broadcast %336 : vector<8x1xf32> to vector<8x32xf32>
    %345 = arith.subf %330, %344 : vector<8x32xf32>
    %cst_196 = arith.constant 9.99999974E-6 : f32
    %346 = vector.broadcast %cst_196 : f32 to vector<8x1xf32>
    %347 = arith.addf %343, %346 : vector<8x1xf32>
    %348 = math.rsqrt %347 : vector<8x1xf32>
    %349 = vector.broadcast %348 : vector<8x1xf32> to vector<8x32xf32>
    %350 = arith.mulf %345, %349 : vector<8x32xf32>
    %351 = vector.broadcast %331 : vector<1x32xf32> to vector<8x32xf32>
    %352 = arith.mulf %350, %351 : vector<8x32xf32>
    %353 = vector.broadcast %332 : vector<1x32xf32> to vector<8x32xf32>
    %354 = arith.addf %352, %353 : vector<8x32xf32>
    %355 = vector.extract_strided_slice %316 {offsets = [3, 0], sizes = [1, 32], strides = [1, 1]} : vector<8x128xf32> to vector<1x32xf32>
    %cst_197 = arith.constant 0.000000e+00 : f32
    %356 = vector.broadcast %cst_197 : f32 to vector<10x32xf32>
    %c0_198 = arith.constant 0 : index
    %c0_199 = arith.constant 0 : index
    %357 = vector.load %arg18[%c0_198, %c0_199] : memref<10x32xf32, #tpu.memory_space<vmem>>, vector<10x32xf32>
    tpu.vector_store %arg18[%c0_198, %c0_199], %356 {strides = array<i32>} : memref<10x32xf32, #tpu.memory_space<vmem>>, vector<10x32xf32>,
    %c1_200 = arith.constant 1 : index
    %c0_201 = arith.constant 0 : index
    %358 = vector.load %arg18[%c1_200, %c0_201] : memref<10x32xf32, #tpu.memory_space<vmem>>, vector<8x32xf32>
    tpu.vector_store %arg18[%c1_200, %c0_201], %354 {strides = array<i32>} : memref<10x32xf32, #tpu.memory_space<vmem>>, vector<8x32xf32>,
    %c0_202 = arith.constant 0 : index
    %c0_203 = arith.constant 0 : index
    %359 = vector.load %arg18[%c0_202, %c0_203] : memref<10x32xf32, #tpu.memory_space<vmem>>, vector<8x32xf32>
    %c1_204 = arith.constant 1 : index
    %c0_205 = arith.constant 0 : index
    %360 = vector.load %arg18[%c1_204, %c0_205] : memref<10x32xf32, #tpu.memory_space<vmem>>, vector<8x32xf32>
    %c2_206 = arith.constant 2 : index
    %c0_207 = arith.constant 0 : index
    %361 = vector.load %arg18[%c2_206, %c0_207] : memref<10x32xf32, #tpu.memory_space<vmem>>, vector<8x32xf32>
    %362 = tpu.concatenate %359, %360, %361 in 1 : vector<8x32xf32>, vector<8x32xf32>, vector<8x32xf32> -> vector<8x96xf32>
    %363 = arith.truncf %362 : vector<8x96xf32> to vector<8x96xbf16>
    %cst_208 = arith.constant dense<0.000000e+00> : vector<8x32xf32>
    %364 = tpu.matmul %363, %314, %cst_208 {dimension_numbers = #tpu.dot_dimension_numbers<[1], [0], [0], [1], [0, 0, 1, 1], [], []>} : vector<8x96xbf16>, vector<96x32xbf16>, vector<8x32xf32> -> vector<8x32xf32>
    %365 = vector.broadcast %355 : vector<1x32xf32> to vector<8x32xf32>
    %366 = arith.addf %364, %365 : vector<8x32xf32>
    %cst_209 = arith.constant 0.000000e+00 : f32
    %367 = vector.broadcast %cst_209 : f32 to vector<8x32xf32>
    %368 = arith.maximumf %366, %367 : vector<8x32xf32>
    %369 = vector.extract_strided_slice %316 {offsets = [4, 0], sizes = [1, 32], strides = [1, 1]} : vector<8x128xf32> to vector<1x32xf32>
    %370 = vector.extract_strided_slice %316 {offsets = [5, 0], sizes = [1, 32], strides = [1, 1]} : vector<8x128xf32> to vector<1x32xf32>
    %cst_210 = arith.constant dense<0.000000e+00> : vector<8xf32>
    %371 = vector.multi_reduction <add>, %368, %cst_210 [1] : vector<8x32xf32> to vector<8xf32>
    %372 = vector.shape_cast %371 : vector<8xf32> to vector<8x1xf32>
    %cst_211 = arith.constant 3.200000e+01 : f32
    %373 = vector.broadcast %cst_211 : f32 to vector<8x1xf32>
    %374 = arith.divf %372, %373 : vector<8x1xf32>
    %375 = vector.broadcast %374 : vector<8x1xf32> to vector<8x32xf32>
    %376 = arith.subf %368, %375 : vector<8x32xf32>
    %377 = arith.mulf %376, %376 : vector<8x32xf32>
    %cst_212 = arith.constant dense<0.000000e+00> : vector<8xf32>
    %378 = vector.multi_reduction <add>, %377, %cst_212 [1] : vector<8x32xf32> to vector<8xf32>
    %379 = vector.shape_cast %378 : vector<8xf32> to vector<8x1xf32>
    %cst_213 = arith.constant 3.200000e+01 : f32
    %380 = vector.broadcast %cst_213 : f32 to vector<8x1xf32>
    %381 = arith.divf %379, %380 : vector<8x1xf32>
    %382 = vector.broadcast %374 : vector<8x1xf32> to vector<8x32xf32>
    %383 = arith.subf %368, %382 : vector<8x32xf32>
    %cst_214 = arith.constant 9.99999974E-6 : f32
    %384 = vector.broadcast %cst_214 : f32 to vector<8x1xf32>
    %385 = arith.addf %381, %384 : vector<8x1xf32>
    %386 = math.rsqrt %385 : vector<8x1xf32>
    %387 = vector.broadcast %386 : vector<8x1xf32> to vector<8x32xf32>
    %388 = arith.mulf %383, %387 : vector<8x32xf32>
    %389 = vector.broadcast %369 : vector<1x32xf32> to vector<8x32xf32>
    %390 = arith.mulf %388, %389 : vector<8x32xf32>
    %391 = vector.broadcast %370 : vector<1x32xf32> to vector<8x32xf32>
    %392 = arith.addf %390, %391 : vector<8x32xf32>
    %393 = arith.truncf %392 : vector<8x32xf32> to vector<8x32xbf16>
    %cst_215 = arith.constant dense<0.000000e+00> : vector<8x1xf32>
    %394 = tpu.matmul %393, %315, %cst_215 {dimension_numbers = #tpu.dot_dimension_numbers<[1], [0], [0], [1], [0, 0, 1, 1], [], []>} : vector<8x32xbf16>, vector<32x1xbf16>, vector<8x1xf32> -> vector<8x1xf32>
    %395 = vector.extract_strided_slice %316 {offsets = [6, 0], sizes = [1, 1], strides = [1, 1]} : vector<8x128xf32> to vector<1x1xf32>
    %396 = vector.broadcast %395 : vector<1x1xf32> to vector<8x1xf32>
    %397 = arith.addf %394, %396 : vector<8x1xf32>
    %398 = arith.mulf %397, %9 : vector<8x1xf32>
    %c0_216 = arith.constant 0 : index
    %c0_217 = arith.constant 0 : index
    %c0_218 = arith.constant 0 : index
    %399 = vector.load %arg15[%c0_216, %c0_217, %c0_218] : memref<1x8x1xf32, #tpu.memory_space<vmem>>, vector<1x8x1xf32>
    %400 = vector.shape_cast %399 : vector<1x8x1xf32> to vector<8x1xf32>
    %401 = vector.shape_cast %398 : vector<8x1xf32> to vector<1x8x1xf32>
    tpu.vector_store %arg15[%c0_216, %c0_217, %c0_218], %401 {strides = array<i32>} : memref<1x8x1xf32, #tpu.memory_space<vmem>>, vector<1x8x1xf32>,
    return
  }
  func.func @transform_0(%arg0: i32) -> (i32, i32, i32) {
    %c0_i32 = arith.constant 0 : i32
    %c0_i32_0 = arith.constant 0 : i32
    %c0_i32_1 = arith.constant 0 : i32
    return %arg0, %c0_i32, %c0_i32_0 : i32, i32, i32
  }
  func.func @transform_1(%arg0: i32) -> (i32, i32, i32) {
    %c0_i32 = arith.constant 0 : i32
    %c0_i32_0 = arith.constant 0 : i32
    %c0_i32_1 = arith.constant 0 : i32
    return %arg0, %c0_i32, %c0_i32_0 : i32, i32, i32
  }
  func.func @transform_2(%arg0: i32) -> (i32, i32, i32) {
    %c0_i32 = arith.constant 0 : i32
    %c0_i32_0 = arith.constant 0 : i32
    %c0_i32_1 = arith.constant 0 : i32
    return %arg0, %c0_i32, %c0_i32_0 : i32, i32, i32
  }
  func.func @transform_3(%arg0: i32) -> (i32, i32, i32) {
    %c0_i32 = arith.constant 0 : i32
    %c0_i32_0 = arith.constant 0 : i32
    %c0_i32_1 = arith.constant 0 : i32
    return %arg0, %c0_i32, %c0_i32_0 : i32, i32, i32
  }
  func.func @transform_4(%arg0: i32) -> (i32, i32, i32) {
    %c0_i32 = arith.constant 0 : i32
    %c0_i32_0 = arith.constant 0 : i32
    %c0_i32_1 = arith.constant 0 : i32
    %c0_i32_2 = arith.constant 0 : i32
    return %c0_i32, %c0_i32_0, %c0_i32_1 : i32, i32, i32
  }
  func.func @transform_5(%arg0: i32) -> (i32, i32, i32) {
    %c0_i32 = arith.constant 0 : i32
    %c0_i32_0 = arith.constant 0 : i32
    %c0_i32_1 = arith.constant 0 : i32
    %c0_i32_2 = arith.constant 0 : i32
    return %c0_i32, %c0_i32_0, %c0_i32_1 : i32, i32, i32
  }
  func.func @transform_6(%arg0: i32) -> (i32, i32, i32) {
    %c0_i32 = arith.constant 0 : i32
    %c0_i32_0 = arith.constant 0 : i32
    %c0_i32_1 = arith.constant 0 : i32
    %c0_i32_2 = arith.constant 0 : i32
    return %c0_i32, %c0_i32_0, %c0_i32_1 : i32, i32, i32
  }
  func.func @transform_7(%arg0: i32) -> (i32, i32, i32) {
    %c0_i32 = arith.constant 0 : i32
    %c0_i32_0 = arith.constant 0 : i32
    %c0_i32_1 = arith.constant 0 : i32
    %c0_i32_2 = arith.constant 0 : i32
    return %c0_i32, %c0_i32_0, %c0_i32_1 : i32, i32, i32
  }
  func.func @transform_8(%arg0: i32) -> (i32, i32, i32) {
    %c0_i32 = arith.constant 0 : i32
    %c0_i32_0 = arith.constant 0 : i32
    %c0_i32_1 = arith.constant 0 : i32
    %c0_i32_2 = arith.constant 0 : i32
    return %c0_i32, %c0_i32_0, %c0_i32_1 : i32, i32, i32
  }
  func.func @transform_9(%arg0: i32) -> (i32, i32) {
    %c0_i32 = arith.constant 0 : i32
    %c0_i32_0 = arith.constant 0 : i32
    %c0_i32_1 = arith.constant 0 : i32
    return %c0_i32, %c0_i32_0 : i32, i32
  }
  func.func @transform_10(%arg0: i32) -> (i32, i32) {
    %c0_i32 = arith.constant 0 : i32
    %c0_i32_0 = arith.constant 0 : i32
    %c0_i32_1 = arith.constant 0 : i32
    return %c0_i32, %c0_i32_0 : i32, i32
  }
  func.func @transform_11(%arg0: i32) -> (i32, i32) {
    %c0_i32 = arith.constant 0 : i32
    %c0_i32_0 = arith.constant 0 : i32
    %c0_i32_1 = arith.constant 0 : i32
    return %c0_i32, %c0_i32_0 : i32, i32
  }
  func.func @transform_12(%arg0: i32) -> (i32, i32) {
    %c0_i32 = arith.constant 0 : i32
    %c0_i32_0 = arith.constant 0 : i32
    %c0_i32_1 = arith.constant 0 : i32
    return %c0_i32, %c0_i32_0 : i32, i32
  }
  func.func @transform_13(%arg0: i32) -> (i32, i32, i32) {
    %c0_i32 = arith.constant 0 : i32
    %c0_i32_0 = arith.constant 0 : i32
    %c0_i32_1 = arith.constant 0 : i32
    return %arg0, %c0_i32, %c0_i32_0 : i32, i32, i32
  }
  func.func @transform_14(%arg0: i32) -> (i32, i32, i32) {
    %c0_i32 = arith.constant 0 : i32
    %c0_i32_0 = arith.constant 0 : i32
    %c0_i32_1 = arith.constant 0 : i32
    return %arg0, %c0_i32, %c0_i32_0 : i32, i32, i32
  }
}

module attributes {stable_mosaic.version = 11 : i64} {
  func.func @_decoder_mel_kernel(%arg0: i32, %arg1: memref<1x16x32xf32, #tpu.memory_space<vmem>>, %arg2: memref<1x1x16xf32, #tpu.memory_space<vmem>>, %arg3: memref<1x16x1xf32, #tpu.memory_space<vmem>>, %arg4: memref<2x32x96xbf16, #tpu.memory_space<vmem>>, %arg5: memref<2x32x32xbf16, #tpu.memory_space<vmem>>, %arg6: memref<2x288x64xbf16, #tpu.memory_space<vmem>>, %arg7: memref<2x64x32xbf16, #tpu.memory_space<vmem>>, %arg8: memref<2x8x128xf32, #tpu.memory_space<vmem>>, %arg9: memref<32x8xbf16, #tpu.memory_space<vmem>>, %arg10: memref<8x128xf32, #tpu.memory_space<vmem>>, %arg11: memref<40x32xbf16, #tpu.memory_space<vmem>>, %arg12: memref<160x32xbf16, #tpu.memory_space<vmem>>, %arg13: memref<160x32xbf16, #tpu.memory_space<vmem>>, %arg14: memref<160x32xbf16, #tpu.memory_space<vmem>>, %arg15: memref<160x8xbf16, #tpu.memory_space<vmem>>, %arg16: memref<1x16x16xf32, #tpu.memory_space<vmem>>, %arg17: memref<24x32xf32, #tpu.memory_space<vmem>>, %arg18: memref<20x8xf32, #tpu.memory_space<vmem>>, %arg19: memref<20x32xf32, #tpu.memory_space<vmem>>) attributes {dimension_semantics = [#tpu.dimension_semantics<parallel>], iteration_bounds = array<i64: 2>, scalar_prefetch = 0 : i64, scratch_operands = 3 : i64, tpu.core_type = #tpu.core_type<tc>, window_params = [{transform_indices = @transform_0, window_bounds = array<i64: 1, 16, 32>}, {transform_indices = @transform_1, window_bounds = array<i64: 1, 1, 16>}, {transform_indices = @transform_2, window_bounds = array<i64: 1, 16, 1>}, {pipeline_mode = #tpu.pipeline_mode<synchronous>, transform_indices = @transform_3, window_bounds = array<i64: 2, 32, 96>}, {pipeline_mode = #tpu.pipeline_mode<synchronous>, transform_indices = @transform_4, window_bounds = array<i64: 2, 32, 32>}, {pipeline_mode = #tpu.pipeline_mode<synchronous>, transform_indices = @transform_5, window_bounds = array<i64: 2, 288, 64>}, {pipeline_mode = #tpu.pipeline_mode<synchronous>, transform_indices = @transform_6, window_bounds = array<i64: 2, 64, 32>}, {pipeline_mode = #tpu.pipeline_mode<synchronous>, transform_indices = @transform_7, window_bounds = array<i64: 2, 8, 128>}, {pipeline_mode = #tpu.pipeline_mode<synchronous>, transform_indices = @transform_8, window_bounds = array<i64: 32, 8>}, {pipeline_mode = #tpu.pipeline_mode<synchronous>, transform_indices = @transform_9, window_bounds = array<i64: 8, 128>}, {pipeline_mode = #tpu.pipeline_mode<synchronous>, transform_indices = @transform_10, window_bounds = array<i64: 40, 32>}, {pipeline_mode = #tpu.pipeline_mode<synchronous>, transform_indices = @transform_11, window_bounds = array<i64: 160, 32>}, {pipeline_mode = #tpu.pipeline_mode<synchronous>, transform_indices = @transform_12, window_bounds = array<i64: 160, 32>}, {pipeline_mode = #tpu.pipeline_mode<synchronous>, transform_indices = @transform_13, window_bounds = array<i64: 160, 32>}, {pipeline_mode = #tpu.pipeline_mode<synchronous>, transform_indices = @transform_14, window_bounds = array<i64: 160, 8>}, {transform_indices = @transform_15, window_bounds = array<i64: 1, 16, 16>}]} {
    %c0 = arith.constant 0 : index
    %c0_0 = arith.constant 0 : index
    %c0_1 = arith.constant 0 : index
    %0 = vector.load %arg1[%c0, %c0_0, %c0_1] : memref<1x16x32xf32, #tpu.memory_space<vmem>>, vector<1x16x32xf32>
    %1 = vector.shape_cast %0 : vector<1x16x32xf32> to vector<16x32xf32>
    %c0_2 = arith.constant 0 : index
    %c0_3 = arith.constant 0 : index
    %c0_4 = arith.constant 0 : index
    %2 = vector.load %arg2[%c0_2, %c0_3, %c0_4] : memref<1x1x16xf32, #tpu.memory_space<vmem>>, vector<1x1x16xf32>
    %3 = vector.shape_cast %2 : vector<1x1x16xf32> to vector<1x16xf32>
    %cst = arith.constant -1.000000e+09 : f32
    %4 = vector.broadcast %cst : f32 to vector<1x16xf32>
    %5 = arith.mulf %3, %4 : vector<1x16xf32>
    %c0_5 = arith.constant 0 : index
    %c0_6 = arith.constant 0 : index
    %c0_7 = arith.constant 0 : index
    %6 = vector.load %arg3[%c0_5, %c0_6, %c0_7] : memref<1x16x1xf32, #tpu.memory_space<vmem>>, vector<1x16x1xf32>
    %7 = vector.shape_cast %6 : vector<1x16x1xf32> to vector<16x1xf32>
    %cst_8 = arith.constant 1.000000e+00 : f32
    %8 = vector.broadcast %cst_8 : f32 to vector<16x1xf32>
    %9 = arith.subf %8, %7 : vector<16x1xf32>
    %c0_9 = arith.constant 0 : index
    %c0_10 = arith.constant 0 : index
    %c0_11 = arith.constant 0 : index
    %10 = vector.load %arg4[%c0_9, %c0_10, %c0_11] : memref<2x32x96xbf16, #tpu.memory_space<vmem>>, vector<1x32x96xbf16>
    %11 = vector.shape_cast %10 : vector<1x32x96xbf16> to vector<32x96xbf16>
    %12 = arith.truncf %1 : vector<16x32xf32> to vector<16x32xbf16>
    %cst_12 = arith.constant dense<0.000000e+00> : vector<16x96xf32>
    %13 = tpu.matmul %12, %11, %cst_12 {dimension_numbers = #tpu.dot_dimension_numbers<[1], [0], [0], [1], [0, 0, 1, 1], [], []>} : vector<16x32xbf16>, vector<32x96xbf16>, vector<16x96xf32> -> vector<16x96xf32>
    %c0_13 = arith.constant 0 : index
    %c0_14 = arith.constant 0 : index
    %c0_15 = arith.constant 0 : index
    %14 = vector.load %arg8[%c0_13, %c0_14, %c0_15] : memref<2x8x128xf32, #tpu.memory_space<vmem>>, vector<1x1x96xf32>
    %15 = vector.shape_cast %14 : vector<1x1x96xf32> to vector<1x96xf32>
    %16 = vector.broadcast %15 : vector<1x96xf32> to vector<16x96xf32>
    %17 = arith.addf %13, %16 : vector<16x96xf32>
    %18 = vector.extract_strided_slice %17 {offsets = [0, 0], sizes = [16, 16], strides = [1, 1]} : vector<16x96xf32> to vector<16x16xf32>
    %19 = vector.extract_strided_slice %17 {offsets = [0, 32], sizes = [16, 16], strides = [1, 1]} : vector<16x96xf32> to vector<16x16xf32>
    %20 = vector.extract_strided_slice %17 {offsets = [0, 64], sizes = [16, 16], strides = [1, 1]} : vector<16x96xf32> to vector<16x16xf32>
    %21 = arith.truncf %18 : vector<16x16xf32> to vector<16x16xbf16>
    %22 = arith.truncf %19 : vector<16x16xf32> to vector<16x16xbf16>
    %cst_16 = arith.constant dense<0.000000e+00> : vector<16x16xf32>
    %23 = tpu.matmul %21, %22, %cst_16 {dimension_numbers = #tpu.dot_dimension_numbers<[1], [1], [0], [0], [0, 0, 1, 0], [], []>} : vector<16x16xbf16>, vector<16x16xbf16>, vector<16x16xf32> -> vector<16x16xf32>
    %24 = vector.broadcast %5 : vector<1x16xf32> to vector<16x16xf32>
    %25 = arith.addf %23, %24 : vector<16x16xf32>
    %cst_17 = arith.constant dense<0xFF800000> : vector<16xf32>
    %26 = vector.multi_reduction <maximumf>, %25, %cst_17 [1] : vector<16x16xf32> to vector<16xf32>
    %27 = vector.shape_cast %26 : vector<16xf32> to vector<16x1xf32>
    %28 = vector.broadcast %27 : vector<16x1xf32> to vector<16x16xf32>
    %29 = arith.subf %25, %28 : vector<16x16xf32>
    %30 = math.exp %29 : vector<16x16xf32>
    %cst_18 = arith.constant dense<0.000000e+00> : vector<16xf32>
    %31 = vector.multi_reduction <add>, %30, %cst_18 [1] : vector<16x16xf32> to vector<16xf32>
    %32 = vector.shape_cast %31 : vector<16xf32> to vector<16x1xf32>
    %33 = tpu.reciprocal %32 {approx = true} : vector<16x1xf32> -> vector<16x1xf32>
    %34 = vector.broadcast %33 : vector<16x1xf32> to vector<16x16xf32>
    %35 = arith.mulf %30, %34 : vector<16x16xf32>
    %36 = arith.truncf %35 : vector<16x16xf32> to vector<16x16xbf16>
    %37 = arith.truncf %20 : vector<16x16xf32> to vector<16x16xbf16>
    %cst_19 = arith.constant dense<0.000000e+00> : vector<16x16xf32>
    %38 = tpu.matmul %36, %37, %cst_19 {dimension_numbers = #tpu.dot_dimension_numbers<[1], [0], [0], [1], [0, 0, 1, 1], [], []>} : vector<16x16xbf16>, vector<16x16xbf16>, vector<16x16xf32> -> vector<16x16xf32>
    %39 = vector.extract_strided_slice %17 {offsets = [0, 16], sizes = [16, 16], strides = [1, 1]} : vector<16x96xf32> to vector<16x16xf32>
    %40 = vector.extract_strided_slice %17 {offsets = [0, 48], sizes = [16, 16], strides = [1, 1]} : vector<16x96xf32> to vector<16x16xf32>
    %41 = vector.extract_strided_slice %17 {offsets = [0, 80], sizes = [16, 16], strides = [1, 1]} : vector<16x96xf32> to vector<16x16xf32>
    %42 = arith.truncf %39 : vector<16x16xf32> to vector<16x16xbf16>
    %43 = arith.truncf %40 : vector<16x16xf32> to vector<16x16xbf16>
    %cst_20 = arith.constant dense<0.000000e+00> : vector<16x16xf32>
    %44 = tpu.matmul %42, %43, %cst_20 {dimension_numbers = #tpu.dot_dimension_numbers<[1], [1], [0], [0], [0, 0, 1, 0], [], []>} : vector<16x16xbf16>, vector<16x16xbf16>, vector<16x16xf32> -> vector<16x16xf32>
    %45 = vector.broadcast %5 : vector<1x16xf32> to vector<16x16xf32>
    %46 = arith.addf %44, %45 : vector<16x16xf32>
    %cst_21 = arith.constant dense<0xFF800000> : vector<16xf32>
    %47 = vector.multi_reduction <maximumf>, %46, %cst_21 [1] : vector<16x16xf32> to vector<16xf32>
    %48 = vector.shape_cast %47 : vector<16xf32> to vector<16x1xf32>
    %49 = vector.broadcast %48 : vector<16x1xf32> to vector<16x16xf32>
    %50 = arith.subf %46, %49 : vector<16x16xf32>
    %51 = math.exp %50 : vector<16x16xf32>
    %cst_22 = arith.constant dense<0.000000e+00> : vector<16xf32>
    %52 = vector.multi_reduction <add>, %51, %cst_22 [1] : vector<16x16xf32> to vector<16xf32>
    %53 = vector.shape_cast %52 : vector<16xf32> to vector<16x1xf32>
    %54 = tpu.reciprocal %53 {approx = true} : vector<16x1xf32> -> vector<16x1xf32>
    %55 = vector.broadcast %54 : vector<16x1xf32> to vector<16x16xf32>
    %56 = arith.mulf %51, %55 : vector<16x16xf32>
    %57 = arith.truncf %56 : vector<16x16xf32> to vector<16x16xbf16>
    %58 = arith.truncf %41 : vector<16x16xf32> to vector<16x16xbf16>
    %cst_23 = arith.constant dense<0.000000e+00> : vector<16x16xf32>
    %59 = tpu.matmul %57, %58, %cst_23 {dimension_numbers = #tpu.dot_dimension_numbers<[1], [0], [0], [1], [0, 0, 1, 1], [], []>} : vector<16x16xbf16>, vector<16x16xbf16>, vector<16x16xf32> -> vector<16x16xf32>
    %60 = tpu.concatenate %38, %59 in 1 : vector<16x16xf32>, vector<16x16xf32> -> vector<16x32xf32>
    %c0_24 = arith.constant 0 : index
    %c0_25 = arith.constant 0 : index
    %c0_26 = arith.constant 0 : index
    %61 = vector.load %arg5[%c0_24, %c0_25, %c0_26] : memref<2x32x32xbf16, #tpu.memory_space<vmem>>, vector<1x32x32xbf16>
    %62 = vector.shape_cast %61 : vector<1x32x32xbf16> to vector<32x32xbf16>
    %63 = arith.truncf %60 : vector<16x32xf32> to vector<16x32xbf16>
    %cst_27 = arith.constant dense<0.000000e+00> : vector<16x32xf32>
    %64 = tpu.matmul %63, %62, %cst_27 {dimension_numbers = #tpu.dot_dimension_numbers<[1], [0], [0], [1], [0, 0, 1, 1], [], []>} : vector<16x32xbf16>, vector<32x32xbf16>, vector<16x32xf32> -> vector<16x32xf32>
    %c0_28 = arith.constant 0 : index
    %c1 = arith.constant 1 : index
    %c0_29 = arith.constant 0 : index
    %65 = vector.load %arg8[%c0_28, %c1, %c0_29] : memref<2x8x128xf32, #tpu.memory_space<vmem>>, vector<1x1x32xf32>
    %66 = vector.shape_cast %65 : vector<1x1x32xf32> to vector<1x32xf32>
    %67 = vector.broadcast %66 : vector<1x32xf32> to vector<16x32xf32>
    %68 = arith.addf %64, %67 : vector<16x32xf32>
    %69 = arith.addf %68, %1 : vector<16x32xf32>
    %c0_30 = arith.constant 0 : index
    %c2 = arith.constant 2 : index
    %c0_31 = arith.constant 0 : index
    %70 = vector.load %arg8[%c0_30, %c2, %c0_31] : memref<2x8x128xf32, #tpu.memory_space<vmem>>, vector<1x1x32xf32>
    %71 = vector.shape_cast %70 : vector<1x1x32xf32> to vector<1x32xf32>
    %c0_32 = arith.constant 0 : index
    %c3 = arith.constant 3 : index
    %c0_33 = arith.constant 0 : index
    %72 = vector.load %arg8[%c0_32, %c3, %c0_33] : memref<2x8x128xf32, #tpu.memory_space<vmem>>, vector<1x1x32xf32>
    %73 = vector.shape_cast %72 : vector<1x1x32xf32> to vector<1x32xf32>
    %cst_34 = arith.constant dense<0.000000e+00> : vector<16xf32>
    %74 = vector.multi_reduction <add>, %69, %cst_34 [1] : vector<16x32xf32> to vector<16xf32>
    %75 = vector.shape_cast %74 : vector<16xf32> to vector<16x1xf32>
    %cst_35 = arith.constant 3.200000e+01 : f32
    %76 = vector.broadcast %cst_35 : f32 to vector<16x1xf32>
    %77 = arith.divf %75, %76 : vector<16x1xf32>
    %78 = vector.broadcast %77 : vector<16x1xf32> to vector<16x32xf32>
    %79 = arith.subf %69, %78 : vector<16x32xf32>
    %80 = arith.mulf %79, %79 : vector<16x32xf32>
    %cst_36 = arith.constant dense<0.000000e+00> : vector<16xf32>
    %81 = vector.multi_reduction <add>, %80, %cst_36 [1] : vector<16x32xf32> to vector<16xf32>
    %82 = vector.shape_cast %81 : vector<16xf32> to vector<16x1xf32>
    %cst_37 = arith.constant 3.200000e+01 : f32
    %83 = vector.broadcast %cst_37 : f32 to vector<16x1xf32>
    %84 = arith.divf %82, %83 : vector<16x1xf32>
    %85 = vector.broadcast %77 : vector<16x1xf32> to vector<16x32xf32>
    %86 = arith.subf %69, %85 : vector<16x32xf32>
    %cst_38 = arith.constant 9.99999974E-6 : f32
    %87 = vector.broadcast %cst_38 : f32 to vector<16x1xf32>
    %88 = arith.addf %84, %87 : vector<16x1xf32>
    %89 = math.rsqrt %88 : vector<16x1xf32>
    %90 = vector.broadcast %89 : vector<16x1xf32> to vector<16x32xf32>
    %91 = arith.mulf %86, %90 : vector<16x32xf32>
    %92 = vector.broadcast %71 : vector<1x32xf32> to vector<16x32xf32>
    %93 = arith.mulf %91, %92 : vector<16x32xf32>
    %94 = vector.broadcast %73 : vector<1x32xf32> to vector<16x32xf32>
    %95 = arith.addf %93, %94 : vector<16x32xf32>
    %96 = vector.broadcast %9 : vector<16x1xf32> to vector<16x32xf32>
    %97 = arith.mulf %95, %96 : vector<16x32xf32>
    %c0_39 = arith.constant 0 : index
    %c0_40 = arith.constant 0 : index
    %c0_41 = arith.constant 0 : index
    %98 = vector.load %arg6[%c0_39, %c0_40, %c0_41] : memref<2x288x64xbf16, #tpu.memory_space<vmem>>, vector<1x288x64xbf16>
    %99 = vector.shape_cast %98 : vector<1x288x64xbf16> to vector<288x64xbf16>
    %c0_42 = arith.constant 0 : index
    %c4 = arith.constant 4 : index
    %c0_43 = arith.constant 0 : index
    %100 = vector.load %arg8[%c0_42, %c4, %c0_43] : memref<2x8x128xf32, #tpu.memory_space<vmem>>, vector<1x1x64xf32>
    %101 = vector.shape_cast %100 : vector<1x1x64xf32> to vector<1x64xf32>
    %cst_44 = arith.constant 0.000000e+00 : f32
    %102 = vector.broadcast %cst_44 : f32 to vector<24x32xf32>
    %c0_45 = arith.constant 0 : index
    %c0_46 = arith.constant 0 : index
    %103 = vector.load %arg17[%c0_45, %c0_46] : memref<24x32xf32, #tpu.memory_space<vmem>>, vector<24x32xf32>
    tpu.vector_store %arg17[%c0_45, %c0_46], %102 {strides = array<i32>} : memref<24x32xf32, #tpu.memory_space<vmem>>, vector<24x32xf32>,
    %c4_47 = arith.constant 4 : index
    %c0_48 = arith.constant 0 : index
    %104 = vector.load %arg17[%c4_47, %c0_48] : memref<24x32xf32, #tpu.memory_space<vmem>>, vector<16x32xf32>
    tpu.vector_store %arg17[%c4_47, %c0_48], %97 {strides = array<i32>} : memref<24x32xf32, #tpu.memory_space<vmem>>, vector<16x32xf32>,
    %c0_49 = arith.constant 0 : index
    %c0_50 = arith.constant 0 : index
    %105 = vector.load %arg17[%c0_49, %c0_50] : memref<24x32xf32, #tpu.memory_space<vmem>>, vector<16x32xf32>
    %c1_51 = arith.constant 1 : index
    %c0_52 = arith.constant 0 : index
    %106 = vector.load %arg17[%c1_51, %c0_52] : memref<24x32xf32, #tpu.memory_space<vmem>>, vector<16x32xf32>
    %c2_53 = arith.constant 2 : index
    %c0_54 = arith.constant 0 : index
    %107 = vector.load %arg17[%c2_53, %c0_54] : memref<24x32xf32, #tpu.memory_space<vmem>>, vector<16x32xf32>
    %c3_55 = arith.constant 3 : index
    %c0_56 = arith.constant 0 : index
    %108 = vector.load %arg17[%c3_55, %c0_56] : memref<24x32xf32, #tpu.memory_space<vmem>>, vector<16x32xf32>
    %c4_57 = arith.constant 4 : index
    %c0_58 = arith.constant 0 : index
    %109 = vector.load %arg17[%c4_57, %c0_58] : memref<24x32xf32, #tpu.memory_space<vmem>>, vector<16x32xf32>
    %c5 = arith.constant 5 : index
    %c0_59 = arith.constant 0 : index
    %110 = vector.load %arg17[%c5, %c0_59] : memref<24x32xf32, #tpu.memory_space<vmem>>, vector<16x32xf32>
    %c6 = arith.constant 6 : index
    %c0_60 = arith.constant 0 : index
    %111 = vector.load %arg17[%c6, %c0_60] : memref<24x32xf32, #tpu.memory_space<vmem>>, vector<16x32xf32>
    %c7 = arith.constant 7 : index
    %c0_61 = arith.constant 0 : index
    %112 = vector.load %arg17[%c7, %c0_61] : memref<24x32xf32, #tpu.memory_space<vmem>>, vector<16x32xf32>
    %c8 = arith.constant 8 : index
    %c0_62 = arith.constant 0 : index
    %113 = vector.load %arg17[%c8, %c0_62] : memref<24x32xf32, #tpu.memory_space<vmem>>, vector<16x32xf32>
    %114 = tpu.concatenate %105, %106, %107, %108, %109, %110, %111, %112, %113 in 1 : vector<16x32xf32>, vector<16x32xf32>, vector<16x32xf32>, vector<16x32xf32>, vector<16x32xf32>, vector<16x32xf32>, vector<16x32xf32>, vector<16x32xf32>, vector<16x32xf32> -> vector<16x288xf32>
    %115 = arith.truncf %114 : vector<16x288xf32> to vector<16x288xbf16>
    %cst_63 = arith.constant dense<0.000000e+00> : vector<16x64xf32>
    %116 = tpu.matmul %115, %99, %cst_63 {dimension_numbers = #tpu.dot_dimension_numbers<[1], [0], [0], [1], [0, 0, 1, 1], [], []>} : vector<16x288xbf16>, vector<288x64xbf16>, vector<16x64xf32> -> vector<16x64xf32>
    %117 = vector.broadcast %101 : vector<1x64xf32> to vector<16x64xf32>
    %118 = arith.addf %116, %117 : vector<16x64xf32>
    %cst_64 = arith.constant 0.000000e+00 : f32
    %119 = vector.broadcast %cst_64 : f32 to vector<16x64xf32>
    %120 = arith.maximumf %118, %119 : vector<16x64xf32>
    %c0_65 = arith.constant 0 : index
    %c0_66 = arith.constant 0 : index
    %c0_67 = arith.constant 0 : index
    %121 = vector.load %arg7[%c0_65, %c0_66, %c0_67] : memref<2x64x32xbf16, #tpu.memory_space<vmem>>, vector<1x64x32xbf16>
    %122 = vector.shape_cast %121 : vector<1x64x32xbf16> to vector<64x32xbf16>
    %123 = arith.truncf %120 : vector<16x64xf32> to vector<16x64xbf16>
    %cst_68 = arith.constant dense<0.000000e+00> : vector<16x32xf32>
    %124 = tpu.matmul %123, %122, %cst_68 {dimension_numbers = #tpu.dot_dimension_numbers<[1], [0], [0], [1], [0, 0, 1, 1], [], []>} : vector<16x64xbf16>, vector<64x32xbf16>, vector<16x32xf32> -> vector<16x32xf32>
    %c0_69 = arith.constant 0 : index
    %c5_70 = arith.constant 5 : index
    %c0_71 = arith.constant 0 : index
    %125 = vector.load %arg8[%c0_69, %c5_70, %c0_71] : memref<2x8x128xf32, #tpu.memory_space<vmem>>, vector<1x1x32xf32>
    %126 = vector.shape_cast %125 : vector<1x1x32xf32> to vector<1x32xf32>
    %127 = vector.broadcast %126 : vector<1x32xf32> to vector<16x32xf32>
    %128 = arith.addf %124, %127 : vector<16x32xf32>
    %129 = arith.addf %128, %97 : vector<16x32xf32>
    %c0_72 = arith.constant 0 : index
    %c6_73 = arith.constant 6 : index
    %c0_74 = arith.constant 0 : index
    %130 = vector.load %arg8[%c0_72, %c6_73, %c0_74] : memref<2x8x128xf32, #tpu.memory_space<vmem>>, vector<1x1x32xf32>
    %131 = vector.shape_cast %130 : vector<1x1x32xf32> to vector<1x32xf32>
    %c0_75 = arith.constant 0 : index
    %c7_76 = arith.constant 7 : index
    %c0_77 = arith.constant 0 : index
    %132 = vector.load %arg8[%c0_75, %c7_76, %c0_77] : memref<2x8x128xf32, #tpu.memory_space<vmem>>, vector<1x1x32xf32>
    %133 = vector.shape_cast %132 : vector<1x1x32xf32> to vector<1x32xf32>
    %cst_78 = arith.constant dense<0.000000e+00> : vector<16xf32>
    %134 = vector.multi_reduction <add>, %129, %cst_78 [1] : vector<16x32xf32> to vector<16xf32>
    %135 = vector.shape_cast %134 : vector<16xf32> to vector<16x1xf32>
    %cst_79 = arith.constant 3.200000e+01 : f32
    %136 = vector.broadcast %cst_79 : f32 to vector<16x1xf32>
    %137 = arith.divf %135, %136 : vector<16x1xf32>
    %138 = vector.broadcast %137 : vector<16x1xf32> to vector<16x32xf32>
    %139 = arith.subf %129, %138 : vector<16x32xf32>
    %140 = arith.mulf %139, %139 : vector<16x32xf32>
    %cst_80 = arith.constant dense<0.000000e+00> : vector<16xf32>
    %141 = vector.multi_reduction <add>, %140, %cst_80 [1] : vector<16x32xf32> to vector<16xf32>
    %142 = vector.shape_cast %141 : vector<16xf32> to vector<16x1xf32>
    %cst_81 = arith.constant 3.200000e+01 : f32
    %143 = vector.broadcast %cst_81 : f32 to vector<16x1xf32>
    %144 = arith.divf %142, %143 : vector<16x1xf32>
    %145 = vector.broadcast %137 : vector<16x1xf32> to vector<16x32xf32>
    %146 = arith.subf %129, %145 : vector<16x32xf32>
    %cst_82 = arith.constant 9.99999974E-6 : f32
    %147 = vector.broadcast %cst_82 : f32 to vector<16x1xf32>
    %148 = arith.addf %144, %147 : vector<16x1xf32>
    %149 = math.rsqrt %148 : vector<16x1xf32>
    %150 = vector.broadcast %149 : vector<16x1xf32> to vector<16x32xf32>
    %151 = arith.mulf %146, %150 : vector<16x32xf32>
    %152 = vector.broadcast %131 : vector<1x32xf32> to vector<16x32xf32>
    %153 = arith.mulf %151, %152 : vector<16x32xf32>
    %154 = vector.broadcast %133 : vector<1x32xf32> to vector<16x32xf32>
    %155 = arith.addf %153, %154 : vector<16x32xf32>
    %156 = vector.broadcast %9 : vector<16x1xf32> to vector<16x32xf32>
    %157 = arith.mulf %155, %156 : vector<16x32xf32>
    %c1_83 = arith.constant 1 : index
    %c0_84 = arith.constant 0 : index
    %c0_85 = arith.constant 0 : index
    %158 = vector.load %arg4[%c1_83, %c0_84, %c0_85] : memref<2x32x96xbf16, #tpu.memory_space<vmem>>, vector<1x32x96xbf16>
    %159 = vector.shape_cast %158 : vector<1x32x96xbf16> to vector<32x96xbf16>
    %160 = arith.truncf %157 : vector<16x32xf32> to vector<16x32xbf16>
    %cst_86 = arith.constant dense<0.000000e+00> : vector<16x96xf32>
    %161 = tpu.matmul %160, %159, %cst_86 {dimension_numbers = #tpu.dot_dimension_numbers<[1], [0], [0], [1], [0, 0, 1, 1], [], []>} : vector<16x32xbf16>, vector<32x96xbf16>, vector<16x96xf32> -> vector<16x96xf32>
    %c1_87 = arith.constant 1 : index
    %c0_88 = arith.constant 0 : index
    %c0_89 = arith.constant 0 : index
    %162 = vector.load %arg8[%c1_87, %c0_88, %c0_89] : memref<2x8x128xf32, #tpu.memory_space<vmem>>, vector<1x1x96xf32>
    %163 = vector.shape_cast %162 : vector<1x1x96xf32> to vector<1x96xf32>
    %164 = vector.broadcast %163 : vector<1x96xf32> to vector<16x96xf32>
    %165 = arith.addf %161, %164 : vector<16x96xf32>
    %166 = vector.extract_strided_slice %165 {offsets = [0, 0], sizes = [16, 16], strides = [1, 1]} : vector<16x96xf32> to vector<16x16xf32>
    %167 = vector.extract_strided_slice %165 {offsets = [0, 32], sizes = [16, 16], strides = [1, 1]} : vector<16x96xf32> to vector<16x16xf32>
    %168 = vector.extract_strided_slice %165 {offsets = [0, 64], sizes = [16, 16], strides = [1, 1]} : vector<16x96xf32> to vector<16x16xf32>
    %169 = arith.truncf %166 : vector<16x16xf32> to vector<16x16xbf16>
    %170 = arith.truncf %167 : vector<16x16xf32> to vector<16x16xbf16>
    %cst_90 = arith.constant dense<0.000000e+00> : vector<16x16xf32>
    %171 = tpu.matmul %169, %170, %cst_90 {dimension_numbers = #tpu.dot_dimension_numbers<[1], [1], [0], [0], [0, 0, 1, 0], [], []>} : vector<16x16xbf16>, vector<16x16xbf16>, vector<16x16xf32> -> vector<16x16xf32>
    %172 = vector.broadcast %5 : vector<1x16xf32> to vector<16x16xf32>
    %173 = arith.addf %171, %172 : vector<16x16xf32>
    %cst_91 = arith.constant dense<0xFF800000> : vector<16xf32>
    %174 = vector.multi_reduction <maximumf>, %173, %cst_91 [1] : vector<16x16xf32> to vector<16xf32>
    %175 = vector.shape_cast %174 : vector<16xf32> to vector<16x1xf32>
    %176 = vector.broadcast %175 : vector<16x1xf32> to vector<16x16xf32>
    %177 = arith.subf %173, %176 : vector<16x16xf32>
    %178 = math.exp %177 : vector<16x16xf32>
    %cst_92 = arith.constant dense<0.000000e+00> : vector<16xf32>
    %179 = vector.multi_reduction <add>, %178, %cst_92 [1] : vector<16x16xf32> to vector<16xf32>
    %180 = vector.shape_cast %179 : vector<16xf32> to vector<16x1xf32>
    %181 = tpu.reciprocal %180 {approx = true} : vector<16x1xf32> -> vector<16x1xf32>
    %182 = vector.broadcast %181 : vector<16x1xf32> to vector<16x16xf32>
    %183 = arith.mulf %178, %182 : vector<16x16xf32>
    %184 = arith.truncf %183 : vector<16x16xf32> to vector<16x16xbf16>
    %185 = arith.truncf %168 : vector<16x16xf32> to vector<16x16xbf16>
    %cst_93 = arith.constant dense<0.000000e+00> : vector<16x16xf32>
    %186 = tpu.matmul %184, %185, %cst_93 {dimension_numbers = #tpu.dot_dimension_numbers<[1], [0], [0], [1], [0, 0, 1, 1], [], []>} : vector<16x16xbf16>, vector<16x16xbf16>, vector<16x16xf32> -> vector<16x16xf32>
    %187 = vector.extract_strided_slice %165 {offsets = [0, 16], sizes = [16, 16], strides = [1, 1]} : vector<16x96xf32> to vector<16x16xf32>
    %188 = vector.extract_strided_slice %165 {offsets = [0, 48], sizes = [16, 16], strides = [1, 1]} : vector<16x96xf32> to vector<16x16xf32>
    %189 = vector.extract_strided_slice %165 {offsets = [0, 80], sizes = [16, 16], strides = [1, 1]} : vector<16x96xf32> to vector<16x16xf32>
    %190 = arith.truncf %187 : vector<16x16xf32> to vector<16x16xbf16>
    %191 = arith.truncf %188 : vector<16x16xf32> to vector<16x16xbf16>
    %cst_94 = arith.constant dense<0.000000e+00> : vector<16x16xf32>
    %192 = tpu.matmul %190, %191, %cst_94 {dimension_numbers = #tpu.dot_dimension_numbers<[1], [1], [0], [0], [0, 0, 1, 0], [], []>} : vector<16x16xbf16>, vector<16x16xbf16>, vector<16x16xf32> -> vector<16x16xf32>
    %193 = vector.broadcast %5 : vector<1x16xf32> to vector<16x16xf32>
    %194 = arith.addf %192, %193 : vector<16x16xf32>
    %cst_95 = arith.constant dense<0xFF800000> : vector<16xf32>
    %195 = vector.multi_reduction <maximumf>, %194, %cst_95 [1] : vector<16x16xf32> to vector<16xf32>
    %196 = vector.shape_cast %195 : vector<16xf32> to vector<16x1xf32>
    %197 = vector.broadcast %196 : vector<16x1xf32> to vector<16x16xf32>
    %198 = arith.subf %194, %197 : vector<16x16xf32>
    %199 = math.exp %198 : vector<16x16xf32>
    %cst_96 = arith.constant dense<0.000000e+00> : vector<16xf32>
    %200 = vector.multi_reduction <add>, %199, %cst_96 [1] : vector<16x16xf32> to vector<16xf32>
    %201 = vector.shape_cast %200 : vector<16xf32> to vector<16x1xf32>
    %202 = tpu.reciprocal %201 {approx = true} : vector<16x1xf32> -> vector<16x1xf32>
    %203 = vector.broadcast %202 : vector<16x1xf32> to vector<16x16xf32>
    %204 = arith.mulf %199, %203 : vector<16x16xf32>
    %205 = arith.truncf %204 : vector<16x16xf32> to vector<16x16xbf16>
    %206 = arith.truncf %189 : vector<16x16xf32> to vector<16x16xbf16>
    %cst_97 = arith.constant dense<0.000000e+00> : vector<16x16xf32>
    %207 = tpu.matmul %205, %206, %cst_97 {dimension_numbers = #tpu.dot_dimension_numbers<[1], [0], [0], [1], [0, 0, 1, 1], [], []>} : vector<16x16xbf16>, vector<16x16xbf16>, vector<16x16xf32> -> vector<16x16xf32>
    %208 = tpu.concatenate %186, %207 in 1 : vector<16x16xf32>, vector<16x16xf32> -> vector<16x32xf32>
    %c1_98 = arith.constant 1 : index
    %c0_99 = arith.constant 0 : index
    %c0_100 = arith.constant 0 : index
    %209 = vector.load %arg5[%c1_98, %c0_99, %c0_100] : memref<2x32x32xbf16, #tpu.memory_space<vmem>>, vector<1x32x32xbf16>
    %210 = vector.shape_cast %209 : vector<1x32x32xbf16> to vector<32x32xbf16>
    %211 = arith.truncf %208 : vector<16x32xf32> to vector<16x32xbf16>
    %cst_101 = arith.constant dense<0.000000e+00> : vector<16x32xf32>
    %212 = tpu.matmul %211, %210, %cst_101 {dimension_numbers = #tpu.dot_dimension_numbers<[1], [0], [0], [1], [0, 0, 1, 1], [], []>} : vector<16x32xbf16>, vector<32x32xbf16>, vector<16x32xf32> -> vector<16x32xf32>
    %c1_102 = arith.constant 1 : index
    %c1_103 = arith.constant 1 : index
    %c0_104 = arith.constant 0 : index
    %213 = vector.load %arg8[%c1_102, %c1_103, %c0_104] : memref<2x8x128xf32, #tpu.memory_space<vmem>>, vector<1x1x32xf32>
    %214 = vector.shape_cast %213 : vector<1x1x32xf32> to vector<1x32xf32>
    %215 = vector.broadcast %214 : vector<1x32xf32> to vector<16x32xf32>
    %216 = arith.addf %212, %215 : vector<16x32xf32>
    %217 = arith.addf %216, %157 : vector<16x32xf32>
    %c1_105 = arith.constant 1 : index
    %c2_106 = arith.constant 2 : index
    %c0_107 = arith.constant 0 : index
    %218 = vector.load %arg8[%c1_105, %c2_106, %c0_107] : memref<2x8x128xf32, #tpu.memory_space<vmem>>, vector<1x1x32xf32>
    %219 = vector.shape_cast %218 : vector<1x1x32xf32> to vector<1x32xf32>
    %c1_108 = arith.constant 1 : index
    %c3_109 = arith.constant 3 : index
    %c0_110 = arith.constant 0 : index
    %220 = vector.load %arg8[%c1_108, %c3_109, %c0_110] : memref<2x8x128xf32, #tpu.memory_space<vmem>>, vector<1x1x32xf32>
    %221 = vector.shape_cast %220 : vector<1x1x32xf32> to vector<1x32xf32>
    %cst_111 = arith.constant dense<0.000000e+00> : vector<16xf32>
    %222 = vector.multi_reduction <add>, %217, %cst_111 [1] : vector<16x32xf32> to vector<16xf32>
    %223 = vector.shape_cast %222 : vector<16xf32> to vector<16x1xf32>
    %cst_112 = arith.constant 3.200000e+01 : f32
    %224 = vector.broadcast %cst_112 : f32 to vector<16x1xf32>
    %225 = arith.divf %223, %224 : vector<16x1xf32>
    %226 = vector.broadcast %225 : vector<16x1xf32> to vector<16x32xf32>
    %227 = arith.subf %217, %226 : vector<16x32xf32>
    %228 = arith.mulf %227, %227 : vector<16x32xf32>
    %cst_113 = arith.constant dense<0.000000e+00> : vector<16xf32>
    %229 = vector.multi_reduction <add>, %228, %cst_113 [1] : vector<16x32xf32> to vector<16xf32>
    %230 = vector.shape_cast %229 : vector<16xf32> to vector<16x1xf32>
    %cst_114 = arith.constant 3.200000e+01 : f32
    %231 = vector.broadcast %cst_114 : f32 to vector<16x1xf32>
    %232 = arith.divf %230, %231 : vector<16x1xf32>
    %233 = vector.broadcast %225 : vector<16x1xf32> to vector<16x32xf32>
    %234 = arith.subf %217, %233 : vector<16x32xf32>
    %cst_115 = arith.constant 9.99999974E-6 : f32
    %235 = vector.broadcast %cst_115 : f32 to vector<16x1xf32>
    %236 = arith.addf %232, %235 : vector<16x1xf32>
    %237 = math.rsqrt %236 : vector<16x1xf32>
    %238 = vector.broadcast %237 : vector<16x1xf32> to vector<16x32xf32>
    %239 = arith.mulf %234, %238 : vector<16x32xf32>
    %240 = vector.broadcast %219 : vector<1x32xf32> to vector<16x32xf32>
    %241 = arith.mulf %239, %240 : vector<16x32xf32>
    %242 = vector.broadcast %221 : vector<1x32xf32> to vector<16x32xf32>
    %243 = arith.addf %241, %242 : vector<16x32xf32>
    %244 = vector.broadcast %9 : vector<16x1xf32> to vector<16x32xf32>
    %245 = arith.mulf %243, %244 : vector<16x32xf32>
    %c1_116 = arith.constant 1 : index
    %c0_117 = arith.constant 0 : index
    %c0_118 = arith.constant 0 : index
    %246 = vector.load %arg6[%c1_116, %c0_117, %c0_118] : memref<2x288x64xbf16, #tpu.memory_space<vmem>>, vector<1x288x64xbf16>
    %247 = vector.shape_cast %246 : vector<1x288x64xbf16> to vector<288x64xbf16>
    %c1_119 = arith.constant 1 : index
    %c4_120 = arith.constant 4 : index
    %c0_121 = arith.constant 0 : index
    %248 = vector.load %arg8[%c1_119, %c4_120, %c0_121] : memref<2x8x128xf32, #tpu.memory_space<vmem>>, vector<1x1x64xf32>
    %249 = vector.shape_cast %248 : vector<1x1x64xf32> to vector<1x64xf32>
    %cst_122 = arith.constant 0.000000e+00 : f32
    %250 = vector.broadcast %cst_122 : f32 to vector<24x32xf32>
    %c0_123 = arith.constant 0 : index
    %c0_124 = arith.constant 0 : index
    %251 = vector.load %arg17[%c0_123, %c0_124] : memref<24x32xf32, #tpu.memory_space<vmem>>, vector<24x32xf32>
    tpu.vector_store %arg17[%c0_123, %c0_124], %250 {strides = array<i32>} : memref<24x32xf32, #tpu.memory_space<vmem>>, vector<24x32xf32>,
    %c4_125 = arith.constant 4 : index
    %c0_126 = arith.constant 0 : index
    %252 = vector.load %arg17[%c4_125, %c0_126] : memref<24x32xf32, #tpu.memory_space<vmem>>, vector<16x32xf32>
    tpu.vector_store %arg17[%c4_125, %c0_126], %245 {strides = array<i32>} : memref<24x32xf32, #tpu.memory_space<vmem>>, vector<16x32xf32>,
    %c0_127 = arith.constant 0 : index
    %c0_128 = arith.constant 0 : index
    %253 = vector.load %arg17[%c0_127, %c0_128] : memref<24x32xf32, #tpu.memory_space<vmem>>, vector<16x32xf32>
    %c1_129 = arith.constant 1 : index
    %c0_130 = arith.constant 0 : index
    %254 = vector.load %arg17[%c1_129, %c0_130] : memref<24x32xf32, #tpu.memory_space<vmem>>, vector<16x32xf32>
    %c2_131 = arith.constant 2 : index
    %c0_132 = arith.constant 0 : index
    %255 = vector.load %arg17[%c2_131, %c0_132] : memref<24x32xf32, #tpu.memory_space<vmem>>, vector<16x32xf32>
    %c3_133 = arith.constant 3 : index
    %c0_134 = arith.constant 0 : index
    %256 = vector.load %arg17[%c3_133, %c0_134] : memref<24x32xf32, #tpu.memory_space<vmem>>, vector<16x32xf32>
    %c4_135 = arith.constant 4 : index
    %c0_136 = arith.constant 0 : index
    %257 = vector.load %arg17[%c4_135, %c0_136] : memref<24x32xf32, #tpu.memory_space<vmem>>, vector<16x32xf32>
    %c5_137 = arith.constant 5 : index
    %c0_138 = arith.constant 0 : index
    %258 = vector.load %arg17[%c5_137, %c0_138] : memref<24x32xf32, #tpu.memory_space<vmem>>, vector<16x32xf32>
    %c6_139 = arith.constant 6 : index
    %c0_140 = arith.constant 0 : index
    %259 = vector.load %arg17[%c6_139, %c0_140] : memref<24x32xf32, #tpu.memory_space<vmem>>, vector<16x32xf32>
    %c7_141 = arith.constant 7 : index
    %c0_142 = arith.constant 0 : index
    %260 = vector.load %arg17[%c7_141, %c0_142] : memref<24x32xf32, #tpu.memory_space<vmem>>, vector<16x32xf32>
    %c8_143 = arith.constant 8 : index
    %c0_144 = arith.constant 0 : index
    %261 = vector.load %arg17[%c8_143, %c0_144] : memref<24x32xf32, #tpu.memory_space<vmem>>, vector<16x32xf32>
    %262 = tpu.concatenate %253, %254, %255, %256, %257, %258, %259, %260, %261 in 1 : vector<16x32xf32>, vector<16x32xf32>, vector<16x32xf32>, vector<16x32xf32>, vector<16x32xf32>, vector<16x32xf32>, vector<16x32xf32>, vector<16x32xf32>, vector<16x32xf32> -> vector<16x288xf32>
    %263 = arith.truncf %262 : vector<16x288xf32> to vector<16x288xbf16>
    %cst_145 = arith.constant dense<0.000000e+00> : vector<16x64xf32>
    %264 = tpu.matmul %263, %247, %cst_145 {dimension_numbers = #tpu.dot_dimension_numbers<[1], [0], [0], [1], [0, 0, 1, 1], [], []>} : vector<16x288xbf16>, vector<288x64xbf16>, vector<16x64xf32> -> vector<16x64xf32>
    %265 = vector.broadcast %249 : vector<1x64xf32> to vector<16x64xf32>
    %266 = arith.addf %264, %265 : vector<16x64xf32>
    %cst_146 = arith.constant 0.000000e+00 : f32
    %267 = vector.broadcast %cst_146 : f32 to vector<16x64xf32>
    %268 = arith.maximumf %266, %267 : vector<16x64xf32>
    %c1_147 = arith.constant 1 : index
    %c0_148 = arith.constant 0 : index
    %c0_149 = arith.constant 0 : index
    %269 = vector.load %arg7[%c1_147, %c0_148, %c0_149] : memref<2x64x32xbf16, #tpu.memory_space<vmem>>, vector<1x64x32xbf16>
    %270 = vector.shape_cast %269 : vector<1x64x32xbf16> to vector<64x32xbf16>
    %271 = arith.truncf %268 : vector<16x64xf32> to vector<16x64xbf16>
    %cst_150 = arith.constant dense<0.000000e+00> : vector<16x32xf32>
    %272 = tpu.matmul %271, %270, %cst_150 {dimension_numbers = #tpu.dot_dimension_numbers<[1], [0], [0], [1], [0, 0, 1, 1], [], []>} : vector<16x64xbf16>, vector<64x32xbf16>, vector<16x32xf32> -> vector<16x32xf32>
    %c1_151 = arith.constant 1 : index
    %c5_152 = arith.constant 5 : index
    %c0_153 = arith.constant 0 : index
    %273 = vector.load %arg8[%c1_151, %c5_152, %c0_153] : memref<2x8x128xf32, #tpu.memory_space<vmem>>, vector<1x1x32xf32>
    %274 = vector.shape_cast %273 : vector<1x1x32xf32> to vector<1x32xf32>
    %275 = vector.broadcast %274 : vector<1x32xf32> to vector<16x32xf32>
    %276 = arith.addf %272, %275 : vector<16x32xf32>
    %277 = arith.addf %276, %245 : vector<16x32xf32>
    %c1_154 = arith.constant 1 : index
    %c6_155 = arith.constant 6 : index
    %c0_156 = arith.constant 0 : index
    %278 = vector.load %arg8[%c1_154, %c6_155, %c0_156] : memref<2x8x128xf32, #tpu.memory_space<vmem>>, vector<1x1x32xf32>
    %279 = vector.shape_cast %278 : vector<1x1x32xf32> to vector<1x32xf32>
    %c1_157 = arith.constant 1 : index
    %c7_158 = arith.constant 7 : index
    %c0_159 = arith.constant 0 : index
    %280 = vector.load %arg8[%c1_157, %c7_158, %c0_159] : memref<2x8x128xf32, #tpu.memory_space<vmem>>, vector<1x1x32xf32>
    %281 = vector.shape_cast %280 : vector<1x1x32xf32> to vector<1x32xf32>
    %cst_160 = arith.constant dense<0.000000e+00> : vector<16xf32>
    %282 = vector.multi_reduction <add>, %277, %cst_160 [1] : vector<16x32xf32> to vector<16xf32>
    %283 = vector.shape_cast %282 : vector<16xf32> to vector<16x1xf32>
    %cst_161 = arith.constant 3.200000e+01 : f32
    %284 = vector.broadcast %cst_161 : f32 to vector<16x1xf32>
    %285 = arith.divf %283, %284 : vector<16x1xf32>
    %286 = vector.broadcast %285 : vector<16x1xf32> to vector<16x32xf32>
    %287 = arith.subf %277, %286 : vector<16x32xf32>
    %288 = arith.mulf %287, %287 : vector<16x32xf32>
    %cst_162 = arith.constant dense<0.000000e+00> : vector<16xf32>
    %289 = vector.multi_reduction <add>, %288, %cst_162 [1] : vector<16x32xf32> to vector<16xf32>
    %290 = vector.shape_cast %289 : vector<16xf32> to vector<16x1xf32>
    %cst_163 = arith.constant 3.200000e+01 : f32
    %291 = vector.broadcast %cst_163 : f32 to vector<16x1xf32>
    %292 = arith.divf %290, %291 : vector<16x1xf32>
    %293 = vector.broadcast %285 : vector<16x1xf32> to vector<16x32xf32>
    %294 = arith.subf %277, %293 : vector<16x32xf32>
    %cst_164 = arith.constant 9.99999974E-6 : f32
    %295 = vector.broadcast %cst_164 : f32 to vector<16x1xf32>
    %296 = arith.addf %292, %295 : vector<16x1xf32>
    %297 = math.rsqrt %296 : vector<16x1xf32>
    %298 = vector.broadcast %297 : vector<16x1xf32> to vector<16x32xf32>
    %299 = arith.mulf %294, %298 : vector<16x32xf32>
    %300 = vector.broadcast %279 : vector<1x32xf32> to vector<16x32xf32>
    %301 = arith.mulf %299, %300 : vector<16x32xf32>
    %302 = vector.broadcast %281 : vector<1x32xf32> to vector<16x32xf32>
    %303 = arith.addf %301, %302 : vector<16x32xf32>
    %304 = vector.broadcast %9 : vector<16x1xf32> to vector<16x32xf32>
    %305 = arith.mulf %303, %304 : vector<16x32xf32>
    %c0_165 = arith.constant 0 : index
    %c0_166 = arith.constant 0 : index
    %306 = vector.load %arg9[%c0_165, %c0_166] : memref<32x8xbf16, #tpu.memory_space<vmem>>, vector<32x8xbf16>
    %307 = arith.truncf %305 : vector<16x32xf32> to vector<16x32xbf16>
    %cst_167 = arith.constant dense<0.000000e+00> : vector<16x8xf32>
    %308 = tpu.matmul %307, %306, %cst_167 {dimension_numbers = #tpu.dot_dimension_numbers<[1], [0], [0], [1], [0, 0, 1, 1], [], []>} : vector<16x32xbf16>, vector<32x8xbf16>, vector<16x8xf32> -> vector<16x8xf32>
    %c0_168 = arith.constant 0 : index
    %c0_169 = arith.constant 0 : index
    %309 = vector.load %arg10[%c0_168, %c0_169] : memref<8x128xf32, #tpu.memory_space<vmem>>, vector<1x8xf32>
    %310 = vector.broadcast %309 : vector<1x8xf32> to vector<16x8xf32>
    %311 = arith.addf %308, %310 : vector<16x8xf32>
    %c0_170 = arith.constant 0 : index
    %c0_171 = arith.constant 0 : index
    %312 = vector.load %arg11[%c0_170, %c0_171] : memref<40x32xbf16, #tpu.memory_space<vmem>>, vector<40x32xbf16>
    %c1_172 = arith.constant 1 : index
    %c0_173 = arith.constant 0 : index
    %313 = vector.load %arg10[%c1_172, %c0_173] : memref<8x128xf32, #tpu.memory_space<vmem>>, vector<1x32xf32>
    %cst_174 = arith.constant 0.000000e+00 : f32
    %314 = vector.broadcast %cst_174 : f32 to vector<20x8xf32>
    %c0_175 = arith.constant 0 : index
    %c0_176 = arith.constant 0 : index
    %315 = vector.load %arg18[%c0_175, %c0_176] : memref<20x8xf32, #tpu.memory_space<vmem>>, vector<20x8xf32>
    tpu.vector_store %arg18[%c0_175, %c0_176], %314 {strides = array<i32>} : memref<20x8xf32, #tpu.memory_space<vmem>>, vector<20x8xf32>,
    %c2_177 = arith.constant 2 : index
    %c0_178 = arith.constant 0 : index
    %316 = vector.load %arg18[%c2_177, %c0_178] : memref<20x8xf32, #tpu.memory_space<vmem>>, vector<16x8xf32>
    tpu.vector_store %arg18[%c2_177, %c0_178], %311 {strides = array<i32>} : memref<20x8xf32, #tpu.memory_space<vmem>>, vector<16x8xf32>,
    %c0_179 = arith.constant 0 : index
    %c0_180 = arith.constant 0 : index
    %317 = vector.load %arg18[%c0_179, %c0_180] : memref<20x8xf32, #tpu.memory_space<vmem>>, vector<16x8xf32>
    %c1_181 = arith.constant 1 : index
    %c0_182 = arith.constant 0 : index
    %318 = vector.load %arg18[%c1_181, %c0_182] : memref<20x8xf32, #tpu.memory_space<vmem>>, vector<16x8xf32>
    %c2_183 = arith.constant 2 : index
    %c0_184 = arith.constant 0 : index
    %319 = vector.load %arg18[%c2_183, %c0_184] : memref<20x8xf32, #tpu.memory_space<vmem>>, vector<16x8xf32>
    %c3_185 = arith.constant 3 : index
    %c0_186 = arith.constant 0 : index
    %320 = vector.load %arg18[%c3_185, %c0_186] : memref<20x8xf32, #tpu.memory_space<vmem>>, vector<16x8xf32>
    %c4_187 = arith.constant 4 : index
    %c0_188 = arith.constant 0 : index
    %321 = vector.load %arg18[%c4_187, %c0_188] : memref<20x8xf32, #tpu.memory_space<vmem>>, vector<16x8xf32>
    %322 = tpu.concatenate %317, %318, %319, %320, %321 in 1 : vector<16x8xf32>, vector<16x8xf32>, vector<16x8xf32>, vector<16x8xf32>, vector<16x8xf32> -> vector<16x40xf32>
    %323 = arith.truncf %322 : vector<16x40xf32> to vector<16x40xbf16>
    %cst_189 = arith.constant dense<0.000000e+00> : vector<16x32xf32>
    %324 = tpu.matmul %323, %312, %cst_189 {dimension_numbers = #tpu.dot_dimension_numbers<[1], [0], [0], [1], [0, 0, 1, 1], [], []>} : vector<16x40xbf16>, vector<40x32xbf16>, vector<16x32xf32> -> vector<16x32xf32>
    %325 = vector.broadcast %313 : vector<1x32xf32> to vector<16x32xf32>
    %326 = arith.addf %324, %325 : vector<16x32xf32>
    %327 = math.tanh %326 : vector<16x32xf32>
    %c0_190 = arith.constant 0 : index
    %c0_191 = arith.constant 0 : index
    %328 = vector.load %arg12[%c0_190, %c0_191] : memref<160x32xbf16, #tpu.memory_space<vmem>>, vector<160x32xbf16>
    %c2_192 = arith.constant 2 : index
    %c0_193 = arith.constant 0 : index
    %329 = vector.load %arg10[%c2_192, %c0_193] : memref<8x128xf32, #tpu.memory_space<vmem>>, vector<1x32xf32>
    %cst_194 = arith.constant 0.000000e+00 : f32
    %330 = vector.broadcast %cst_194 : f32 to vector<20x32xf32>
    %c0_195 = arith.constant 0 : index
    %c0_196 = arith.constant 0 : index
    %331 = vector.load %arg19[%c0_195, %c0_196] : memref<20x32xf32, #tpu.memory_space<vmem>>, vector<20x32xf32>
    tpu.vector_store %arg19[%c0_195, %c0_196], %330 {strides = array<i32>} : memref<20x32xf32, #tpu.memory_space<vmem>>, vector<20x32xf32>,
    %c2_197 = arith.constant 2 : index
    %c0_198 = arith.constant 0 : index
    %332 = vector.load %arg19[%c2_197, %c0_198] : memref<20x32xf32, #tpu.memory_space<vmem>>, vector<16x32xf32>
    tpu.vector_store %arg19[%c2_197, %c0_198], %327 {strides = array<i32>} : memref<20x32xf32, #tpu.memory_space<vmem>>, vector<16x32xf32>,
    %c0_199 = arith.constant 0 : index
    %c0_200 = arith.constant 0 : index
    %333 = vector.load %arg19[%c0_199, %c0_200] : memref<20x32xf32, #tpu.memory_space<vmem>>, vector<16x32xf32>
    %c1_201 = arith.constant 1 : index
    %c0_202 = arith.constant 0 : index
    %334 = vector.load %arg19[%c1_201, %c0_202] : memref<20x32xf32, #tpu.memory_space<vmem>>, vector<16x32xf32>
    %c2_203 = arith.constant 2 : index
    %c0_204 = arith.constant 0 : index
    %335 = vector.load %arg19[%c2_203, %c0_204] : memref<20x32xf32, #tpu.memory_space<vmem>>, vector<16x32xf32>
    %c3_205 = arith.constant 3 : index
    %c0_206 = arith.constant 0 : index
    %336 = vector.load %arg19[%c3_205, %c0_206] : memref<20x32xf32, #tpu.memory_space<vmem>>, vector<16x32xf32>
    %c4_207 = arith.constant 4 : index
    %c0_208 = arith.constant 0 : index
    %337 = vector.load %arg19[%c4_207, %c0_208] : memref<20x32xf32, #tpu.memory_space<vmem>>, vector<16x32xf32>
    %338 = tpu.concatenate %333, %334, %335, %336, %337 in 1 : vector<16x32xf32>, vector<16x32xf32>, vector<16x32xf32>, vector<16x32xf32>, vector<16x32xf32> -> vector<16x160xf32>
    %339 = arith.truncf %338 : vector<16x160xf32> to vector<16x160xbf16>
    %cst_209 = arith.constant dense<0.000000e+00> : vector<16x32xf32>
    %340 = tpu.matmul %339, %328, %cst_209 {dimension_numbers = #tpu.dot_dimension_numbers<[1], [0], [0], [1], [0, 0, 1, 1], [], []>} : vector<16x160xbf16>, vector<160x32xbf16>, vector<16x32xf32> -> vector<16x32xf32>
    %341 = vector.broadcast %329 : vector<1x32xf32> to vector<16x32xf32>
    %342 = arith.addf %340, %341 : vector<16x32xf32>
    %343 = math.tanh %342 : vector<16x32xf32>
    %c0_210 = arith.constant 0 : index
    %c0_211 = arith.constant 0 : index
    %344 = vector.load %arg13[%c0_210, %c0_211] : memref<160x32xbf16, #tpu.memory_space<vmem>>, vector<160x32xbf16>
    %c3_212 = arith.constant 3 : index
    %c0_213 = arith.constant 0 : index
    %345 = vector.load %arg10[%c3_212, %c0_213] : memref<8x128xf32, #tpu.memory_space<vmem>>, vector<1x32xf32>
    %cst_214 = arith.constant 0.000000e+00 : f32
    %346 = vector.broadcast %cst_214 : f32 to vector<20x32xf32>
    %c0_215 = arith.constant 0 : index
    %c0_216 = arith.constant 0 : index
    %347 = vector.load %arg19[%c0_215, %c0_216] : memref<20x32xf32, #tpu.memory_space<vmem>>, vector<20x32xf32>
    tpu.vector_store %arg19[%c0_215, %c0_216], %346 {strides = array<i32>} : memref<20x32xf32, #tpu.memory_space<vmem>>, vector<20x32xf32>,
    %c2_217 = arith.constant 2 : index
    %c0_218 = arith.constant 0 : index
    %348 = vector.load %arg19[%c2_217, %c0_218] : memref<20x32xf32, #tpu.memory_space<vmem>>, vector<16x32xf32>
    tpu.vector_store %arg19[%c2_217, %c0_218], %343 {strides = array<i32>} : memref<20x32xf32, #tpu.memory_space<vmem>>, vector<16x32xf32>,
    %c0_219 = arith.constant 0 : index
    %c0_220 = arith.constant 0 : index
    %349 = vector.load %arg19[%c0_219, %c0_220] : memref<20x32xf32, #tpu.memory_space<vmem>>, vector<16x32xf32>
    %c1_221 = arith.constant 1 : index
    %c0_222 = arith.constant 0 : index
    %350 = vector.load %arg19[%c1_221, %c0_222] : memref<20x32xf32, #tpu.memory_space<vmem>>, vector<16x32xf32>
    %c2_223 = arith.constant 2 : index
    %c0_224 = arith.constant 0 : index
    %351 = vector.load %arg19[%c2_223, %c0_224] : memref<20x32xf32, #tpu.memory_space<vmem>>, vector<16x32xf32>
    %c3_225 = arith.constant 3 : index
    %c0_226 = arith.constant 0 : index
    %352 = vector.load %arg19[%c3_225, %c0_226] : memref<20x32xf32, #tpu.memory_space<vmem>>, vector<16x32xf32>
    %c4_227 = arith.constant 4 : index
    %c0_228 = arith.constant 0 : index
    %353 = vector.load %arg19[%c4_227, %c0_228] : memref<20x32xf32, #tpu.memory_space<vmem>>, vector<16x32xf32>
    %354 = tpu.concatenate %349, %350, %351, %352, %353 in 1 : vector<16x32xf32>, vector<16x32xf32>, vector<16x32xf32>, vector<16x32xf32>, vector<16x32xf32> -> vector<16x160xf32>
    %355 = arith.truncf %354 : vector<16x160xf32> to vector<16x160xbf16>
    %cst_229 = arith.constant dense<0.000000e+00> : vector<16x32xf32>
    %356 = tpu.matmul %355, %344, %cst_229 {dimension_numbers = #tpu.dot_dimension_numbers<[1], [0], [0], [1], [0, 0, 1, 1], [], []>} : vector<16x160xbf16>, vector<160x32xbf16>, vector<16x32xf32> -> vector<16x32xf32>
    %357 = vector.broadcast %345 : vector<1x32xf32> to vector<16x32xf32>
    %358 = arith.addf %356, %357 : vector<16x32xf32>
    %359 = math.tanh %358 : vector<16x32xf32>
    %c0_230 = arith.constant 0 : index
    %c0_231 = arith.constant 0 : index
    %360 = vector.load %arg14[%c0_230, %c0_231] : memref<160x32xbf16, #tpu.memory_space<vmem>>, vector<160x32xbf16>
    %c4_232 = arith.constant 4 : index
    %c0_233 = arith.constant 0 : index
    %361 = vector.load %arg10[%c4_232, %c0_233] : memref<8x128xf32, #tpu.memory_space<vmem>>, vector<1x32xf32>
    %cst_234 = arith.constant 0.000000e+00 : f32
    %362 = vector.broadcast %cst_234 : f32 to vector<20x32xf32>
    %c0_235 = arith.constant 0 : index
    %c0_236 = arith.constant 0 : index
    %363 = vector.load %arg19[%c0_235, %c0_236] : memref<20x32xf32, #tpu.memory_space<vmem>>, vector<20x32xf32>
    tpu.vector_store %arg19[%c0_235, %c0_236], %362 {strides = array<i32>} : memref<20x32xf32, #tpu.memory_space<vmem>>, vector<20x32xf32>,
    %c2_237 = arith.constant 2 : index
    %c0_238 = arith.constant 0 : index
    %364 = vector.load %arg19[%c2_237, %c0_238] : memref<20x32xf32, #tpu.memory_space<vmem>>, vector<16x32xf32>
    tpu.vector_store %arg19[%c2_237, %c0_238], %359 {strides = array<i32>} : memref<20x32xf32, #tpu.memory_space<vmem>>, vector<16x32xf32>,
    %c0_239 = arith.constant 0 : index
    %c0_240 = arith.constant 0 : index
    %365 = vector.load %arg19[%c0_239, %c0_240] : memref<20x32xf32, #tpu.memory_space<vmem>>, vector<16x32xf32>
    %c1_241 = arith.constant 1 : index
    %c0_242 = arith.constant 0 : index
    %366 = vector.load %arg19[%c1_241, %c0_242] : memref<20x32xf32, #tpu.memory_space<vmem>>, vector<16x32xf32>
    %c2_243 = arith.constant 2 : index
    %c0_244 = arith.constant 0 : index
    %367 = vector.load %arg19[%c2_243, %c0_244] : memref<20x32xf32, #tpu.memory_space<vmem>>, vector<16x32xf32>
    %c3_245 = arith.constant 3 : index
    %c0_246 = arith.constant 0 : index
    %368 = vector.load %arg19[%c3_245, %c0_246] : memref<20x32xf32, #tpu.memory_space<vmem>>, vector<16x32xf32>
    %c4_247 = arith.constant 4 : index
    %c0_248 = arith.constant 0 : index
    %369 = vector.load %arg19[%c4_247, %c0_248] : memref<20x32xf32, #tpu.memory_space<vmem>>, vector<16x32xf32>
    %370 = tpu.concatenate %365, %366, %367, %368, %369 in 1 : vector<16x32xf32>, vector<16x32xf32>, vector<16x32xf32>, vector<16x32xf32>, vector<16x32xf32> -> vector<16x160xf32>
    %371 = arith.truncf %370 : vector<16x160xf32> to vector<16x160xbf16>
    %cst_249 = arith.constant dense<0.000000e+00> : vector<16x32xf32>
    %372 = tpu.matmul %371, %360, %cst_249 {dimension_numbers = #tpu.dot_dimension_numbers<[1], [0], [0], [1], [0, 0, 1, 1], [], []>} : vector<16x160xbf16>, vector<160x32xbf16>, vector<16x32xf32> -> vector<16x32xf32>
    %373 = vector.broadcast %361 : vector<1x32xf32> to vector<16x32xf32>
    %374 = arith.addf %372, %373 : vector<16x32xf32>
    %375 = math.tanh %374 : vector<16x32xf32>
    %c0_250 = arith.constant 0 : index
    %c0_251 = arith.constant 0 : index
    %376 = vector.load %arg15[%c0_250, %c0_251] : memref<160x8xbf16, #tpu.memory_space<vmem>>, vector<160x8xbf16>
    %c5_252 = arith.constant 5 : index
    %c0_253 = arith.constant 0 : index
    %377 = vector.load %arg10[%c5_252, %c0_253] : memref<8x128xf32, #tpu.memory_space<vmem>>, vector<1x8xf32>
    %cst_254 = arith.constant 0.000000e+00 : f32
    %378 = vector.broadcast %cst_254 : f32 to vector<20x32xf32>
    %c0_255 = arith.constant 0 : index
    %c0_256 = arith.constant 0 : index
    %379 = vector.load %arg19[%c0_255, %c0_256] : memref<20x32xf32, #tpu.memory_space<vmem>>, vector<20x32xf32>
    tpu.vector_store %arg19[%c0_255, %c0_256], %378 {strides = array<i32>} : memref<20x32xf32, #tpu.memory_space<vmem>>, vector<20x32xf32>,
    %c2_257 = arith.constant 2 : index
    %c0_258 = arith.constant 0 : index
    %380 = vector.load %arg19[%c2_257, %c0_258] : memref<20x32xf32, #tpu.memory_space<vmem>>, vector<16x32xf32>
    tpu.vector_store %arg19[%c2_257, %c0_258], %375 {strides = array<i32>} : memref<20x32xf32, #tpu.memory_space<vmem>>, vector<16x32xf32>,
    %c0_259 = arith.constant 0 : index
    %c0_260 = arith.constant 0 : index
    %381 = vector.load %arg19[%c0_259, %c0_260] : memref<20x32xf32, #tpu.memory_space<vmem>>, vector<16x32xf32>
    %c1_261 = arith.constant 1 : index
    %c0_262 = arith.constant 0 : index
    %382 = vector.load %arg19[%c1_261, %c0_262] : memref<20x32xf32, #tpu.memory_space<vmem>>, vector<16x32xf32>
    %c2_263 = arith.constant 2 : index
    %c0_264 = arith.constant 0 : index
    %383 = vector.load %arg19[%c2_263, %c0_264] : memref<20x32xf32, #tpu.memory_space<vmem>>, vector<16x32xf32>
    %c3_265 = arith.constant 3 : index
    %c0_266 = arith.constant 0 : index
    %384 = vector.load %arg19[%c3_265, %c0_266] : memref<20x32xf32, #tpu.memory_space<vmem>>, vector<16x32xf32>
    %c4_267 = arith.constant 4 : index
    %c0_268 = arith.constant 0 : index
    %385 = vector.load %arg19[%c4_267, %c0_268] : memref<20x32xf32, #tpu.memory_space<vmem>>, vector<16x32xf32>
    %386 = tpu.concatenate %381, %382, %383, %384, %385 in 1 : vector<16x32xf32>, vector<16x32xf32>, vector<16x32xf32>, vector<16x32xf32>, vector<16x32xf32> -> vector<16x160xf32>
    %387 = arith.truncf %386 : vector<16x160xf32> to vector<16x160xbf16>
    %cst_269 = arith.constant dense<0.000000e+00> : vector<16x8xf32>
    %388 = tpu.matmul %387, %376, %cst_269 {dimension_numbers = #tpu.dot_dimension_numbers<[1], [0], [0], [1], [0, 0, 1, 1], [], []>} : vector<16x160xbf16>, vector<160x8xbf16>, vector<16x8xf32> -> vector<16x8xf32>
    %389 = vector.broadcast %377 : vector<1x8xf32> to vector<16x8xf32>
    %390 = arith.addf %388, %389 : vector<16x8xf32>
    %391 = arith.addf %390, %311 : vector<16x8xf32>
    %392 = tpu.concatenate %311, %391 in 1 : vector<16x8xf32>, vector<16x8xf32> -> vector<16x16xf32>
    %393 = vector.broadcast %9 : vector<16x1xf32> to vector<16x16xf32>
    %394 = arith.mulf %392, %393 : vector<16x16xf32>
    %c0_270 = arith.constant 0 : index
    %c0_271 = arith.constant 0 : index
    %c0_272 = arith.constant 0 : index
    %395 = vector.load %arg16[%c0_270, %c0_271, %c0_272] : memref<1x16x16xf32, #tpu.memory_space<vmem>>, vector<1x16x16xf32>
    %396 = vector.shape_cast %395 : vector<1x16x16xf32> to vector<16x16xf32>
    %397 = vector.shape_cast %394 : vector<16x16xf32> to vector<1x16x16xf32>
    tpu.vector_store %arg16[%c0_270, %c0_271, %c0_272], %397 {strides = array<i32>} : memref<1x16x16xf32, #tpu.memory_space<vmem>>, vector<1x16x16xf32>,
    return
  }
  func.func @transform_0(%arg0: i32) -> (i32, i32, i32) {
    %c0_i32 = arith.constant 0 : i32
    %c0_i32_0 = arith.constant 0 : i32
    %c0_i32_1 = arith.constant 0 : i32
    return %arg0, %c0_i32, %c0_i32_0 : i32, i32, i32
  }
  func.func @transform_1(%arg0: i32) -> (i32, i32, i32) {
    %c0_i32 = arith.constant 0 : i32
    %c0_i32_0 = arith.constant 0 : i32
    %c0_i32_1 = arith.constant 0 : i32
    return %arg0, %c0_i32, %c0_i32_0 : i32, i32, i32
  }
  func.func @transform_2(%arg0: i32) -> (i32, i32, i32) {
    %c0_i32 = arith.constant 0 : i32
    %c0_i32_0 = arith.constant 0 : i32
    %c0_i32_1 = arith.constant 0 : i32
    return %arg0, %c0_i32, %c0_i32_0 : i32, i32, i32
  }
  func.func @transform_3(%arg0: i32) -> (i32, i32, i32) {
    %c0_i32 = arith.constant 0 : i32
    %c0_i32_0 = arith.constant 0 : i32
    %c0_i32_1 = arith.constant 0 : i32
    %c0_i32_2 = arith.constant 0 : i32
    return %c0_i32, %c0_i32_0, %c0_i32_1 : i32, i32, i32
  }
  func.func @transform_4(%arg0: i32) -> (i32, i32, i32) {
    %c0_i32 = arith.constant 0 : i32
    %c0_i32_0 = arith.constant 0 : i32
    %c0_i32_1 = arith.constant 0 : i32
    %c0_i32_2 = arith.constant 0 : i32
    return %c0_i32, %c0_i32_0, %c0_i32_1 : i32, i32, i32
  }
  func.func @transform_5(%arg0: i32) -> (i32, i32, i32) {
    %c0_i32 = arith.constant 0 : i32
    %c0_i32_0 = arith.constant 0 : i32
    %c0_i32_1 = arith.constant 0 : i32
    %c0_i32_2 = arith.constant 0 : i32
    return %c0_i32, %c0_i32_0, %c0_i32_1 : i32, i32, i32
  }
  func.func @transform_6(%arg0: i32) -> (i32, i32, i32) {
    %c0_i32 = arith.constant 0 : i32
    %c0_i32_0 = arith.constant 0 : i32
    %c0_i32_1 = arith.constant 0 : i32
    %c0_i32_2 = arith.constant 0 : i32
    return %c0_i32, %c0_i32_0, %c0_i32_1 : i32, i32, i32
  }
  func.func @transform_7(%arg0: i32) -> (i32, i32, i32) {
    %c0_i32 = arith.constant 0 : i32
    %c0_i32_0 = arith.constant 0 : i32
    %c0_i32_1 = arith.constant 0 : i32
    %c0_i32_2 = arith.constant 0 : i32
    return %c0_i32, %c0_i32_0, %c0_i32_1 : i32, i32, i32
  }
  func.func @transform_8(%arg0: i32) -> (i32, i32) {
    %c0_i32 = arith.constant 0 : i32
    %c0_i32_0 = arith.constant 0 : i32
    %c0_i32_1 = arith.constant 0 : i32
    return %c0_i32, %c0_i32_0 : i32, i32
  }
  func.func @transform_9(%arg0: i32) -> (i32, i32) {
    %c0_i32 = arith.constant 0 : i32
    %c0_i32_0 = arith.constant 0 : i32
    %c0_i32_1 = arith.constant 0 : i32
    return %c0_i32, %c0_i32_0 : i32, i32
  }
  func.func @transform_10(%arg0: i32) -> (i32, i32) {
    %c0_i32 = arith.constant 0 : i32
    %c0_i32_0 = arith.constant 0 : i32
    %c0_i32_1 = arith.constant 0 : i32
    return %c0_i32, %c0_i32_0 : i32, i32
  }
  func.func @transform_11(%arg0: i32) -> (i32, i32) {
    %c0_i32 = arith.constant 0 : i32
    %c0_i32_0 = arith.constant 0 : i32
    %c0_i32_1 = arith.constant 0 : i32
    return %c0_i32, %c0_i32_0 : i32, i32
  }
  func.func @transform_12(%arg0: i32) -> (i32, i32) {
    %c0_i32 = arith.constant 0 : i32
    %c0_i32_0 = arith.constant 0 : i32
    %c0_i32_1 = arith.constant 0 : i32
    return %c0_i32, %c0_i32_0 : i32, i32
  }
  func.func @transform_13(%arg0: i32) -> (i32, i32) {
    %c0_i32 = arith.constant 0 : i32
    %c0_i32_0 = arith.constant 0 : i32
    %c0_i32_1 = arith.constant 0 : i32
    return %c0_i32, %c0_i32_0 : i32, i32
  }
  func.func @transform_14(%arg0: i32) -> (i32, i32) {
    %c0_i32 = arith.constant 0 : i32
    %c0_i32_0 = arith.constant 0 : i32
    %c0_i32_1 = arith.constant 0 : i32
    return %c0_i32, %c0_i32_0 : i32, i32
  }
  func.func @transform_15(%arg0: i32) -> (i32, i32, i32) {
    %c0_i32 = arith.constant 0 : i32
    %c0_i32_0 = arith.constant 0 : i32
    %c0_i32_1 = arith.constant 0 : i32
    return %arg0, %c0_i32, %c0_i32_0 : i32, i32, i32
  }
}

module attributes {stable_mosaic.version = 11 : i64} {
  func.func @_pitch_energy_kernel(%arg0: i32, %arg1: memref<1x16x32xf32, #tpu.memory_space<vmem>>, %arg2: memref<1x16x1xf32, #tpu.memory_space<vmem>>, %arg3: memref<2x96x32xbf16, #tpu.memory_space<vmem>>, %arg4: memref<2x96x32xbf16, #tpu.memory_space<vmem>>, %arg5: memref<2x32x1xbf16, #tpu.memory_space<vmem>>, %arg6: memref<2x8x128xf32, #tpu.memory_space<vmem>>, %arg7: memref<1x16x2xf32, #tpu.memory_space<vmem>>, %arg8: memref<18x32xf32, #tpu.memory_space<vmem>>, %arg9: memref<18x32xf32, #tpu.memory_space<vmem>>) attributes {dimension_semantics = [#tpu.dimension_semantics<parallel>], iteration_bounds = array<i64: 2>, scalar_prefetch = 0 : i64, scratch_operands = 2 : i64, tpu.core_type = #tpu.core_type<tc>, window_params = [{transform_indices = @transform_0, window_bounds = array<i64: 1, 16, 32>}, {transform_indices = @transform_1, window_bounds = array<i64: 1, 16, 1>}, {pipeline_mode = #tpu.pipeline_mode<synchronous>, transform_indices = @transform_2, window_bounds = array<i64: 2, 96, 32>}, {pipeline_mode = #tpu.pipeline_mode<synchronous>, transform_indices = @transform_3, window_bounds = array<i64: 2, 96, 32>}, {pipeline_mode = #tpu.pipeline_mode<synchronous>, transform_indices = @transform_4, window_bounds = array<i64: 2, 32, 1>}, {pipeline_mode = #tpu.pipeline_mode<synchronous>, transform_indices = @transform_5, window_bounds = array<i64: 2, 8, 128>}, {transform_indices = @transform_6, window_bounds = array<i64: 1, 16, 2>}]} {
    %c0 = arith.constant 0 : index
    %c0_0 = arith.constant 0 : index
    %c0_1 = arith.constant 0 : index
    %0 = vector.load %arg1[%c0, %c0_0, %c0_1] : memref<1x16x32xf32, #tpu.memory_space<vmem>>, vector<1x16x32xf32>
    %1 = vector.shape_cast %0 : vector<1x16x32xf32> to vector<16x32xf32>
    %c0_2 = arith.constant 0 : index
    %c0_3 = arith.constant 0 : index
    %c0_4 = arith.constant 0 : index
    %2 = vector.load %arg2[%c0_2, %c0_3, %c0_4] : memref<1x16x1xf32, #tpu.memory_space<vmem>>, vector<1x16x1xf32>
    %3 = vector.shape_cast %2 : vector<1x16x1xf32> to vector<16x1xf32>
    %cst = arith.constant 1.000000e+00 : f32
    %4 = vector.broadcast %cst : f32 to vector<16x1xf32>
    %5 = arith.subf %4, %3 : vector<16x1xf32>
    %c0_5 = arith.constant 0 : index
    %c0_6 = arith.constant 0 : index
    %c0_7 = arith.constant 0 : index
    %6 = vector.load %arg3[%c0_5, %c0_6, %c0_7] : memref<2x96x32xbf16, #tpu.memory_space<vmem>>, vector<1x96x32xbf16>
    %7 = vector.shape_cast %6 : vector<1x96x32xbf16> to vector<96x32xbf16>
    %c0_8 = arith.constant 0 : index
    %c0_9 = arith.constant 0 : index
    %c0_10 = arith.constant 0 : index
    %8 = vector.load %arg4[%c0_8, %c0_9, %c0_10] : memref<2x96x32xbf16, #tpu.memory_space<vmem>>, vector<1x96x32xbf16>
    %9 = vector.shape_cast %8 : vector<1x96x32xbf16> to vector<96x32xbf16>
    %c0_11 = arith.constant 0 : index
    %c0_12 = arith.constant 0 : index
    %c0_13 = arith.constant 0 : index
    %10 = vector.load %arg5[%c0_11, %c0_12, %c0_13] : memref<2x32x1xbf16, #tpu.memory_space<vmem>>, vector<1x32x1xbf16>
    %11 = vector.shape_cast %10 : vector<1x32x1xbf16> to vector<32x1xbf16>
    %c0_14 = arith.constant 0 : index
    %c0_15 = arith.constant 0 : index
    %c0_16 = arith.constant 0 : index
    %12 = vector.load %arg6[%c0_14, %c0_15, %c0_16] : memref<2x8x128xf32, #tpu.memory_space<vmem>>, vector<1x8x128xf32>
    %13 = vector.shape_cast %12 : vector<1x8x128xf32> to vector<8x128xf32>
    %14 = vector.extract_strided_slice %13 {offsets = [0, 0], sizes = [1, 32], strides = [1, 1]} : vector<8x128xf32> to vector<1x32xf32>
    %cst_17 = arith.constant 0.000000e+00 : f32
    %15 = vector.broadcast %cst_17 : f32 to vector<18x32xf32>
    %c0_18 = arith.constant 0 : index
    %c0_19 = arith.constant 0 : index
    %16 = vector.load %arg8[%c0_18, %c0_19] : memref<18x32xf32, #tpu.memory_space<vmem>>, vector<18x32xf32>
    tpu.vector_store %arg8[%c0_18, %c0_19], %15 {strides = array<i32>} : memref<18x32xf32, #tpu.memory_space<vmem>>, vector<18x32xf32>,
    %c1 = arith.constant 1 : index
    %c0_20 = arith.constant 0 : index
    %17 = vector.load %arg8[%c1, %c0_20] : memref<18x32xf32, #tpu.memory_space<vmem>>, vector<16x32xf32>
    tpu.vector_store %arg8[%c1, %c0_20], %1 {strides = array<i32>} : memref<18x32xf32, #tpu.memory_space<vmem>>, vector<16x32xf32>,
    %c0_21 = arith.constant 0 : index
    %c0_22 = arith.constant 0 : index
    %18 = vector.load %arg8[%c0_21, %c0_22] : memref<18x32xf32, #tpu.memory_space<vmem>>, vector<16x32xf32>
    %c1_23 = arith.constant 1 : index
    %c0_24 = arith.constant 0 : index
    %19 = vector.load %arg8[%c1_23, %c0_24] : memref<18x32xf32, #tpu.memory_space<vmem>>, vector<16x32xf32>
    %c2 = arith.constant 2 : index
    %c0_25 = arith.constant 0 : index
    %20 = vector.load %arg8[%c2, %c0_25] : memref<18x32xf32, #tpu.memory_space<vmem>>, vector<16x32xf32>
    %21 = tpu.concatenate %18, %19, %20 in 1 : vector<16x32xf32>, vector<16x32xf32>, vector<16x32xf32> -> vector<16x96xf32>
    %22 = arith.truncf %21 : vector<16x96xf32> to vector<16x96xbf16>
    %cst_26 = arith.constant dense<0.000000e+00> : vector<16x32xf32>
    %23 = tpu.matmul %22, %7, %cst_26 {dimension_numbers = #tpu.dot_dimension_numbers<[1], [0], [0], [1], [0, 0, 1, 1], [], []>} : vector<16x96xbf16>, vector<96x32xbf16>, vector<16x32xf32> -> vector<16x32xf32>
    %24 = vector.broadcast %14 : vector<1x32xf32> to vector<16x32xf32>
    %25 = arith.addf %23, %24 : vector<16x32xf32>
    %cst_27 = arith.constant 0.000000e+00 : f32
    %26 = vector.broadcast %cst_27 : f32 to vector<16x32xf32>
    %27 = arith.maximumf %25, %26 : vector<16x32xf32>
    %28 = vector.extract_strided_slice %13 {offsets = [1, 0], sizes = [1, 32], strides = [1, 1]} : vector<8x128xf32> to vector<1x32xf32>
    %29 = vector.extract_strided_slice %13 {offsets = [2, 0], sizes = [1, 32], strides = [1, 1]} : vector<8x128xf32> to vector<1x32xf32>
    %cst_28 = arith.constant dense<0.000000e+00> : vector<16xf32>
    %30 = vector.multi_reduction <add>, %27, %cst_28 [1] : vector<16x32xf32> to vector<16xf32>
    %31 = vector.shape_cast %30 : vector<16xf32> to vector<16x1xf32>
    %cst_29 = arith.constant 3.200000e+01 : f32
    %32 = vector.broadcast %cst_29 : f32 to vector<16x1xf32>
    %33 = arith.divf %31, %32 : vector<16x1xf32>
    %34 = vector.broadcast %33 : vector<16x1xf32> to vector<16x32xf32>
    %35 = arith.subf %27, %34 : vector<16x32xf32>
    %36 = arith.mulf %35, %35 : vector<16x32xf32>
    %cst_30 = arith.constant dense<0.000000e+00> : vector<16xf32>
    %37 = vector.multi_reduction <add>, %36, %cst_30 [1] : vector<16x32xf32> to vector<16xf32>
    %38 = vector.shape_cast %37 : vector<16xf32> to vector<16x1xf32>
    %cst_31 = arith.constant 3.200000e+01 : f32
    %39 = vector.broadcast %cst_31 : f32 to vector<16x1xf32>
    %40 = arith.divf %38, %39 : vector<16x1xf32>
    %41 = vector.broadcast %33 : vector<16x1xf32> to vector<16x32xf32>
    %42 = arith.subf %27, %41 : vector<16x32xf32>
    %cst_32 = arith.constant 9.99999974E-6 : f32
    %43 = vector.broadcast %cst_32 : f32 to vector<16x1xf32>
    %44 = arith.addf %40, %43 : vector<16x1xf32>
    %45 = math.rsqrt %44 : vector<16x1xf32>
    %46 = vector.broadcast %45 : vector<16x1xf32> to vector<16x32xf32>
    %47 = arith.mulf %42, %46 : vector<16x32xf32>
    %48 = vector.broadcast %28 : vector<1x32xf32> to vector<16x32xf32>
    %49 = arith.mulf %47, %48 : vector<16x32xf32>
    %50 = vector.broadcast %29 : vector<1x32xf32> to vector<16x32xf32>
    %51 = arith.addf %49, %50 : vector<16x32xf32>
    %52 = vector.extract_strided_slice %13 {offsets = [3, 0], sizes = [1, 32], strides = [1, 1]} : vector<8x128xf32> to vector<1x32xf32>
    %cst_33 = arith.constant 0.000000e+00 : f32
    %53 = vector.broadcast %cst_33 : f32 to vector<18x32xf32>
    %c0_34 = arith.constant 0 : index
    %c0_35 = arith.constant 0 : index
    %54 = vector.load %arg9[%c0_34, %c0_35] : memref<18x32xf32, #tpu.memory_space<vmem>>, vector<18x32xf32>
    tpu.vector_store %arg9[%c0_34, %c0_35], %53 {strides = array<i32>} : memref<18x32xf32, #tpu.memory_space<vmem>>, vector<18x32xf32>,
    %c1_36 = arith.constant 1 : index
    %c0_37 = arith.constant 0 : index
    %55 = vector.load %arg9[%c1_36, %c0_37] : memref<18x32xf32, #tpu.memory_space<vmem>>, vector<16x32xf32>
    tpu.vector_store %arg9[%c1_36, %c0_37], %51 {strides = array<i32>} : memref<18x32xf32, #tpu.memory_space<vmem>>, vector<16x32xf32>,
    %c0_38 = arith.constant 0 : index
    %c0_39 = arith.constant 0 : index
    %56 = vector.load %arg9[%c0_38, %c0_39] : memref<18x32xf32, #tpu.memory_space<vmem>>, vector<16x32xf32>
    %c1_40 = arith.constant 1 : index
    %c0_41 = arith.constant 0 : index
    %57 = vector.load %arg9[%c1_40, %c0_41] : memref<18x32xf32, #tpu.memory_space<vmem>>, vector<16x32xf32>
    %c2_42 = arith.constant 2 : index
    %c0_43 = arith.constant 0 : index
    %58 = vector.load %arg9[%c2_42, %c0_43] : memref<18x32xf32, #tpu.memory_space<vmem>>, vector<16x32xf32>
    %59 = tpu.concatenate %56, %57, %58 in 1 : vector<16x32xf32>, vector<16x32xf32>, vector<16x32xf32> -> vector<16x96xf32>
    %60 = arith.truncf %59 : vector<16x96xf32> to vector<16x96xbf16>
    %cst_44 = arith.constant dense<0.000000e+00> : vector<16x32xf32>
    %61 = tpu.matmul %60, %9, %cst_44 {dimension_numbers = #tpu.dot_dimension_numbers<[1], [0], [0], [1], [0, 0, 1, 1], [], []>} : vector<16x96xbf16>, vector<96x32xbf16>, vector<16x32xf32> -> vector<16x32xf32>
    %62 = vector.broadcast %52 : vector<1x32xf32> to vector<16x32xf32>
    %63 = arith.addf %61, %62 : vector<16x32xf32>
    %cst_45 = arith.constant 0.000000e+00 : f32
    %64 = vector.broadcast %cst_45 : f32 to vector<16x32xf32>
    %65 = arith.maximumf %63, %64 : vector<16x32xf32>
    %66 = vector.extract_strided_slice %13 {offsets = [4, 0], sizes = [1, 32], strides = [1, 1]} : vector<8x128xf32> to vector<1x32xf32>
    %67 = vector.extract_strided_slice %13 {offsets = [5, 0], sizes = [1, 32], strides = [1, 1]} : vector<8x128xf32> to vector<1x32xf32>
    %cst_46 = arith.constant dense<0.000000e+00> : vector<16xf32>
    %68 = vector.multi_reduction <add>, %65, %cst_46 [1] : vector<16x32xf32> to vector<16xf32>
    %69 = vector.shape_cast %68 : vector<16xf32> to vector<16x1xf32>
    %cst_47 = arith.constant 3.200000e+01 : f32
    %70 = vector.broadcast %cst_47 : f32 to vector<16x1xf32>
    %71 = arith.divf %69, %70 : vector<16x1xf32>
    %72 = vector.broadcast %71 : vector<16x1xf32> to vector<16x32xf32>
    %73 = arith.subf %65, %72 : vector<16x32xf32>
    %74 = arith.mulf %73, %73 : vector<16x32xf32>
    %cst_48 = arith.constant dense<0.000000e+00> : vector<16xf32>
    %75 = vector.multi_reduction <add>, %74, %cst_48 [1] : vector<16x32xf32> to vector<16xf32>
    %76 = vector.shape_cast %75 : vector<16xf32> to vector<16x1xf32>
    %cst_49 = arith.constant 3.200000e+01 : f32
    %77 = vector.broadcast %cst_49 : f32 to vector<16x1xf32>
    %78 = arith.divf %76, %77 : vector<16x1xf32>
    %79 = vector.broadcast %71 : vector<16x1xf32> to vector<16x32xf32>
    %80 = arith.subf %65, %79 : vector<16x32xf32>
    %cst_50 = arith.constant 9.99999974E-6 : f32
    %81 = vector.broadcast %cst_50 : f32 to vector<16x1xf32>
    %82 = arith.addf %78, %81 : vector<16x1xf32>
    %83 = math.rsqrt %82 : vector<16x1xf32>
    %84 = vector.broadcast %83 : vector<16x1xf32> to vector<16x32xf32>
    %85 = arith.mulf %80, %84 : vector<16x32xf32>
    %86 = vector.broadcast %66 : vector<1x32xf32> to vector<16x32xf32>
    %87 = arith.mulf %85, %86 : vector<16x32xf32>
    %88 = vector.broadcast %67 : vector<1x32xf32> to vector<16x32xf32>
    %89 = arith.addf %87, %88 : vector<16x32xf32>
    %90 = arith.truncf %89 : vector<16x32xf32> to vector<16x32xbf16>
    %cst_51 = arith.constant dense<0.000000e+00> : vector<16x1xf32>
    %91 = tpu.matmul %90, %11, %cst_51 {dimension_numbers = #tpu.dot_dimension_numbers<[1], [0], [0], [1], [0, 0, 1, 1], [], []>} : vector<16x32xbf16>, vector<32x1xbf16>, vector<16x1xf32> -> vector<16x1xf32>
    %92 = vector.extract_strided_slice %13 {offsets = [6, 0], sizes = [1, 1], strides = [1, 1]} : vector<8x128xf32> to vector<1x1xf32>
    %93 = vector.broadcast %92 : vector<1x1xf32> to vector<16x1xf32>
    %94 = arith.addf %91, %93 : vector<16x1xf32>
    %95 = arith.mulf %94, %5 : vector<16x1xf32>
    %c1_52 = arith.constant 1 : index
    %c0_53 = arith.constant 0 : index
    %c0_54 = arith.constant 0 : index
    %96 = vector.load %arg3[%c1_52, %c0_53, %c0_54] : memref<2x96x32xbf16, #tpu.memory_space<vmem>>, vector<1x96x32xbf16>
    %97 = vector.shape_cast %96 : vector<1x96x32xbf16> to vector<96x32xbf16>
    %c1_55 = arith.constant 1 : index
    %c0_56 = arith.constant 0 : index
    %c0_57 = arith.constant 0 : index
    %98 = vector.load %arg4[%c1_55, %c0_56, %c0_57] : memref<2x96x32xbf16, #tpu.memory_space<vmem>>, vector<1x96x32xbf16>
    %99 = vector.shape_cast %98 : vector<1x96x32xbf16> to vector<96x32xbf16>
    %c1_58 = arith.constant 1 : index
    %c0_59 = arith.constant 0 : index
    %c0_60 = arith.constant 0 : index
    %100 = vector.load %arg5[%c1_58, %c0_59, %c0_60] : memref<2x32x1xbf16, #tpu.memory_space<vmem>>, vector<1x32x1xbf16>
    %101 = vector.shape_cast %100 : vector<1x32x1xbf16> to vector<32x1xbf16>
    %c1_61 = arith.constant 1 : index
    %c0_62 = arith.constant 0 : index
    %c0_63 = arith.constant 0 : index
    %102 = vector.load %arg6[%c1_61, %c0_62, %c0_63] : memref<2x8x128xf32, #tpu.memory_space<vmem>>, vector<1x8x128xf32>
    %103 = vector.shape_cast %102 : vector<1x8x128xf32> to vector<8x128xf32>
    %104 = vector.extract_strided_slice %103 {offsets = [0, 0], sizes = [1, 32], strides = [1, 1]} : vector<8x128xf32> to vector<1x32xf32>
    %cst_64 = arith.constant 0.000000e+00 : f32
    %105 = vector.broadcast %cst_64 : f32 to vector<18x32xf32>
    %c0_65 = arith.constant 0 : index
    %c0_66 = arith.constant 0 : index
    %106 = vector.load %arg8[%c0_65, %c0_66] : memref<18x32xf32, #tpu.memory_space<vmem>>, vector<18x32xf32>
    tpu.vector_store %arg8[%c0_65, %c0_66], %105 {strides = array<i32>} : memref<18x32xf32, #tpu.memory_space<vmem>>, vector<18x32xf32>,
    %c1_67 = arith.constant 1 : index
    %c0_68 = arith.constant 0 : index
    %107 = vector.load %arg8[%c1_67, %c0_68] : memref<18x32xf32, #tpu.memory_space<vmem>>, vector<16x32xf32>
    tpu.vector_store %arg8[%c1_67, %c0_68], %1 {strides = array<i32>} : memref<18x32xf32, #tpu.memory_space<vmem>>, vector<16x32xf32>,
    %c0_69 = arith.constant 0 : index
    %c0_70 = arith.constant 0 : index
    %108 = vector.load %arg8[%c0_69, %c0_70] : memref<18x32xf32, #tpu.memory_space<vmem>>, vector<16x32xf32>
    %c1_71 = arith.constant 1 : index
    %c0_72 = arith.constant 0 : index
    %109 = vector.load %arg8[%c1_71, %c0_72] : memref<18x32xf32, #tpu.memory_space<vmem>>, vector<16x32xf32>
    %c2_73 = arith.constant 2 : index
    %c0_74 = arith.constant 0 : index
    %110 = vector.load %arg8[%c2_73, %c0_74] : memref<18x32xf32, #tpu.memory_space<vmem>>, vector<16x32xf32>
    %111 = tpu.concatenate %108, %109, %110 in 1 : vector<16x32xf32>, vector<16x32xf32>, vector<16x32xf32> -> vector<16x96xf32>
    %112 = arith.truncf %111 : vector<16x96xf32> to vector<16x96xbf16>
    %cst_75 = arith.constant dense<0.000000e+00> : vector<16x32xf32>
    %113 = tpu.matmul %112, %97, %cst_75 {dimension_numbers = #tpu.dot_dimension_numbers<[1], [0], [0], [1], [0, 0, 1, 1], [], []>} : vector<16x96xbf16>, vector<96x32xbf16>, vector<16x32xf32> -> vector<16x32xf32>
    %114 = vector.broadcast %104 : vector<1x32xf32> to vector<16x32xf32>
    %115 = arith.addf %113, %114 : vector<16x32xf32>
    %cst_76 = arith.constant 0.000000e+00 : f32
    %116 = vector.broadcast %cst_76 : f32 to vector<16x32xf32>
    %117 = arith.maximumf %115, %116 : vector<16x32xf32>
    %118 = vector.extract_strided_slice %103 {offsets = [1, 0], sizes = [1, 32], strides = [1, 1]} : vector<8x128xf32> to vector<1x32xf32>
    %119 = vector.extract_strided_slice %103 {offsets = [2, 0], sizes = [1, 32], strides = [1, 1]} : vector<8x128xf32> to vector<1x32xf32>
    %cst_77 = arith.constant dense<0.000000e+00> : vector<16xf32>
    %120 = vector.multi_reduction <add>, %117, %cst_77 [1] : vector<16x32xf32> to vector<16xf32>
    %121 = vector.shape_cast %120 : vector<16xf32> to vector<16x1xf32>
    %cst_78 = arith.constant 3.200000e+01 : f32
    %122 = vector.broadcast %cst_78 : f32 to vector<16x1xf32>
    %123 = arith.divf %121, %122 : vector<16x1xf32>
    %124 = vector.broadcast %123 : vector<16x1xf32> to vector<16x32xf32>
    %125 = arith.subf %117, %124 : vector<16x32xf32>
    %126 = arith.mulf %125, %125 : vector<16x32xf32>
    %cst_79 = arith.constant dense<0.000000e+00> : vector<16xf32>
    %127 = vector.multi_reduction <add>, %126, %cst_79 [1] : vector<16x32xf32> to vector<16xf32>
    %128 = vector.shape_cast %127 : vector<16xf32> to vector<16x1xf32>
    %cst_80 = arith.constant 3.200000e+01 : f32
    %129 = vector.broadcast %cst_80 : f32 to vector<16x1xf32>
    %130 = arith.divf %128, %129 : vector<16x1xf32>
    %131 = vector.broadcast %123 : vector<16x1xf32> to vector<16x32xf32>
    %132 = arith.subf %117, %131 : vector<16x32xf32>
    %cst_81 = arith.constant 9.99999974E-6 : f32
    %133 = vector.broadcast %cst_81 : f32 to vector<16x1xf32>
    %134 = arith.addf %130, %133 : vector<16x1xf32>
    %135 = math.rsqrt %134 : vector<16x1xf32>
    %136 = vector.broadcast %135 : vector<16x1xf32> to vector<16x32xf32>
    %137 = arith.mulf %132, %136 : vector<16x32xf32>
    %138 = vector.broadcast %118 : vector<1x32xf32> to vector<16x32xf32>
    %139 = arith.mulf %137, %138 : vector<16x32xf32>
    %140 = vector.broadcast %119 : vector<1x32xf32> to vector<16x32xf32>
    %141 = arith.addf %139, %140 : vector<16x32xf32>
    %142 = vector.extract_strided_slice %103 {offsets = [3, 0], sizes = [1, 32], strides = [1, 1]} : vector<8x128xf32> to vector<1x32xf32>
    %cst_82 = arith.constant 0.000000e+00 : f32
    %143 = vector.broadcast %cst_82 : f32 to vector<18x32xf32>
    %c0_83 = arith.constant 0 : index
    %c0_84 = arith.constant 0 : index
    %144 = vector.load %arg9[%c0_83, %c0_84] : memref<18x32xf32, #tpu.memory_space<vmem>>, vector<18x32xf32>
    tpu.vector_store %arg9[%c0_83, %c0_84], %143 {strides = array<i32>} : memref<18x32xf32, #tpu.memory_space<vmem>>, vector<18x32xf32>,
    %c1_85 = arith.constant 1 : index
    %c0_86 = arith.constant 0 : index
    %145 = vector.load %arg9[%c1_85, %c0_86] : memref<18x32xf32, #tpu.memory_space<vmem>>, vector<16x32xf32>
    tpu.vector_store %arg9[%c1_85, %c0_86], %141 {strides = array<i32>} : memref<18x32xf32, #tpu.memory_space<vmem>>, vector<16x32xf32>,
    %c0_87 = arith.constant 0 : index
    %c0_88 = arith.constant 0 : index
    %146 = vector.load %arg9[%c0_87, %c0_88] : memref<18x32xf32, #tpu.memory_space<vmem>>, vector<16x32xf32>
    %c1_89 = arith.constant 1 : index
    %c0_90 = arith.constant 0 : index
    %147 = vector.load %arg9[%c1_89, %c0_90] : memref<18x32xf32, #tpu.memory_space<vmem>>, vector<16x32xf32>
    %c2_91 = arith.constant 2 : index
    %c0_92 = arith.constant 0 : index
    %148 = vector.load %arg9[%c2_91, %c0_92] : memref<18x32xf32, #tpu.memory_space<vmem>>, vector<16x32xf32>
    %149 = tpu.concatenate %146, %147, %148 in 1 : vector<16x32xf32>, vector<16x32xf32>, vector<16x32xf32> -> vector<16x96xf32>
    %150 = arith.truncf %149 : vector<16x96xf32> to vector<16x96xbf16>
    %cst_93 = arith.constant dense<0.000000e+00> : vector<16x32xf32>
    %151 = tpu.matmul %150, %99, %cst_93 {dimension_numbers = #tpu.dot_dimension_numbers<[1], [0], [0], [1], [0, 0, 1, 1], [], []>} : vector<16x96xbf16>, vector<96x32xbf16>, vector<16x32xf32> -> vector<16x32xf32>
    %152 = vector.broadcast %142 : vector<1x32xf32> to vector<16x32xf32>
    %153 = arith.addf %151, %152 : vector<16x32xf32>
    %cst_94 = arith.constant 0.000000e+00 : f32
    %154 = vector.broadcast %cst_94 : f32 to vector<16x32xf32>
    %155 = arith.maximumf %153, %154 : vector<16x32xf32>
    %156 = vector.extract_strided_slice %103 {offsets = [4, 0], sizes = [1, 32], strides = [1, 1]} : vector<8x128xf32> to vector<1x32xf32>
    %157 = vector.extract_strided_slice %103 {offsets = [5, 0], sizes = [1, 32], strides = [1, 1]} : vector<8x128xf32> to vector<1x32xf32>
    %cst_95 = arith.constant dense<0.000000e+00> : vector<16xf32>
    %158 = vector.multi_reduction <add>, %155, %cst_95 [1] : vector<16x32xf32> to vector<16xf32>
    %159 = vector.shape_cast %158 : vector<16xf32> to vector<16x1xf32>
    %cst_96 = arith.constant 3.200000e+01 : f32
    %160 = vector.broadcast %cst_96 : f32 to vector<16x1xf32>
    %161 = arith.divf %159, %160 : vector<16x1xf32>
    %162 = vector.broadcast %161 : vector<16x1xf32> to vector<16x32xf32>
    %163 = arith.subf %155, %162 : vector<16x32xf32>
    %164 = arith.mulf %163, %163 : vector<16x32xf32>
    %cst_97 = arith.constant dense<0.000000e+00> : vector<16xf32>
    %165 = vector.multi_reduction <add>, %164, %cst_97 [1] : vector<16x32xf32> to vector<16xf32>
    %166 = vector.shape_cast %165 : vector<16xf32> to vector<16x1xf32>
    %cst_98 = arith.constant 3.200000e+01 : f32
    %167 = vector.broadcast %cst_98 : f32 to vector<16x1xf32>
    %168 = arith.divf %166, %167 : vector<16x1xf32>
    %169 = vector.broadcast %161 : vector<16x1xf32> to vector<16x32xf32>
    %170 = arith.subf %155, %169 : vector<16x32xf32>
    %cst_99 = arith.constant 9.99999974E-6 : f32
    %171 = vector.broadcast %cst_99 : f32 to vector<16x1xf32>
    %172 = arith.addf %168, %171 : vector<16x1xf32>
    %173 = math.rsqrt %172 : vector<16x1xf32>
    %174 = vector.broadcast %173 : vector<16x1xf32> to vector<16x32xf32>
    %175 = arith.mulf %170, %174 : vector<16x32xf32>
    %176 = vector.broadcast %156 : vector<1x32xf32> to vector<16x32xf32>
    %177 = arith.mulf %175, %176 : vector<16x32xf32>
    %178 = vector.broadcast %157 : vector<1x32xf32> to vector<16x32xf32>
    %179 = arith.addf %177, %178 : vector<16x32xf32>
    %180 = arith.truncf %179 : vector<16x32xf32> to vector<16x32xbf16>
    %cst_100 = arith.constant dense<0.000000e+00> : vector<16x1xf32>
    %181 = tpu.matmul %180, %101, %cst_100 {dimension_numbers = #tpu.dot_dimension_numbers<[1], [0], [0], [1], [0, 0, 1, 1], [], []>} : vector<16x32xbf16>, vector<32x1xbf16>, vector<16x1xf32> -> vector<16x1xf32>
    %182 = vector.extract_strided_slice %103 {offsets = [6, 0], sizes = [1, 1], strides = [1, 1]} : vector<8x128xf32> to vector<1x1xf32>
    %183 = vector.broadcast %182 : vector<1x1xf32> to vector<16x1xf32>
    %184 = arith.addf %181, %183 : vector<16x1xf32>
    %185 = arith.mulf %184, %5 : vector<16x1xf32>
    %186 = tpu.concatenate %95, %185 in 1 : vector<16x1xf32>, vector<16x1xf32> -> vector<16x2xf32>
    %c0_101 = arith.constant 0 : index
    %c0_102 = arith.constant 0 : index
    %c0_103 = arith.constant 0 : index
    %187 = vector.load %arg7[%c0_101, %c0_102, %c0_103] : memref<1x16x2xf32, #tpu.memory_space<vmem>>, vector<1x16x2xf32>
    %188 = vector.shape_cast %187 : vector<1x16x2xf32> to vector<16x2xf32>
    %189 = vector.shape_cast %186 : vector<16x2xf32> to vector<1x16x2xf32>
    tpu.vector_store %arg7[%c0_101, %c0_102, %c0_103], %189 {strides = array<i32>} : memref<1x16x2xf32, #tpu.memory_space<vmem>>, vector<1x16x2xf32>,
    return
  }
  func.func @transform_0(%arg0: i32) -> (i32, i32, i32) {
    %c0_i32 = arith.constant 0 : i32
    %c0_i32_0 = arith.constant 0 : i32
    %c0_i32_1 = arith.constant 0 : i32
    return %arg0, %c0_i32, %c0_i32_0 : i32, i32, i32
  }
  func.func @transform_1(%arg0: i32) -> (i32, i32, i32) {
    %c0_i32 = arith.constant 0 : i32
    %c0_i32_0 = arith.constant 0 : i32
    %c0_i32_1 = arith.constant 0 : i32
    return %arg0, %c0_i32, %c0_i32_0 : i32, i32, i32
  }
  func.func @transform_2(%arg0: i32) -> (i32, i32, i32) {
    %c0_i32 = arith.constant 0 : i32
    %c0_i32_0 = arith.constant 0 : i32
    %c0_i32_1 = arith.constant 0 : i32
    %c0_i32_2 = arith.constant 0 : i32
    return %c0_i32, %c0_i32_0, %c0_i32_1 : i32, i32, i32
  }
  func.func @transform_3(%arg0: i32) -> (i32, i32, i32) {
    %c0_i32 = arith.constant 0 : i32
    %c0_i32_0 = arith.constant 0 : i32
    %c0_i32_1 = arith.constant 0 : i32
    %c0_i32_2 = arith.constant 0 : i32
    return %c0_i32, %c0_i32_0, %c0_i32_1 : i32, i32, i32
  }
  func.func @transform_4(%arg0: i32) -> (i32, i32, i32) {
    %c0_i32 = arith.constant 0 : i32
    %c0_i32_0 = arith.constant 0 : i32
    %c0_i32_1 = arith.constant 0 : i32
    %c0_i32_2 = arith.constant 0 : i32
    return %c0_i32, %c0_i32_0, %c0_i32_1 : i32, i32, i32
  }
  func.func @transform_5(%arg0: i32) -> (i32, i32, i32) {
    %c0_i32 = arith.constant 0 : i32
    %c0_i32_0 = arith.constant 0 : i32
    %c0_i32_1 = arith.constant 0 : i32
    %c0_i32_2 = arith.constant 0 : i32
    return %c0_i32, %c0_i32_0, %c0_i32_1 : i32, i32, i32
  }
  func.func @transform_6(%arg0: i32) -> (i32, i32, i32) {
    %c0_i32 = arith.constant 0 : i32
    %c0_i32_0 = arith.constant 0 : i32
    %c0_i32_1 = arith.constant 0 : i32
    return %arg0, %c0_i32, %c0_i32_0 : i32, i32, i32
  }
}

</mosaic_0001>

<bundles_post_ra>
// kernel: custom-call.2
= control target key start
LH: loop header
LB: loop body
LE: loop exit
PB: predicated region body
PF: predicated region fallthrough
CT: control target
= control target key end

     0   :  { %s6_s0 = inlined_call_operand.vmem [shape: u32[2,16], index: 0, kind: output, shape index: {}]  }

// kernel: ne.4
= control target key start
LH: loop header
LB: loop body
LE: loop exit
PB: predicated region body
PF: predicated region fallthrough
CT: control target
= control target key end

     0   :  { %v16_v2 = vmov 0   ;;  %s41_s0 = inlined_call_operand.vmem [shape: f32[2,16], index: 0, kind: input, shape index: {}, may-alias: {0,1}]   ;;  %s42_s1 = inlined_call_operand.vmem [shape: f32[2,16], index: 1, kind: input, shape index: {}, may-alias: {0,1}]   ;;  %s43_s2 = inlined_call_operand.vmem [shape: pred[2,16], index: 2, kind: output, shape index: {}]  }
   0x1   :  { %v3_v0 = vld [vmem:[%s41_s0] sm:$0x3] }
   0x2   :  { %v4_v1 = vld [vmem:[%s42_s1] sm:$0x3] }
   0x3   :  { %vm7_vm0 = vcmp.ne.f32.partialorder %v3_v0, %v4_v1 }
   0x4   :  { %v8_v3 = vsel %vm7_vm0, 1, %v16_v2 }
   0x5   :  { %v10_v4 = vpack.c.b16 %v16_v2, %v8_v3 }
   0x7   :  { %v11_v5 = vpack.c.b8 %v16_v2, %v10_v4 }
   0x9   :  { %14 = vst [vmem:[%s43_s2] sm:$0x1] %v11_v5 }

// kernel: squeeze.15
= control target key start
LH: loop header
LB: loop body
LE: loop exit
PB: predicated region body
PF: predicated region fallthrough
CT: control target
= control target key end

     0   :  { %vm8_vm0 = vcmask 130048   ;;  %s42_s0 = inlined_call_operand.vmem [shape: f32[32], index: 0, kind: input, shape index: {}]   ;;  %s43_s1 = inlined_call_operand.vmem [shape: f32[2,16], index: 1, kind: output, shape index: {}]  }
   0x1   :  { %v5_v0 = vld [vmem:[%s42_s0] sm:$0x1]  ;;  %s25_s0 = smov 112  }
   0x2   :  { %6 = vst [vmem:[#allocation1] sm:$0x1] %v5_v0 }
   0x9   :  { %v10_v1 = vld [vmem:[#allocation1] sm:$0x1]  }
   0xa   :  { %v7_v2 = vld [vmem:[#allocation1] sm:$0x1]   ;;  %11 = vrot.lane.b32.xlu0 %v10_v1, %s25_s0 }
   0xb   :  { %9 = vst.msk [vmem:[#allocation0] sm:$0x1] %vm8_vm0, %v7_v2  }
  0x7c   :  { %v12_v3 = vpop.permute.xlu0 %11  }
  0x7d   :  { %15 = vst.msk [vmem:[#allocation0 + $0x1] sm:$0x1] %vm8_vm0, %v12_v3  }
  0x84   :  { %v20_v4 = vld [vmem:[#allocation0] sm:$0x3] }
  0x85   :  { %23 = vst [vmem:[%s43_s1] sm:$0x3] %v20_v4 }

// kernel: fastspeech2_forward.3
= control target key start
LH: loop header
LB: loop body
LE: loop exit
PB: predicated region body
PF: predicated region fallthrough
CT: control target
= control target key end

     0   :  { %s3222_s29 = smov 0   ;;  %s3756_s0 = inlined_call_operand.vmem [shape: f32[2,8,32], index: 0, kind: input, shape index: {}]   ;;  %s3757_s1 = inlined_call_operand.vmem [shape: f32[2,1,8], index: 1, kind: input, shape index: {}]   ;;  %s3758_s2 = inlined_call_operand.vmem [shape: f32[2,8,1], index: 2, kind: input, shape index: {}]   ;;  %s3759_s3 = inlined_call_operand.vmem [shape: f32[2,1,32], index: 3, kind: input, shape index: {}]   ;;  %s3760_s4 = inlined_call_operand.vmem [shape: bf16[2,32,96], index: 4, kind: input, shape index: {}]   ;;  %s3761_s5 = inlined_call_operand.vmem [shape: bf16[2,32,32], index: 5, kind: input, shape index: {}]   ;;  %s3762_s6 = inlined_call_operand.vmem [shape: bf16[2,288,64], index: 6, kind: input, shape index: {}]   ;;  %s3763_s7 = inlined_call_operand.vmem [shape: bf16[2,64,32], index: 7, kind: input, shape index: {}]   ;;  %s3764_s8 = inlined_call_operand.vmem [shape: f32[2,8,128], index: 8, kind: input, shape index: {}]   ;;  %s3765_s9 = inlined_call_operand.vmem [shape: bf16[96,32], index: 9, kind: input, shape index: {}]   ;;  %s3766_s10 = inlined_call_operand.vmem [shape: bf16[96,32], index: 10, kind: input, shape index: {}]   ;;  %s3767_s11 = inlined_call_operand.vmem [shape: bf16[32,1], index: 11, kind: input, shape index: {}]   ;;  %s3768_s12 = inlined_call_operand.vmem [shape: f32[8,128], index: 12, kind: input, shape index: {}]   ;;  %s3769_s13 = inlined_call_operand.vmem [shape: f32[2,8,32], index: 13, kind: output, shape index: {0}]   ;;  %s3770_s14 = inlined_call_operand.vmem [shape: f32[2,8,1], index: 14, kind: output, shape index: {1}]  }
   0x1 LB: > { %s2548_s30 = sadd.s32 4294967295, %s3135_s29   ;;  %p2552_p0 = scmp.ge.s32.totalorder %s3135_s29, 1  ;;  %s3135_s29 = sphi %s3222_s29, %s25_s29  }
   0x2   : > { %p439_p1 = scmp.lt.s32.totalorder %s3135_s29, 3 }
   0x4   : > { %p440_p2 = pnand %p2552_p0, %p439_p1 }
   0x5   : > { %p497_p3 = scmp.lt.s32.totalorder (!%p440_p2), %s2548_s30, 1  ;;  %s3773_s25 = smov (!%p440_p2), 112  }
   0x6   : > { %443 = sbr.rel (%p440_p2) target bundleno = 6505 (0x1969), region = 72  ;;  %s3140_s26 = smov (!%p440_p2), 96  }
   0x7   : > { %s3141_s27 = smov (!%p440_p2), 80   ;;  %s3142_s17 = smov (!%p440_p2), 64  }
   0x8   : > { %s3772_s18 = smov (!%p440_p2), 48   ;;  %s3771_s24 = smov (!%p440_p2), 16  }
   0x9   : > { %s3774_s20 = smov (!%p440_p2), 112   ;;  %s3776_s15 = smov (!%p440_p2), 16  }
   0xb   : > { %v3035_v0 = vld [vmem:[%s3760_s4 + $0x8] sm:$0xff]   ;;  %v3137_v1 = vmov 0.0   ;;  %v3036_v2 = vld [vmem:[%s3760_s4] sm:$0xff]   ;;  %vm3138_vm0 = vmmov 0   ;;  %vm547_vm1 = vcmask 261120   ;;  %s3778_s30 = smov (!%p497_p3, %s2548_s30), 1  ;;  %v593_v17 = vlaneseq }
   0xc   : > { %2826 = vmatprep.subr.bf16.mxu0 %v3137_v1  ;;  %2834 = vmatprep.subr.bf16.mxu1 %v3137_v1  ;;  %960 = vst.msk [vmem:[#allocation2] sm:$0xff] %vm547_vm1, %v3137_v1  ;;  %961 = vst.msk [vmem:[#allocation2 + $0x8] sm:$0xff] %vm547_vm1, %v3137_v1  ;;  %s3254_s19 = sshll.u32 %s3778_s30, 3  ;;  %v2557_v5 = vld [vmem:[%s3764_s8] ss:$0 sm:$0xff]  ;;  %vm601_vm2 = vcmask 130048   ;;  %s503_s16 = scalar_lea.vmem %s3757_s1, %s3778_s30 }
   0xd   : > { %2827 = vmatpush3.bf16.msra.mxu0 %v3035_v0  ;;  %2830 = vmatprep.mubr.msk.bf16.mxu0 %vm3138_vm0, %v3137_v1  ;;  %2122 = vst.msk [vmem:[#allocation3] sm:$0xff] %vm547_vm1, %v3137_v1  ;;  %2247 = vst.msk [vmem:[#allocation4] sm:$0xff] %vm547_vm1, %v3137_v1  ;;  %s500_s22 = scalar_lea.vmem %s3756_s0, %s3254_s19  ;;  %v3288_v18 = vshrl.u32 %v593_v17, 7  ;;  %v521_v19 = vld [vmem:[%s503_s16] sm:$0x1]  ;;  %vm648_vm3 = vcmask 64512   ;;  %s507_s21 = scalar_lea.vmem %s3758_s2, %s3254_s19 }
   0xe   : > { %2828 = vmatprep.subr.bf16.mxu0 %v3137_v1  ;;  %2836 = vmatprep.mubr.msk.bf16.mxu1 %vm3138_vm0, %v3137_v1  ;;  %v3261_v3 = vld [vmem:[%s500_s22] sm:$0xff]  ;;  %v522_v20 = vmul.f32 -1e+09, %v521_v19  ;;  %vm666_vm4 = vcmask 1043456   ;;  %v3037_v57 = vld [vmem:[%s3761_s5 + $0x8] sm:$0xff]   ;;  %vm997_vm5 = vcmask 523264   ;;  %s510_s23 = scalar_lea.vmem %s3759_s3, %s3778_s30  ;;  %s514_s16 = scalar_lea.vmem %s3769_s13, %s3254_s19 }
   0xf   : > { %v529_v4 = vpack.c.bf16 %v3261_v3, %v3261_v3  ;;  %v595_v21 = vsub.s32 0, %v3288_v18  ;;  %v3038_v58 = vld [vmem:[%s3761_s5] sm:$0xff]   ;;  %vm999_vm6 = vcmask 785408   ;;  %vm2123_vm7 = vcmask 254976  }
  0x10   : > { %v3332_v17 = vld [vmem:[%s507_s21] sm:$0xff]  ;;  %2124 = vst.msk [vmem:[#allocation3 + $0x8] sm:$0x3] %vm2123_vm7, %v3137_v1  ;;  %2248 = vst.msk [vmem:[#allocation4 + $0x8] sm:$0x3] %vm2123_vm7, %v3137_v1  ;;  %vm2432_vm8 = vcmask 7168  }
  0x11   : > { %2829 = vmatpush3.bf16.msra.mxu0 %v3036_v2  ;;  %v3293_v22 = vrot.slane %v522_v20, %v595_v21  ;;  %v524_v19 = vsub.f32 1.0, %v3332_v17 }
  0x12   : > { %2840 = vmatprep.subr.bf16.mxu0 %v3137_v1 }
  0x14   : > { %2831 = vmatmul.mubr.msk.bf16.vlgmr.msra.gmra.mxu0 %vm547_vm1, %v529_v4 }
  0x15   : > { %2842 = vmatprep.mubr.msk.bf16.mxu0 %vm3138_vm0, %v3137_v1 }
  0xd4   : > { %v585_v6 = vpop.f32.mrf.mxu0 }
  0xd5   : > { %v586_v7 = vadd.f32 %v2557_v5, %v585_v6 }
  0xd6   : > { %v2832_v8 = vpop.f32.mrf.mxu0 }
  0xd7   : > { %v591_v9 = vpack.c.bf16 %v586_v7, %v586_v7  ;;  %v2565_v8 = vld [vmem:[%s3764_s8 + $0x1] ss:$0 sm:$0xff] }
  0xd8   : > { %v588_v10 = vpop.f32.mrf.mxu0 }
  0xd9   : > { %710 = vrot.lane.b32.xlu1 %v591_v9, %s3773_s25  ;;  %599 = vrot.lane.b32.xlu0 %v591_v9, %s3140_s26 }
  0xda   : > { %v2833_v11 = vpop.f32.mrf.mxu0 }
  0xdd   : > { %712 = vrot.lane.b32.xlu0 %v591_v9, %s3141_s27 }
 0x14b   : > { %v600_v12 = vpop.permute.xlu0 %599  ;;  %v711_v16 = vpop.permute.xlu1 %710 }
 0x14c   : > { %v606_v13 = vsel %vm601_vm2, %v600_v12, 0 }
 0x14d   : > { %2835 = vmatpush3.bf16.xpose.msra.mxu1 %v606_v13 }
 0x14e   : > { %2846 = vmatprep.subr.bf16.mxu1 %v3137_v1 }
 0x14f   : > { %v713_v14 = vpop.permute.xlu0 %712 }
 0x150   : > { %v718_v15 = vsel %vm601_vm2, %v713_v14, 0 }
 0x154   : > { %2837 = vmatmul.mubr.msk.bf16.vlgmr.msra.gmra.mxu1 %vm601_vm2, %v591_v9 }
 0x155   : > { %2847 = vmatpush3.bf16.xpose.msra.mxu1 %v718_v15  ;;  %2848 = vmatprep.mubr.msk.bf16.mxu1 %vm3138_vm0, %v3137_v1 }
 0x156   : > { %2858 = vmatprep.subr.bf16.mxu1 %v3137_v1 }
 0x15c   : > { %2849 = vmatmul.mubr.msk.bf16.vlgmr.msra.gmra.mxu1 %vm601_vm2, %v711_v16  ;;  %v3145_v16 = vmov 0  }
 0x15d   : > { %2862 = vmatprep.mubr.msk.bf16.mxu1 %vm3138_vm0, %v3137_v1  ;;  %2859 = vmatpush3.bf16.msra.mxu1 %v3037_v57 }
 0x15e   : > { %2860 = vmatprep.subr.bf16.mxu1 %v3137_v1  ;;  %3004 = vset.pattern.permute.xlu0 %v3145_v16 }
 0x161   : > { %2861 = vmatpush3.bf16.msra.mxu1 %v3038_v58 }
 0x162   : > { %2866 = vmatprep.subr.bf16.mxu1 %v3137_v1 }
 0x214   : > { %v642_v23 = vpop.f32.mrf.mxu1 }
 0x215   : > { %v643_v24 = vadd.f32 %v642_v23, %v3293_v22 }
 0x216   : > { %v2838_v25 = vpop.f32.mrf.mxu1 }
 0x217   : > { %v649_v26 = vsel %vm648_vm3, %v643_v24, -inf }
 0x218   : > { %650 = vmax.xlane.f32.xlu1 %v649_v26  ;;  %v645_v27 = vpop.f32.mrf.mxu1  ;;  %v3039_v26 = vld [vmem:[%s3762_s6 + $0x88] sm:$0xff]  }
 0x219   : > { %v3040_v27 = vld [vmem:[%s3762_s6 + $0x80] sm:$0xff]  }
 0x21a   : > { %v2839_v28 = vpop.f32.mrf.mxu1 }
 0x21b   : > { %v3041_v28 = vld [vmem:[%s3762_s6 + $0x78] sm:$0xff]  }
 0x21c   : > { %v754_v29 = vpop.f32.mrf.mxu1 }
 0x21d   : > { %v755_v30 = vadd.f32 %v754_v29, %v3293_v22  ;;  %v3042_v29 = vld [vmem:[%s3762_s6 + $0x38] sm:$0xff]  }
 0x21e   : > { %v2850_v31 = vpop.f32.mrf.mxu1 }
 0x21f   : > { %v760_v32 = vsel %vm648_vm3, %v755_v30, -inf  ;;  %v3044_v31 = vld [vmem:[%s3762_s6 + $0x30] sm:$0xff]  }
 0x220   : > { %761 = vmax.xlane.f32.xlu0 %v760_v32  ;;  %v757_v33 = vpop.f32.mrf.mxu1  ;;  %v3045_v32 = vld [vmem:[%s3762_s6 + $0x68] sm:$0xff]  }
 0x221   : > { %v3046_v33 = vld [vmem:[%s3762_s6 + $0x28] sm:$0xff]  }
 0x222   : > { %v2851_v34 = vpop.f32.mrf.mxu1 }
 0x223   : > { %v3047_v34 = vld [vmem:[%s3762_s6 + $0x60] sm:$0xff]  }
 0x2a1   : > { %v651_v35 = vpop.xlane.xlu1 %650 }
 0x2a2   : > { %v652_v36 = vsub.f32 %v643_v24, %v651_v35  ;;  %v3048_v35 = vld [vmem:[%s3762_s6 + $0x20] sm:$0xff]  }
 0x2a4   : > { %v653_v37 = vmul.f32 1.442695, %v652_v36  ;;  %v3049_v36 = vld [vmem:[%s3762_s6 + $0x58] sm:$0xff]  }
 0x2a6   : > { %3101 = vpow2.f32 %v653_v37  ;;  %v3050_v37 = vld [vmem:[%s3762_s6 + $0x18] sm:$0xff]  }
 0x2a9   : > { %v762_v38 = vpop.xlane.xlu0 %761 }
 0x2aa   : > { %v763_v39 = vsub.f32 %v755_v30, %v762_v38  ;;  %v3043_v30 = vld [vmem:[%s3762_s6 + $0x70] sm:$0xff]  }
 0x2ac   : > { %v764_v40 = vmul.f32 1.442695, %v763_v39 }
 0x2ae   : > { %3103 = vpow2.f32 %v764_v40 }
 0x2b3   : > { %v3102_v41 = vpop.eup %3101 }
 0x2b4   : > { %v655_v42 = vsel %vm648_vm3, %v3102_v41, 0.0 }
 0x2b5   : > { %656 = vadd.xlane.f32.xlu0 %v655_v42  ;;  %v2569_v42 = vld [vmem:[%s3764_s8 + $0x2] ss:$0 sm:$0xff] }
 0x2bb   : > { %v3104_v43 = vpop.eup %3103 }
 0x2bc   : > { %v766_v44 = vsel %vm648_vm3, %v3104_v43, 0.0 }
 0x2bd   : > { %767 = vadd.xlane.f32.xlu1 %v766_v44  ;;  %v2570_v44 = vld [vmem:[%s3764_s8 + $0x3] ss:$0 sm:$0xff] }
 0x2cb   : > { %661 = vrot.lane.b32.xlu0 %v591_v9, %s3142_s17 }
 0x2ce   : > { %772 = vrot.lane.b32.xlu1 %v591_v9, %s3772_s18 }
 0x33e   : > { %v657_v45 = vpop.xlane.xlu0 %656 }
 0x33f   : > { %3105 = vrcp.f32 %v657_v45 }
 0x342   : > { %v662_v46 = vpop.permute.xlu0 %661 }
 0x343   : > { %v668_v47 = vsel %vm666_vm4, %v662_v46, 0 }
 0x344   : > { %2841 = vmatpush3.bf16.msra.mxu0 %v668_v47 }
 0x345   : > { %2852 = vmatprep.subr.bf16.mxu0 %v3137_v1 }
 0x346   : > { %v768_v48 = vpop.xlane.xlu1 %767 }
 0x347   : > { %3107 = vrcp.f32 %v768_v48 }
 0x34a   : > { %v773_v51 = vpop.permute.xlu1 %772 }
 0x34b   : > { %v778_v53 = vsel %vm666_vm4, %v773_v51, 0  ;;  %v3053_v51 = vld [vmem:[%s3762_s6 + $0x48] sm:$0xff]  }
 0x34c   : > { %v3106_v49 = vpop.eup %3105 }
 0x34d   : > { %v659_v50 = vmul.f32 %v3106_v49, %v3102_v41  ;;  %v3051_v49 = vld [vmem:[%s3762_s6 + $0x50] sm:$0xff]  }
 0x34f   : > { %v660_v52 = vpack.c.bf16 %v659_v50, %v659_v50  ;;  %v3052_v50 = vld [vmem:[%s3762_s6 + $0x10] sm:$0xff]  }
 0x351   : > { %2843 = vmatmul.mubr.msk.bf16.vlgmr.msra.gmra.mxu0 %vm648_vm3, %v660_v52  ;;  %v3054_v52 = vld [vmem:[%s3762_s6 + $0x8] sm:$0xff]  }
 0x352   : > { %2853 = vmatpush3.bf16.msra.mxu0 %v778_v53  ;;  %2854 = vmatprep.mubr.msk.bf16.mxu0 %vm3138_vm0, %v3137_v1 }
 0x353   : > { %2735 = vmatprep.subr.bf16.mxu0 %v3041_v28 }
 0x354   : > { %v3108_v54 = vpop.eup %3107 }
 0x355   : > { %v770_v55 = vmul.f32 %v3108_v54, %v3104_v43 }
 0x357   : > { %v771_v56 = vpack.c.bf16 %v770_v55, %v770_v55 }
 0x359   : > { %2855 = vmatmul.mubr.msk.bf16.vlgmr.msra.gmra.mxu0 %vm648_vm3, %v771_v56 }
 0x35a   : > { %2736 = vmatpush3.bf16.msra.mxu0 %v3042_v29 }
 0x35b   : > { %2737 = vmatprep.subr.bf16.mxu0 %v3043_v30  ;;  %v3058_v30 = vld [vmem:[%s3763_s7 + $0x10] sm:$0xff]  }
 0x35e   : > { %2738 = vmatpush3.bf16.msra.mxu0 %v3044_v31 }
 0x35f   : > { %2739 = vmatprep.subr.bf16.mxu0 %v3045_v32 }
 0x362   : > { %2740 = vmatpush3.bf16.msra.mxu0 %v3046_v33  ;;  %v3059_v33 = vld [vmem:[%s3763_s7 + $0x8] sm:$0xff]  }
 0x363   : > { %2741 = vmatprep.subr.bf16.mxu0 %v3047_v34  ;;  %v3060_v34 = vld [vmem:[%s3763_s7] sm:$0xff]  }
 0x366   : > { %2742 = vmatpush3.bf16.msra.mxu0 %v3048_v35 }
 0x367   : > { %2743 = vmatprep.subr.bf16.mxu0 %v3049_v36  ;;  %v2571_v36 = vld [vmem:[%s3764_s8 + $0x4] ss:$0 sm:$0xff] }
 0x36a   : > { %2744 = vmatpush3.bf16.msra.mxu0 %v3050_v37 }
 0x36b   : > { %2745 = vmatprep.subr.bf16.mxu0 %v3051_v49 }
 0x36e   : > { %2746 = vmatpush3.bf16.msra.mxu0 %v3052_v50 }
 0x36f   : > { %2747 = vmatprep.subr.bf16.mxu0 %v3053_v51 }
 0x372   : > { %2748 = vmatpush3.bf16.msra.mxu0 %v3054_v52 }
 0x411   : > { %v704_v59 = vpop.f32.mrf.mxu0 }
 0x413   : > { %v2844_v60 = vpop.f32.mrf.mxu0 }
 0x415   : > { %v707_v61 = vpop.f32.mrf.mxu0 }
 0x417   : > { %v2845_v62 = vpop.f32.mrf.mxu0 }
 0x419   : > { %v814_v63 = vpop.f32.mrf.mxu0 }
 0x41a   : > { %821 = vrot.lane.b32.xlu1 %v814_v63, %s3771_s24  ;;  %s3146_s24 = smov 32  }
 0x41b   : > { %v2856_v0 = vpop.f32.mrf.mxu0 }
 0x41c   : > { %v3055_v0 = vld [vmem:[%s3762_s6 + $0x40] sm:$0xff]  }
 0x41d   : > { %v817_v2 = vpop.f32.mrf.mxu0  ;;  %2749 = vmatprep.subr.bf16.mxu0 %v3055_v0 }
 0x41e   : > { %v3056_v2 = vld [vmem:[%s3762_s6] sm:$0xff]  }
 0x41f   : > { %v2857_v4 = vpop.f32.mrf.mxu0  ;;  %2750 = vmatpush3.bf16.msra.mxu0 %v3056_v2  ;;  %v2597_v2 = vld [vmem:[%s3764_s8 + $0x6] ss:$0 sm:$0xff] }
 0x420   : > { %2894 = vmatprep.subr.bf16.mxu0 %v3137_v1 }
 0x48c   : > { %v822_v5 = vpop.permute.xlu1 %821 }
 0x48d   : > { %v824_v6 = vsel %vm601_vm2, %v704_v59, %v822_v5 }
 0x48e   : > { %v829_v7 = vpack.c.bf16 %v824_v6, %v824_v6  ;;  %v3057_v6 = vld [vmem:[%s3763_s7 + $0x18] sm:$0xff]  }
 0x490   : > { %2863 = vmatmul.mubr.msk.bf16.vlgmr.msra.gmra.mxu1 %vm547_vm1, %v829_v7 }
 0x491   : > { %2870 = vmatprep.mubr.msk.bf16.mxu1 %vm3138_vm0, %v3137_v1  ;;  %2867 = vmatpush3.bf16.msra.mxu1 %v3039_v26 }
 0x492   : > { %2868 = vmatprep.subr.bf16.mxu1 %v3137_v1 }
 0x495   : > { %2869 = vmatpush3.bf16.msra.mxu1 %v3040_v27 }
 0x496   : > { %2874 = vmatprep.subr.bf16.mxu1 %v3137_v1 }
 0x550   : > { %v884_v9 = vpop.f32.mrf.mxu1 }
 0x551   : > { %v885_v10 = vadd.f32 %v2565_v8, %v884_v9 }
 0x552   : > { %v2864_v11 = vpop.f32.mrf.mxu1 }
 0x553   : > { %v890_v12 = vadd.f32 %v885_v10, %v3261_v3 }
 0x554   : > { %v887_v13 = vpop.f32.mrf.mxu1 }
 0x555   : > { %v893_v14 = vsel %vm547_vm1, %v890_v12, 0.0 }
 0x556   : > { %894 = vadd.xlane.f32.xlu0 %v893_v14  ;;  %v2865_v15 = vpop.f32.mrf.mxu1 }
 0x56c   : > { %919 = vperm.xlu0 %3004, %v524_v19  }
 0x5df   : > { %v895_v20 = vpop.xlane.xlu0 %894 }
 0x5e0   : > { %v897_v3 = vmul.f32 0.03125, %v895_v20 }
 0x5e2   : > { %v898_v23 = vsub.f32 %v890_v12, %v897_v3 }
 0x5e4   : > { %v899_v24 = vmul.f32 %v898_v23, %v898_v23 }
 0x5e6   : > { %v900_v25 = vsel %vm547_vm1, %v899_v24, 0.0 }
 0x5e7   : > { %901 = vadd.xlane.f32.xlu1 %v900_v25  ;;  %v3382_v46 = vpop.permute.xlu0 %919 }
 0x670   : > { %v902_v38 = vpop.xlane.xlu1 %901 }
 0x671   : > { %v903_v39 = vmul.f32 0.03125, %v902_v38 }
 0x673   : > { %v904_v40 = vadd.f32 1e-05, %v903_v39 }
 0x675   : > { %3109 = vrsqrt.f32 %v904_v40 }
 0x682   : > { %v3110_v41 = vpop.eup %3109 }
 0x683   : > { %v906_v43 = vmul.f32 %v3110_v41, %v898_v23 }
 0x685   : > { %v911_v45 = vmul.f32 %v2569_v42, %v906_v43 }
 0x687   : > { %v916_v47 = vadd.f32 %v2570_v44, %v911_v45  ;;  %v2591_v45 = vld [vmem:[%s3764_s8 + $0x5] ss:$0 sm:$0xff] }
 0x689   : > { %v3385_v48 = vmul.f32 %v3382_v46, %v916_v47 }
 0x68b   : > { %962 = vst.msk [vmem:[#allocation2 + $0x4] sm:$0xff] %vm547_vm1, %v3385_v48 }
 0x692   : > { %v971_v53 = vld [vmem:[#allocation2 + $0x8] sm:$0xff]  ;;  %v963_v63 = vld [vmem:[#allocation2] sm:$0xff] }
 0x693   : > { %v964_v54 = vld [vmem:[#allocation2 + $0x1] sm:$0xff]  ;;  %v1006_v56 = vpack.c.bf16 %v971_v53, %v971_v53 }
 0x694   : > { %v968_v55 = vld [vmem:[#allocation2 + $0x5] sm:$0xff] }
 0x695   : > { %v3005_v57 = vpack.i.bf16 %v964_v54, %v968_v55  ;;  %v965_v58 = vld [vmem:[#allocation2 + $0x2] sm:$0xff]  ;;  %2871 = vmatmul.mubr.msk.bf16.vlgmr.msra.gmra.mxu1 %vm547_vm1, %v1006_v56 }
 0x696   : > { %v969_v59 = vld [vmem:[#allocation2 + $0x6] sm:$0xff]  ;;  %2882 = vmatprep.mubr.msk.bf16.mxu1 %vm3138_vm0, %v3137_v1  ;;  %2875 = vmatpush3.bf16.msra.mxu1 %v3057_v6 }
 0x697   : > { %v966_v60 = vld [vmem:[#allocation2 + $0x3] sm:$0xff]  ;;  %3006 = vrot.lane.b32.xlu1 %v3005_v57, %s3146_s24  ;;  %v3010_v4 = vpack.i.bf16 %v965_v58, %v969_v59  ;;  %2876 = vmatprep.subr.bf16.mxu1 %v3137_v1 }
 0x698   : > { %v970_v61 = vld [vmem:[#allocation2 + $0x7] sm:$0xff] }
 0x699   : > { %v967_v62 = vld [vmem:[#allocation2 + $0x4] sm:$0xff]  ;;  %v3015_v5 = vpack.i.bf16 %v966_v60, %v970_v61  ;;  %v3061_v60 = vld [vmem:[%s3760_s4 + $0x18] sm:$0xff]  }
 0x69a   : > { %1734 = vst.msk [vmem:[#allocation2] sm:$0xff] %vm547_vm1, %v3137_v1  ;;  %1735 = vst.msk [vmem:[#allocation2 + $0x8] sm:$0xff] %vm547_vm1, %v3137_v1  ;;  %2877 = vmatpush3.bf16.msra.mxu1 %v3058_v30 }
 0x69b   : > { %3011 = vrot.lane.b32.xlu1 %v3010_v4, %s3142_s17  ;;  %2878 = vmatprep.subr.bf16.mxu1 %v3137_v1 }
 0x69e   : > { %2879 = vmatpush3.bf16.msra.mxu1 %v3059_v33 }
 0x69f   : > { %3016 = vrot.lane.b32.xlu1 %v3015_v5, %s3140_s26  ;;  %2880 = vmatprep.subr.bf16.mxu1 %v3137_v1  ;;  %v2598_v5 = vld [vmem:[%s3764_s8 + $0x7] ss:$0 sm:$0xff] }
 0x6a2   : > { %2881 = vmatpush3.bf16.msra.mxu1 %v3060_v34 }
 0x6a3   : > { %2886 = vmatprep.subr.bf16.mxu1 %v3137_v1 }
 0x709   : > { %v3007_v7 = vpop.permute.xlu1 %3006 }
 0x70a   : > { %v3009_v9 = vunpack.i.h.bf16 %v3007_v7  ;;  %v3008_v10 = vunpack.i.l.bf16 %v3007_v7 }
 0x70c   : > { %v996_v14 = vsel %vm547_vm1, %v963_v63, %v3009_v9  ;;  %v1001_v15 = vsel %vm547_vm1, %v967_v62, %v3008_v10  ;;  %v2604_v10 = vld [vmem:[%s3764_s8 + $0x8] ss:$0 sm:$0xff] }
 0x70d   : > { %v3012_v8 = vpop.permute.xlu1 %3011 }
 0x70e   : > { %v3014_v11 = vunpack.i.h.bf16 %v3012_v8  ;;  %v3013_v12 = vunpack.i.l.bf16 %v3012_v8 }
 0x710   : > { %v998_v3 = vsel %vm997_vm5, %v996_v14, %v3014_v11  ;;  %v1002_v23 = vsel %vm997_vm5, %v1001_v15, %v3013_v12 }
 0x711   : > { %v3017_v13 = vpop.permute.xlu1 %3016 }
 0x712   : > { %v3019_v16 = vunpack.i.h.bf16 %v3017_v13  ;;  %v3018_v20 = vunpack.i.l.bf16 %v3017_v13 }
 0x714   : > { %v1000_v24 = vsel %vm999_vm6, %v998_v3, %v3019_v16  ;;  %v1003_v25 = vsel %vm999_vm6, %v1002_v23, %v3018_v20 }
 0x715   : > { %v1004_v26 = vpack.c.bf16 %v1000_v24, %v1000_v24  ;;  %v1005_v27 = vpack.c.bf16 %v1003_v25, %v1003_v25 }
 0x717   : > { %1154 = vmatprep.mubr.bf16.mxu0 %v1005_v27 }
 0x718   : > { %1155 = vmatmul.mubr.bf16.vlgmr.msra.gmra.mxu0 %v1004_v26 }
 0x719   : > { %2896 = vmatprep.mubr.msk.bf16.mxu0 %vm3138_vm0, %v3137_v1 }
 0x755   : > { %v1196_v28 = vpop.f32.mrf.mxu1 }
 0x757   : > { %v2872_v29 = vpop.f32.mrf.mxu1 }
 0x759   : > { %v1199_v31 = vpop.f32.mrf.mxu1 }
 0x75b   : > { %v2873_v32 = vpop.f32.mrf.mxu1 }
 0x7d8   : > { %v2751_v35 = vpop.f32.mrf.mxu0 }
 0x7da   : > { %v2752_v37 = vpop.f32.mrf.mxu0 }
 0x7db   : > { %v2753_v38 = vadd.f32 %v2752_v37, %v2751_v35 }
 0x7dc   : > { %v2754_v39 = vpop.f32.mrf.mxu0 }
 0x7dd   : > { %v1157_v40 = vadd.f32 %v2753_v38, %v2571_v36 }
 0x7de   : > { %v2755_v41 = vpop.f32.mrf.mxu0 }
 0x7df   : > { %v1197_v42 = vadd.f32 %v1196_v28, %v1157_v40 }
 0x7e1   : > { %v1202_v43 = vmax.f32 %v1197_v42, 0.0 }
 0x7e3   : > { %v1211_v44 = vpack.c.bf16 %v1202_v43, %v1202_v43 }
 0x7e5   : > { %2883 = vmatmul.mubr.msk.bf16.vlgmr.msra.gmra.mxu1 %vm997_vm5, %v1211_v44 }
 0x7e6   : > { %2890 = vmatprep.mubr.msk.bf16.mxu1 %vm3138_vm0, %v3137_v1  ;;  %2887 = vmatpush3.bf16.msra.mxu1 %v3061_v60 }
 0x7e7   : > { %2888 = vmatprep.subr.bf16.mxu1 %v3137_v1 }
 0x8a5   : > { %v1278_v47 = vpop.f32.mrf.mxu1 }
 0x8a6   : > { %v1279_v49 = vadd.f32 %v2591_v45, %v1278_v47 }
 0x8a7   : > { %v2884_v50 = vpop.f32.mrf.mxu1 }
 0x8a8   : > { %v1284_v51 = vadd.f32 %v1279_v49, %v3385_v48  ;;  %v3062_v48 = vld [vmem:[%s3760_s4 + $0x10] sm:$0xff]  }
 0x8a9   : > { %v1281_v52 = vpop.f32.mrf.mxu1  ;;  %2889 = vmatpush3.bf16.msra.mxu1 %v3062_v48  ;;  %v3063_v48 = vld [vmem:[%s3761_s5 + $0x18] sm:$0xff]  }
 0x8aa   : > { %v1287_v53 = vsel %vm547_vm1, %v1284_v51, 0.0  ;;  %2900 = vmatprep.subr.bf16.mxu1 %v3137_v1 }
 0x8ab   : > { %1288 = vadd.xlane.f32.xlu1 %v1287_v53  ;;  %v2885_v54 = vpop.f32.mrf.mxu1 }
 0x934   : > { %v1289_v55 = vpop.xlane.xlu1 %1288 }
 0x935   : > { %v1290_v56 = vmul.f32 0.03125, %v1289_v55 }
 0x937   : > { %v1291_v57 = vsub.f32 %v1284_v51, %v1290_v56 }
 0x939   : > { %v1292_v58 = vmul.f32 %v1291_v57, %v1291_v57 }
 0x93b   : > { %v1293_v59 = vsel %vm547_vm1, %v1292_v58, 0.0 }
 0x93c   : > { %1294 = vadd.xlane.f32.xlu0 %v1293_v59 }
 0x9c5   : > { %v1295_v61 = vpop.xlane.xlu0 %1294 }
 0x9c6   : > { %v1296_v62 = vmul.f32 0.03125, %v1295_v61  ;;  %v3064_v61 = vld [vmem:[%s3761_s5 + $0x10] sm:$0xff]  }
 0x9c8   : > { %v1297_v63 = vadd.f32 1e-05, %v1296_v62 }
 0x9ca   : > { %3111 = vrsqrt.f32 %v1297_v63 }
 0x9d7   : > { %v3112_v0 = vpop.eup %3111 }
 0x9d8   : > { %v1299_v4 = vmul.f32 %v3112_v0, %v1291_v57 }
 0x9da   : > { %v1304_v6 = vmul.f32 %v2597_v2, %v1299_v4 }
 0x9dc   : > { %v1309_v7 = vadd.f32 %v2598_v5, %v1304_v6 }
 0x9de   : > { %v3469_v8 = vmul.f32 %v1309_v7, %v3382_v46 }
 0x9e0   : > { %v1316_v9 = vpack.c.bf16 %v3469_v8, %v3469_v8 }
 0x9e2   : > { %2891 = vmatmul.mubr.msk.bf16.vlgmr.msra.gmra.mxu1 %vm547_vm1, %v1316_v9 }
 0x9e3   : > { %2902 = vmatprep.mubr.msk.bf16.mxu1 %vm3138_vm0, %v3137_v1 }
 0xaa2   : > { %v1372_v11 = vpop.f32.mrf.mxu1 }
 0xaa3   : > { %v1373_v12 = vadd.f32 %v2604_v10, %v1372_v11 }
 0xaa4   : > { %v2892_v13 = vpop.f32.mrf.mxu1 }
 0xaa5   : > { %v1378_v14 = vpack.c.bf16 %v1373_v12, %v1373_v12  ;;  %v2617_v12 = vld [vmem:[%s3764_s8 + $0x9] ss:$0 sm:$0xff] }
 0xaa6   : > { %v1375_v15 = vpop.f32.mrf.mxu1 }
 0xaa7   : > { %1490 = vrot.lane.b32.xlu0 %v1378_v14, %s3141_s27  ;;  %1380 = vrot.lane.b32.xlu1 %v1378_v14, %s3140_s26  ;;  %s3775_s27 = smov 48  }
 0xaa8   : > { %v2893_v16 = vpop.f32.mrf.mxu1 }
 0xaab   : > { %1488 = vrot.lane.b32.xlu1 %v1378_v14, %s3774_s20 }
 0xb19   : > { %v1381_v20 = vpop.permute.xlu1 %1380  ;;  %v1491_v23 = vpop.permute.xlu0 %1490 }
 0xb1a   : > { %v1386_v3 = vsel %vm601_vm2, %v1381_v20, 0  ;;  %v1496_v24 = vsel %vm601_vm2, %v1491_v23, 0 }
 0xb1b   : > { %2895 = vmatpush3.bf16.xpose.msra.mxu0 %v1386_v3 }
 0xb1c   : > { %2906 = vmatprep.subr.bf16.mxu0 %v3137_v1 }
 0xb1d   : > { %v1489_v25 = vpop.permute.xlu1 %1488 }
 0xb22   : > { %2897 = vmatmul.mubr.msk.bf16.vlgmr.msra.gmra.mxu0 %vm601_vm2, %v1378_v14 }
 0xb23   : > { %2907 = vmatpush3.bf16.xpose.msra.mxu0 %v1496_v24  ;;  %2908 = vmatprep.mubr.msk.bf16.mxu0 %vm3138_vm0, %v3137_v1 }
 0xb24   : > { %2918 = vmatprep.subr.bf16.mxu0 %v3137_v1 }
 0xb2a   : > { %2909 = vmatmul.mubr.msk.bf16.vlgmr.msra.gmra.mxu0 %vm601_vm2, %v1489_v25 }
 0xb2b   : > { %2922 = vmatprep.mubr.msk.bf16.mxu0 %vm3138_vm0, %v3137_v1  ;;  %2919 = vmatpush3.bf16.msra.mxu0 %v3063_v48 }
 0xb2c   : > { %2920 = vmatprep.subr.bf16.mxu0 %v3137_v1 }
 0xb2f   : > { %2921 = vmatpush3.bf16.msra.mxu0 %v3064_v61 }
 0xb30   : > { %2926 = vmatprep.subr.bf16.mxu0 %v3137_v1 }
 0xbe2   : > { %v1422_v26 = vpop.f32.mrf.mxu0 }
 0xbe3   : > { %v1423_v27 = vadd.f32 %v1422_v26, %v3293_v22 }
 0xbe4   : > { %v2898_v28 = vpop.f32.mrf.mxu0 }
 0xbe5   : > { %v1428_v29 = vsel %vm648_vm3, %v1423_v27, -inf }
 0xbe6   : > { %1429 = vmax.xlane.f32.xlu1 %v1428_v29  ;;  %v1425_v30 = vpop.f32.mrf.mxu0  ;;  %v3065_v29 = vld [vmem:[%s3762_s6 + $0x118] sm:$0xff]  }
 0xbe7   : > { %v3067_v30 = vld [vmem:[%s3762_s6 + $0x108] sm:$0xff]  }
 0xbe8   : > { %v2899_v31 = vpop.f32.mrf.mxu0 }
 0xbe9   : > { %v3068_v31 = vld [vmem:[%s3762_s6 + $0xc8] sm:$0xff]  }
 0xbea   : > { %v1532_v32 = vpop.f32.mrf.mxu0 }
 0xbeb   : > { %v1533_v33 = vadd.f32 %v1532_v32, %v3293_v22  ;;  %v3069_v32 = vld [vmem:[%s3762_s6 + $0x100] sm:$0xff]  }
 0xbec   : > { %v2910_v34 = vpop.f32.mrf.mxu0 }
 0xbed   : > { %v1538_v35 = vsel %vm648_vm3, %v1533_v33, -inf  ;;  %v3071_v34 = vld [vmem:[%s3762_s6 + $0xf8] sm:$0xff]  }
 0xbee   : > { %1539 = vmax.xlane.f32.xlu0 %v1538_v35  ;;  %v1535_v36 = vpop.f32.mrf.mxu0  ;;  %v3072_v35 = vld [vmem:[%s3762_s6 + $0xb8] sm:$0xff]  }
 0xbef   : > { %v3073_v36 = vld [vmem:[%s3762_s6 + $0xf0] sm:$0xff]  }
 0xbf0   : > { %v2911_v37 = vpop.f32.mrf.mxu0 }
 0xbf1   : > { %v3074_v37 = vld [vmem:[%s3762_s6 + $0xb0] sm:$0xff]  }
 0xc04   : > { %1440 = vrot.lane.b32.xlu0 %v1378_v14, %s3142_s17 }
 0xc6f   : > { %v1430_v38 = vpop.xlane.xlu1 %1429 }
 0xc70   : > { %v1431_v39 = vsub.f32 %v1423_v27, %v1430_v38  ;;  %v3075_v38 = vld [vmem:[%s3762_s6 + $0xe8] sm:$0xff]  }
 0xc72   : > { %v1432_v40 = vmul.f32 1.442695, %v1431_v39  ;;  %v3076_v39 = vld [vmem:[%s3762_s6 + $0xa8] sm:$0xff]  }
 0xc74   : > { %3113 = vpow2.f32 %v1432_v40  ;;  %v3077_v40 = vld [vmem:[%s3762_s6 + $0xe0] sm:$0xff]  }
 0xc77   : > { %v1540_v41 = vpop.xlane.xlu0 %1539 }
 0xc78   : > { %v1541_v42 = vsub.f32 %v1533_v33, %v1540_v41  ;;  %v3070_v33 = vld [vmem:[%s3762_s6 + $0xc0] sm:$0xff]  }
 0xc79   : > { %v3078_v41 = vld [vmem:[%s3762_s6 + $0xa0] sm:$0xff]  }
 0xc7a   : > { %v1542_v43 = vmul.f32 1.442695, %v1541_v42 }
 0xc7b   : > { %v1441_v44 = vpop.permute.xlu0 %1440 }
 0xc7c   : > { %3115 = vpow2.f32 %v1542_v43  ;;  %v1446_v45 = vsel %vm666_vm4, %v1441_v44, 0 }
 0xc7d   : > { %2901 = vmatpush3.bf16.msra.mxu1 %v1446_v45 }
 0xc7e   : > { %2912 = vmatprep.subr.bf16.mxu1 %v3137_v1 }
 0xc81   : > { %v3114_v22 = vpop.eup %3113 }
 0xc82   : > { %v1434_v47 = vsel %vm648_vm3, %v3114_v22, 0.0 }
 0xc83   : > { %1435 = vadd.xlane.f32.xlu1 %v1434_v47 }
 0xc89   : > { %v3116_v49 = vpop.eup %3115 }
 0xc8a   : > { %v1544_v50 = vsel %vm648_vm3, %v3116_v49, 0.0 }
 0xc8b   : > { %1545 = vadd.xlane.f32.xlu1 %v1544_v50 }
 0xc9c   : > { %1550 = vrot.lane.b32.xlu1 %v1378_v14, %s3775_s27 }
 0xd0c   : > { %v1436_v51 = vpop.xlane.xlu1 %1435 }
 0xd0d   : > { %3117 = vrcp.f32 %v1436_v51 }
 0xd14   : > { %v1546_v52 = vpop.xlane.xlu1 %1545 }
 0xd15   : > { %3119 = vrcp.f32 %v1546_v52 }
 0xd18   : > { %v1551_v55 = vpop.permute.xlu1 %1550 }
 0xd19   : > { %v1556_v57 = vsel %vm666_vm4, %v1551_v55, 0  ;;  %v3081_v55 = vld [vmem:[%s3762_s6 + $0xd0] sm:$0xff]  }
 0xd1a   : > { %v3118_v53 = vpop.eup %3117 }
 0xd1b   : > { %v1438_v54 = vmul.f32 %v3118_v53, %v3114_v22  ;;  %v2623_v22 = vld [vmem:[%s3764_s8 + $0xa] ss:$0 sm:$0xff]  ;;  %v3079_v53 = vld [vmem:[%s3762_s6 + $0xd8] sm:$0xff]  }
 0xd1d   : > { %v1439_v56 = vpack.c.bf16 %v1438_v54, %v1438_v54  ;;  %v3080_v54 = vld [vmem:[%s3762_s6 + $0x98] sm:$0xff]  }
 0xd1f   : > { %2903 = vmatmul.mubr.msk.bf16.vlgmr.msra.gmra.mxu1 %vm648_vm3, %v1439_v56  ;;  %v3082_v56 = vld [vmem:[%s3762_s6 + $0x90] sm:$0xff]  }
 0xd20   : > { %2913 = vmatpush3.bf16.msra.mxu1 %v1556_v57  ;;  %2914 = vmatprep.mubr.msk.bf16.mxu1 %vm3138_vm0, %v3137_v1 }
 0xd21   : > { %2779 = vmatprep.subr.bf16.mxu1 %v3067_v30 }
 0xd22   : > { %v3120_v58 = vpop.eup %3119 }
 0xd23   : > { %v1548_v59 = vmul.f32 %v3120_v58, %v3116_v49  ;;  %v2624_v49 = vld [vmem:[%s3764_s8 + $0xb] ss:$0 sm:$0xff] }
 0xd25   : > { %v1549_v60 = vpack.c.bf16 %v1548_v59, %v1548_v59 }
 0xd27   : > { %2915 = vmatmul.mubr.msk.bf16.vlgmr.msra.gmra.mxu1 %vm648_vm3, %v1549_v60 }
 0xd28   : > { %2780 = vmatpush3.bf16.msra.mxu1 %v3068_v31 }
 0xd29   : > { %2781 = vmatprep.subr.bf16.mxu1 %v3069_v32  ;;  %v3085_v32 = vld [vmem:[%s3763_s7 + $0x28] sm:$0xff]  }
 0xd2c   : > { %2782 = vmatpush3.bf16.msra.mxu1 %v3070_v33 }
 0xd2d   : > { %2783 = vmatprep.subr.bf16.mxu1 %v3071_v34 }
 0xd30   : > { %2784 = vmatpush3.bf16.msra.mxu1 %v3072_v35  ;;  %v3086_v35 = vld [vmem:[%s3763_s7 + $0x20] sm:$0xff]  }
 0xd31   : > { %2785 = vmatprep.subr.bf16.mxu1 %v3073_v36 }
 0xd34   : > { %2786 = vmatpush3.bf16.msra.mxu1 %v3074_v37  ;;  %v2662_v37 = vld [vmem:[%s3764_s8 + $0xc] ss:$0 sm:$0xff] }
 0xd35   : > { %2787 = vmatprep.subr.bf16.mxu1 %v3075_v38 }
 0xd38   : > { %2788 = vmatpush3.bf16.msra.mxu1 %v3076_v39 }
 0xd39   : > { %2789 = vmatprep.subr.bf16.mxu1 %v3077_v40 }
 0xd3c   : > { %2790 = vmatpush3.bf16.msra.mxu1 %v3078_v41 }
 0xd3d   : > { %2791 = vmatprep.subr.bf16.mxu1 %v3079_v53 }
 0xd40   : > { %2792 = vmatpush3.bf16.msra.mxu1 %v3080_v54 }
 0xd41   : > { %2793 = vmatprep.subr.bf16.mxu1 %v3081_v55 }
 0xd44   : > { %2794 = vmatpush3.bf16.msra.mxu1 %v3082_v56 }
 0xd45   : > { %2962 = vmatprep.subr.bf16.mxu1 %v3137_v1 }
 0xddf   : > { %v1482_v62 = vpop.f32.mrf.mxu1 }
 0xde1   : > { %v2904_v63 = vpop.f32.mrf.mxu1 }
 0xde3   : > { %v1485_v0 = vpop.f32.mrf.mxu1 }
 0xde5   : > { %v2905_v2 = vpop.f32.mrf.mxu1 }
 0xde7   : > { %v1592_v4 = vpop.f32.mrf.mxu1 }
 0xde8   : > { %1599 = vrot.lane.b32.xlu1 %v1592_v4, %s3776_s15 }
 0xde9   : > { %v2916_v5 = vpop.f32.mrf.mxu1 }
 0xdea   : > { %v3083_v5 = vld [vmem:[%s3763_s7 + $0x38] sm:$0xff]  }
 0xdeb   : > { %v1595_v6 = vpop.f32.mrf.mxu1 }
 0xded   : > { %v2917_v7 = vpop.f32.mrf.mxu1 }
 0xe5a   : > { %v1600_v9 = vpop.permute.xlu1 %1599 }
 0xe5b   : > { %v1602_v10 = vsel %vm601_vm2, %v1482_v62, %v1600_v9 }
 0xe5c   : > { %v1608_v11 = vpack.c.bf16 %v1602_v10, %v1602_v10 }
 0xe5e   : > { %2923 = vmatmul.mubr.msk.bf16.vlgmr.msra.gmra.mxu0 %vm547_vm1, %v1608_v11 }
 0xe5f   : > { %2930 = vmatprep.mubr.msk.bf16.mxu0 %vm3138_vm0, %v3137_v1  ;;  %2927 = vmatpush3.bf16.msra.mxu0 %v3065_v29 }
 0xe60   : > { %2928 = vmatprep.subr.bf16.mxu0 %v3137_v1 }
 0xf1e   : > { %v1663_v13 = vpop.f32.mrf.mxu0 }
 0xf1f   : > { %v1664_v14 = vadd.f32 %v2617_v12, %v1663_v13 }
 0xf20   : > { %v2924_v15 = vpop.f32.mrf.mxu0 }
 0xf21   : > { %v1669_v16 = vadd.f32 %v1664_v14, %v3469_v8  ;;  %v3066_v8 = vld [vmem:[%s3762_s6 + $0x110] sm:$0xff]  }
 0xf22   : > { %v1666_v20 = vpop.f32.mrf.mxu0  ;;  %2929 = vmatpush3.bf16.msra.mxu0 %v3066_v8  ;;  %v3084_v8 = vld [vmem:[%s3763_s7 + $0x30] sm:$0xff]  }
 0xf23   : > { %v1672_v3 = vsel %vm547_vm1, %v1669_v16, 0.0  ;;  %2934 = vmatprep.subr.bf16.mxu0 %v3137_v1 }
 0xf24   : > { %1673 = vadd.xlane.f32.xlu0 %v1672_v3  ;;  %v2925_v23 = vpop.f32.mrf.mxu0 }
 0xfad   : > { %v1674_v24 = vpop.xlane.xlu0 %1673 }
 0xfae   : > { %v1675_v25 = vmul.f32 0.03125, %v1674_v24 }
 0xfb0   : > { %v1676_v26 = vsub.f32 %v1669_v16, %v1675_v25 }
 0xfb2   : > { %v1677_v27 = vmul.f32 %v1676_v26, %v1676_v26 }
 0xfb4   : > { %v1678_v28 = vsel %vm547_vm1, %v1677_v27, 0.0 }
 0xfb5   : > { %1679 = vadd.xlane.f32.xlu1 %v1678_v28 }
0x103e   : > { %v1680_v42 = vpop.xlane.xlu1 %1679 }
0x103f   : > { %v1681_v43 = vmul.f32 0.03125, %v1680_v42 }
0x1041   : > { %v1682_v44 = vadd.f32 1e-05, %v1681_v43 }
0x1043   : > { %3121 = vrsqrt.f32 %v1682_v44 }
0x1050   : > { %v3122_v45 = vpop.eup %3121 }
0x1051   : > { %v1684_v47 = vmul.f32 %v3122_v45, %v1676_v26 }
0x1053   : > { %v1689_v50 = vmul.f32 %v2623_v22, %v1684_v47  ;;  %v2691_v22 = vld [vmem:[%s3764_s8 + $0xd] ss:$0 sm:$0xff] }
0x1055   : > { %v1694_v51 = vadd.f32 %v2624_v49, %v1689_v50 }
0x1057   : > { %v3577_v52 = vmul.f32 %v1694_v51, %v3382_v46 }
0x1059   : > { %1736 = vst.msk [vmem:[#allocation2 + $0x4] sm:$0xff] %vm547_vm1, %v3577_v52 }
0x1060   : > { %v1745_v57 = vld [vmem:[#allocation2 + $0x8] sm:$0xff]  ;;  %v1737_v14 = vld [vmem:[#allocation2] sm:$0xff] }
0x1061   : > { %v1739_v58 = vld [vmem:[#allocation2 + $0x2] sm:$0xff]  ;;  %v1778_v60 = vpack.c.bf16 %v1745_v57, %v1745_v57 }
0x1062   : > { %v1743_v59 = vld [vmem:[#allocation2 + $0x6] sm:$0xff] }
0x1063   : > { %v3025_v48 = vpack.i.bf16 %v1739_v58, %v1743_v59  ;;  %v1738_v61 = vld [vmem:[#allocation2 + $0x1] sm:$0xff]  ;;  %2931 = vmatmul.mubr.msk.bf16.vlgmr.msra.gmra.mxu0 %vm547_vm1, %v1778_v60 }
0x1064   : > { %v1742_v62 = vld [vmem:[#allocation2 + $0x5] sm:$0xff]  ;;  %2942 = vmatprep.mubr.msk.bf16.mxu0 %vm3138_vm0, %v3137_v1  ;;  %2935 = vmatpush3.bf16.msra.mxu0 %v3083_v5 }
0x1065   : > { %v3020_v63 = vpack.i.bf16 %v1738_v61, %v1742_v62  ;;  %3026 = vrot.lane.b32.xlu1 %v3025_v48, %s3142_s17  ;;  %v1740_v0 = vld [vmem:[#allocation2 + $0x3] sm:$0xff]  ;;  %2936 = vmatprep.subr.bf16.mxu0 %v3137_v1  ;;  %v3089_v61 = vld [vmem:[%s3765_s9 + $0x18] sm:$0xff]   ;;  %v3090_v62 = vld [vmem:[%s3765_s9 + $0x10] sm:$0xff]  }
0x1066   : > { %v1744_v2 = vld [vmem:[#allocation2 + $0x7] sm:$0xff] }
0x1067   : > { %3021 = vrot.lane.b32.xlu0 %v3020_v63, %s3146_s24  ;;  %v3030_v4 = vpack.i.bf16 %v1740_v0, %v1744_v2  ;;  %v1741_v13 = vld [vmem:[#allocation2 + $0x4] sm:$0xff] }
0x1068   : > { %2937 = vmatpush3.bf16.msra.mxu0 %v3084_v8  ;;  %v3088_v48 = vld [vmem:[%s3765_s9 + $0x20] sm:$0xff]   ;;  %v3091_v63 = vld [vmem:[%s3765_s9 + $0x8] sm:$0xff]  }
0x1069   : > { %2938 = vmatprep.subr.bf16.mxu0 %v3137_v1 }
0x106b   : > { %3031 = vrot.lane.b32.xlu0 %v3030_v4, %s3140_s26 }
0x106c   : > { %2939 = vmatpush3.bf16.msra.mxu0 %v3085_v32 }
0x106d   : > { %2940 = vmatprep.subr.bf16.mxu0 %v3137_v1 }
0x1070   : > { %2941 = vmatpush3.bf16.msra.mxu0 %v3086_v35 }
0x1071   : > { %2946 = vmatprep.subr.bf16.mxu0 %v3137_v1 }
0x10d7   : > { %v3027_v6 = vpop.permute.xlu1 %3026 }
0x10d8   : > { %v3029_v11 = vunpack.i.h.bf16 %v3027_v6  ;;  %v3028_v12 = vunpack.i.l.bf16 %v3027_v6  ;;  %v2699_v6 = vld [vmem:[%s3764_s8 + $0xe] ss:$0 sm:$0xff] }
0x10d9   : > { %v3022_v7 = vpop.permute.xlu0 %3021 }
0x10da   : > { %v3024_v9 = vunpack.i.h.bf16 %v3022_v7  ;;  %v3023_v10 = vunpack.i.l.bf16 %v3022_v7 }
0x10dc   : > { %v1770_v15 = vsel %vm547_vm1, %v1737_v14, %v3024_v9  ;;  %v1773_v16 = vsel %vm547_vm1, %v1741_v13, %v3023_v10  ;;  %v2700_v9 = vld [vmem:[%s3764_s8 + $0xf] ss:$0 sm:$0xff]  ;;  %v3092_v13 = vld [vmem:[%s3765_s9] sm:$0xff]  }
0x10dd   : > { %v3032_v20 = vpop.permute.xlu0 %3031  ;;  %v1771_v24 = vsel %vm997_vm5, %v1770_v15, %v3029_v11  ;;  %v1774_v25 = vsel %vm997_vm5, %v1773_v16, %v3028_v12  ;;  %v2701_v12 = vld [vmem:[%s510_s23] ss:$0 sm:$0xff]  ;;  %s518_s23 = scalar_lea.vmem %s3770_s14, %s3254_s19 }
0x10de   : > { %v3034_v3 = vunpack.i.h.bf16 %v3032_v20  ;;  %v3033_v23 = vunpack.i.l.bf16 %v3032_v20 }
0x10e0   : > { %v1772_v26 = vsel %vm999_vm6, %v1771_v24, %v3034_v3  ;;  %v1775_v27 = vsel %vm999_vm6, %v1774_v25, %v3033_v23 }
0x10e1   : > { %v1776_v28 = vpack.c.bf16 %v1772_v26, %v1772_v26  ;;  %v1777_v29 = vpack.c.bf16 %v1775_v27, %v1775_v27  ;;  %v3689_v27 = vld [vmem:[%s3768_s12] sm:$0xff] }
0x10e3   : > { %1926 = vmatprep.mubr.bf16.mxu1 %v1777_v29 }
0x10e4   : > { %1927 = vmatmul.mubr.bf16.vlgmr.msra.gmra.mxu1 %v1776_v28  ;;  %v2143_v28 = vrot.slane %v3689_v27, %v595_v21  ;;  %v3093_v21 = vld [vmem:[%s3766_s10 + $0x28] sm:$0xff]  }
0x10e5   : > { %2974 = vmatprep.mubr.msk.bf16.mxu1 %vm3138_vm0, %v3137_v1  ;;  %2963 = vmatpush3.bf16.msra.mxu1 %v3093_v21 }
0x10e6   : > { %2964 = vmatprep.subr.bf16.mxu1 %v3137_v1 }
0x1123   : > { %v1968_v30 = vpop.f32.mrf.mxu0 }
0x1125   : > { %v2932_v31 = vpop.f32.mrf.mxu0 }
0x1127   : > { %v1971_v33 = vpop.f32.mrf.mxu0 }
0x1129   : > { %v2933_v34 = vpop.f32.mrf.mxu0 }
0x11a4   : > { %v2795_v36 = vpop.f32.mrf.mxu1 }
0x11a6   : > { %v2796_v38 = vpop.f32.mrf.mxu1 }
0x11a7   : > { %v2797_v39 = vadd.f32 %v2796_v38, %v2795_v36 }
0x11a8   : > { %v2798_v40 = vpop.f32.mrf.mxu1 }
0x11a9   : > { %v1929_v41 = vadd.f32 %v2797_v39, %v2662_v37  ;;  %v3094_v40 = vld [vmem:[%s3766_s10 + $0x20] sm:$0xff]  }
0x11aa   : > { %v2799_v42 = vpop.f32.mrf.mxu1  ;;  %2965 = vmatpush3.bf16.msra.mxu1 %v3094_v40 }
0x11ab   : > { %v1969_v43 = vadd.f32 %v1968_v30, %v1929_v41  ;;  %v3095_v41 = vld [vmem:[%s3766_s10 + $0x18] sm:$0xff]   ;;  %2966 = vmatprep.subr.bf16.mxu1 %v3137_v1  ;;  %v3096_v42 = vld [vmem:[%s3766_s10 + $0x10] sm:$0xff]  }
0x11ad   : > { %v1974_v44 = vmax.f32 %v1969_v43, 0.0  ;;  %v3097_v43 = vld [vmem:[%s3766_s10 + $0x8] sm:$0xff]  }
0x11ae   : > { %2967 = vmatpush3.bf16.msra.mxu1 %v3095_v41 }
0x11af   : > { %v1984_v45 = vpack.c.bf16 %v1974_v44, %v1974_v44  ;;  %2968 = vmatprep.subr.bf16.mxu1 %v3137_v1 }
0x11b1   : > { %2943 = vmatmul.mubr.msk.bf16.vlgmr.msra.gmra.mxu0 %vm997_vm5, %v1984_v45 }
0x11b2   : > { %2958 = vmatprep.mubr.msk.bf16.mxu0 %vm3138_vm0, %v3137_v1  ;;  %2969 = vmatpush3.bf16.msra.mxu1 %v3096_v42 }
0x11b3   : > { %2970 = vmatprep.subr.bf16.mxu1 %v3137_v1 }
0x11b6   : > { %2971 = vmatpush3.bf16.msra.mxu1 %v3097_v43 }
0x11b7   : > { %2972 = vmatprep.subr.bf16.mxu1 %v3137_v1 }
0x1271   : > { %v2051_v47 = vpop.f32.mrf.mxu0 }
0x1272   : > { %v2052_v49 = vadd.f32 %v2691_v22, %v2051_v47  ;;  %v2239_v47 = vsub.s32 1, %v3288_v18 }
0x1273   : > { %v2944_v50 = vpop.f32.mrf.mxu0 }
0x1274   : > { %v2057_v51 = vadd.f32 %v2052_v49, %v3577_v52  ;;  %v3087_v52 = vld [vmem:[%s3765_s9 + $0x28] sm:$0xff]   ;;  %v2244_v49 = vsub.s32 2, %v3288_v18  ;;  %v2240_v50 = vrot.slane %v3689_v27, %v2239_v47 }
0x1275   : > { %v2054_v53 = vpop.f32.mrf.mxu0  ;;  %2947 = vmatpush3.bf16.msra.mxu0 %v3087_v52 }
0x1276   : > { %v2060_v54 = vsel %vm547_vm1, %v2057_v51, 0.0  ;;  %2948 = vmatprep.subr.bf16.mxu0 %v3137_v1  ;;  %v2245_v53 = vrot.slane %v3689_v27, %v2244_v49 }
0x1277   : > { %2061 = vadd.xlane.f32.xlu1 %v2060_v54  ;;  %v2945_v55 = vpop.f32.mrf.mxu0 }
0x1278   : > { %v3098_v55 = vld [vmem:[%s3766_s10] sm:$0xff]  }
0x1279   : > { %2949 = vmatpush3.bf16.msra.mxu0 %v3088_v48  ;;  %2973 = vmatpush3.bf16.msra.mxu1 %v3098_v55 }
0x127a   : > { %2950 = vmatprep.subr.bf16.mxu0 %v3137_v1 }
0x127d   : > { %2951 = vmatpush3.bf16.msra.mxu0 %v3089_v61 }
0x127e   : > { %2952 = vmatprep.subr.bf16.mxu0 %v3137_v1 }
0x1281   : > { %2953 = vmatpush3.bf16.msra.mxu0 %v3090_v62 }
0x1282   : > { %2954 = vmatprep.subr.bf16.mxu0 %v3137_v1 }
0x1285   : > { %2955 = vmatpush3.bf16.msra.mxu0 %v3091_v63 }
0x1286   : > { %2956 = vmatprep.subr.bf16.mxu0 %v3137_v1 }
0x1289   : > { %2957 = vmatpush3.bf16.msra.mxu0 %v3092_v13 }
0x128a   : > { %2978 = vmatprep.subr.bf16.mxu0 %v3137_v1 }
0x1300   : > { %v2062_v56 = vpop.xlane.xlu1 %2061 }
0x1301   : > { %v2063_v57 = vmul.f32 0.03125, %v2062_v56 }
0x1303   : > { %v2064_v58 = vsub.f32 %v2057_v51, %v2063_v57 }
0x1305   : > { %v2065_v59 = vmul.f32 %v2064_v58, %v2064_v58 }
0x1307   : > { %v2066_v60 = vsel %vm547_vm1, %v2065_v59, 0.0 }
0x1308   : > { %2067 = vadd.xlane.f32.xlu0 %v2066_v60 }
0x1391   : > { %v2068_v0 = vpop.xlane.xlu0 %2067 }
0x1392   : > { %v2069_v2 = vmul.f32 0.03125, %v2068_v0  ;;  %v2266_v0 = vsub.s32 3, %v3288_v18 }
0x1394   : > { %v2070_v4 = vadd.f32 1e-05, %v2069_v2  ;;  %v2267_v2 = vrot.slane %v3689_v27, %v2266_v0 }
0x1396   : > { %3123 = vrsqrt.f32 %v2070_v4 }
0x13a3   : > { %v3124_v5 = vpop.eup %3123 }
0x13a4   : > { %v2072_v7 = vmul.f32 %v3124_v5, %v2064_v58 }
0x13a6   : > { %v2077_v10 = vmul.f32 %v2699_v6, %v2072_v7 }
0x13a8   : > { %v2082_v11 = vadd.f32 %v2700_v9, %v2077_v10 }
0x13aa   : > { %v2083_v14 = vmul.f32 %v2082_v11, %v3382_v46 }
0x13ac   : > { %v2091_v15 = vadd.f32 %v2701_v12, %v2083_v14 }
0x13ae   : > { %2092 = vst.msk [vmem:[%s514_s16] sm:$0xff] %vm547_vm1, %v2091_v15  ;;  %2125 = vst.msk [vmem:[#allocation3 + $0x1] sm:$0xff] %vm547_vm1, %v2091_v15 }
0x13b5   : > { %v2128_v16 = vld [vmem:[#allocation3 + $0x2] sm:$0xff] }
0x13b6   : > { %v2127_v20 = vld [vmem:[#allocation3 + $0x1] sm:$0xff]  ;;  %2134 = vrot.lane.b32.xlu1 %v2128_v16, %s3142_s17 }
0x13b7   : > { %2130 = vrot.lane.b32.xlu0 %v2127_v20, %s3146_s24  ;;  %v2126_v23 = vld [vmem:[#allocation3] sm:$0xff]  ;;  %v3099_v20 = vld [vmem:[%s3767_s11 + $0x8] sm:$0xff]  }
0x1428   : > { %v2135_v3 = vpop.permute.xlu1 %2134 }
0x1429   : > { %v2131_v46 = vpop.permute.xlu0 %2130 }
0x142a   : > { %v2137_v24 = vsel %vm547_vm1, %v2126_v23, %v2131_v46 }
0x142b   : > { %v2138_v25 = vsel %vm997_vm5, %v2137_v24, %v2135_v3  ;;  %v3100_v3 = vld [vmem:[%s3767_s11] sm:$0xff]  }
0x142c   : > { %v2139_v26 = vpack.c.bf16 %v2138_v25, %v2138_v25  ;;  %v2363_v25 = vsub.s32 4, %v3288_v18 }
0x142e   : > { %2959 = vmatmul.mubr.msk.bf16.vlgmr.msra.gmra.mxu0 %vm999_vm6, %v2139_v26  ;;  %v2368_v26 = vsub.s32 5, %v3288_v18 }
0x142f   : > { %2982 = vmatprep.mubr.msk.bf16.mxu0 %vm3138_vm0, %v3137_v1  ;;  %2979 = vmatpush3.bf16.msra.mxu0 %v3099_v20 }
0x1430   : > { %2980 = vmatprep.subr.bf16.mxu0 %v3137_v1  ;;  %v2374_v1 = vsub.s32 6, %v3288_v18 }
0x1433   : > { %2981 = vmatpush3.bf16.msra.mxu0 %v3100_v3 }
0x14ee   : > { %v2217_v29 = vpop.f32.mrf.mxu0 }
0x14ef   : > { %v2218_v8 = vadd.f32 %v2217_v29, %v2143_v28  ;;  %v2364_v28 = vrot.slane %v3689_v27, %v2363_v25 }
0x14f0   : > { %v2960_v30 = vpop.f32.mrf.mxu0 }
0x14f1   : > { %v2223_v31 = vmax.f32 %v2218_v8, 0.0  ;;  %v2369_v30 = vrot.slane %v3689_v27, %v2368_v26 }
0x14f2   : > { %v2220_v32 = vpop.f32.mrf.mxu0 }
0x14f3   : > { %v2224_v33 = vsel %vm547_vm1, %v2223_v31, 0.0 }
0x14f4   : > { %2225 = vadd.xlane.f32.xlu1 %v2224_v33  ;;  %v2961_v34 = vpop.f32.mrf.mxu0 }
0x14f5   : > { %v2375_v34 = vrot.slane %v3689_v27, %v2374_v1 }
0x157d   : > { %v2226_v35 = vpop.xlane.xlu1 %2225 }
0x157e   : > { %v2227_v36 = vmul.f32 0.03125, %v2226_v35 }
0x1580   : > { %v2228_v37 = vsub.f32 %v2223_v31, %v2227_v36 }
0x1582   : > { %v2229_v38 = vmul.f32 %v2228_v37, %v2228_v37 }
0x1584   : > { %v2230_v39 = vsel %vm547_vm1, %v2229_v38, 0.0 }
0x1585   : > { %2231 = vadd.xlane.f32.xlu0 %v2230_v39 }
0x160e   : > { %v2232_v44 = vpop.xlane.xlu0 %2231 }
0x160f   : > { %v2233_v45 = vmul.f32 0.03125, %v2232_v44 }
0x1611   : > { %v2234_v22 = vadd.f32 1e-05, %v2233_v45 }
0x1613   : > { %3125 = vrsqrt.f32 %v2234_v22 }
0x1620   : > { %v3126_v51 = vpop.eup %3125 }
0x1621   : > { %v2236_v54 = vmul.f32 %v3126_v51, %v2228_v37 }
0x1623   : > { %v2241_v56 = vmul.f32 %v2240_v50, %v2236_v54 }
0x1625   : > { %v2246_v57 = vadd.f32 %v2245_v53, %v2241_v56 }
0x1627   : > { %2249 = vst.msk [vmem:[#allocation4 + $0x1] sm:$0xff] %vm547_vm1, %v2246_v57 }
0x162e   : > { %v2252_v58 = vld [vmem:[#allocation4 + $0x2] sm:$0xff] }
0x162f   : > { %v2251_v59 = vld [vmem:[#allocation4 + $0x1] sm:$0xff]  ;;  %2258 = vrot.lane.b32.xlu1 %v2252_v58, %s3142_s17 }
0x1630   : > { %2254 = vrot.lane.b32.xlu0 %v2251_v59, %s3146_s24  ;;  %v2250_v48 = vld [vmem:[#allocation4] sm:$0xff] }
0x16a1   : > { %v2259_v60 = vpop.permute.xlu1 %2258 }
0x16a2   : > { %v2255_v52 = vpop.permute.xlu0 %2254 }
0x16a3   : > { %v2261_v61 = vsel %vm547_vm1, %v2250_v48, %v2255_v52 }
0x16a4   : > { %v2262_v62 = vsel %vm997_vm5, %v2261_v61, %v2259_v60 }
0x16a5   : > { %v2263_v63 = vpack.c.bf16 %v2262_v62, %v2262_v62 }
0x16a7   : > { %2975 = vmatmul.mubr.msk.bf16.vlgmr.msra.gmra.mxu1 %vm999_vm6, %v2263_v63 }
0x1767   : > { %v2341_v4 = vpop.f32.mrf.mxu1 }
0x1768   : > { %v2342_v5 = vadd.f32 %v2341_v4, %v2267_v2 }
0x1769   : > { %v2976_v6 = vpop.f32.mrf.mxu1 }
0x176a   : > { %v2347_v7 = vmax.f32 %v2342_v5, 0.0 }
0x176b   : > { %v2344_v9 = vpop.f32.mrf.mxu1 }
0x176c   : > { %v2348_v10 = vsel %vm547_vm1, %v2347_v7, 0.0 }
0x176d   : > { %2349 = vadd.xlane.f32.xlu1 %v2348_v10  ;;  %v2977_v11 = vpop.f32.mrf.mxu1 }
0x17f6   : > { %v2350_v12 = vpop.xlane.xlu1 %2349 }
0x17f7   : > { %v2351_v13 = vmul.f32 0.03125, %v2350_v12 }
0x17f9   : > { %v2352_v14 = vsub.f32 %v2347_v7, %v2351_v13 }
0x17fb   : > { %v2353_v15 = vmul.f32 %v2352_v14, %v2352_v14 }
0x17fd   : > { %v2354_v16 = vsel %vm547_vm1, %v2353_v15, 0.0 }
0x17fe   : > { %2355 = vadd.xlane.f32.xlu0 %v2354_v16 }
0x1887   : > { %v2356_v46 = vpop.xlane.xlu0 %2355 }
0x1888   : > { %v2357_v23 = vmul.f32 0.03125, %v2356_v46 }
0x188a   : > { %v2358_v24 = vadd.f32 1e-05, %v2357_v23 }
0x188c   : > { %3127 = vrsqrt.f32 %v2358_v24 }
0x1899   : > { %v3128_v29 = vpop.eup %3127 }
0x189a   : > { %v2360_v8 = vmul.f32 %v3128_v29, %v2352_v14 }
0x189c   : > { %v2365_v31 = vmul.f32 %v2364_v28, %v2360_v8 }
0x189e   : > { %v2370_v32 = vadd.f32 %v2369_v30, %v2365_v31 }
0x18a0   : > { %v2371_v33 = vpack.c.bf16 %v2370_v32, %v2370_v32 }
0x18a2   : > { %2983 = vmatmul.mubr.msk.bf16.vlgmr.msra.gmra.mxu0 %vm547_vm1, %v2371_v33 }
0x1962   : > { %v2425_v35 = vpop.f32.mrf.mxu0 }
0x1963   : > { %v2426_v36 = vadd.f32 %v2425_v35, %v2375_v34 }
0x1964   : > { %v2984_v37 = vpop.f32.mrf.mxu0 }
0x1965   : > { %v2431_v38 = vmul.f32 %v2426_v36, %v524_v19 }
0x1966   : > { %v2428_v39 = vpop.f32.mrf.mxu0 }
0x1967   : > { %2433 = vst.msk [vmem:[%s518_s23] sm:$0xff] %vm2432_vm8, %v2431_v38 }
0x1968   : > { %v2985_v21 = vpop.f32.mrf.mxu0 }
0x1969 PF: > { %s25_s29 = sadd.s32 1, %s3135_s29  }
0x196a   : > { %p22_p4 = scmp.ge.s32.totalorder %s25_s29, 4  }
0x196c   :  { %24 = sbr.rel (!%p22_p4) target bundleno = 1 (0x1), region = 128 }

// kernel: fastspeech2_forward.4
= control target key start
LH: loop header
LB: loop body
LE: loop exit
PB: predicated region body
PF: predicated region fallthrough
CT: control target
= control target key end

     0   :  { %s1515_s21 = smov 0   ;;  %s1805_s0 = inlined_call_operand.vmem [shape: f32[2,16,32], index: 0, kind: input, shape index: {}]   ;;  %s1806_s1 = inlined_call_operand.vmem [shape: f32[2,16,1], index: 1, kind: input, shape index: {}]   ;;  %s1807_s2 = inlined_call_operand.vmem [shape: bf16[2,96,32], index: 2, kind: input, shape index: {}]   ;;  %s1808_s3 = inlined_call_operand.vmem [shape: bf16[2,96,32], index: 3, kind: input, shape index: {}]   ;;  %s1809_s4 = inlined_call_operand.vmem [shape: bf16[2,32,1], index: 4, kind: input, shape index: {}]   ;;  %s1810_s5 = inlined_call_operand.vmem [shape: f32[2,8,128], index: 5, kind: input, shape index: {}]   ;;  %s1811_s6 = inlined_call_operand.vmem [shape: f32[2,16,2], index: 6, kind: output, shape index: {}]  }
   0x1 LB: > { %s1177_s22 = sadd.s32 4294967295, %s1473_s21   ;;  %p1181_p0 = scmp.ge.s32.totalorder %s1473_s21, 1  ;;  %s1473_s21 = sphi %s1515_s21, %s16_s21  }
   0x2   : > { %p222_p1 = scmp.lt.s32.totalorder %s1473_s21, 3 }
   0x4   : > { %p223_p2 = pnand %p1181_p0, %p222_p1 }
   0x5   : > { %p257_p3 = scmp.lt.s32.totalorder (!%p223_p2), %s1177_s22, 1  ;;  %s1477_s13 = smov (!%p223_p2), 32  }
   0x6   : > { %226 = sbr.rel (%p223_p2) target bundleno = 2286 (0x8ee), region = 44  ;;  %s1478_s16 = smov (!%p223_p2), 64  }
   0x7   : > { %s1479_s28 = smov (!%p223_p2), 1  }
   0xb   : > { %vm308_vm0 = vcmask 261120   ;;  %vm311_vm1 = vcmask 254976   ;;  %v1423_v0 = vld [vmem:[%s1807_s2 + $0x28] sm:$0xff]   ;;  %v1475_v1 = vmov 0.0   ;;  %s1813_s22 = smov (!%p257_p3, %s1177_s22), 1  ;;  %v1424_v2 = vld [vmem:[%s1807_s2 + $0x20] sm:$0xff]   ;;  %v343_v28 = vlaneseq }
   0xc   : > { %309 = vst.msk [vmem:[#allocation2] sm:$0xff] %vm308_vm0, %v1475_v1  ;;  %310 = vst.msk [vmem:[#allocation2 + $0x8] sm:$0xff] %vm308_vm0, %v1475_v1  ;;  %1290 = vmatprep.subr.bf16.mxu0 %v1475_v1  ;;  %1306 = vmatprep.subr.bf16.mxu1 %v1475_v1  ;;  %s1544_s27 = sshll.u32 %s1813_s22, 4  ;;  %v1425_v3 = vld [vmem:[%s1807_s2 + $0x18] sm:$0xff]   ;;  %v1426_v6 = vld [vmem:[%s1807_s2 + $0x10] sm:$0xff]   ;;  %vm1476_vm2 = vmmov 0  }
   0xd   : > { %312 = vst.msk [vmem:[#allocation2 + $0x10] sm:$0x3] %vm311_vm1, %v1475_v1  ;;  %471 = vst.msk [vmem:[#allocation3 + $0x10] sm:$0x3] %vm311_vm1, %v1475_v1  ;;  %1291 = vmatpush3.bf16.msra.mxu0 %v1423_v0  ;;  %s261_s30 = scalar_lea.vmem %s1805_s0, %s1544_s27  ;;  %1302 = vmatprep.mubr.msk.bf16.mxu0 %vm1476_vm2, %v1475_v1  ;;  %v1427_v7 = vld [vmem:[%s1807_s2 + $0x8] sm:$0xff]   ;;  %v1428_v16 = vld [vmem:[%s1807_s2] sm:$0xff]   ;;  %s266_s26 = scalar_lea.vmem %s1806_s1, %s1544_s27 }
   0xe   : > { %469 = vst.msk [vmem:[#allocation3] sm:$0xff] %vm308_vm0, %v1475_v1  ;;  %470 = vst.msk [vmem:[#allocation3 + $0x8] sm:$0xff] %vm308_vm0, %v1475_v1  ;;  %1292 = vmatprep.subr.bf16.mxu0 %v1475_v1  ;;  %v273_v4 = vld [vmem:[%s261_s30] sm:$0xff]  ;;  %v274_v5 = vld [vmem:[%s261_s30 + $0x8] sm:$0xff]  ;;  %1318 = vmatprep.mubr.msk.bf16.mxu1 %vm1476_vm2, %v1475_v1  ;;  %vm339_vm3 = vcmask 523264   ;;  %vm383_vm4 = vcmask 785408   ;;  %s271_s7 = scalar_lea.vmem %s1811_s6, %s1544_s27 }
   0xf   : > { %313 = vst.msk [vmem:[#allocation2 + $0x1] sm:$0xff] %vm308_vm0, %v273_v4  ;;  %314 = vst.msk [vmem:[#allocation2 + $0x9] sm:$0xff] %vm308_vm0, %v274_v5  ;;  %v1590_v29 = vshrl.u32 %v343_v28, 7  ;;  %v1596_v31 = vld [vmem:[%s1810_s5] sm:$0xff]  ;;  %v1429_v53 = vld [vmem:[%s1808_s3 + $0x28] sm:$0xff]   ;;  %vm1104_vm5 = vcmask 7168  }
  0x10   : > { %1307 = vmatpush3.bf16.msra.mxu1 %v1429_v53  ;;  %v1430_v54 = vld [vmem:[%s1808_s3 + $0x20] sm:$0xff]   ;;  %v1431_v55 = vld [vmem:[%s1808_s3 + $0x18] sm:$0xff]   ;;  %v1432_v56 = vld [vmem:[%s1808_s3 + $0x10] sm:$0xff]   ;;  %vm1107_vm6 = vcmask 15360  }
  0x11   : > { %1293 = vmatpush3.bf16.msra.mxu0 %v1424_v2  ;;  %v345_v30 = vsub.s32 0, %v1590_v29  ;;  %1308 = vmatprep.subr.bf16.mxu1 %v1475_v1  ;;  %v459_v63 = vsub.s32 1, %v1590_v29  ;;  %v465_v0 = vsub.s32 2, %v1590_v29 }
  0x12   : > { %1294 = vmatprep.subr.bf16.mxu0 %v1475_v1 }
  0x13   : > { %v346_v32 = vrot.slane %v1596_v31, %v345_v30  ;;  %v460_v2 = vrot.slane %v1596_v31, %v459_v63 }
  0x14   : > { %1309 = vmatpush3.bf16.msra.mxu1 %v1430_v54 }
  0x15   : > { %1295 = vmatpush3.bf16.msra.mxu0 %v1425_v3  ;;  %1310 = vmatprep.subr.bf16.mxu1 %v1475_v1 }
  0x16   : > { %1296 = vmatprep.subr.bf16.mxu0 %v1475_v1  ;;  %v317_v8 = vld [vmem:[#allocation2 + $0x1] sm:$0xff]  ;;  %v318_v9 = vld [vmem:[#allocation2 + $0x9] sm:$0xff] }
  0x17   : > { %v319_v10 = vld [vmem:[#allocation2 + $0x2] sm:$0xff]  ;;  %v1383_v11 = vpack.i.bf16 %v318_v9, %v317_v8  ;;  %v320_v12 = vld [vmem:[#allocation2 + $0xa] sm:$0xff] }
  0x18   : > { %v315_v13 = vld [vmem:[#allocation2] sm:$0xff]  ;;  %v316_v14 = vld [vmem:[#allocation2 + $0x8] sm:$0xff]  ;;  %723 = vst.msk [vmem:[#allocation2 + $0x10] sm:$0x3] %vm311_vm1, %v1475_v1  ;;  %v1388_v15 = vpack.i.bf16 %v320_v12, %v319_v10  ;;  %1311 = vmatpush3.bf16.msra.mxu1 %v1431_v55 }
  0x19   : > { %1297 = vmatpush3.bf16.msra.mxu0 %v1426_v6  ;;  %721 = vst.msk [vmem:[#allocation2] sm:$0xff] %vm308_vm0, %v1475_v1  ;;  %722 = vst.msk [vmem:[#allocation2 + $0x8] sm:$0xff] %vm308_vm0, %v1475_v1  ;;  %1384 = vrot.lane.b32.xlu0 %v1383_v11, %s1477_s13  ;;  %v1433_v11 = vld [vmem:[%s1808_s3 + $0x8] sm:$0xff]  }
  0x1a   : > { %1298 = vmatprep.subr.bf16.mxu0 %v1475_v1  ;;  %724 = vst.msk [vmem:[#allocation2 + $0x1] sm:$0xff] %vm308_vm0, %v273_v4  ;;  %725 = vst.msk [vmem:[#allocation2 + $0x9] sm:$0xff] %vm308_vm0, %v274_v5  ;;  %1312 = vmatprep.subr.bf16.mxu1 %v1475_v1  ;;  %v466_v4 = vrot.slane %v1596_v31, %v465_v0 }
  0x1c   : > { %1313 = vmatpush3.bf16.msra.mxu1 %v1432_v56 }
  0x1d   : > { %1299 = vmatpush3.bf16.msra.mxu0 %v1427_v7  ;;  %1389 = vrot.lane.b32.xlu0 %v1388_v15, %s1478_s16 }
  0x1e   : > { %1300 = vmatprep.subr.bf16.mxu0 %v1475_v1  ;;  %1314 = vmatprep.subr.bf16.mxu1 %v1475_v1 }
  0x20   : > { %1315 = vmatpush3.bf16.msra.mxu1 %v1433_v11 }
  0x21   : > { %1301 = vmatpush3.bf16.msra.mxu0 %v1428_v16  ;;  %1316 = vmatprep.subr.bf16.mxu1 %v1475_v1 }
  0x22   : > { %1322 = vmatprep.subr.bf16.mxu0 %v1475_v1 }
  0x8b   : > { %v1385_v17 = vpop.permute.xlu0 %1384 }
  0x8c   : > { %v1387_v18 = vunpack.i.h.bf16 %v1385_v17  ;;  %v1386_v19 = vunpack.i.l.bf16 %v1385_v17 }
  0x8e   : > { %v337_v23 = vsel %vm308_vm0, %v315_v13, %v1386_v19  ;;  %v338_v24 = vsel %vm308_vm0, %v316_v14, %v1387_v18  ;;  %v1434_v13 = vld [vmem:[%s1808_s3] sm:$0xff]  }
  0x8f   : > { %v1390_v20 = vpop.permute.xlu0 %1389  ;;  %1317 = vmatpush3.bf16.msra.mxu1 %v1434_v13 }
  0x90   : > { %v1392_v21 = vunpack.i.h.bf16 %v1390_v20  ;;  %v1391_v22 = vunpack.i.l.bf16 %v1390_v20  ;;  %1330 = vmatprep.subr.bf16.mxu1 %v1475_v1 }
  0x92   : > { %v340_v25 = vsel %vm339_vm3, %v337_v23, %v1391_v22  ;;  %v341_v26 = vsel %vm339_vm3, %v338_v24, %v1392_v21  ;;  %v728_v21 = vld [vmem:[#allocation2 + $0x1] sm:$0xff]  ;;  %v729_v22 = vld [vmem:[#allocation2 + $0x9] sm:$0xff] }
  0x93   : > { %v342_v27 = vpack.c.bf16 %v341_v26, %v340_v25  ;;  %v1403_v24 = vpack.i.bf16 %v729_v22, %v728_v21  ;;  %v730_v25 = vld [vmem:[#allocation2 + $0x2] sm:$0xff]  ;;  %v731_v26 = vld [vmem:[#allocation2 + $0xa] sm:$0xff] }
  0x95   : > { %1303 = vmatmul.mubr.msk.bf16.vlgmr.msra.gmra.mxu0 %vm383_vm4, %v342_v27  ;;  %v1408_v27 = vpack.i.bf16 %v731_v26, %v730_v25 }
  0x96   : > { %1326 = vmatprep.mubr.msk.bf16.mxu0 %vm1476_vm2, %v1475_v1 }
 0x155   : > { %v421_v33 = vpop.f32.mrf.mxu0 }
 0x156   : > { %v422_v34 = vadd.f32 %v421_v33, %v346_v32 }
 0x157   : > { %v1304_v35 = vpop.f32.mrf.mxu0 }
 0x158   : > { %v428_v36 = vmax.f32 %v422_v34, 0.0 }
 0x159   : > { %v424_v37 = vpop.f32.mrf.mxu0 }
 0x15a   : > { %v425_v38 = vadd.f32 %v424_v37, %v346_v32  ;;  %v430_v39 = vsel %vm308_vm0, %v428_v36, 0.0 }
 0x15b   : > { %431 = vadd.xlane.f32.xlu1 %v430_v39  ;;  %v1305_v40 = vpop.f32.mrf.mxu0 }
 0x15c   : > { %v429_v41 = vmax.f32 %v425_v38, 0.0 }
 0x15e   : > { %v433_v42 = vsel %vm308_vm0, %v429_v41, 0.0 }
 0x15f   : > { %434 = vadd.xlane.f32.xlu1 %v433_v42 }
 0x1e4   : > { %v432_v43 = vpop.xlane.xlu1 %431 }
 0x1e5   : > { %v437_v44 = vmul.f32 0.03125, %v432_v43  ;;  %v1436_v43 = vld [vmem:[%s1807_s2 + $0x50] sm:$0xff]  }
 0x1e7   : > { %v439_v45 = vsub.f32 %v428_v36, %v437_v44  ;;  %v1437_v44 = vld [vmem:[%s1807_s2 + $0x48] sm:$0xff]  }
 0x1e8   : > { %v435_v46 = vpop.xlane.xlu1 %434 }
 0x1e9   : > { %v438_v47 = vmul.f32 0.03125, %v435_v46  ;;  %v441_v48 = vmul.f32 %v439_v45, %v439_v45  ;;  %v1438_v46 = vld [vmem:[%s1807_s2 + $0x40] sm:$0xff]  }
 0x1eb   : > { %v440_v49 = vsub.f32 %v429_v41, %v438_v47  ;;  %v443_v50 = vsel %vm308_vm0, %v441_v48, 0.0  ;;  %v1435_v41 = vld [vmem:[%s1807_s2 + $0x58] sm:$0xff]  }
 0x1ec   : > { %444 = vadd.xlane.f32.xlu0 %v443_v50  ;;  %v726_v50 = vld [vmem:[#allocation2] sm:$0xff] }
 0x1ed   : > { %v442_v51 = vmul.f32 %v440_v49, %v440_v49 }
 0x1ef   : > { %v446_v52 = vsel %vm308_vm0, %v442_v51, 0.0  ;;  %v727_v51 = vld [vmem:[#allocation2 + $0x8] sm:$0xff] }
 0x1f0   : > { %447 = vadd.xlane.f32.xlu1 %v446_v52  ;;  %v1439_v52 = vld [vmem:[%s1807_s2 + $0x38] sm:$0xff]  }
 0x275   : > { %v445_v57 = vpop.xlane.xlu0 %444 }
 0x276   : > { %v449_v58 = vmul.f32 0.03125, %v445_v57  ;;  %v1440_v57 = vld [vmem:[%s1807_s2 + $0x30] sm:$0xff]  }
 0x278   : > { %v451_v59 = vadd.f32 1e-05, %v449_v58 }
 0x279   : > { %v448_v60 = vpop.xlane.xlu1 %447 }
 0x27a   : > { %1451 = vrsqrt.f32 %v451_v59  ;;  %v450_v61 = vmul.f32 0.03125, %v448_v60 }
 0x27c   : > { %v452_v62 = vadd.f32 1e-05, %v450_v61 }
 0x27e   : > { %1453 = vrsqrt.f32 %v452_v62 }
 0x287   : > { %v1452_v3 = vpop.eup %1451 }
 0x288   : > { %v455_v5 = vmul.f32 %v1452_v3, %v439_v45 }
 0x28a   : > { %v461_v6 = vmul.f32 %v460_v2, %v455_v5  ;;  %v1691_v5 = vld [vmem:[%s1810_s5 + $0x8] sm:$0xff] }
 0x28b   : > { %v1454_v7 = vpop.eup %1453 }
 0x28c   : > { %v467_v8 = vadd.f32 %v466_v4, %v461_v6  ;;  %v456_v9 = vmul.f32 %v1454_v7, %v440_v49  ;;  %v756_v7 = vrot.slane %v1691_v5, %v345_v30 }
 0x28e   : > { %472 = vst.msk [vmem:[#allocation3 + $0x1] sm:$0xff] %vm308_vm0, %v467_v8  ;;  %v462_v10 = vmul.f32 %v460_v2, %v456_v9 }
 0x290   : > { %v468_v12 = vadd.f32 %v466_v4, %v462_v10  ;;  %v503_v4 = vsub.s32 3, %v1590_v29 }
 0x292   : > { %473 = vst.msk [vmem:[#allocation3 + $0x9] sm:$0xff] %vm308_vm0, %v468_v12  ;;  %v504_v6 = vrot.slane %v1596_v31, %v503_v4 }
 0x295   : > { %v476_v14 = vld [vmem:[#allocation3 + $0x1] sm:$0xff] }
 0x296   : > { %v474_v15 = vld [vmem:[#allocation3] sm:$0xff] }
 0x299   : > { %v477_v16 = vld [vmem:[#allocation3 + $0x9] sm:$0xff] }
 0x29a   : > { %v478_v17 = vld [vmem:[#allocation3 + $0x2] sm:$0xff]  ;;  %v479_v18 = vld [vmem:[#allocation3 + $0xa] sm:$0xff]  ;;  %v1393_v19 = vpack.i.bf16 %v477_v16, %v476_v14 }
 0x29b   : > { %879 = vst.msk [vmem:[#allocation3 + $0x10] sm:$0x3] %vm311_vm1, %v1475_v1  ;;  %v475_v20 = vld [vmem:[#allocation3 + $0x8] sm:$0xff]  ;;  %v1398_v23 = vpack.i.bf16 %v479_v18, %v478_v17 }
 0x29c   : > { %877 = vst.msk [vmem:[#allocation3] sm:$0xff] %vm308_vm0, %v1475_v1  ;;  %878 = vst.msk [vmem:[#allocation3 + $0x8] sm:$0xff] %vm308_vm0, %v1475_v1  ;;  %1394 = vrot.lane.b32.xlu1 %v1393_v19, %s1477_s13 }
 0x2a0   : > { %1399 = vrot.lane.b32.xlu1 %v1398_v23, %s1478_s16 }
 0x2a4   : > { %1404 = vrot.lane.b32.xlu1 %v1403_v24, %s1477_s13 }
 0x2a8   : > { %1409 = vrot.lane.b32.xlu1 %v1408_v27, %s1478_s16 }
 0x30e   : > { %v1395_v28 = vpop.permute.xlu1 %1394 }
 0x30f   : > { %v1397_v32 = vunpack.i.h.bf16 %v1395_v28  ;;  %v1396_v33 = vunpack.i.l.bf16 %v1395_v28 }
 0x311   : > { %v496_v37 = vsel %vm308_vm0, %v474_v15, %v1396_v33  ;;  %v497_v38 = vsel %vm308_vm0, %v475_v20, %v1397_v32 }
 0x312   : > { %v1400_v34 = vpop.permute.xlu1 %1399 }
 0x313   : > { %v1402_v35 = vunpack.i.h.bf16 %v1400_v34  ;;  %v1401_v36 = vunpack.i.l.bf16 %v1400_v34 }
 0x315   : > { %v498_v39 = vsel %vm339_vm3, %v496_v37, %v1401_v36  ;;  %v499_v40 = vsel %vm339_vm3, %v497_v38, %v1402_v35 }
 0x316   : > { %v500_v42 = vpack.c.bf16 %v499_v40, %v498_v39  ;;  %v1405_v45 = vpop.permute.xlu1 %1404 }
 0x317   : > { %v1407_v47 = vunpack.i.h.bf16 %v1405_v45  ;;  %v1406_v48 = vunpack.i.l.bf16 %v1405_v45 }
 0x318   : > { %1319 = vmatmul.mubr.msk.bf16.vlgmr.msra.gmra.mxu1 %vm383_vm4, %v500_v42 }
 0x319   : > { %1331 = vmatpush3.bf16.msra.mxu1 %v1435_v41  ;;  %1342 = vmatprep.mubr.msk.bf16.mxu1 %vm1476_vm2, %v1475_v1  ;;  %v749_v55 = vsel %vm308_vm0, %v727_v51, %v1407_v47  ;;  %v748_v56 = vsel %vm308_vm0, %v726_v50, %v1406_v48  ;;  %v1442_v47 = vld [vmem:[%s1809_s4] sm:$0xff]  }
 0x31a   : > { %1332 = vmatprep.subr.bf16.mxu1 %v1475_v1  ;;  %v1410_v49 = vpop.permute.xlu1 %1409 }
 0x31b   : > { %v1412_v53 = vunpack.i.h.bf16 %v1410_v49  ;;  %v1411_v54 = vunpack.i.l.bf16 %v1410_v49 }
 0x31d   : > { %1333 = vmatpush3.bf16.msra.mxu1 %v1436_v43  ;;  %v750_v58 = vsel %vm339_vm3, %v748_v56, %v1411_v54  ;;  %v751_v59 = vsel %vm339_vm3, %v749_v55, %v1412_v53 }
 0x31e   : > { %1334 = vmatprep.subr.bf16.mxu1 %v1475_v1  ;;  %v752_v60 = vpack.c.bf16 %v751_v59, %v750_v58 }
 0x321   : > { %1335 = vmatpush3.bf16.msra.mxu1 %v1437_v44 }
 0x322   : > { %1336 = vmatprep.subr.bf16.mxu1 %v1475_v1 }
 0x325   : > { %1337 = vmatpush3.bf16.msra.mxu1 %v1438_v46  ;;  %v1441_v46 = vld [vmem:[%s1809_s4 + $0x8] sm:$0xff]  }
 0x326   : > { %1338 = vmatprep.subr.bf16.mxu1 %v1475_v1  ;;  %1323 = vmatpush3.bf16.msra.mxu0 %v1441_v46 }
 0x327   : > { %1324 = vmatprep.subr.bf16.mxu0 %v1475_v1 }
 0x329   : > { %1339 = vmatpush3.bf16.msra.mxu1 %v1439_v52 }
 0x32a   : > { %1340 = vmatprep.subr.bf16.mxu1 %v1475_v1  ;;  %1325 = vmatpush3.bf16.msra.mxu0 %v1442_v47 }
 0x32b   : > { %1346 = vmatprep.subr.bf16.mxu0 %v1475_v1 }
 0x32d   : > { %1341 = vmatpush3.bf16.msra.mxu1 %v1440_v57 }
 0x32e   : > { %1362 = vmatprep.subr.bf16.mxu1 %v1475_v1 }
 0x330   : > { %1343 = vmatmul.mubr.msk.bf16.vlgmr.msra.gmra.mxu1 %vm383_vm4, %v752_v60  ;;  %v868_v60 = vrot.slane %v1691_v5, %v459_v63 }
 0x331   : > { %1366 = vmatprep.mubr.msk.bf16.mxu1 %vm1476_vm2, %v1475_v1 }
 0x3d8   : > { %v578_v61 = vpop.f32.mrf.mxu1 }
 0x3d9   : > { %v579_v9 = vadd.f32 %v578_v61, %v504_v6 }
 0x3da   : > { %v1320_v62 = vpop.f32.mrf.mxu1 }
 0x3db   : > { %v585_v14 = vmax.f32 %v579_v9, 0.0  ;;  %v874_v62 = vrot.slane %v1691_v5, %v465_v0  ;;  %v615_v9 = vsub.s32 4, %v1590_v29 }
 0x3dc   : > { %v581_v2 = vpop.f32.mrf.mxu1 }
 0x3dd   : > { %v582_v15 = vadd.f32 %v581_v2, %v504_v6  ;;  %v587_v21 = vsel %vm308_vm0, %v585_v14, 0.0  ;;  %v616_v63 = vrot.slane %v1596_v31, %v615_v9 }
 0x3de   : > { %v1321_v3 = vpop.f32.mrf.mxu1 }
 0x3df   : > { %v586_v20 = vmax.f32 %v582_v15, 0.0 }
 0x3e1   : > { %v590_v30 = vsel %vm308_vm0, %v586_v20, 0.0 }
 0x3f0   : > { %v830_v8 = vpop.f32.mrf.mxu1 }
 0x3f1   : > { %v831_v10 = vadd.f32 %v830_v8, %v756_v7 }
 0x3f2   : > { %v1344_v11 = vpop.f32.mrf.mxu1 }
 0x3f3   : > { %v837_v12 = vmax.f32 %v831_v10, 0.0 }
 0x3f4   : > { %v833_v13 = vpop.f32.mrf.mxu1 }
 0x3f5   : > { %v834_v16 = vadd.f32 %v833_v13, %v756_v7  ;;  %v839_v17 = vsel %vm308_vm0, %v837_v12, 0.0 }
 0x3f6   : > { %840 = vadd.xlane.f32.xlu0 %v839_v17  ;;  %v1345_v18 = vpop.f32.mrf.mxu1 }
 0x3f7   : > { %v838_v19 = vmax.f32 %v834_v16, 0.0 }
 0x3f9   : > { %v842_v22 = vsel %vm308_vm0, %v838_v19, 0.0 }
 0x3fa   : > { %588 = vadd.xlane.f32.xlu0 %v587_v21  ;;  %843 = vadd.xlane.f32.xlu1 %v842_v22 }
 0x3fe   : > { %591 = vadd.xlane.f32.xlu0 %v590_v30 }
 0x47f   : > { %v841_v23 = vpop.xlane.xlu0 %840 }
 0x480   : > { %v845_v24 = vmul.f32 0.03125, %v841_v23 }
 0x482   : > { %v847_v25 = vsub.f32 %v837_v12, %v845_v24 }
 0x483   : > { %v589_v26 = vpop.xlane.xlu0 %588  ;;  %v844_v27 = vpop.xlane.xlu1 %843 }
 0x484   : > { %v593_v28 = vmul.f32 0.03125, %v589_v26  ;;  %v846_v32 = vmul.f32 0.03125, %v844_v27  ;;  %v849_v33 = vmul.f32 %v847_v25, %v847_v25  ;;  %v1443_v27 = vld [vmem:[%s1808_s3 + $0x58] sm:$0xff]  }
 0x486   : > { %v595_v34 = vsub.f32 %v585_v14, %v593_v28  ;;  %v848_v35 = vsub.f32 %v838_v19, %v846_v32  ;;  %v851_v36 = vsel %vm308_vm0, %v849_v33, 0.0  ;;  %v621_v14 = vsub.s32 5, %v1590_v29  ;;  %v1444_v28 = vld [vmem:[%s1808_s3 + $0x50] sm:$0xff]   ;;  %v1445_v32 = vld [vmem:[%s1808_s3 + $0x48] sm:$0xff]   ;;  %v1446_v33 = vld [vmem:[%s1808_s3 + $0x40] sm:$0xff]  }
 0x487   : > { %852 = vadd.xlane.f32.xlu0 %v851_v36  ;;  %v592_v37 = vpop.xlane.xlu0 %591 }
 0x488   : > { %v594_v38 = vmul.f32 0.03125, %v592_v37  ;;  %v850_v39 = vmul.f32 %v848_v35, %v848_v35  ;;  %v597_v42 = vmul.f32 %v595_v34, %v595_v34  ;;  %v622_v17 = vrot.slane %v1596_v31, %v621_v14 }
 0x48a   : > { %v596_v40 = vsub.f32 %v586_v20, %v594_v38  ;;  %v854_v41 = vsel %vm308_vm0, %v850_v39, 0.0  ;;  %v599_v43 = vsel %vm308_vm0, %v597_v42, 0.0 }
 0x48b   : > { %855 = vadd.xlane.f32.xlu0 %v854_v41 }
 0x48c   : > { %v598_v44 = vmul.f32 %v596_v40, %v596_v40 }
 0x48e   : > { %v602_v45 = vsel %vm308_vm0, %v598_v44, 0.0 }
 0x48f   : > { %600 = vadd.xlane.f32.xlu0 %v599_v43 }
 0x493   : > { %603 = vadd.xlane.f32.xlu0 %v602_v45 }
 0x510   : > { %v853_v48 = vpop.xlane.xlu0 %852 }
 0x511   : > { %v857_v49 = vmul.f32 0.03125, %v853_v48 }
 0x513   : > { %v859_v50 = vadd.f32 1e-05, %v857_v49 }
 0x514   : > { %v856_v51 = vpop.xlane.xlu0 %855 }
 0x515   : > { %1455 = vrsqrt.f32 %v859_v50  ;;  %v858_v52 = vmul.f32 0.03125, %v856_v51 }
 0x517   : > { %v860_v53 = vadd.f32 1e-05, %v858_v52 }
 0x518   : > { %v601_v54 = vpop.xlane.xlu0 %600 }
 0x519   : > { %1457 = vrsqrt.f32 %v860_v53  ;;  %v605_v55 = vmul.f32 0.03125, %v601_v54  ;;  %v912_v53 = vrot.slane %v1691_v5, %v503_v4 }
 0x51b   : > { %v607_v56 = vadd.f32 1e-05, %v605_v55 }
 0x51c   : > { %v604_v57 = vpop.xlane.xlu0 %603 }
 0x51d   : > { %1459 = vrsqrt.f32 %v607_v56  ;;  %v606_v58 = vmul.f32 0.03125, %v604_v57 }
 0x51f   : > { %v608_v59 = vadd.f32 1e-05, %v606_v58 }
 0x521   : > { %1461 = vrsqrt.f32 %v608_v59 }
 0x522   : > { %v1456_v61 = vpop.eup %1455 }
 0x523   : > { %v863_v2 = vmul.f32 %v1456_v61, %v847_v25 }
 0x525   : > { %v869_v3 = vmul.f32 %v868_v60, %v863_v2 }
 0x526   : > { %v1458_v6 = vpop.eup %1457 }
 0x527   : > { %v875_v7 = vadd.f32 %v874_v62, %v869_v3  ;;  %v864_v8 = vmul.f32 %v1458_v6, %v848_v35  ;;  %v1448_v35 = vld [vmem:[%s1808_s3 + $0x30] sm:$0xff]  }
 0x529   : > { %880 = vst.msk [vmem:[#allocation3 + $0x1] sm:$0xff] %vm308_vm0, %v875_v7  ;;  %v870_v10 = vmul.f32 %v868_v60, %v864_v8 }
 0x52a   : > { %v1460_v11 = vpop.eup %1459 }
 0x52b   : > { %v876_v12 = vadd.f32 %v874_v62, %v870_v10  ;;  %v611_v13 = vmul.f32 %v1460_v11, %v595_v34  ;;  %v1447_v34 = vld [vmem:[%s1808_s3 + $0x38] sm:$0xff]  }
 0x52d   : > { %881 = vst.msk [vmem:[#allocation3 + $0x9] sm:$0xff] %vm308_vm0, %v876_v12  ;;  %v617_v16 = vmul.f32 %v616_v63, %v611_v13 }
 0x52e   : > { %v1462_v0 = vpop.eup %1461 }
 0x52f   : > { %v612_v15 = vmul.f32 %v1462_v0, %v596_v40  ;;  %v623_v20 = vadd.f32 %v622_v17, %v617_v16  ;;  %v1449_v0 = vld [vmem:[%s1809_s4 + $0x18] sm:$0xff]  }
 0x530   : > { %v884_v19 = vld [vmem:[#allocation3 + $0x1] sm:$0xff]  ;;  %1363 = vmatpush3.bf16.msra.mxu1 %v1449_v0 }
 0x531   : > { %v618_v18 = vmul.f32 %v616_v63, %v612_v15  ;;  %v882_v42 = vld [vmem:[#allocation3] sm:$0xff]  ;;  %v1450_v15 = vld [vmem:[%s1809_s4 + $0x10] sm:$0xff]   ;;  %1364 = vmatprep.subr.bf16.mxu1 %v1475_v1 }
 0x533   : > { %v624_v21 = vadd.f32 %v622_v17, %v618_v18 }
 0x534   : > { %v886_v22 = vld [vmem:[#allocation3 + $0x2] sm:$0xff]  ;;  %v887_v30 = vld [vmem:[#allocation3 + $0xa] sm:$0xff]  ;;  %1365 = vmatpush3.bf16.msra.mxu1 %v1450_v15 }
 0x535   : > { %v885_v23 = vld [vmem:[#allocation3 + $0x9] sm:$0xff]  ;;  %v1418_v24 = vpack.i.bf16 %v887_v30, %v886_v22  ;;  %v625_v26 = vpack.c.bf16 %v624_v21, %v623_v20 }
 0x536   : > { %v1413_v25 = vpack.i.bf16 %v885_v23, %v884_v19  ;;  %v883_v43 = vld [vmem:[#allocation3 + $0x8] sm:$0xff]  ;;  %v1024_v23 = vrot.slane %v1691_v5, %v615_v9 }
 0x537   : > { %1419 = vrot.lane.b32.xlu1 %v1418_v24, %s1478_s16  ;;  %1327 = vmatmul.mubr.msk.bf16.vlgmr.msra.gmra.mxu0 %vm308_vm0, %v625_v26 }
 0x538   : > { %1414 = vrot.lane.b32.xlu0 %v1413_v25, %s1477_s13  ;;  %1347 = vmatpush3.bf16.msra.mxu0 %v1443_v27 }
 0x539   : > { %1358 = vmatprep.mubr.msk.bf16.mxu0 %vm1476_vm2, %v1475_v1  ;;  %1348 = vmatprep.subr.bf16.mxu0 %v1475_v1 }
 0x53c   : > { %1349 = vmatpush3.bf16.msra.mxu0 %v1444_v28 }
 0x53d   : > { %1350 = vmatprep.subr.bf16.mxu0 %v1475_v1 }
 0x540   : > { %1351 = vmatpush3.bf16.msra.mxu0 %v1445_v32 }
 0x541   : > { %1352 = vmatprep.subr.bf16.mxu0 %v1475_v1 }
 0x544   : > { %1353 = vmatpush3.bf16.msra.mxu0 %v1446_v33 }
 0x545   : > { %1354 = vmatprep.subr.bf16.mxu0 %v1475_v1 }
 0x548   : > { %1355 = vmatpush3.bf16.msra.mxu0 %v1447_v34  ;;  %v628_v34 = vsub.s32 6, %v1590_v29 }
 0x549   : > { %1356 = vmatprep.subr.bf16.mxu0 %v1475_v1  ;;  %v1030_v1 = vrot.slane %v1691_v5, %v621_v14 }
 0x54a   : > { %v1037_v9 = vrot.slane %v1691_v5, %v628_v34  ;;  %v629_v29 = vrot.slane %v1596_v31, %v628_v34 }
 0x54c   : > { %1357 = vmatpush3.bf16.msra.mxu0 %v1448_v35  ;;  %v275_v35 = vld [vmem:[%s266_s26] sm:$0xff] }
 0x5a9   : > { %v1420_v36 = vpop.permute.xlu1 %1419 }
 0x5aa   : > { %v1415_v37 = vpop.permute.xlu0 %1414  ;;  %v1422_v38 = vunpack.i.h.bf16 %v1420_v36  ;;  %v1421_v39 = vunpack.i.l.bf16 %v1420_v36 }
 0x5ab   : > { %v1417_v40 = vunpack.i.h.bf16 %v1415_v37  ;;  %v1416_v41 = vunpack.i.l.bf16 %v1415_v37  ;;  %v277_v37 = vsub.f32 1.0, %v275_v35 }
 0x5ad   : > { %v905_v44 = vsel %vm308_vm0, %v883_v43, %v1417_v40  ;;  %v904_v45 = vsel %vm308_vm0, %v882_v42, %v1416_v41 }
 0x5ae   : > { %v907_v46 = vsel %vm339_vm3, %v905_v44, %v1422_v38  ;;  %v906_v47 = vsel %vm339_vm3, %v904_v45, %v1421_v39  ;;  %v276_v39 = vld [vmem:[%s266_s26 + $0x8] sm:$0xff] }
 0x5af   : > { %v908_v48 = vpack.c.bf16 %v907_v46, %v906_v47  ;;  %v278_v42 = vsub.f32 1.0, %v276_v39 }
 0x5b1   : > { %1359 = vmatmul.mubr.msk.bf16.vlgmr.msra.gmra.mxu0 %vm383_vm4, %v908_v48 }
 0x5f7   : > { %v1764_v49 = vpop.f32.mrf.mxu0 }
 0x5f8   : > { %v680_v5 = vadd.f32 %v1764_v49, %v629_v29 }
 0x5f9   : > { %v1328_v50 = vpop.f32.mrf.mxu0 }
 0x5fa   : > { %v686_v46 = vmul.f32 %v680_v5, %v277_v37 }
 0x5fb   : > { %v1766_v51 = vpop.f32.mrf.mxu0 }
 0x5fc   : > { %v683_v47 = vadd.f32 %v1766_v51, %v629_v29 }
 0x5fd   : > { %v1329_v52 = vpop.f32.mrf.mxu0 }
 0x5fe   : > { %v687_v52 = vmul.f32 %v683_v47, %v278_v42 }
 0x671   : > { %v986_v54 = vpop.f32.mrf.mxu0 }
 0x672   : > { %v987_v55 = vadd.f32 %v986_v54, %v912_v53 }
 0x673   : > { %v1360_v56 = vpop.f32.mrf.mxu0 }
 0x674   : > { %v993_v57 = vmax.f32 %v987_v55, 0.0 }
 0x675   : > { %v989_v58 = vpop.f32.mrf.mxu0 }
 0x676   : > { %v990_v59 = vadd.f32 %v989_v58, %v912_v53  ;;  %v995_v60 = vsel %vm308_vm0, %v993_v57, 0.0 }
 0x677   : > { %996 = vadd.xlane.f32.xlu0 %v995_v60  ;;  %v1361_v61 = vpop.f32.mrf.mxu0 }
 0x678   : > { %v994_v62 = vmax.f32 %v990_v59, 0.0 }
 0x67a   : > { %v998_v2 = vsel %vm308_vm0, %v994_v62, 0.0 }
 0x67b   : > { %999 = vadd.xlane.f32.xlu1 %v998_v2 }
 0x700   : > { %v997_v3 = vpop.xlane.xlu0 %996 }
 0x701   : > { %v1001_v6 = vmul.f32 0.03125, %v997_v3 }
 0x703   : > { %v1003_v7 = vsub.f32 %v993_v57, %v1001_v6 }
 0x704   : > { %v1000_v8 = vpop.xlane.xlu1 %999 }
 0x705   : > { %v1002_v10 = vmul.f32 0.03125, %v1000_v8  ;;  %v1005_v4 = vmul.f32 %v1003_v7, %v1003_v7 }
 0x707   : > { %v1004_v11 = vsub.f32 %v994_v62, %v1002_v10  ;;  %v1007_v12 = vsel %vm308_vm0, %v1005_v4, 0.0 }
 0x708   : > { %1008 = vadd.xlane.f32.xlu0 %v1007_v12 }
 0x709   : > { %v1006_v13 = vmul.f32 %v1004_v11, %v1004_v11 }
 0x70b   : > { %v1010_v63 = vsel %vm308_vm0, %v1006_v13, 0.0 }
 0x70c   : > { %1011 = vadd.xlane.f32.xlu0 %v1010_v63 }
 0x791   : > { %v1009_v16 = vpop.xlane.xlu0 %1008 }
 0x792   : > { %v1013_v17 = vmul.f32 0.03125, %v1009_v16 }
 0x794   : > { %v1015_v18 = vadd.f32 1e-05, %v1013_v17 }
 0x795   : > { %v1012_v19 = vpop.xlane.xlu0 %1011 }
 0x796   : > { %1463 = vrsqrt.f32 %v1015_v18  ;;  %v1014_v20 = vmul.f32 0.03125, %v1012_v19 }
 0x798   : > { %v1016_v21 = vadd.f32 1e-05, %v1014_v20 }
 0x79a   : > { %1465 = vrsqrt.f32 %v1016_v21 }
 0x7a3   : > { %v1464_v22 = vpop.eup %1463 }
 0x7a4   : > { %v1019_v30 = vmul.f32 %v1464_v22, %v1003_v7 }
 0x7a6   : > { %v1025_v26 = vmul.f32 %v1024_v23, %v1019_v30 }
 0x7a7   : > { %v1466_v24 = vpop.eup %1465 }
 0x7a8   : > { %v1020_v25 = vmul.f32 %v1466_v24, %v1004_v11  ;;  %v1031_v28 = vadd.f32 %v1030_v1, %v1025_v26 }
 0x7aa   : > { %v1026_v27 = vmul.f32 %v1024_v23, %v1020_v25 }
 0x7ac   : > { %v1032_v32 = vadd.f32 %v1030_v1, %v1026_v27 }
 0x7ae   : > { %v1033_v33 = vpack.c.bf16 %v1032_v32, %v1031_v28 }
 0x7b0   : > { %1367 = vmatmul.mubr.msk.bf16.vlgmr.msra.gmra.mxu1 %vm308_vm0, %v1033_v33 }
 0x870   : > { %v1087_v36 = vpop.f32.mrf.mxu1 }
 0x871   : > { %v1088_v38 = vadd.f32 %v1087_v36, %v1037_v9 }
 0x872   : > { %v1368_v14 = vpop.f32.mrf.mxu1 }
 0x873   : > { %v1094_v40 = vmul.f32 %v1088_v38, %v277_v37 }
 0x874   : > { %v1090_v41 = vpop.f32.mrf.mxu1 }
 0x875   : > { %v1091_v43 = vadd.f32 %v1090_v41, %v1037_v9  ;;  %1098 = vrot.lane.b32.xlu0 %v1094_v40, %s1479_s28 }
 0x876   : > { %v1369_v44 = vpop.f32.mrf.mxu1 }
 0x877   : > { %v1095_v45 = vmul.f32 %v1091_v43, %v278_v42 }
 0x879   : > { %1100 = vrot.lane.b32.xlu1 %v1095_v45, %s1479_s28 }
 0x8e7   : > { %v1099_v48 = vpop.permute.xlu0 %1098 }
 0x8e8   : > { %v1105_v50 = vsel %vm1104_vm5, %v686_v46, %v1099_v48 }
 0x8e9   : > { %1108 = vst.msk [vmem:[%s271_s7] sm:$0xff] %vm1107_vm6, %v1105_v50 }
 0x8eb   : > { %v1101_v53 = vpop.permute.xlu1 %1100 }
 0x8ec   : > { %v1106_v54 = vsel %vm1104_vm5, %v687_v52, %v1101_v53 }
 0x8ed   : > { %1109 = vst.msk [vmem:[%s271_s7 + $0x8] sm:$0xff] %vm1107_vm6, %v1106_v54 }
 0x8ee PF: > { %s16_s21 = sadd.s32 1, %s1473_s21  }
 0x8ef   : > { %p13_p4 = scmp.ge.s32.totalorder %s16_s21, 4  }
 0x8f1   :  { %15 = sbr.rel (!%p13_p4) target bundleno = 1 (0x1), region = 81 }

// kernel: fastspeech2_forward.5
= control target key start
LH: loop header
LB: loop body
LE: loop exit
PB: predicated region body
PF: predicated region fallthrough
CT: control target
= control target key end

     0   :  { %s4201_s18 = smov 0   ;;  %s5005_s0 = inlined_call_operand.vmem [shape: f32[2,16,32], index: 0, kind: input, shape index: {}]   ;;  %s5006_s1 = inlined_call_operand.vmem [shape: f32[2,1,16], index: 1, kind: input, shape index: {}]   ;;  %s5007_s2 = inlined_call_operand.vmem [shape: f32[2,16,1], index: 2, kind: input, shape index: {}]   ;;  %s5008_s3 = inlined_call_operand.vmem [shape: bf16[2,32,96], index: 3, kind: input, shape index: {}]   ;;  %s5009_s4 = inlined_call_operand.vmem [shape: bf16[2,32,32], index: 4, kind: input, shape index: {}]   ;;  %s5010_s5 = inlined_call_operand.vmem [shape: bf16[2,288,64], index: 5, kind: input, shape index: {}]   ;;  %s5011_s6 = inlined_call_operand.vmem [shape: bf16[2,64,32], index: 6, kind: input, shape index: {}]   ;;  %s5012_s7 = inlined_call_operand.vmem [shape: f32[2,8,128], index: 7, kind: input, shape index: {}]   ;;  %s5013_s8 = inlined_call_operand.vmem [shape: bf16[32,8], index: 8, kind: input, shape index: {}]   ;;  %s5014_s9 = inlined_call_operand.vmem [shape: f32[8,128], index: 9, kind: input, shape index: {}]   ;;  %s5015_s10 = inlined_call_operand.vmem [shape: bf16[40,32], index: 10, kind: input, shape index: {}]   ;;  %s5016_s11 = inlined_call_operand.vmem [shape: bf16[160,32], index: 11, kind: input, shape index: {}]   ;;  %s5017_s12 = inlined_call_operand.vmem [shape: bf16[160,32], index: 12, kind: input, shape index: {}]   ;;  %s5018_s13 = inlined_call_operand.vmem [shape: bf16[160,32], index: 13, kind: input, shape index: {}]   ;;  %s5019_s14 = inlined_call_operand.vmem [shape: bf16[160,8], index: 14, kind: input, shape index: {}]   ;;  %s5020_s15 = inlined_call_operand.vmem [shape: f32[2,16,16], index: 15, kind: output, shape index: {}]  }
   0x1 LB: > { %s3318_s19 = sadd.s32 4294967295, %s4107_s18   ;;  %p3322_p0 = scmp.ge.s32.totalorder %s4107_s18, 1  ;;  %s4107_s18 = sphi %s4201_s18, %s25_s18  }
   0x2   : > { %p455_p1 = scmp.lt.s32.totalorder %s4107_s18, 3 }
   0x4   : > { %p456_p2 = pnand %p3322_p0, %p455_p1 }
   0x5   : > { %p511_p3 = scmp.lt.s32.totalorder (!%p456_p2), %s3318_s19, 1  ;;  %s4111_s30 = smov (!%p456_p2), 112  }
   0x6   : > { %459 = sbr.rel (%p456_p2) target bundleno = 7161 (0x1bf9), region = 80  ;;  %s5024_s16 = smov (!%p456_p2), 96  }
   0x7   : > { %s4113_s17 = smov (!%p456_p2), 80   ;;  %s4115_s23 = smov (!%p456_p2), 64  }
   0x8   : > { %s5021_s29 = smov (!%p456_p2), 16   ;;  %s5027_s20 = smov (!%p456_p2), 16  }
   0xb   : > { %v3940_v0 = vld [vmem:[%s5008_s3 + $0x8] sm:$0xff]   ;;  %v4109_v1 = vmov 0.0   ;;  %v3941_v2 = vld [vmem:[%s5008_s3] sm:$0xff]   ;;  %vm4110_vm0 = vmmov 0   ;;  %vm560_vm1 = vcmask 261120   ;;  %s5030_s19 = smov (!%p511_p3, %s3318_s19), 1  ;;  %v607_v19 = vlaneseq }
   0xc   : > { %3630 = vmatprep.subr.bf16.mxu0 %v4109_v1  ;;  %3638 = vmatprep.subr.bf16.mxu1 %v4109_v1  ;;  %1022 = vst.msk [vmem:[#allocation2] sm:$0xff] %vm560_vm1, %v4109_v1  ;;  %1023 = vst.msk [vmem:[#allocation2 + $0x8] sm:$0xff] %vm560_vm1, %v4109_v1  ;;  %s4235_s24 = sshll.u32 %s5030_s19, 4  ;;  %v3329_v7 = vld [vmem:[%s5012_s7] ss:$0 sm:$0xff]  ;;  %vm615_vm2 = vcmask 130048   ;;  %s518_s22 = scalar_lea.vmem %s5006_s1, %s5030_s19 }
   0xd   : > { %3631 = vmatpush3.bf16.msra.mxu0 %v3940_v0  ;;  %3634 = vmatprep.mubr.msk.bf16.mxu0 %vm4110_vm0, %v4109_v1  ;;  %1024 = vst.msk [vmem:[#allocation2 + $0x10] sm:$0xff] %vm560_vm1, %v4109_v1  ;;  %2536 = vst.msk [vmem:[#allocation4] sm:$0xff] %vm560_vm1, %v4109_v1  ;;  %s515_s27 = scalar_lea.vmem %s5005_s0, %s4235_s24  ;;  %v608_v20 = vshrl.u32 %v607_v19, 7  ;;  %v532_v21 = vld [vmem:[%s518_s22] sm:$0x1]  ;;  %s5023_s19 = smov 48  }
   0xe   : > { %3632 = vmatprep.subr.bf16.mxu0 %v4109_v1  ;;  %2537 = vst.msk [vmem:[#allocation4 + $0x8] sm:$0xff] %vm560_vm1, %v4109_v1  ;;  %3640 = vmatprep.mubr.msk.bf16.mxu1 %vm4110_vm0, %v4109_v1  ;;  %v4242_v3 = vld [vmem:[%s515_s27] sm:$0xff]  ;;  %v4244_v4 = vld [vmem:[%s515_s27 + $0x8] sm:$0xff]  ;;  %v533_v22 = vmul.f32 -1e+09, %v532_v21  ;;  %s523_s26 = scalar_lea.vmem %s5007_s2, %s4235_s24  ;;  %s4118_s27 = smov 32  }
   0xf   : > { %v542_v5 = vpack.c.bf16 %v4244_v4, %v4242_v3  ;;  %v609_v23 = vsub.s32 0, %v608_v20  ;;  %v3943_v19 = vld [vmem:[%s5009_s4] sm:$0xff]   ;;  %vm1094_vm3 = vcmask 523264   ;;  %vm1097_vm4 = vcmask 785408  }
  0x10   : > { %vm2386_vm5 = vcmask 64512   ;;  %vm2389_vm6 = vcmask 60416   ;;  %vm2468_vm7 = vcmask 1043456   ;;  %vm2439_vm8 = vcmask 195584  }
  0x11   : > { %3633 = vmatpush3.bf16.msra.mxu0 %v3941_v2  ;;  %v4277_v24 = vrot.slane %v533_v22, %v609_v23  ;;  %2387 = vst.msk [vmem:[#allocation3] sm:$0xff] %vm2386_vm5, %v4109_v1  ;;  %2388 = vst.msk [vmem:[#allocation3 + $0x8] sm:$0xff] %vm2386_vm5, %v4109_v1  ;;  %vm2464_vm9 = vcmask 326656   ;;  %vm2538_vm10 = vcmask 257024  }
  0x12   : > { %3644 = vmatprep.subr.bf16.mxu0 %v4109_v1  ;;  %2390 = vst.msk [vmem:[#allocation3 + $0x10] sm:$0xf] %vm2389_vm6, %v4109_v1 }
  0x13   : > { %2539 = vst.msk [vmem:[#allocation4 + $0x10] sm:$0xf] %vm2538_vm10, %v4109_v1 }
  0x14   : > { %3635 = vmatmul.mubr.msk.bf16.vlgmr.msra.gmra.mxu0 %vm560_vm1, %v542_v5 }
  0x15   : > { %3646 = vmatprep.mubr.msk.bf16.mxu0 %vm4110_vm0, %v4109_v1 }
  0xd4   : > { %v598_v6 = vpop.f32.mrf.mxu0 }
  0xd5   : > { %v599_v10 = vadd.f32 %v3329_v7, %v598_v6 }
  0xd6   : > { %v3636_v8 = vpop.f32.mrf.mxu0 }
  0xd8   : > { %v601_v9 = vpop.f32.mrf.mxu0 }
  0xd9   : > { %v602_v11 = vadd.f32 %v3329_v7, %v601_v9 }
  0xda   : > { %v3637_v12 = vpop.f32.mrf.mxu0 }
  0xdb   : > { %v4254_v13 = vpack.c.bf16 %v602_v11, %v599_v10 }
  0xdd   : > { %733 = vrot.lane.b32.xlu1 %v4254_v13, %s4111_s30  ;;  %613 = vrot.lane.b32.xlu0 %v4254_v13, %s5024_s16 }
  0xe1   : > { %735 = vrot.lane.b32.xlu0 %v4254_v13, %s4113_s17 }
 0x14f   : > { %v614_v14 = vpop.permute.xlu0 %613  ;;  %v734_v18 = vpop.permute.xlu1 %733 }
 0x150   : > { %v620_v15 = vsel %vm615_vm2, %v614_v14, 0 }
 0x151   : > { %3639 = vmatpush3.bf16.xpose.msra.mxu1 %v620_v15 }
 0x152   : > { %3650 = vmatprep.subr.bf16.mxu1 %v4109_v1 }
 0x153   : > { %v736_v16 = vpop.permute.xlu0 %735 }
 0x154   : > { %v741_v17 = vsel %vm615_vm2, %v736_v16, 0  ;;  %v3942_v16 = vld [vmem:[%s5009_s4 + $0x8] sm:$0xff]  }
 0x158   : > { %3641 = vmatmul.mubr.msk.bf16.vlgmr.msra.gmra.mxu1 %vm615_vm2, %v4254_v13 }
 0x159   : > { %3651 = vmatpush3.bf16.xpose.msra.mxu1 %v741_v17  ;;  %3652 = vmatprep.mubr.msk.bf16.mxu1 %vm4110_vm0, %v4109_v1 }
 0x15a   : > { %3662 = vmatprep.subr.bf16.mxu1 %v4109_v1 }
 0x160   : > { %3653 = vmatmul.mubr.msk.bf16.vlgmr.msra.gmra.mxu1 %vm615_vm2, %v734_v18 }
 0x161   : > { %3666 = vmatprep.mubr.msk.bf16.mxu1 %vm4110_vm0, %v4109_v1  ;;  %3663 = vmatpush3.bf16.msra.mxu1 %v3942_v16 }
 0x162   : > { %3664 = vmatprep.subr.bf16.mxu1 %v4109_v1 }
 0x165   : > { %3665 = vmatpush3.bf16.msra.mxu1 %v3943_v19 }
 0x166   : > { %3670 = vmatprep.subr.bf16.mxu1 %v4109_v1 }
 0x218   : > { %v656_v25 = vpop.f32.mrf.mxu1 }
 0x219   : > { %v657_v26 = vadd.f32 %v656_v25, %v4277_v24 }
 0x21a   : > { %v3642_v27 = vpop.f32.mrf.mxu1 }
 0x21b   : > { %v663_v28 = vsel %vm615_vm2, %v657_v26, -inf }
 0x21c   : > { %664 = vmax.xlane.f32.xlu1 %v663_v28  ;;  %v659_v29 = vpop.f32.mrf.mxu1 }
 0x21d   : > { %v660_v30 = vadd.f32 %v659_v29, %v4277_v24 }
 0x21e   : > { %v3643_v31 = vpop.f32.mrf.mxu1 }
 0x21f   : > { %v666_v32 = vsel %vm615_vm2, %v660_v30, -inf }
 0x220   : > { %667 = vmax.xlane.f32.xlu0 %v666_v32  ;;  %v777_v33 = vpop.f32.mrf.mxu1 }
 0x221   : > { %v778_v34 = vadd.f32 %v777_v33, %v4277_v24 }
 0x222   : > { %v3654_v35 = vpop.f32.mrf.mxu1 }
 0x223   : > { %v784_v36 = vsel %vm615_vm2, %v778_v34, -inf }
 0x224   : > { %785 = vmax.xlane.f32.xlu0 %v784_v36  ;;  %v780_v37 = vpop.f32.mrf.mxu1 }
 0x225   : > { %v781_v38 = vadd.f32 %v780_v37, %v4277_v24 }
 0x226   : > { %v3655_v39 = vpop.f32.mrf.mxu1 }
 0x227   : > { %v787_v40 = vsel %vm615_vm2, %v781_v38, -inf }
 0x228   : > { %788 = vmax.xlane.f32.xlu1 %v787_v40 }
 0x2a5   : > { %v665_v41 = vpop.xlane.xlu1 %664 }
 0x2a6   : > { %v669_v42 = vsub.f32 %v657_v26, %v665_v41 }
 0x2a8   : > { %v671_v43 = vmul.f32 1.442695, %v669_v42 }
 0x2a9   : > { %v668_v44 = vpop.xlane.xlu0 %667 }
 0x2aa   : > { %4037 = vpow2.f32 %v671_v43  ;;  %v670_v45 = vsub.f32 %v660_v30, %v668_v44 }
 0x2ac   : > { %v673_v46 = vmul.f32 1.442695, %v670_v45  ;;  %v4117_v45 = vmov 0  }
 0x2ad   : > { %v786_v47 = vpop.xlane.xlu0 %785  ;;  %3793 = vset.pattern.permute.xlu1 %v4117_v45  ;;  %3794 = vset.pattern.permute.xlu0 %v4117_v45 }
 0x2ae   : > { %4039 = vpow2.f32 %v673_v46  ;;  %v790_v48 = vsub.f32 %v778_v34, %v786_v47  ;;  %v3337_v34 = vld [vmem:[%s5012_s7 + $0x1] ss:$0 sm:$0xff] }
 0x2af   : > { %v534_v46 = vld [vmem:[%s523_s26] sm:$0xff] }
 0x2b0   : > { %v792_v49 = vmul.f32 1.442695, %v790_v48 }
 0x2b1   : > { %v789_v50 = vpop.xlane.xlu1 %788 }
 0x2b2   : > { %4041 = vpow2.f32 %v792_v49  ;;  %v791_v51 = vsub.f32 %v781_v38, %v789_v50 }
 0x2b4   : > { %v794_v52 = vmul.f32 1.442695, %v791_v51 }
 0x2b6   : > { %4043 = vpow2.f32 %v794_v52 }
 0x2b7   : > { %v4038_v53 = vpop.eup %4037 }
 0x2b8   : > { %v675_v54 = vsel %vm615_vm2, %v4038_v53, 0.0 }
 0x2b9   : > { %676 = vadd.xlane.f32.xlu0 %v675_v54 }
 0x2bb   : > { %v4040_v55 = vpop.eup %4039 }
 0x2bc   : > { %v678_v56 = vsel %vm615_vm2, %v4040_v55, 0.0 }
 0x2bd   : > { %679 = vadd.xlane.f32.xlu1 %v678_v56  ;;  %v535_v56 = vld [vmem:[%s523_s26 + $0x8] sm:$0xff] }
 0x2bf   : > { %v4042_v57 = vpop.eup %4041 }
 0x2c0   : > { %v796_v58 = vsel %vm615_vm2, %v4042_v57, 0.0 }
 0x2c1   : > { %797 = vadd.xlane.f32.xlu0 %v796_v58  ;;  %v3944_v58 = vld [vmem:[%s5010_s5 + $0x88] sm:$0xff]  }
 0x2c3   : > { %v4044_v59 = vpop.eup %4043 }
 0x2c4   : > { %v799_v60 = vsel %vm615_vm2, %v4044_v59, 0.0 }
 0x2c5   : > { %800 = vadd.xlane.f32.xlu1 %v799_v60  ;;  %v3946_v60 = vld [vmem:[%s5010_s5 + $0x78] sm:$0xff]  }
 0x2d6   : > { %807 = vrot.lane.b32.xlu1 %v4254_v13, %s5023_s19 }
 0x2d7   : > { %686 = vrot.lane.b32.xlu0 %v4254_v13, %s4115_s23 }
 0x342   : > { %v677_v61 = vpop.xlane.xlu0 %676 }
 0x343   : > { %4045 = vrcp.f32 %v677_v61  ;;  %v3947_v61 = vld [vmem:[%s5010_s5 + $0x38] sm:$0xff]  }
 0x346   : > { %v680_v62 = vpop.xlane.xlu1 %679 }
 0x347   : > { %4047 = vrcp.f32 %v680_v62  ;;  %v3948_v62 = vld [vmem:[%s5010_s5 + $0x70] sm:$0xff]  }
 0x34a   : > { %v798_v63 = vpop.xlane.xlu0 %797 }
 0x34b   : > { %4049 = vrcp.f32 %v798_v63  ;;  %v3949_v63 = vld [vmem:[%s5010_s5 + $0x30] sm:$0xff]  }
 0x34e   : > { %v801_v0 = vpop.xlane.xlu1 %800  ;;  %v687_v2 = vpop.permute.xlu0 %686 }
 0x34f   : > { %4051 = vrcp.f32 %v801_v0  ;;  %3645 = vmatpush3.bf16.msra.mxu0 %v687_v2 }
 0x350   : > { %3656 = vmatprep.subr.bf16.mxu0 %v4109_v1  ;;  %v4046_v5 = vpop.eup %4045 }
 0x351   : > { %v683_v7 = vmul.f32 %v4046_v5, %v4038_v53 }
 0x352   : > { %v808_v10 = vpop.permute.xlu1 %807 }
 0x354   : > { %v4048_v6 = vpop.eup %4047 }
 0x355   : > { %v684_v8 = vmul.f32 %v4048_v6, %v4040_v55 }
 0x357   : > { %v685_v9 = vpack.c.bf16 %v684_v8, %v683_v7 }
 0x358   : > { %v4050_v11 = vpop.eup %4049 }
 0x359   : > { %3647 = vmatmul.mubr.msk.bf16.vlgmr.msra.gmra.mxu0 %vm615_vm2, %v685_v9  ;;  %v804_v13 = vmul.f32 %v4050_v11, %v4042_v57  ;;  %v537_v57 = vsub.f32 1.0, %v535_v56  ;;  %v3961_v56 = vld [vmem:[%s5010_s5] sm:$0xff]  }
 0x35a   : > { %3657 = vmatpush3.bf16.msra.mxu0 %v808_v10  ;;  %3658 = vmatprep.mubr.msk.bf16.mxu0 %vm4110_vm0, %v4109_v1  ;;  %v3341_v10 = vld [vmem:[%s5012_s7 + $0x2] ss:$0 sm:$0xff] }
 0x35b   : > { %3549 = vmatprep.subr.bf16.mxu0 %v3946_v60 }
 0x35c   : > { %v4052_v12 = vpop.eup %4051 }
 0x35d   : > { %v805_v14 = vmul.f32 %v4052_v12, %v4044_v59  ;;  %v3945_v59 = vld [vmem:[%s5010_s5 + $0x80] sm:$0xff]  }
 0x35e   : > { %v3342_v12 = vld [vmem:[%s5012_s7 + $0x3] ss:$0 sm:$0xff] }
 0x35f   : > { %v806_v15 = vpack.c.bf16 %v805_v14, %v804_v13 }
 0x361   : > { %3659 = vmatmul.mubr.msk.bf16.vlgmr.msra.gmra.mxu0 %vm615_vm2, %v806_v15 }
 0x362   : > { %3550 = vmatpush3.bf16.msra.mxu0 %v3947_v61 }
 0x363   : > { %3551 = vmatprep.subr.bf16.mxu0 %v3948_v62 }
 0x366   : > { %3552 = vmatpush3.bf16.msra.mxu0 %v3949_v63 }
 0x419   : > { %v726_v17 = vpop.f32.mrf.mxu0 }
 0x41b   : > { %v3648_v18 = vpop.f32.mrf.mxu0 }
 0x41d   : > { %v729_v20 = vpop.f32.mrf.mxu0 }
 0x41f   : > { %v3649_v21 = vpop.f32.mrf.mxu0 }
 0x421   : > { %v847_v22 = vpop.f32.mrf.mxu0 }
 0x423   : > { %v3660_v23 = vpop.f32.mrf.mxu0 }
 0x424   : > { %v3950_v23 = vld [vmem:[%s5010_s5 + $0x68] sm:$0xff]  }
 0x425   : > { %v850_v25 = vpop.f32.mrf.mxu0  ;;  %3553 = vmatprep.subr.bf16.mxu0 %v3950_v23 }
 0x426   : > { %v3788_v26 = vpack.i.bf16 %v850_v25, %v847_v22  ;;  %v3951_v25 = vld [vmem:[%s5010_s5 + $0x28] sm:$0xff]  }
 0x427   : > { %v3661_v27 = vpop.f32.mrf.mxu0  ;;  %3554 = vmatpush3.bf16.msra.mxu0 %v3951_v25 }
 0x428   : > { %3789 = vrot.lane.b32.xlu1 %v3788_v26, %s5021_s29  ;;  %v3952_v26 = vld [vmem:[%s5010_s5 + $0x60] sm:$0xff]   ;;  %s5028_s29 = smov 96  }
 0x429   : > { %v3953_v27 = vld [vmem:[%s5010_s5 + $0x20] sm:$0xff]   ;;  %3555 = vmatprep.subr.bf16.mxu0 %v3952_v26 }
 0x42b   : > { %3556 = vmatpush3.bf16.msra.mxu0 %v3953_v27 }
 0x49a   : > { %v3790_v28 = vpop.permute.xlu1 %3789 }
 0x49b   : > { %v3792_v29 = vunpack.i.h.bf16 %v3790_v28  ;;  %v3791_v30 = vunpack.i.l.bf16 %v3790_v28 }
 0x49d   : > { %v863_v31 = vsel %vm615_vm2, %v729_v20, %v3792_v29  ;;  %v862_v32 = vsel %vm615_vm2, %v726_v17, %v3791_v30 }
 0x49e   : > { %v868_v33 = vpack.c.bf16 %v863_v31, %v862_v32 }
 0x4a0   : > { %3667 = vmatmul.mubr.msk.bf16.vlgmr.msra.gmra.mxu1 %vm560_vm1, %v868_v33 }
 0x4a1   : > { %3674 = vmatprep.mubr.msk.bf16.mxu1 %vm4110_vm0, %v4109_v1  ;;  %3671 = vmatpush3.bf16.msra.mxu1 %v3944_v58 }
 0x4a2   : > { %3672 = vmatprep.subr.bf16.mxu1 %v4109_v1 }
 0x4a5   : > { %3673 = vmatpush3.bf16.msra.mxu1 %v3945_v59 }
 0x4a6   : > { %3678 = vmatprep.subr.bf16.mxu1 %v4109_v1 }
 0x560   : > { %v923_v35 = vpop.f32.mrf.mxu1 }
 0x561   : > { %v924_v36 = vadd.f32 %v3337_v34, %v923_v35 }
 0x562   : > { %v3668_v37 = vpop.f32.mrf.mxu1 }
 0x563   : > { %v930_v38 = vadd.f32 %v924_v36, %v4242_v3  ;;  %v536_v3 = vsub.f32 1.0, %v534_v46 }
 0x564   : > { %v926_v39 = vpop.f32.mrf.mxu1 }
 0x565   : > { %v927_v40 = vadd.f32 %v3337_v34, %v926_v39  ;;  %v934_v41 = vsel %vm560_vm1, %v930_v38, 0.0 }
 0x566   : > { %935 = vadd.xlane.f32.xlu0 %v934_v41  ;;  %v3669_v42 = vpop.f32.mrf.mxu1 }
 0x567   : > { %v931_v43 = vadd.f32 %v927_v40, %v4244_v4 }
 0x569   : > { %v937_v44 = vsel %vm560_vm1, %v931_v43, 0.0 }
 0x56a   : > { %938 = vadd.xlane.f32.xlu1 %v937_v44 }
 0x57b   : > { %975 = vperm.xlu1 %3793, %v536_v3  }
 0x5ef   : > { %v936_v47 = vpop.xlane.xlu0 %935 }
 0x5f0   : > { %v941_v48 = vmul.f32 0.03125, %v936_v47  ;;  %v3954_v47 = vld [vmem:[%s5010_s5 + $0x58] sm:$0xff]  }
 0x5f1   : > { %3557 = vmatprep.subr.bf16.mxu0 %v3954_v47 }
 0x5f2   : > { %v943_v49 = vsub.f32 %v930_v38, %v941_v48  ;;  %v3955_v48 = vld [vmem:[%s5010_s5 + $0x18] sm:$0xff]  }
 0x5f3   : > { %v939_v50 = vpop.xlane.xlu1 %938  ;;  %3558 = vmatpush3.bf16.msra.mxu0 %v3955_v48 }
 0x5f4   : > { %v942_v4 = vmul.f32 0.03125, %v939_v50  ;;  %v945_v51 = vmul.f32 %v943_v49, %v943_v49 }
 0x5f6   : > { %v944_v52 = vsub.f32 %v931_v43, %v942_v4  ;;  %v947_v53 = vsel %vm560_vm1, %v945_v51, 0.0  ;;  %v3957_v4 = vld [vmem:[%s5010_s5 + $0x10] sm:$0xff]   ;;  %v3958_v51 = vld [vmem:[%s5010_s5 + $0x48] sm:$0xff]  }
 0x5f7   : > { %948 = vadd.xlane.f32.xlu0 %v947_v53  ;;  %v4355_v15 = vpop.permute.xlu1 %975  ;;  %v3959_v53 = vld [vmem:[%s5010_s5 + $0x8] sm:$0xff]  }
 0x5f8   : > { %v946_v54 = vmul.f32 %v944_v52, %v944_v52 }
 0x5fa   : > { %v950_v55 = vsel %vm560_vm1, %v946_v54, 0.0  ;;  %v3960_v54 = vld [vmem:[%s5010_s5 + $0x40] sm:$0xff]  }
 0x5fb   : > { %951 = vadd.xlane.f32.xlu0 %v950_v55 }
 0x611   : > { %980 = vperm.xlu0 %3794, %v537_v57  }
 0x680   : > { %v949_v0 = vpop.xlane.xlu0 %948 }
 0x681   : > { %v953_v2 = vmul.f32 0.03125, %v949_v0 }
 0x683   : > { %v955_v5 = vadd.f32 1e-05, %v953_v2 }
 0x684   : > { %v952_v6 = vpop.xlane.xlu0 %951 }
 0x685   : > { %4053 = vrsqrt.f32 %v955_v5  ;;  %v954_v7 = vmul.f32 0.03125, %v952_v6 }
 0x687   : > { %v956_v8 = vadd.f32 1e-05, %v954_v7 }
 0x689   : > { %4055 = vrsqrt.f32 %v956_v8 }
 0x68c   : > { %v4360_v20 = vpop.permute.xlu0 %980 }
 0x692   : > { %v4054_v9 = vpop.eup %4053 }
 0x693   : > { %v959_v11 = vmul.f32 %v4054_v9, %v943_v49  ;;  %v3956_v49 = vld [vmem:[%s5010_s5 + $0x50] sm:$0xff]  }
 0x694   : > { %3559 = vmatprep.subr.bf16.mxu0 %v3956_v49 }
 0x695   : > { %v965_v13 = vmul.f32 %v3341_v10, %v959_v11  ;;  %3560 = vmatpush3.bf16.msra.mxu0 %v3957_v4 }
 0x696   : > { %v4056_v14 = vpop.eup %4055  ;;  %3561 = vmatprep.subr.bf16.mxu0 %v3958_v51 }
 0x697   : > { %v971_v16 = vadd.f32 %v3342_v12, %v965_v13  ;;  %v960_v17 = vmul.f32 %v4056_v14, %v944_v52 }
 0x699   : > { %v4358_v18 = vmul.f32 %v4355_v15, %v971_v16  ;;  %v966_v19 = vmul.f32 %v3341_v10, %v960_v17  ;;  %3562 = vmatpush3.bf16.msra.mxu0 %v3959_v53 }
 0x69a   : > { %3563 = vmatprep.subr.bf16.mxu0 %v3960_v54 }
 0x69b   : > { %1025 = vst.msk [vmem:[#allocation2 + $0x4] sm:$0xff] %vm560_vm1, %v4358_v18  ;;  %v972_v21 = vadd.f32 %v3342_v12, %v966_v19 }
 0x69d   : > { %v4365_v22 = vmul.f32 %v4360_v20, %v972_v21  ;;  %3564 = vmatpush3.bf16.msra.mxu0 %v3961_v56  ;;  %v3363_v56 = vld [vmem:[%s5012_s7 + $0x5] ss:$0 sm:$0xff] }
 0x69e   : > { %3698 = vmatprep.subr.bf16.mxu0 %v4109_v1 }
 0x69f   : > { %1026 = vst.msk [vmem:[#allocation2 + $0xc] sm:$0xff] %vm560_vm1, %v4365_v22 }
 0x6a2   : > { %v1029_v31 = vld [vmem:[#allocation2 + $0x1] sm:$0xff] }
 0x6a3   : > { %v1031_v32 = vld [vmem:[#allocation2 + $0x2] sm:$0xff] }
 0x6a4   : > { %v1033_v33 = vld [vmem:[#allocation2 + $0x3] sm:$0xff] }
 0x6a5   : > { %v1035_v34 = vld [vmem:[#allocation2 + $0x4] sm:$0xff] }
 0x6a6   : > { %v1037_v28 = vld [vmem:[#allocation2 + $0x5] sm:$0xff]  ;;  %v1038_v29 = vld [vmem:[#allocation2 + $0xd] sm:$0xff] }
 0x6a7   : > { %v4381_v30 = vld [vmem:[#allocation2 + $0x8] sm:$0xff]  ;;  %v4383_v35 = vld [vmem:[#allocation2] sm:$0xff]  ;;  %v3795_v36 = vpack.i.bf16 %v1038_v29, %v1037_v28  ;;  %v1043_v37 = vld [vmem:[#allocation2 + $0x10] sm:$0xff] }
 0x6a8   : > { %v1030_v38 = vld [vmem:[#allocation2 + $0x9] sm:$0xff]  ;;  %v1108_v40 = vpack.c.bf16 %v1043_v37, %v4381_v30 }
 0x6a9   : > { %v1039_v39 = vld [vmem:[#allocation2 + $0x6] sm:$0xff]  ;;  %v1040_v41 = vld [vmem:[#allocation2 + $0xe] sm:$0xff]  ;;  %3796 = vrot.lane.b32.xlu1 %v3795_v36, %s4118_s27  ;;  %v3800_v50 = vpack.i.bf16 %v1030_v38, %v1029_v31 }
 0x6aa   : > { %v1032_v42 = vld [vmem:[#allocation2 + $0xa] sm:$0xff]  ;;  %3675 = vmatmul.mubr.msk.bf16.vlgmr.msra.gmra.mxu1 %vm560_vm1, %v1108_v40  ;;  %v3805_v52 = vpack.i.bf16 %v1040_v41, %v1039_v39  ;;  %v3962_v39 = vld [vmem:[%s5011_s6 + $0x18] sm:$0xff]  }
 0x6ab   : > { %v1041_v43 = vld [vmem:[#allocation2 + $0x7] sm:$0xff]  ;;  %v1042_v44 = vld [vmem:[#allocation2 + $0xf] sm:$0xff]  ;;  %3686 = vmatprep.mubr.msk.bf16.mxu1 %vm4110_vm0, %v4109_v1  ;;  %v3810_v55 = vpack.i.bf16 %v1032_v42, %v1031_v32  ;;  %3679 = vmatpush3.bf16.msra.mxu1 %v3962_v39 }
 0x6ac   : > { %v1034_v46 = vld [vmem:[#allocation2 + $0xb] sm:$0xff]  ;;  %1903 = vst.msk [vmem:[#allocation2] sm:$0xff] %vm560_vm1, %v4109_v1  ;;  %v3815_v57 = vpack.i.bf16 %v1042_v44, %v1041_v43  ;;  %3680 = vmatprep.subr.bf16.mxu1 %v4109_v1  ;;  %v3965_v42 = vld [vmem:[%s5011_s6] sm:$0xff]  }
 0x6ad   : > { %v1036_v3 = vld [vmem:[#allocation2 + $0xc] sm:$0xff]  ;;  %3801 = vrot.lane.b32.xlu1 %v3800_v50, %s4118_s27  ;;  %v3820_v58 = vpack.i.bf16 %v1034_v46, %v1033_v33  ;;  %v3343_v44 = vld [vmem:[%s5012_s7 + $0x4] ss:$0 sm:$0xff] }
 0x6ae   : > { %1904 = vst.msk [vmem:[#allocation2 + $0x8] sm:$0xff] %vm560_vm1, %v4109_v1  ;;  %1905 = vst.msk [vmem:[#allocation2 + $0x10] sm:$0xff] %vm560_vm1, %v4109_v1  ;;  %v3963_v40 = vld [vmem:[%s5011_s6 + $0x10] sm:$0xff]   ;;  %v3964_v41 = vld [vmem:[%s5011_s6 + $0x8] sm:$0xff]  }
 0x6af   : > { %3681 = vmatpush3.bf16.msra.mxu1 %v3963_v40 }
 0x6b0   : > { %3682 = vmatprep.subr.bf16.mxu1 %v4109_v1 }
 0x6b1   : > { %3806 = vrot.lane.b32.xlu1 %v3805_v52, %s4115_s23 }
 0x6b3   : > { %3683 = vmatpush3.bf16.msra.mxu1 %v3964_v41  ;;  %v3376_v41 = vld [vmem:[%s5012_s7 + $0x8] ss:$0 sm:$0xff] }
 0x6b4   : > { %3684 = vmatprep.subr.bf16.mxu1 %v4109_v1 }
 0x6b5   : > { %3811 = vrot.lane.b32.xlu1 %v3810_v55, %s4115_s23 }
 0x6b7   : > { %3685 = vmatpush3.bf16.msra.mxu1 %v3965_v42 }
 0x6b8   : > { %3690 = vmatprep.subr.bf16.mxu1 %v4109_v1 }
 0x6b9   : > { %3816 = vrot.lane.b32.xlu1 %v3815_v57, %s5024_s16 }
 0x6bd   : > { %3821 = vrot.lane.b32.xlu1 %v3820_v58, %s5024_s16 }
 0x71b   : > { %v3797_v59 = vpop.permute.xlu1 %3796 }
 0x71c   : > { %v3799_v62 = vunpack.i.h.bf16 %v3797_v59  ;;  %v3798_v63 = vunpack.i.l.bf16 %v3797_v59 }
 0x71e   : > { %v1101_v6 = vsel %vm560_vm1, %v1036_v3, %v3799_v62  ;;  %v1100_v7 = vsel %vm560_vm1, %v1035_v34, %v3798_v63 }
 0x71f   : > { %v3802_v60 = vpop.permute.xlu1 %3801 }
 0x720   : > { %v3804_v9 = vunpack.i.h.bf16 %v3802_v60  ;;  %v3803_v10 = vunpack.i.l.bf16 %v3802_v60 }
 0x722   : > { %v1092_v26 = vsel %vm560_vm1, %v4383_v35, %v3803_v10  ;;  %v1093_v27 = vsel %vm560_vm1, %v4381_v30, %v3804_v9 }
 0x723   : > { %v3807_v61 = vpop.permute.xlu1 %3806 }
 0x724   : > { %v3809_v2 = vunpack.i.h.bf16 %v3807_v61  ;;  %v3808_v5 = vunpack.i.l.bf16 %v3807_v61 }
 0x726   : > { %v1103_v13 = vsel %vm1094_vm3, %v1101_v6, %v3809_v2  ;;  %v1102_v14 = vsel %vm1094_vm3, %v1100_v7, %v3808_v5 }
 0x727   : > { %v3812_v0 = vpop.permute.xlu1 %3811 }
 0x728   : > { %v3814_v16 = vunpack.i.h.bf16 %v3812_v0  ;;  %v3813_v17 = vunpack.i.l.bf16 %v3812_v0 }
 0x72a   : > { %v1095_v31 = vsel %vm1094_vm3, %v1092_v26, %v3813_v17  ;;  %v1096_v32 = vsel %vm1094_vm3, %v1093_v27, %v3814_v16  ;;  %v3967_v16 = vld [vmem:[%s5008_s3 + $0x10] sm:$0xff]  }
 0x72b   : > { %v3817_v8 = vpop.permute.xlu1 %3816 }
 0x72c   : > { %v3819_v11 = vunpack.i.h.bf16 %v3817_v8  ;;  %v3818_v12 = vunpack.i.l.bf16 %v3817_v8 }
 0x72e   : > { %v1104_v19 = vsel %vm1097_vm4, %v1102_v14, %v3818_v12  ;;  %v1105_v21 = vsel %vm1097_vm4, %v1103_v13, %v3819_v11 }
 0x72f   : > { %v3822_v23 = vpop.permute.xlu1 %3821  ;;  %v1107_v25 = vpack.c.bf16 %v1105_v21, %v1104_v19 }
 0x730   : > { %v3824_v28 = vunpack.i.h.bf16 %v3822_v23  ;;  %v3823_v29 = vunpack.i.l.bf16 %v3822_v23 }
 0x731   : > { %1256 = vmatprep.mubr.bf16.mxu0 %v1107_v25 }
 0x732   : > { %v1098_v33 = vsel %vm1097_vm4, %v1095_v31, %v3823_v29  ;;  %v1099_v34 = vsel %vm1097_vm4, %v1096_v32, %v3824_v28  ;;  %v3369_v28 = vld [vmem:[%s5012_s7 + $0x6] ss:$0 sm:$0xff] }
 0x733   : > { %v1106_v36 = vpack.c.bf16 %v1099_v34, %v1098_v33  ;;  %v3370_v33 = vld [vmem:[%s5012_s7 + $0x7] ss:$0 sm:$0xff] }
 0x735   : > { %1257 = vmatmul.mubr.bf16.vlgmr.msra.gmra.mxu0 %v1106_v36 }
 0x736   : > { %3700 = vmatprep.mubr.msk.bf16.mxu0 %vm4110_vm0, %v4109_v1 }
 0x76a   : > { %v1299_v35 = vpop.f32.mrf.mxu1 }
 0x76c   : > { %v3676_v37 = vpop.f32.mrf.mxu1 }
 0x76e   : > { %v1302_v38 = vpop.f32.mrf.mxu1 }
 0x770   : > { %v3677_v30 = vpop.f32.mrf.mxu1 }
 0x7f5   : > { %v3565_v43 = vpop.f32.mrf.mxu0 }
 0x7f7   : > { %v3566_v46 = vpop.f32.mrf.mxu0 }
 0x7f8   : > { %v3567_v3 = vadd.f32 %v3566_v46, %v3565_v43 }
 0x7f9   : > { %v3568_v47 = vpop.f32.mrf.mxu0 }
 0x7fa   : > { %v1259_v48 = vadd.f32 %v3567_v3, %v3343_v44 }
 0x7fb   : > { %v3569_v49 = vpop.f32.mrf.mxu0 }
 0x7fc   : > { %v3570_v50 = vadd.f32 %v3569_v49, %v3568_v47  ;;  %v1300_v4 = vadd.f32 %v1299_v35, %v1259_v48 }
 0x7fe   : > { %v1262_v51 = vadd.f32 %v3570_v50, %v3343_v44  ;;  %v1306_v53 = vmax.f32 %v1300_v4, 0.0 }
 0x800   : > { %v1303_v52 = vadd.f32 %v1302_v38, %v1262_v51 }
 0x802   : > { %v1307_v54 = vmax.f32 %v1303_v52, 0.0 }
 0x804   : > { %v1316_v55 = vpack.c.bf16 %v1307_v54, %v1306_v53 }
 0x806   : > { %3687 = vmatmul.mubr.msk.bf16.vlgmr.msra.gmra.mxu1 %vm1094_vm3, %v1316_v55 }
 0x807   : > { %3694 = vmatprep.mubr.msk.bf16.mxu1 %vm4110_vm0, %v4109_v1 }
 0x8c6   : > { %v1383_v57 = vpop.f32.mrf.mxu1 }
 0x8c7   : > { %v1384_v58 = vadd.f32 %v3363_v56, %v1383_v57 }
 0x8c8   : > { %v3688_v59 = vpop.f32.mrf.mxu1 }
 0x8c9   : > { %v1390_v60 = vadd.f32 %v1384_v58, %v4358_v18 }
 0x8ca   : > { %v1386_v61 = vpop.f32.mrf.mxu1 }
 0x8cb   : > { %v1387_v62 = vadd.f32 %v3363_v56, %v1386_v61  ;;  %v1394_v63 = vsel %vm560_vm1, %v1390_v60, 0.0 }
 0x8cc   : > { %1395 = vadd.xlane.f32.xlu1 %v1394_v63  ;;  %v3689_v0 = vpop.f32.mrf.mxu1 }
 0x8cd   : > { %v1391_v2 = vadd.f32 %v1387_v62, %v4365_v22  ;;  %v3966_v22 = vld [vmem:[%s5008_s3 + $0x18] sm:$0xff]  }
 0x8ce   : > { %3691 = vmatpush3.bf16.msra.mxu1 %v3966_v22 }
 0x8cf   : > { %v1397_v5 = vsel %vm560_vm1, %v1391_v2, 0.0  ;;  %3692 = vmatprep.subr.bf16.mxu1 %v4109_v1 }
 0x8d0   : > { %1398 = vadd.xlane.f32.xlu0 %v1397_v5 }
 0x8d2   : > { %3693 = vmatpush3.bf16.msra.mxu1 %v3967_v16 }
 0x8d3   : > { %3704 = vmatprep.subr.bf16.mxu1 %v4109_v1 }
 0x955   : > { %v1396_v6 = vpop.xlane.xlu1 %1395 }
 0x956   : > { %v1400_v7 = vmul.f32 0.03125, %v1396_v6 }
 0x958   : > { %v1402_v8 = vsub.f32 %v1390_v60, %v1400_v7 }
 0x959   : > { %v1399_v9 = vpop.xlane.xlu0 %1398 }
 0x95a   : > { %v1401_v10 = vmul.f32 0.03125, %v1399_v9  ;;  %v1404_v11 = vmul.f32 %v1402_v8, %v1402_v8 }
 0x95c   : > { %v1403_v12 = vsub.f32 %v1391_v2, %v1401_v10  ;;  %v1406_v18 = vsel %vm560_vm1, %v1404_v11, 0.0 }
 0x95d   : > { %1407 = vadd.xlane.f32.xlu1 %v1406_v18 }
 0x95e   : > { %v1405_v13 = vmul.f32 %v1403_v12, %v1403_v12 }
 0x960   : > { %v1409_v14 = vsel %vm560_vm1, %v1405_v13, 0.0 }
 0x961   : > { %1410 = vadd.xlane.f32.xlu0 %v1409_v14 }
 0x9e6   : > { %v1408_v17 = vpop.xlane.xlu1 %1407 }
 0x9e7   : > { %v1412_v19 = vmul.f32 0.03125, %v1408_v17 }
 0x9e9   : > { %v1414_v21 = vadd.f32 1e-05, %v1412_v19 }
 0x9ea   : > { %v1411_v23 = vpop.xlane.xlu0 %1410 }
 0x9eb   : > { %4057 = vrsqrt.f32 %v1414_v21  ;;  %v1413_v25 = vmul.f32 0.03125, %v1411_v23 }
 0x9ed   : > { %v1415_v26 = vadd.f32 1e-05, %v1413_v25 }
 0x9ef   : > { %4059 = vrsqrt.f32 %v1415_v26 }
 0x9f8   : > { %v4058_v27 = vpop.eup %4057 }
 0x9f9   : > { %v1418_v29 = vmul.f32 %v4058_v27, %v1402_v8 }
 0x9fb   : > { %v1424_v31 = vmul.f32 %v3369_v28, %v1418_v29 }
 0x9fc   : > { %v4060_v32 = vpop.eup %4059 }
 0x9fd   : > { %v1419_v34 = vmul.f32 %v4060_v32, %v1403_v12  ;;  %v1430_v35 = vadd.f32 %v3370_v33, %v1424_v31 }
 0x9ff   : > { %v1425_v36 = vmul.f32 %v3369_v28, %v1419_v34  ;;  %v4488_v38 = vmul.f32 %v1430_v35, %v4355_v15 }
 0xa01   : > { %v1431_v37 = vadd.f32 %v3370_v33, %v1425_v36 }
 0xa03   : > { %v4491_v30 = vmul.f32 %v1431_v37, %v4360_v20 }
 0xa05   : > { %v1439_v39 = vpack.c.bf16 %v4491_v30, %v4488_v38 }
 0xa07   : > { %3695 = vmatmul.mubr.msk.bf16.vlgmr.msra.gmra.mxu1 %vm560_vm1, %v1439_v39 }
 0xa08   : > { %3706 = vmatprep.mubr.msk.bf16.mxu1 %vm4110_vm0, %v4109_v1 }
 0xac7   : > { %v1495_v40 = vpop.f32.mrf.mxu1 }
 0xac8   : > { %v1496_v44 = vadd.f32 %v3376_v41, %v1495_v40 }
 0xac9   : > { %v3696_v42 = vpop.f32.mrf.mxu1 }
 0xacb   : > { %v1498_v43 = vpop.f32.mrf.mxu1 }
 0xacc   : > { %v1499_v46 = vadd.f32 %v3376_v41, %v1498_v43 }
 0xacd   : > { %v3697_v3 = vpop.f32.mrf.mxu1 }
 0xace   : > { %v4501_v47 = vpack.c.bf16 %v1499_v46, %v1496_v44 }
 0xad0   : > { %1625 = vrot.lane.b32.xlu0 %v4501_v47, %s4113_s17  ;;  %1504 = vrot.lane.b32.xlu1 %v4501_v47, %s5024_s16  ;;  %s4120_s17 = smov 24  }
 0xad4   : > { %1623 = vrot.lane.b32.xlu1 %v4501_v47, %s4111_s30  ;;  %s5026_s30 = smov 48  }
 0xb42   : > { %v1505_v48 = vpop.permute.xlu1 %1504  ;;  %v1626_v50 = vpop.permute.xlu0 %1625 }
 0xb43   : > { %v1510_v49 = vsel %vm615_vm2, %v1505_v48, 0  ;;  %v1631_v4 = vsel %vm615_vm2, %v1626_v50, 0 }
 0xb44   : > { %3699 = vmatpush3.bf16.xpose.msra.mxu0 %v1510_v49 }
 0xb45   : > { %3710 = vmatprep.subr.bf16.mxu0 %v4109_v1 }
 0xb46   : > { %v1624_v51 = vpop.permute.xlu1 %1623 }
 0xb4b   : > { %3701 = vmatmul.mubr.msk.bf16.vlgmr.msra.gmra.mxu0 %vm615_vm2, %v4501_v47 }
 0xb4c   : > { %3711 = vmatpush3.bf16.xpose.msra.mxu0 %v1631_v4  ;;  %3712 = vmatprep.mubr.msk.bf16.mxu0 %vm4110_vm0, %v4109_v1  ;;  %v3969_v4 = vld [vmem:[%s5009_s4 + $0x10] sm:$0xff]  }
 0xb4d   : > { %3722 = vmatprep.subr.bf16.mxu0 %v4109_v1 }
 0xb53   : > { %3713 = vmatmul.mubr.msk.bf16.vlgmr.msra.gmra.mxu0 %vm615_vm2, %v1624_v51 }
 0xb54   : > { %3726 = vmatprep.mubr.msk.bf16.mxu0 %vm4110_vm0, %v4109_v1 }
 0xc0b   : > { %v1546_v52 = vpop.f32.mrf.mxu0 }
 0xc0c   : > { %v1547_v53 = vadd.f32 %v1546_v52, %v4277_v24 }
 0xc0d   : > { %v3702_v54 = vpop.f32.mrf.mxu0 }
 0xc0e   : > { %v1553_v55 = vsel %vm615_vm2, %v1547_v53, -inf }
 0xc0f   : > { %1554 = vmax.xlane.f32.xlu1 %v1553_v55  ;;  %v1549_v56 = vpop.f32.mrf.mxu0 }
 0xc10   : > { %v1550_v57 = vadd.f32 %v1549_v56, %v4277_v24 }
 0xc11   : > { %v3703_v58 = vpop.f32.mrf.mxu0 }
 0xc12   : > { %v1556_v59 = vsel %vm615_vm2, %v1550_v57, -inf }
 0xc13   : > { %1557 = vmax.xlane.f32.xlu0 %v1556_v59  ;;  %v1667_v60 = vpop.f32.mrf.mxu0 }
 0xc14   : > { %v1668_v61 = vadd.f32 %v1667_v60, %v4277_v24 }
 0xc15   : > { %v3714_v62 = vpop.f32.mrf.mxu0 }
 0xc16   : > { %v1674_v63 = vsel %vm615_vm2, %v1668_v61, -inf }
 0xc17   : > { %1675 = vmax.xlane.f32.xlu0 %v1674_v63  ;;  %v1670_v0 = vpop.f32.mrf.mxu0  ;;  %v3389_v63 = vld [vmem:[%s5012_s7 + $0x9] ss:$0 sm:$0xff] }
 0xc18   : > { %v1671_v2 = vadd.f32 %v1670_v0, %v4277_v24 }
 0xc19   : > { %v3715_v5 = vpop.f32.mrf.mxu0 }
 0xc1a   : > { %v1677_v6 = vsel %vm615_vm2, %v1671_v2, -inf }
 0xc1b   : > { %1678 = vmax.xlane.f32.xlu1 %v1677_v6 }
 0xc98   : > { %v1555_v7 = vpop.xlane.xlu1 %1554 }
 0xc99   : > { %v1559_v8 = vsub.f32 %v1547_v53, %v1555_v7 }
 0xc9b   : > { %v1561_v9 = vmul.f32 1.442695, %v1559_v8 }
 0xc9c   : > { %v1558_v10 = vpop.xlane.xlu0 %1557 }
 0xc9d   : > { %4061 = vpow2.f32 %v1561_v9  ;;  %v1560_v11 = vsub.f32 %v1550_v57, %v1558_v10 }
 0xc9f   : > { %v1563_v12 = vmul.f32 1.442695, %v1560_v11 }
 0xca0   : > { %v1676_v18 = vpop.xlane.xlu0 %1675 }
 0xca1   : > { %4063 = vpow2.f32 %v1563_v12  ;;  %v1680_v13 = vsub.f32 %v1668_v61, %v1676_v18 }
 0xca3   : > { %v1682_v14 = vmul.f32 1.442695, %v1680_v13 }
 0xca4   : > { %v1679_v22 = vpop.xlane.xlu1 %1678 }
 0xca5   : > { %4065 = vpow2.f32 %v1682_v14  ;;  %v1681_v16 = vsub.f32 %v1671_v2, %v1679_v22 }
 0xca7   : > { %v1684_v17 = vmul.f32 1.442695, %v1681_v16 }
 0xca9   : > { %4067 = vpow2.f32 %v1684_v17 }
 0xcaa   : > { %v4062_v24 = vpop.eup %4061 }
 0xcab   : > { %v1565_v19 = vsel %vm615_vm2, %v4062_v24, 0.0 }
 0xcac   : > { %1566 = vadd.xlane.f32.xlu0 %v1565_v19 }
 0xcae   : > { %v4064_v21 = vpop.eup %4063 }
 0xcaf   : > { %v1568_v23 = vsel %vm615_vm2, %v4064_v21, 0.0 }
 0xcb0   : > { %1569 = vadd.xlane.f32.xlu1 %v1568_v23  ;;  %v3971_v23 = vld [vmem:[%s5010_s5 + $0x110] sm:$0xff]  }
 0xcb2   : > { %v4066_v25 = vpop.eup %4065 }
 0xcb3   : > { %v1686_v26 = vsel %vm615_vm2, %v4066_v25, 0.0 }
 0xcb4   : > { %1687 = vadd.xlane.f32.xlu0 %v1686_v26  ;;  %v3973_v26 = vld [vmem:[%s5010_s5 + $0xc8] sm:$0xff]  }
 0xcb6   : > { %v4068_v27 = vpop.eup %4067 }
 0xcb7   : > { %v1689_v28 = vsel %vm615_vm2, %v4068_v27, 0.0 }
 0xcb8   : > { %1690 = vadd.xlane.f32.xlu1 %v1689_v28  ;;  %v3975_v28 = vld [vmem:[%s5010_s5 + $0xc0] sm:$0xff]  }
 0xcc9   : > { %1697 = vrot.lane.b32.xlu1 %v4501_v47, %s5026_s30  ;;  %s4119_s30 = smov 8  }
 0xcca   : > { %1576 = vrot.lane.b32.xlu0 %v4501_v47, %s4115_s23  ;;  %v3968_v47 = vld [vmem:[%s5009_s4 + $0x18] sm:$0xff]  }
 0xccb   : > { %3723 = vmatpush3.bf16.msra.mxu0 %v3968_v47 }
 0xccc   : > { %3724 = vmatprep.subr.bf16.mxu0 %v4109_v1 }
 0xccf   : > { %3725 = vmatpush3.bf16.msra.mxu0 %v3969_v4 }
 0xcd0   : > { %3730 = vmatprep.subr.bf16.mxu0 %v4109_v1 }
 0xd35   : > { %v1567_v29 = vpop.xlane.xlu0 %1566 }
 0xd36   : > { %4069 = vrcp.f32 %v1567_v29  ;;  %v3976_v29 = vld [vmem:[%s5010_s5 + $0xf8] sm:$0xff]  }
 0xd39   : > { %v1570_v31 = vpop.xlane.xlu1 %1569 }
 0xd3a   : > { %4071 = vrcp.f32 %v1570_v31  ;;  %v3977_v31 = vld [vmem:[%s5010_s5 + $0xb8] sm:$0xff]  }
 0xd3d   : > { %v1688_v32 = vpop.xlane.xlu0 %1687 }
 0xd3e   : > { %4073 = vrcp.f32 %v1688_v32  ;;  %v3978_v32 = vld [vmem:[%s5010_s5 + $0xf0] sm:$0xff]  }
 0xd41   : > { %v1577_v33 = vpop.permute.xlu0 %1576  ;;  %v1691_v34 = vpop.xlane.xlu1 %1690 }
 0xd42   : > { %4075 = vrcp.f32 %v1691_v34  ;;  %3705 = vmatpush3.bf16.msra.mxu1 %v1577_v33  ;;  %v3979_v33 = vld [vmem:[%s5010_s5 + $0xb0] sm:$0xff]  }
 0xd43   : > { %3716 = vmatprep.subr.bf16.mxu1 %v4109_v1  ;;  %v4070_v36 = vpop.eup %4069 }
 0xd44   : > { %v1573_v37 = vmul.f32 %v4070_v36, %v4062_v24 }
 0xd45   : > { %v1698_v41 = vpop.permute.xlu1 %1697 }
 0xd47   : > { %v4072_v35 = vpop.eup %4071 }
 0xd48   : > { %v1574_v39 = vmul.f32 %v4072_v35, %v4064_v21 }
 0xd4a   : > { %v1575_v40 = vpack.c.bf16 %v1574_v39, %v1573_v37 }
 0xd4b   : > { %v4074_v42 = vpop.eup %4073 }
 0xd4c   : > { %3707 = vmatmul.mubr.msk.bf16.vlgmr.msra.gmra.mxu1 %vm615_vm2, %v1575_v40  ;;  %v1694_v44 = vmul.f32 %v4074_v42, %v4066_v25  ;;  %v3972_v25 = vld [vmem:[%s5010_s5 + $0x108] sm:$0xff]  }
 0xd4d   : > { %3717 = vmatpush3.bf16.msra.mxu1 %v1698_v41  ;;  %3718 = vmatprep.mubr.msk.bf16.mxu1 %vm4110_vm0, %v4109_v1  ;;  %v3395_v42 = vld [vmem:[%s5012_s7 + $0xa] ss:$0 sm:$0xff] }
 0xd4e   : > { %3593 = vmatprep.subr.bf16.mxu1 %v3972_v25 }
 0xd4f   : > { %v4076_v43 = vpop.eup %4075 }
 0xd50   : > { %v1695_v46 = vmul.f32 %v4076_v43, %v4068_v27  ;;  %v3974_v27 = vld [vmem:[%s5010_s5 + $0x100] sm:$0xff]  }
 0xd52   : > { %v1696_v3 = vpack.c.bf16 %v1695_v46, %v1694_v44  ;;  %v3396_v44 = vld [vmem:[%s5012_s7 + $0xb] ss:$0 sm:$0xff] }
 0xd54   : > { %3719 = vmatmul.mubr.msk.bf16.vlgmr.msra.gmra.mxu1 %vm615_vm2, %v1696_v3 }
 0xd55   : > { %3594 = vmatpush3.bf16.msra.mxu1 %v3973_v26 }
 0xd56   : > { %3595 = vmatprep.subr.bf16.mxu1 %v3974_v27 }
 0xd59   : > { %3596 = vmatpush3.bf16.msra.mxu1 %v3975_v28 }
 0xd5a   : > { %3597 = vmatprep.subr.bf16.mxu1 %v3976_v29 }
 0xd5d   : > { %3598 = vmatpush3.bf16.msra.mxu1 %v3977_v31 }
 0xd5e   : > { %3599 = vmatprep.subr.bf16.mxu1 %v3978_v32 }
 0xd61   : > { %3600 = vmatpush3.bf16.msra.mxu1 %v3979_v33 }
 0xe0c   : > { %v1616_v48 = vpop.f32.mrf.mxu1 }
 0xe0e   : > { %v3708_v49 = vpop.f32.mrf.mxu1 }
 0xe10   : > { %v1619_v50 = vpop.f32.mrf.mxu1 }
 0xe12   : > { %v3709_v51 = vpop.f32.mrf.mxu1 }
 0xe14   : > { %v1737_v52 = vpop.f32.mrf.mxu1 }
 0xe16   : > { %v3720_v53 = vpop.f32.mrf.mxu1 }
 0xe17   : > { %v3981_v53 = vld [vmem:[%s5010_s5 + $0xa8] sm:$0xff]  }
 0xe18   : > { %v1740_v54 = vpop.f32.mrf.mxu1 }
 0xe19   : > { %v3825_v55 = vpack.i.bf16 %v1740_v54, %v1737_v52  ;;  %v3980_v52 = vld [vmem:[%s5010_s5 + $0xe8] sm:$0xff]   ;;  %v3982_v54 = vld [vmem:[%s5010_s5 + $0xe0] sm:$0xff]  }
 0xe1a   : > { %v3721_v56 = vpop.f32.mrf.mxu1  ;;  %3601 = vmatprep.subr.bf16.mxu1 %v3980_v52 }
 0xe1b   : > { %3826 = vrot.lane.b32.xlu1 %v3825_v55, %s5027_s20  ;;  %3602 = vmatpush3.bf16.msra.mxu1 %v3981_v53  ;;  %v3983_v55 = vld [vmem:[%s5010_s5 + $0xa0] sm:$0xff]  }
 0xe1c   : > { %3603 = vmatprep.subr.bf16.mxu1 %v3982_v54 }
 0xe1f   : > { %3604 = vmatpush3.bf16.msra.mxu1 %v3983_v55 }
 0xe8d   : > { %v3827_v57 = vpop.permute.xlu1 %3826 }
 0xe8e   : > { %v3829_v58 = vunpack.i.h.bf16 %v3827_v57  ;;  %v3828_v59 = vunpack.i.l.bf16 %v3827_v57 }
 0xe90   : > { %v1753_v60 = vsel %vm615_vm2, %v1619_v50, %v3829_v58  ;;  %v1752_v61 = vsel %vm615_vm2, %v1616_v48, %v3828_v59 }
 0xe91   : > { %v1759_v62 = vpack.c.bf16 %v1753_v60, %v1752_v61 }
 0xe93   : > { %3727 = vmatmul.mubr.msk.bf16.vlgmr.msra.gmra.mxu0 %vm560_vm1, %v1759_v62 }
 0xe94   : > { %3734 = vmatprep.mubr.msk.bf16.mxu0 %vm4110_vm0, %v4109_v1 }
 0xf53   : > { %v1814_v0 = vpop.f32.mrf.mxu0 }
 0xf54   : > { %v1815_v2 = vadd.f32 %v3389_v63, %v1814_v0 }
 0xf55   : > { %v3728_v5 = vpop.f32.mrf.mxu0 }
 0xf56   : > { %v1821_v6 = vadd.f32 %v1815_v2, %v4488_v38 }
 0xf57   : > { %v1817_v7 = vpop.f32.mrf.mxu0 }
 0xf58   : > { %v1818_v8 = vadd.f32 %v3389_v63, %v1817_v7  ;;  %v1825_v9 = vsel %vm560_vm1, %v1821_v6, 0.0 }
 0xf59   : > { %1826 = vadd.xlane.f32.xlu0 %v1825_v9  ;;  %v3729_v10 = vpop.f32.mrf.mxu0  ;;  %v3985_v9 = vld [vmem:[%s5010_s5 + $0x98] sm:$0xff]  }
 0xf5a   : > { %v1822_v11 = vadd.f32 %v1818_v8, %v4491_v30  ;;  %v3970_v30 = vld [vmem:[%s5010_s5 + $0x118] sm:$0xff]  }
 0xf5b   : > { %3731 = vmatpush3.bf16.msra.mxu0 %v3970_v30  ;;  %v3984_v8 = vld [vmem:[%s5010_s5 + $0xd8] sm:$0xff]  }
 0xf5c   : > { %v1828_v12 = vsel %vm560_vm1, %v1822_v11, 0.0  ;;  %3732 = vmatprep.subr.bf16.mxu0 %v4109_v1  ;;  %3605 = vmatprep.subr.bf16.mxu1 %v3984_v8 }
 0xf5d   : > { %1829 = vadd.xlane.f32.xlu1 %v1828_v12  ;;  %v3986_v12 = vld [vmem:[%s5010_s5 + $0xd0] sm:$0xff]   ;;  %3606 = vmatpush3.bf16.msra.mxu1 %v3985_v9 }
 0xf5e   : > { %3607 = vmatprep.subr.bf16.mxu1 %v3986_v12 }
 0xf5f   : > { %3733 = vmatpush3.bf16.msra.mxu0 %v3971_v23 }
 0xf60   : > { %3738 = vmatprep.subr.bf16.mxu0 %v4109_v1 }
 0xfe2   : > { %v1827_v18 = vpop.xlane.xlu0 %1826 }
 0xfe3   : > { %v1831_v13 = vmul.f32 0.03125, %v1827_v18 }
 0xfe5   : > { %v1833_v14 = vsub.f32 %v1821_v6, %v1831_v13 }
 0xfe6   : > { %v1830_v22 = vpop.xlane.xlu1 %1829 }
 0xfe7   : > { %v1832_v16 = vmul.f32 0.03125, %v1830_v22  ;;  %v1835_v17 = vmul.f32 %v1833_v14, %v1833_v14 }
 0xfe9   : > { %v1834_v24 = vsub.f32 %v1822_v11, %v1832_v16  ;;  %v1837_v38 = vsel %vm560_vm1, %v1835_v17, 0.0 }
 0xfea   : > { %1838 = vadd.xlane.f32.xlu0 %v1837_v38 }
 0xfeb   : > { %v1836_v19 = vmul.f32 %v1834_v24, %v1834_v24 }
 0xfed   : > { %v1840_v21 = vsel %vm560_vm1, %v1836_v19, 0.0 }
 0xfee   : > { %1841 = vadd.xlane.f32.xlu0 %v1840_v21 }
0x1073   : > { %v1839_v34 = vpop.xlane.xlu0 %1838 }
0x1074   : > { %v1843_v36 = vmul.f32 0.03125, %v1839_v34 }
0x1076   : > { %v1845_v35 = vadd.f32 1e-05, %v1843_v36 }
0x1077   : > { %v1842_v37 = vpop.xlane.xlu0 %1841 }
0x1078   : > { %4077 = vrsqrt.f32 %v1845_v35  ;;  %v1844_v39 = vmul.f32 0.03125, %v1842_v37 }
0x107a   : > { %v1846_v40 = vadd.f32 1e-05, %v1844_v39 }
0x107c   : > { %4079 = vrsqrt.f32 %v1846_v40 }
0x1085   : > { %v4078_v41 = vpop.eup %4077 }
0x1086   : > { %v1849_v43 = vmul.f32 %v4078_v41, %v1833_v14  ;;  %v3987_v14 = vld [vmem:[%s5010_s5 + $0x90] sm:$0xff]  }
0x1087   : > { %3608 = vmatpush3.bf16.msra.mxu1 %v3987_v14 }
0x1088   : > { %v1855_v46 = vmul.f32 %v3395_v42, %v1849_v43  ;;  %3758 = vmatprep.subr.bf16.mxu1 %v4109_v1 }
0x1089   : > { %v4080_v3 = vpop.eup %4079 }
0x108a   : > { %v1861_v47 = vadd.f32 %v3396_v44, %v1855_v46  ;;  %v1850_v48 = vmul.f32 %v4080_v3, %v1834_v24 }
0x108c   : > { %v4603_v49 = vmul.f32 %v1861_v47, %v4355_v15  ;;  %v1856_v50 = vmul.f32 %v3395_v42, %v1850_v48 }
0x108e   : > { %1906 = vst.msk [vmem:[#allocation2 + $0x4] sm:$0xff] %vm560_vm1, %v4603_v49  ;;  %v1862_v4 = vadd.f32 %v3396_v44, %v1856_v50 }
0x1090   : > { %v4608_v51 = vmul.f32 %v1862_v4, %v4360_v20 }
0x1092   : > { %1907 = vst.msk [vmem:[#allocation2 + $0xc] sm:$0xff] %vm560_vm1, %v4608_v51 }
0x1095   : > { %v1910_v56 = vld [vmem:[#allocation2 + $0x1] sm:$0xff] }
0x1096   : > { %v1912_v13 = vld [vmem:[#allocation2 + $0x2] sm:$0xff] }
0x1097   : > { %v1914_v17 = vld [vmem:[#allocation2 + $0x3] sm:$0xff] }
0x1098   : > { %v1916_v26 = vld [vmem:[#allocation2 + $0x4] sm:$0xff] }
0x1099   : > { %v1918_v57 = vld [vmem:[#allocation2 + $0x5] sm:$0xff]  ;;  %v1919_v58 = vld [vmem:[#allocation2 + $0xd] sm:$0xff] }
0x109a   : > { %v1911_v59 = vld [vmem:[#allocation2 + $0x9] sm:$0xff]  ;;  %v3830_v60 = vpack.i.bf16 %v1919_v58, %v1918_v57  ;;  %v1908_v3 = vld [vmem:[#allocation2] sm:$0xff] }
0x109b   : > { %v3835_v61 = vpack.i.bf16 %v1911_v59, %v1910_v56  ;;  %v1909_v62 = vld [vmem:[#allocation2 + $0x8] sm:$0xff]  ;;  %v1924_v63 = vld [vmem:[#allocation2 + $0x10] sm:$0xff] }
0x109c   : > { %v1920_v0 = vld [vmem:[#allocation2 + $0x6] sm:$0xff]  ;;  %v1987_v2 = vpack.c.bf16 %v1924_v63, %v1909_v62  ;;  %v1921_v5 = vld [vmem:[#allocation2 + $0xe] sm:$0xff]  ;;  %3831 = vrot.lane.b32.xlu1 %v3830_v60, %s4118_s27 }
0x109d   : > { %v1922_v6 = vld [vmem:[#allocation2 + $0x7] sm:$0xff]  ;;  %v1923_v7 = vld [vmem:[#allocation2 + $0xf] sm:$0xff]  ;;  %3836 = vrot.lane.b32.xlu0 %v3835_v61, %s4118_s27  ;;  %v3840_v10 = vpack.i.bf16 %v1921_v5, %v1920_v0 }
0x109e   : > { %3735 = vmatmul.mubr.msk.bf16.vlgmr.msra.gmra.mxu0 %vm560_vm1, %v1987_v2  ;;  %v3850_v11 = vpack.i.bf16 %v1923_v7, %v1922_v6  ;;  %v1913_v18 = vld [vmem:[#allocation2 + $0xa] sm:$0xff]  ;;  %v3991_v2 = vld [vmem:[%s5011_s6 + $0x20] sm:$0xff]  }
0x109f   : > { %3746 = vmatprep.mubr.msk.bf16.mxu0 %vm4110_vm0, %v4109_v1  ;;  %v3845_v22 = vpack.i.bf16 %v1913_v18, %v1912_v13  ;;  %v1915_v16 = vld [vmem:[#allocation2 + $0xb] sm:$0xff] }
0x10a0   : > { %3841 = vrot.lane.b32.xlu1 %v3840_v10, %s4115_s23  ;;  %v3855_v24 = vpack.i.bf16 %v1915_v16, %v1914_v17  ;;  %v1917_v27 = vld [vmem:[#allocation2 + $0xc] sm:$0xff] }
0x10a1   : > { %3851 = vrot.lane.b32.xlu0 %v3850_v11, %s5028_s29  ;;  %v3989_v63 = vld [vmem:[%s5011_s6 + $0x30] sm:$0xff]   ;;  %v3990_v0 = vld [vmem:[%s5011_s6 + $0x28] sm:$0xff]  }
0x10a2   : > { %v3434_v6 = vld [vmem:[%s5012_s7 + $0xc] ss:$0 sm:$0xff] }
0x10a4   : > { %3846 = vrot.lane.b32.xlu1 %v3845_v22, %s4115_s23 }
0x10a8   : > { %3856 = vrot.lane.b32.xlu1 %v3855_v24, %s5028_s29  ;;  %v3463_v24 = vld [vmem:[%s5012_s7 + $0xd] ss:$0 sm:$0xff] }
0x110e   : > { %v3832_v38 = vpop.permute.xlu1 %3831 }
0x110f   : > { %v3837_v19 = vpop.permute.xlu0 %3836  ;;  %v3834_v21 = vunpack.i.h.bf16 %v3832_v38  ;;  %v3833_v30 = vunpack.i.l.bf16 %v3832_v38 }
0x1110   : > { %v3839_v41 = vunpack.i.h.bf16 %v3837_v19  ;;  %v3838_v42 = vunpack.i.l.bf16 %v3837_v19 }
0x1111   : > { %v1979_v33 = vsel %vm560_vm1, %v1916_v26, %v3833_v30  ;;  %v1980_v34 = vsel %vm560_vm1, %v1917_v27, %v3834_v21 }
0x1112   : > { %v3842_v23 = vpop.permute.xlu1 %3841  ;;  %v1973_v48 = vsel %vm560_vm1, %v1908_v3, %v3838_v42  ;;  %v1974_v50 = vsel %vm560_vm1, %v1909_v62, %v3839_v41  ;;  %v3988_v62 = vld [vmem:[%s5011_s6 + $0x38] sm:$0xff]   ;;  %v3993_v41 = vld [vmem:[%s5013_s8] sm:$0xff]  }
0x1113   : > { %v3852_v25 = vpop.permute.xlu0 %3851  ;;  %v3844_v28 = vunpack.i.h.bf16 %v3842_v23  ;;  %v3843_v29 = vunpack.i.l.bf16 %v3842_v23  ;;  %3739 = vmatpush3.bf16.msra.mxu0 %v3988_v62  ;;  %v3473_v62 = vld [vmem:[%s5014_s9] ss:$0 sm:$0xff] }
0x1114   : > { %v3854_v31 = vunpack.i.h.bf16 %v3852_v25  ;;  %v3853_v32 = vunpack.i.l.bf16 %v3852_v25  ;;  %3740 = vmatprep.subr.bf16.mxu0 %v4109_v1 }
0x1115   : > { %v1981_v36 = vsel %vm1094_vm3, %v1979_v33, %v3843_v29  ;;  %v1982_v35 = vsel %vm1094_vm3, %v1980_v34, %v3844_v28 }
0x1116   : > { %v3847_v37 = vpop.permute.xlu1 %3846  ;;  %v1983_v39 = vsel %vm1097_vm4, %v1981_v36, %v3853_v32  ;;  %v1984_v40 = vsel %vm1097_vm4, %v1982_v35, %v3854_v31 }
0x1117   : > { %v1986_v43 = vpack.c.bf16 %v1984_v40, %v1983_v39  ;;  %v3849_v44 = vunpack.i.h.bf16 %v3847_v37  ;;  %v3848_v46 = vunpack.i.l.bf16 %v3847_v37  ;;  %3741 = vmatpush3.bf16.msra.mxu0 %v3989_v63 }
0x1118   : > { %3742 = vmatprep.subr.bf16.mxu0 %v4109_v1 }
0x1119   : > { %2135 = vmatprep.mubr.bf16.mxu1 %v1986_v43  ;;  %v1975_v53 = vsel %vm1094_vm3, %v1973_v48, %v3848_v46  ;;  %v1976_v54 = vsel %vm1094_vm3, %v1974_v50, %v3849_v44  ;;  %v3471_v50 = vld [vmem:[%s5012_s7 + $0xe] ss:$0 sm:$0xff] }
0x111a   : > { %v3857_v47 = vpop.permute.xlu1 %3856 }
0x111b   : > { %v3859_v4 = vunpack.i.h.bf16 %v3857_v47  ;;  %v3858_v52 = vunpack.i.l.bf16 %v3857_v47  ;;  %3743 = vmatpush3.bf16.msra.mxu0 %v3990_v0 }
0x111c   : > { %3744 = vmatprep.subr.bf16.mxu0 %v4109_v1 }
0x111d   : > { %v1977_v55 = vsel %vm1097_vm4, %v1975_v53, %v3858_v52  ;;  %v1978_v56 = vsel %vm1097_vm4, %v1976_v54, %v3859_v4  ;;  %v3472_v54 = vld [vmem:[%s5012_s7 + $0xf] ss:$0 sm:$0xff] }
0x111e   : > { %v1985_v57 = vpack.c.bf16 %v1978_v56, %v1977_v55 }
0x111f   : > { %3745 = vmatpush3.bf16.msra.mxu0 %v3991_v2 }
0x1120   : > { %2136 = vmatmul.mubr.bf16.vlgmr.msra.gmra.mxu1 %v1985_v57  ;;  %3750 = vmatprep.subr.bf16.mxu0 %v4109_v1 }
0x1121   : > { %3764 = vmatprep.mubr.msk.bf16.mxu1 %vm4110_vm0, %v4109_v1 }
0x115e   : > { %v2178_v58 = vpop.f32.mrf.mxu0 }
0x1160   : > { %v3736_v59 = vpop.f32.mrf.mxu0 }
0x1162   : > { %v2181_v60 = vpop.f32.mrf.mxu0 }
0x1164   : > { %v3737_v61 = vpop.f32.mrf.mxu0 }
0x11e0   : > { %v3609_v5 = vpop.f32.mrf.mxu1 }
0x11e2   : > { %v3610_v7 = vpop.f32.mrf.mxu1 }
0x11e3   : > { %v3611_v8 = vadd.f32 %v3610_v7, %v3609_v5 }
0x11e4   : > { %v3612_v9 = vpop.f32.mrf.mxu1 }
0x11e5   : > { %v2138_v10 = vadd.f32 %v3611_v8, %v3434_v6  ;;  %v3994_v8 = vld [vmem:[%s5015_s10 + $0x10] ss:$0 sps:$4 sm:$0xff]  }
0x11e6   : > { %v3613_v11 = vpop.f32.mrf.mxu1 }
0x11e7   : > { %v3614_v12 = vadd.f32 %v3613_v11, %v3612_v9  ;;  %v2179_v18 = vadd.f32 %v2178_v58, %v2138_v10  ;;  %v2470_v9 = vsel %vm2468_vm7, %v3994_v8, 0  ;;  %v3995_v10 = vld [vmem:[%s5015_s10 + $0x8] sm:$0xff]  }
0x11e8   : > { %3759 = vmatpush3.bf16.msra.mxu1 %v2470_v9 }
0x11e9   : > { %v2141_v13 = vadd.f32 %v3614_v12, %v3434_v6  ;;  %v2185_v22 = vmax.f32 %v2179_v18, 0.0  ;;  %3760 = vmatprep.subr.bf16.mxu1 %v4109_v1 }
0x11eb   : > { %v2182_v14 = vadd.f32 %v2181_v60, %v2141_v13 }
0x11ec   : > { %3761 = vmatpush3.bf16.msra.mxu1 %v3995_v10 }
0x11ed   : > { %v2186_v16 = vmax.f32 %v2182_v14, 0.0  ;;  %3762 = vmatprep.subr.bf16.mxu1 %v4109_v1 }
0x11ef   : > { %v2196_v17 = vpack.c.bf16 %v2186_v16, %v2185_v22 }
0x11f1   : > { %3747 = vmatmul.mubr.msk.bf16.vlgmr.msra.gmra.mxu0 %vm1094_vm3, %v2196_v17 }
0x11f2   : > { %3754 = vmatprep.mubr.msk.bf16.mxu0 %vm4110_vm0, %v4109_v1 }
0x12b1   : > { %v2263_v38 = vpop.f32.mrf.mxu0 }
0x12b2   : > { %v2264_v19 = vadd.f32 %v3463_v24, %v2263_v38 }
0x12b3   : > { %v3748_v21 = vpop.f32.mrf.mxu0 }
0x12b4   : > { %v2270_v30 = vadd.f32 %v2264_v19, %v4603_v49 }
0x12b5   : > { %v2266_v23 = vpop.f32.mrf.mxu0 }
0x12b6   : > { %v2267_v25 = vadd.f32 %v3463_v24, %v2266_v23  ;;  %v2274_v26 = vsel %vm560_vm1, %v2270_v30, 0.0  ;;  %v3996_v24 = vld [vmem:[%s5015_s10] sm:$0xff]  }
0x12b7   : > { %2275 = vadd.xlane.f32.xlu0 %v2274_v26  ;;  %v3749_v27 = vpop.f32.mrf.mxu0  ;;  %3763 = vmatpush3.bf16.msra.mxu1 %v3996_v24 }
0x12b8   : > { %v2271_v28 = vadd.f32 %v2267_v25, %v4608_v51  ;;  %v3992_v51 = vld [vmem:[%s5013_s8 + $0x8] sm:$0xff]   ;;  %2829 = vmatprep.subr.bf16.mxu1 %v4117_v45 }
0x12b9   : > { %3751 = vmatpush3.bf16.msra.mxu0 %v3992_v51 }
0x12ba   : > { %v2277_v29 = vsel %vm560_vm1, %v2271_v28, 0.0  ;;  %3752 = vmatprep.subr.bf16.mxu0 %v4109_v1 }
0x12bb   : > { %2278 = vadd.xlane.f32.xlu1 %v2277_v29 }
0x12bd   : > { %3753 = vmatpush3.bf16.msra.mxu0 %v3993_v41 }
0x12be   : > { %2651 = vmatprep.subr.bf16.mxu0 %v4117_v45 }
0x1340   : > { %v2276_v31 = vpop.xlane.xlu0 %2275 }
0x1341   : > { %v2280_v32 = vmul.f32 0.03125, %v2276_v31 }
0x1343   : > { %v2282_v33 = vsub.f32 %v2270_v30, %v2280_v32 }
0x1344   : > { %v2279_v34 = vpop.xlane.xlu1 %2278 }
0x1345   : > { %v2281_v36 = vmul.f32 0.03125, %v2279_v34  ;;  %v2284_v35 = vmul.f32 %v2282_v33, %v2282_v33 }
0x1347   : > { %v2283_v37 = vsub.f32 %v2271_v28, %v2281_v36  ;;  %v2286_v49 = vsel %vm560_vm1, %v2284_v35, 0.0 }
0x1348   : > { %2287 = vadd.xlane.f32.xlu0 %v2286_v49 }
0x1349   : > { %v2285_v39 = vmul.f32 %v2283_v37, %v2283_v37 }
0x134b   : > { %v2289_v40 = vsel %vm560_vm1, %v2285_v39, 0.0 }
0x134c   : > { %2290 = vadd.xlane.f32.xlu0 %v2289_v40 }
0x13d1   : > { %v2288_v42 = vpop.xlane.xlu0 %2287 }
0x13d2   : > { %v2292_v43 = vmul.f32 0.03125, %v2288_v42 }
0x13d4   : > { %v2294_v44 = vadd.f32 1e-05, %v2292_v43 }
0x13d5   : > { %v2291_v46 = vpop.xlane.xlu0 %2290 }
0x13d6   : > { %4081 = vrsqrt.f32 %v2294_v44  ;;  %v2293_v3 = vmul.f32 0.03125, %v2291_v46 }
0x13d8   : > { %v2295_v47 = vadd.f32 1e-05, %v2293_v3 }
0x13da   : > { %4083 = vrsqrt.f32 %v2295_v47  ;;  %v3997_v47 = vld [vmem:[%s5016_s11 + $0x38] sm:$0xff]  }
0x13e3   : > { %v4082_v48 = vpop.eup %4081 }
0x13e4   : > { %v2298_v4 = vmul.f32 %v4082_v48, %v2282_v33  ;;  %v3998_v48 = vld [vmem:[%s5016_s11 + $0x30] sm:$0xff]  }
0x13e6   : > { %v2304_v52 = vmul.f32 %v3471_v50, %v2298_v4  ;;  %v4000_v4 = vld [vmem:[%s5016_s11 + $0x20] sm:$0xff]  }
0x13e7   : > { %v4084_v53 = vpop.eup %4083 }
0x13e8   : > { %v2299_v55 = vmul.f32 %v4084_v53, %v2283_v37  ;;  %v2310_v57 = vadd.f32 %v3472_v54, %v2304_v52  ;;  %v4001_v52 = vld [vmem:[%s5016_s11 + $0x18] sm:$0xff]   ;;  %v4002_v53 = vld [vmem:[%s5016_s11 + $0x10] sm:$0xff]  }
0x13ea   : > { %v2305_v56 = vmul.f32 %v3471_v50, %v2299_v55  ;;  %v2312_v59 = vmul.f32 %v2310_v57, %v4355_v15  ;;  %v3999_v50 = vld [vmem:[%s5016_s11 + $0x28] sm:$0xff]   ;;  %v4004_v55 = vld [vmem:[%s5016_s11] sm:$0xff]  }
0x13ec   : > { %v2311_v58 = vadd.f32 %v3472_v54, %v2305_v56  ;;  %v4003_v54 = vld [vmem:[%s5016_s11 + $0x8] sm:$0xff]   ;;  %v3477_v56 = vld [vmem:[%s5014_s9 + $0x1] ss:$0 sm:$0xff] }
0x13ee   : > { %v2313_v60 = vmul.f32 %v2311_v58, %v4360_v20 }
0x13f0   : > { %v2318_v61 = vpack.c.bf16 %v2313_v60, %v2312_v59 }
0x13f2   : > { %3755 = vmatmul.mubr.msk.bf16.vlgmr.msra.gmra.mxu0 %vm560_vm1, %v2318_v61 }
0x13f3   : > { %2652 = vmatpush1.bf16.msra.mxu0 %v3997_v47 }
0x13f4   : > { %2653 = vmatprep.subr.bf16.mxu0 %v4117_v45 }
0x13f7   : > { %2654 = vmatpush1.bf16.msra.mxu0 %v3998_v48 }
0x13f8   : > { %2655 = vmatprep.subr.bf16.mxu0 %v4117_v45 }
0x13fb   : > { %2656 = vmatpush1.bf16.msra.mxu0 %v3999_v50 }
0x13fc   : > { %2657 = vmatprep.subr.bf16.mxu0 %v4117_v45 }
0x13ff   : > { %2658 = vmatpush1.bf16.msra.mxu0 %v4000_v4 }
0x1400   : > { %2659 = vmatprep.subr.bf16.mxu0 %v4117_v45 }
0x1403   : > { %2660 = vmatpush1.bf16.msra.mxu0 %v4001_v52 }
0x1404   : > { %2661 = vmatprep.subr.bf16.mxu0 %v4117_v45 }
0x1407   : > { %2662 = vmatpush1.bf16.msra.mxu0 %v4002_v53 }
0x1408   : > { %2663 = vmatprep.subr.bf16.mxu0 %v4117_v45 }
0x140b   : > { %2664 = vmatpush1.bf16.msra.mxu0 %v4003_v54 }
0x140c   : > { %2665 = vmatprep.subr.bf16.mxu0 %v4117_v45 }
0x140f   : > { %2666 = vmatpush1.bf16.msra.mxu0 %v4004_v55 }
0x1410   : > { %2679 = vmatprep.subr.bf16.mxu0 %v4117_v45 }
0x14b2   : > { %v2373_v63 = vpop.f32.mrf.mxu0 }
0x14b3   : > { %v4716_v0 = vadd.f32 %v3473_v62, %v2373_v63 }
0x14b4   : > { %v3756_v2 = vpop.f32.mrf.mxu0 }
0x14b5   : > { %2391 = vst.msk [vmem:[#allocation3 + $0x2] sm:$0xff] %vm2386_vm5, %v4716_v0 }
0x14b6   : > { %v2376_v5 = vpop.f32.mrf.mxu0 }
0x14b7   : > { %v4720_v6 = vadd.f32 %v3473_v62, %v2376_v5  ;;  %v4005_v5 = vld [vmem:[%s5016_s11 + $0x48] sm:$0xff]  }
0x14b8   : > { %v3757_v7 = vpop.f32.mrf.mxu0  ;;  %2680 = vmatpush2.bf16.msra.mxu0 %v4005_v5 }
0x14b9   : > { %2392 = vst.msk [vmem:[#allocation3 + $0xa] sm:$0xff] %vm2386_vm5, %v4720_v6  ;;  %2681 = vmatprep.subr.bf16.mxu0 %v4117_v45  ;;  %v4006_v7 = vld [vmem:[%s5016_s11 + $0x40] sm:$0xff]  }
0x14bc   : > { %v2397_v11 = vld [vmem:[#allocation3 + $0x2] sm:$0xff]  ;;  %2682 = vmatpush2.bf16.msra.mxu0 %v4006_v7 }
0x14bd   : > { %v2395_v18 = vld [vmem:[#allocation3 + $0x1] sm:$0xff]  ;;  %3007 = vmatprep.subr.bf16.mxu0 %v4117_v45 }
0x14be   : > { %v2393_v32 = vld [vmem:[#allocation3] sm:$0xff] }
0x14c0   : > { %v2398_v12 = vld [vmem:[#allocation3 + $0xa] sm:$0xff] }
0x14c1   : > { %v2396_v13 = vld [vmem:[#allocation3 + $0x9] sm:$0xff]  ;;  %v3865_v14 = vpack.i.bf16 %v2398_v12, %v2397_v11 }
0x14c2   : > { %v3860_v22 = vpack.i.bf16 %v2396_v13, %v2395_v18  ;;  %v2399_v16 = vld [vmem:[#allocation3 + $0x3] sm:$0xff]  ;;  %v2400_v17 = vld [vmem:[#allocation3 + $0xb] sm:$0xff] }
0x14c3   : > { %3866 = vrot.lane.b32.xlu0 %v3865_v14, %s5027_s20  ;;  %v3870_v38 = vpack.i.bf16 %v2400_v17, %v2399_v16  ;;  %v2401_v19 = vld [vmem:[#allocation3 + $0x4] sm:$0xff]  ;;  %v2402_v21 = vld [vmem:[#allocation3 + $0xc] sm:$0xff] }
0x14c4   : > { %3861 = vrot.lane.b32.xlu1 %v3860_v22, %s4119_s30  ;;  %v3875_v30 = vpack.i.bf16 %v2402_v21, %v2401_v19  ;;  %v2394_v33 = vld [vmem:[#allocation3 + $0x8] sm:$0xff] }
0x14c8   : > { %3871 = vrot.lane.b32.xlu1 %v3870_v38, %s4120_s17  ;;  %s528_s17 = scalar_lea.vmem %s5020_s15, %s4235_s24 }
0x14cc   : > { %3876 = vrot.lane.b32.xlu1 %v3875_v30, %s4118_s27 }
0x1535   : > { %v3867_v25 = vpop.permute.xlu0 %3866 }
0x1536   : > { %v3862_v23 = vpop.permute.xlu1 %3861  ;;  %v3869_v29 = vunpack.i.h.bf16 %v3867_v25  ;;  %v3868_v31 = vunpack.i.l.bf16 %v3867_v25 }
0x1537   : > { %v3864_v26 = vunpack.i.h.bf16 %v3862_v23  ;;  %v3863_v27 = vunpack.i.l.bf16 %v3862_v23 }
0x1539   : > { %v2435_v34 = vsel %vm2386_vm5, %v2393_v32, %v3863_v27  ;;  %v2436_v36 = vsel %vm2386_vm5, %v2394_v33, %v3864_v26 }
0x153a   : > { %v3872_v28 = vpop.permute.xlu1 %3871  ;;  %v2437_v39 = vsel %vm615_vm2, %v2435_v34, %v3868_v31  ;;  %v2438_v40 = vsel %vm615_vm2, %v2436_v36, %v3869_v29 }
0x153b   : > { %v3874_v35 = vunpack.i.h.bf16 %v3872_v28  ;;  %v3873_v37 = vunpack.i.l.bf16 %v3872_v28 }
0x153d   : > { %v2440_v42 = vsel %vm2439_vm8, %v2437_v39, %v3873_v37  ;;  %v2441_v43 = vsel %vm2439_vm8, %v2438_v40, %v3874_v35  ;;  %v4007_v39 = vld [vmem:[%s5017_s12 + $0x38] sm:$0xff]   ;;  %v4008_v40 = vld [vmem:[%s5017_s12 + $0x30] sm:$0xff]  }
0x153e   : > { %v3877_v49 = vpop.permute.xlu1 %3876 }
0x153f   : > { %v3879_v51 = vunpack.i.h.bf16 %v3877_v49  ;;  %v3878_v41 = vunpack.i.l.bf16 %v3877_v49 }
0x1541   : > { %v2442_v44 = vsel %vm560_vm1, %v2440_v42, %v3878_v41  ;;  %v2443_v46 = vsel %vm560_vm1, %v2441_v43, %v3879_v51  ;;  %v4009_v51 = vld [vmem:[%s5017_s12 + $0x28] sm:$0xff]   ;;  %v4010_v41 = vld [vmem:[%s5017_s12 + $0x20] sm:$0xff]   ;;  %v4011_v42 = vld [vmem:[%s5017_s12 + $0x18] sm:$0xff]  }
0x1542   : > { %v2444_v3 = vpack.c.bf16 %v2443_v46, %v2442_v44  ;;  %v4012_v43 = vld [vmem:[%s5017_s12 + $0x10] sm:$0xff]   ;;  %v4013_v44 = vld [vmem:[%s5017_s12 + $0x8] sm:$0xff]   ;;  %v4014_v46 = vld [vmem:[%s5017_s12] sm:$0xff]  }
0x1544   : > { %3765 = vmatmul.mubr.msk.bf16.vlgmr.msra.gmra.mxu1 %vm2464_vm9, %v2444_v3  ;;  %v3482_v3 = vld [vmem:[%s5014_s9 + $0x2] ss:$0 sm:$0xff] }
0x1545   : > { %2830 = vmatpush1.bf16.msra.mxu1 %v4007_v39 }
0x1546   : > { %2831 = vmatprep.subr.bf16.mxu1 %v4117_v45 }
0x1549   : > { %2832 = vmatpush1.bf16.msra.mxu1 %v4008_v40 }
0x154a   : > { %2833 = vmatprep.subr.bf16.mxu1 %v4117_v45 }
0x154d   : > { %2834 = vmatpush1.bf16.msra.mxu1 %v4009_v51 }
0x154e   : > { %2835 = vmatprep.subr.bf16.mxu1 %v4117_v45 }
0x1551   : > { %2836 = vmatpush1.bf16.msra.mxu1 %v4010_v41 }
0x1552   : > { %2837 = vmatprep.subr.bf16.mxu1 %v4117_v45 }
0x1555   : > { %2838 = vmatpush1.bf16.msra.mxu1 %v4011_v42 }
0x1556   : > { %2839 = vmatprep.subr.bf16.mxu1 %v4117_v45 }
0x1559   : > { %2840 = vmatpush1.bf16.msra.mxu1 %v4012_v43 }
0x155a   : > { %2841 = vmatprep.subr.bf16.mxu1 %v4117_v45 }
0x155d   : > { %2842 = vmatpush1.bf16.msra.mxu1 %v4013_v44 }
0x155e   : > { %2843 = vmatprep.subr.bf16.mxu1 %v4117_v45 }
0x1561   : > { %2844 = vmatpush1.bf16.msra.mxu1 %v4014_v46 }
0x1562   : > { %2857 = vmatprep.subr.bf16.mxu1 %v4117_v45 }
0x1604   : > { %v2506_v57 = vpop.f32.mrf.mxu1 }
0x1605   : > { %v2507_v58 = vadd.f32 %v3477_v56, %v2506_v57  ;;  %v4016_v57 = vld [vmem:[%s5017_s12 + $0x40] sm:$0xff]  }
0x1606   : > { %v3766_v59 = vpop.f32.mrf.mxu1 }
0x1607   : > { %4085 = vtanh.f32 %v2507_v58 }
0x1608   : > { %v2509_v60 = vpop.f32.mrf.mxu1 }
0x1609   : > { %v2510_v61 = vadd.f32 %v3477_v56, %v2509_v60  ;;  %v4015_v56 = vld [vmem:[%s5017_s12 + $0x48] sm:$0xff]  }
0x160a   : > { %v3767_v62 = vpop.f32.mrf.mxu1  ;;  %2858 = vmatpush2.bf16.msra.mxu1 %v4015_v56 }
0x160b   : > { %4087 = vtanh.f32 %v2510_v61  ;;  %2859 = vmatprep.subr.bf16.mxu1 %v4117_v45 }
0x160e   : > { %2860 = vmatpush2.bf16.msra.mxu1 %v4016_v57 }
0x160f   : > { %3185 = vmatprep.subr.bf16.mxu1 %v4117_v45 }
0x1614   : > { %v4086_v63 = vpop.eup %4085 }
0x1615   : > { %2540 = vst.msk [vmem:[#allocation4 + $0x2] sm:$0xff] %vm560_vm1, %v4086_v63 }
0x1618   : > { %v4088_v2 = vpop.eup %4087 }
0x1619   : > { %2541 = vst.msk [vmem:[#allocation4 + $0xa] sm:$0xff] %vm560_vm1, %v4088_v2 }
0x161c   : > { %v2546_v8 = vld [vmem:[#allocation4 + $0x2] sm:$0xff] }
0x161d   : > { %v2544_v9 = vld [vmem:[#allocation4 + $0x1] sm:$0xff] }
0x161e   : > { %v2542_v10 = vld [vmem:[#allocation4] sm:$0xff] }
0x1620   : > { %v2550_v11 = vld [vmem:[#allocation4 + $0x4] sm:$0xff]  ;;  %v2551_v12 = vld [vmem:[#allocation4 + $0xc] sm:$0xff] }
0x1621   : > { %v2547_v18 = vld [vmem:[#allocation4 + $0xa] sm:$0xff]  ;;  %v2583_v13 = vpack.c.bf16 %v2551_v12, %v2550_v11 }
0x1622   : > { %v2549_v14 = vld [vmem:[#allocation4 + $0xb] sm:$0xff]  ;;  %v3885_v22 = vpack.i.bf16 %v2547_v18, %v2546_v8  ;;  %v2548_v17 = vld [vmem:[#allocation4 + $0x3] sm:$0xff] }
0x1623   : > { %v2545_v16 = vld [vmem:[#allocation4 + $0x9] sm:$0xff]  ;;  %2715 = vst.msk [vmem:[#allocation4] sm:$0xff] %vm560_vm1, %v4109_v1  ;;  %3493 = vmatprep.mubr.msk.bf16.mxu0 %vm560_vm1, %v2583_v13  ;;  %v3890_v19 = vpack.i.bf16 %v2549_v14, %v2548_v17 }
0x1624   : > { %2717 = vst.msk [vmem:[#allocation4 + $0x10] sm:$0xf] %vm2538_vm10, %v4109_v1  ;;  %v3880_v24 = vpack.i.bf16 %v2545_v16, %v2544_v9  ;;  %v2543_v38 = vld [vmem:[#allocation4 + $0x8] sm:$0xff]  ;;  %3886 = vrot.lane.b32.xlu1 %v3885_v22, %s4115_s23 }
0x1625   : > { %2716 = vst.msk [vmem:[#allocation4 + $0x8] sm:$0xff] %vm560_vm1, %v4109_v1 }
0x1626   : > { %3881 = vrot.lane.b32.xlu0 %v3880_v24, %s4118_s27 }
0x162a   : > { %3891 = vrot.lane.b32.xlu0 %v3890_v19, %s5028_s29 }
0x1696   : > { %v3887_v21 = vpop.permute.xlu1 %3886 }
0x1697   : > { %v3889_v26 = vunpack.i.h.bf16 %v3887_v21  ;;  %v3888_v27 = vunpack.i.l.bf16 %v3887_v21 }
0x1698   : > { %v3882_v30 = vpop.permute.xlu0 %3881 }
0x1699   : > { %v3884_v23 = vunpack.i.h.bf16 %v3882_v30  ;;  %v3883_v25 = vunpack.i.l.bf16 %v3882_v30 }
0x169b   : > { %v2576_v28 = vsel %vm560_vm1, %v2542_v10, %v3883_v25  ;;  %v2577_v29 = vsel %vm560_vm1, %v2543_v38, %v3884_v23 }
0x169c   : > { %v3892_v31 = vpop.permute.xlu0 %3891  ;;  %v2578_v34 = vsel %vm1094_vm3, %v2576_v28, %v3888_v27  ;;  %v2579_v36 = vsel %vm1094_vm3, %v2577_v29, %v3889_v26  ;;  %v4017_v29 = vld [vmem:[%s5018_s13 + $0x38] sm:$0xff]  }
0x169d   : > { %v3894_v32 = vunpack.i.h.bf16 %v3892_v31  ;;  %v3893_v33 = vunpack.i.l.bf16 %v3892_v31  ;;  %v4018_v31 = vld [vmem:[%s5018_s13 + $0x30] sm:$0xff]  }
0x169f   : > { %v2580_v35 = vsel %vm1097_vm4, %v2578_v34, %v3893_v33  ;;  %v2581_v37 = vsel %vm1097_vm4, %v2579_v36, %v3894_v32  ;;  %v4019_v32 = vld [vmem:[%s5018_s13 + $0x28] sm:$0xff]   ;;  %v4020_v33 = vld [vmem:[%s5018_s13 + $0x20] sm:$0xff]   ;;  %v4021_v34 = vld [vmem:[%s5018_s13 + $0x18] sm:$0xff]  }
0x16a0   : > { %v2582_v49 = vpack.c.bf16 %v2581_v37, %v2580_v35  ;;  %v4022_v36 = vld [vmem:[%s5018_s13 + $0x10] sm:$0xff]   ;;  %v4023_v35 = vld [vmem:[%s5018_s13 + $0x8] sm:$0xff]   ;;  %v4024_v37 = vld [vmem:[%s5018_s13] sm:$0xff]  }
0x16a2   : > { %2684 = vmatmul.mubr.bf16.vlgmr.msra.gmra.mxu0 %v2582_v49  ;;  %v3494_v49 = vld [vmem:[%s5014_s9 + $0x3] ss:$0 sm:$0xff] }
0x16a3   : > { %3008 = vmatpush1.bf16.msra.mxu0 %v4017_v29 }
0x16a4   : > { %3009 = vmatprep.subr.bf16.mxu0 %v4117_v45 }
0x16a7   : > { %3010 = vmatpush1.bf16.msra.mxu0 %v4018_v31 }
0x16a8   : > { %3011 = vmatprep.subr.bf16.mxu0 %v4117_v45 }
0x16ab   : > { %3012 = vmatpush1.bf16.msra.mxu0 %v4019_v32 }
0x16ac   : > { %3013 = vmatprep.subr.bf16.mxu0 %v4117_v45 }
0x16af   : > { %3014 = vmatpush1.bf16.msra.mxu0 %v4020_v33 }
0x16b0   : > { %3015 = vmatprep.subr.bf16.mxu0 %v4117_v45 }
0x16b3   : > { %3016 = vmatpush1.bf16.msra.mxu0 %v4021_v34 }
0x16b4   : > { %3017 = vmatprep.subr.bf16.mxu0 %v4117_v45 }
0x16b7   : > { %3018 = vmatpush1.bf16.msra.mxu0 %v4022_v36 }
0x16b8   : > { %3019 = vmatprep.subr.bf16.mxu0 %v4117_v45 }
0x16bb   : > { %3020 = vmatpush1.bf16.msra.mxu0 %v4023_v35 }
0x16bc   : > { %3021 = vmatprep.subr.bf16.mxu0 %v4117_v45 }
0x16bf   : > { %3022 = vmatpush1.bf16.msra.mxu0 %v4024_v37  ;;  %v4035_v37 = vld [vmem:[%s5019_s14 + $0x48] sm:$0xff]  }
0x16c0   : > { %3035 = vmatprep.subr.bf16.mxu0 %v4117_v45 }
0x1762   : > { %v2685_v47 = vpop.f32.mrf.mxu0 }
0x1763   : > { %v2686_v48 = vadd.f32 %v3482_v3, %v2685_v47  ;;  %v4026_v47 = vld [vmem:[%s5018_s13 + $0x40] sm:$0xff]  }
0x1764   : > { %v2687_v50 = vpop.f32.mrf.mxu0 }
0x1765   : > { %4089 = vtanh.f32 %v2686_v48 }
0x1766   : > { %v2688_v4 = vpop.f32.mrf.mxu0 }
0x1767   : > { %v2689_v52 = vadd.f32 %v3482_v3, %v2688_v4  ;;  %v4025_v3 = vld [vmem:[%s5018_s13 + $0x48] sm:$0xff]  }
0x1768   : > { %v2690_v53 = vpop.f32.mrf.mxu0  ;;  %3036 = vmatpush2.bf16.msra.mxu0 %v4025_v3 }
0x1769   : > { %4091 = vtanh.f32 %v2689_v52  ;;  %3037 = vmatprep.subr.bf16.mxu0 %v4117_v45 }
0x176c   : > { %3038 = vmatpush2.bf16.msra.mxu0 %v4026_v47 }
0x1772   : > { %v4090_v54 = vpop.eup %4089 }
0x1773   : > { %2718 = vst.msk [vmem:[#allocation4 + $0x2] sm:$0xff] %vm560_vm1, %v4090_v54 }
0x1776   : > { %v4092_v55 = vpop.eup %4091 }
0x1777   : > { %2719 = vst.msk [vmem:[#allocation4 + $0xa] sm:$0xff] %vm560_vm1, %v4092_v55 }
0x177a   : > { %v2724_v58 = vld [vmem:[#allocation4 + $0x2] sm:$0xff] }
0x177b   : > { %v2722_v59 = vld [vmem:[#allocation4 + $0x1] sm:$0xff] }
0x177c   : > { %v2720_v60 = vld [vmem:[#allocation4] sm:$0xff] }
0x177e   : > { %v2728_v61 = vld [vmem:[#allocation4 + $0x4] sm:$0xff]  ;;  %v2729_v62 = vld [vmem:[#allocation4 + $0xc] sm:$0xff] }
0x177f   : > { %v2725_v63 = vld [vmem:[#allocation4 + $0xa] sm:$0xff]  ;;  %v2761_v2 = vpack.c.bf16 %v2729_v62, %v2728_v61 }
0x1780   : > { %v3900_v5 = vpack.i.bf16 %v2725_v63, %v2724_v58  ;;  %v2723_v7 = vld [vmem:[#allocation4 + $0x9] sm:$0xff] }
0x1781   : > { %v2726_v8 = vld [vmem:[#allocation4 + $0x3] sm:$0xff]  ;;  %v2727_v9 = vld [vmem:[#allocation4 + $0xb] sm:$0xff]  ;;  %v3895_v10 = vpack.i.bf16 %v2723_v7, %v2722_v59  ;;  %3505 = vmatprep.mubr.msk.bf16.mxu1 %vm560_vm1, %v2761_v2 }
0x1782   : > { %2895 = vst.msk [vmem:[#allocation4 + $0x10] sm:$0xf] %vm2538_vm10, %v4109_v1  ;;  %v2721_v11 = vld [vmem:[#allocation4 + $0x8] sm:$0xff]  ;;  %3901 = vrot.lane.b32.xlu0 %v3900_v5, %s4115_s23  ;;  %v3905_v12 = vpack.i.bf16 %v2727_v9, %v2726_v8 }
0x1783   : > { %2893 = vst.msk [vmem:[#allocation4] sm:$0xff] %vm560_vm1, %v4109_v1  ;;  %2894 = vst.msk [vmem:[#allocation4 + $0x8] sm:$0xff] %vm560_vm1, %v4109_v1  ;;  %3896 = vrot.lane.b32.xlu1 %v3895_v10, %s4118_s27 }
0x1787   : > { %3906 = vrot.lane.b32.xlu1 %v3905_v12, %s5028_s29 }
0x17f4   : > { %v3902_v18 = vpop.permute.xlu0 %3901 }
0x17f5   : > { %v3897_v13 = vpop.permute.xlu1 %3896  ;;  %v3904_v16 = vunpack.i.h.bf16 %v3902_v18  ;;  %v3903_v17 = vunpack.i.l.bf16 %v3902_v18 }
0x17f6   : > { %v3899_v14 = vunpack.i.h.bf16 %v3897_v13  ;;  %v3898_v22 = vunpack.i.l.bf16 %v3897_v13 }
0x17f8   : > { %v2754_v24 = vsel %vm560_vm1, %v2720_v60, %v3898_v22  ;;  %v2755_v38 = vsel %vm560_vm1, %v2721_v11, %v3899_v14 }
0x17f9   : > { %v3907_v19 = vpop.permute.xlu1 %3906  ;;  %v2756_v23 = vsel %vm1094_vm3, %v2754_v24, %v3903_v17  ;;  %v2757_v25 = vsel %vm1094_vm3, %v2755_v38, %v3904_v16  ;;  %v4027_v24 = vld [vmem:[%s5019_s14 + $0x38] sm:$0xff]   ;;  %v4028_v38 = vld [vmem:[%s5019_s14 + $0x30] sm:$0xff]  }
0x17fa   : > { %v3909_v21 = vunpack.i.h.bf16 %v3907_v19  ;;  %v3908_v30 = vunpack.i.l.bf16 %v3907_v19  ;;  %v4029_v19 = vld [vmem:[%s5019_s14 + $0x28] sm:$0xff]  }
0x17fc   : > { %v2758_v26 = vsel %vm1097_vm4, %v2756_v23, %v3908_v30  ;;  %v2759_v27 = vsel %vm1097_vm4, %v2757_v25, %v3909_v21  ;;  %v4030_v21 = vld [vmem:[%s5019_s14 + $0x20] sm:$0xff]   ;;  %v4031_v30 = vld [vmem:[%s5019_s14 + $0x18] sm:$0xff]   ;;  %v4032_v23 = vld [vmem:[%s5019_s14 + $0x10] sm:$0xff]  }
0x17fd   : > { %v2760_v28 = vpack.c.bf16 %v2759_v27, %v2758_v26  ;;  %v4033_v25 = vld [vmem:[%s5019_s14 + $0x8] sm:$0xff]   ;;  %v4034_v26 = vld [vmem:[%s5019_s14] sm:$0xff]  }
0x17fe   : > { %v3506_v27 = vld [vmem:[%s5014_s9 + $0x4] ss:$0 sm:$0xff] }
0x17ff   : > { %2862 = vmatmul.mubr.bf16.vlgmr.msra.gmra.mxu1 %v2760_v28 }
0x1800   : > { %3186 = vmatpush1.bf16.msra.mxu1 %v4027_v24 }
0x1801   : > { %3187 = vmatprep.subr.bf16.mxu1 %v4117_v45 }
0x1804   : > { %3188 = vmatpush1.bf16.msra.mxu1 %v4028_v38 }
0x1805   : > { %3189 = vmatprep.subr.bf16.mxu1 %v4117_v45 }
0x1808   : > { %3190 = vmatpush1.bf16.msra.mxu1 %v4029_v19 }
0x1809   : > { %3191 = vmatprep.subr.bf16.mxu1 %v4117_v45 }
0x180c   : > { %3192 = vmatpush1.bf16.msra.mxu1 %v4030_v21 }
0x180d   : > { %3193 = vmatprep.subr.bf16.mxu1 %v4117_v45 }
0x1810   : > { %3194 = vmatpush1.bf16.msra.mxu1 %v4031_v30 }
0x1811   : > { %3195 = vmatprep.subr.bf16.mxu1 %v4117_v45 }
0x1814   : > { %3196 = vmatpush1.bf16.msra.mxu1 %v4032_v23 }
0x1815   : > { %3197 = vmatprep.subr.bf16.mxu1 %v4117_v45 }
0x1818   : > { %3198 = vmatpush1.bf16.msra.mxu1 %v4033_v25 }
0x1819   : > { %3199 = vmatprep.subr.bf16.mxu1 %v4117_v45 }
0x181c   : > { %3200 = vmatpush1.bf16.msra.mxu1 %v4034_v26 }
0x181d   : > { %3213 = vmatprep.subr.bf16.mxu1 %v4117_v45 }
0x1820   : > { %3214 = vmatpush2.bf16.msra.mxu1 %v4035_v37 }
0x1821   : > { %3215 = vmatprep.subr.bf16.mxu1 %v4117_v45 }
0x18bf   : > { %v2863_v39 = vpop.f32.mrf.mxu1 }
0x18c0   : > { %v2864_v40 = vadd.f32 %v3494_v49, %v2863_v39 }
0x18c1   : > { %v2865_v51 = vpop.f32.mrf.mxu1 }
0x18c2   : > { %4093 = vtanh.f32 %v2864_v40 }
0x18c3   : > { %v2866_v41 = vpop.f32.mrf.mxu1 }
0x18c4   : > { %v2867_v42 = vadd.f32 %v3494_v49, %v2866_v41  ;;  %v4036_v49 = vld [vmem:[%s5019_s14 + $0x40] sm:$0xff]  }
0x18c5   : > { %v2868_v43 = vpop.f32.mrf.mxu1  ;;  %3216 = vmatpush2.bf16.msra.mxu1 %v4036_v49 }
0x18c6   : > { %4095 = vtanh.f32 %v2867_v42 }
0x18cf   : > { %v4094_v44 = vpop.eup %4093 }
0x18d0   : > { %2896 = vst.msk [vmem:[#allocation4 + $0x2] sm:$0xff] %vm560_vm1, %v4094_v44 }
0x18d3   : > { %v4096_v46 = vpop.eup %4095 }
0x18d4   : > { %2897 = vst.msk [vmem:[#allocation4 + $0xa] sm:$0xff] %vm560_vm1, %v4096_v46 }
0x18d7   : > { %v2902_v48 = vld [vmem:[#allocation4 + $0x2] sm:$0xff] }
0x18d8   : > { %v2900_v50 = vld [vmem:[#allocation4 + $0x1] sm:$0xff] }
0x18d9   : > { %v2898_v4 = vld [vmem:[#allocation4] sm:$0xff] }
0x18db   : > { %v2906_v52 = vld [vmem:[#allocation4 + $0x4] sm:$0xff]  ;;  %v2907_v53 = vld [vmem:[#allocation4 + $0xc] sm:$0xff] }
0x18dc   : > { %v2903_v54 = vld [vmem:[#allocation4 + $0xa] sm:$0xff]  ;;  %v2939_v55 = vpack.c.bf16 %v2907_v53, %v2906_v52 }
0x18dd   : > { %v3915_v56 = vpack.i.bf16 %v2903_v54, %v2902_v48  ;;  %v2901_v57 = vld [vmem:[#allocation4 + $0x9] sm:$0xff] }
0x18de   : > { %v2904_v58 = vld [vmem:[#allocation4 + $0x3] sm:$0xff]  ;;  %v2905_v59 = vld [vmem:[#allocation4 + $0xb] sm:$0xff]  ;;  %v3910_v60 = vpack.i.bf16 %v2901_v57, %v2900_v50  ;;  %3517 = vmatprep.mubr.msk.bf16.mxu0 %vm560_vm1, %v2939_v55 }
0x18df   : > { %3073 = vst.msk [vmem:[#allocation4 + $0x10] sm:$0xf] %vm2538_vm10, %v4109_v1  ;;  %v2899_v61 = vld [vmem:[#allocation4 + $0x8] sm:$0xff]  ;;  %3916 = vrot.lane.b32.xlu1 %v3915_v56, %s4115_s23  ;;  %v3920_v62 = vpack.i.bf16 %v2905_v59, %v2904_v58 }
0x18e0   : > { %3071 = vst.msk [vmem:[#allocation4] sm:$0xff] %vm560_vm1, %v4109_v1  ;;  %3072 = vst.msk [vmem:[#allocation4 + $0x8] sm:$0xff] %vm560_vm1, %v4109_v1  ;;  %3911 = vrot.lane.b32.xlu0 %v3910_v60, %s4118_s27 }
0x18e4   : > { %3921 = vrot.lane.b32.xlu0 %v3920_v62, %s5028_s29 }
0x1951   : > { %v3917_v63 = vpop.permute.xlu1 %3916 }
0x1952   : > { %v3912_v2 = vpop.permute.xlu0 %3911  ;;  %v3919_v8 = vunpack.i.h.bf16 %v3917_v63  ;;  %v3918_v9 = vunpack.i.l.bf16 %v3917_v63 }
0x1953   : > { %v3914_v5 = vunpack.i.h.bf16 %v3912_v2  ;;  %v3913_v7 = vunpack.i.l.bf16 %v3912_v2 }
0x1955   : > { %v2932_v10 = vsel %vm560_vm1, %v2898_v4, %v3913_v7  ;;  %v2933_v11 = vsel %vm560_vm1, %v2899_v61, %v3914_v5 }
0x1956   : > { %v3922_v12 = vpop.permute.xlu0 %3921  ;;  %v2934_v1 = vsel %vm1094_vm3, %v2932_v10, %v3918_v9  ;;  %v2935_v14 = vsel %vm1094_vm3, %v2933_v11, %v3919_v8  ;;  %v3518_v9 = vld [vmem:[%s5014_s9 + $0x5] ss:$0 sm:$0xff] }
0x1957   : > { %v3924_v18 = vunpack.i.h.bf16 %v3922_v12  ;;  %v3923_v13 = vunpack.i.l.bf16 %v3922_v12 }
0x1959   : > { %v2936_v22 = vsel %vm1097_vm4, %v2934_v1, %v3923_v13  ;;  %v2937_v16 = vsel %vm1097_vm4, %v2935_v14, %v3924_v18 }
0x195a   : > { %v2938_v17 = vpack.c.bf16 %v2937_v16, %v2936_v22 }
0x195c   : > { %3040 = vmatmul.mubr.bf16.vlgmr.msra.gmra.mxu0 %v2938_v17 }
0x1a1c   : > { %v3041_v28 = vpop.f32.mrf.mxu0 }
0x1a1d   : > { %v3042_v29 = vadd.f32 %v3506_v27, %v3041_v28 }
0x1a1e   : > { %v3043_v31 = vpop.f32.mrf.mxu0 }
0x1a1f   : > { %4097 = vtanh.f32 %v3042_v29 }
0x1a20   : > { %v3044_v32 = vpop.f32.mrf.mxu0 }
0x1a21   : > { %v3045_v33 = vadd.f32 %v3506_v27, %v3044_v32 }
0x1a22   : > { %v3046_v34 = vpop.f32.mrf.mxu0 }
0x1a23   : > { %4099 = vtanh.f32 %v3045_v33 }
0x1a2c   : > { %v4098_v36 = vpop.eup %4097 }
0x1a2d   : > { %3074 = vst.msk [vmem:[#allocation4 + $0x2] sm:$0xff] %vm560_vm1, %v4098_v36 }
0x1a30   : > { %v4100_v35 = vpop.eup %4099 }
0x1a31   : > { %3075 = vst.msk [vmem:[#allocation4 + $0xa] sm:$0xff] %vm560_vm1, %v4100_v35 }
0x1a34   : > { %v3080_v39 = vld [vmem:[#allocation4 + $0x2] sm:$0xff] }
0x1a35   : > { %v3078_v44 = vld [vmem:[#allocation4 + $0x1] sm:$0xff] }
0x1a36   : > { %v3076_v56 = vld [vmem:[#allocation4] sm:$0xff] }
0x1a38   : > { %v3084_v40 = vld [vmem:[#allocation4 + $0x4] sm:$0xff]  ;;  %v3085_v51 = vld [vmem:[#allocation4 + $0xc] sm:$0xff] }
0x1a39   : > { %v3081_v41 = vld [vmem:[#allocation4 + $0xa] sm:$0xff]  ;;  %v3117_v42 = vpack.c.bf16 %v3085_v51, %v3084_v40 }
0x1a3a   : > { %v3930_v43 = vpack.i.bf16 %v3081_v41, %v3080_v39  ;;  %v3079_v46 = vld [vmem:[#allocation4 + $0x9] sm:$0xff] }
0x1a3b   : > { %v3925_v3 = vpack.i.bf16 %v3079_v46, %v3078_v44  ;;  %3529 = vmatprep.mubr.msk.bf16.mxu1 %vm560_vm1, %v3117_v42  ;;  %v3082_v47 = vld [vmem:[#allocation4 + $0x3] sm:$0xff]  ;;  %v3083_v45 = vld [vmem:[#allocation4 + $0xb] sm:$0xff] }
0x1a3c   : > { %3931 = vrot.lane.b32.xlu0 %v3930_v43, %s4115_s23  ;;  %v3935_v48 = vpack.i.bf16 %v3083_v45, %v3082_v47  ;;  %v3077_v57 = vld [vmem:[#allocation4 + $0x8] sm:$0xff] }
0x1a3d   : > { %3926 = vrot.lane.b32.xlu1 %v3925_v3, %s4118_s27 }
0x1a41   : > { %3936 = vrot.lane.b32.xlu1 %v3935_v48, %s5028_s29 }
0x1aae   : > { %v3932_v50 = vpop.permute.xlu0 %3931 }
0x1aaf   : > { %v3927_v4 = vpop.permute.xlu1 %3926  ;;  %v3934_v54 = vunpack.i.h.bf16 %v3932_v50  ;;  %v3933_v55 = vunpack.i.l.bf16 %v3932_v50 }
0x1ab0   : > { %v3929_v52 = vunpack.i.h.bf16 %v3927_v4  ;;  %v3928_v53 = vunpack.i.l.bf16 %v3927_v4 }
0x1ab2   : > { %v3110_v58 = vsel %vm560_vm1, %v3076_v56, %v3928_v53  ;;  %v3111_v59 = vsel %vm560_vm1, %v3077_v57, %v3929_v52 }
0x1ab3   : > { %v3937_v60 = vpop.permute.xlu1 %3936  ;;  %v3112_v63 = vsel %vm1094_vm3, %v3110_v58, %v3933_v55  ;;  %v3113_v2 = vsel %vm1094_vm3, %v3111_v59, %v3934_v54 }
0x1ab4   : > { %v3939_v61 = vunpack.i.h.bf16 %v3937_v60  ;;  %v3938_v62 = vunpack.i.l.bf16 %v3937_v60 }
0x1ab6   : > { %v3114_v5 = vsel %vm1097_vm4, %v3112_v63, %v3938_v62  ;;  %v3115_v7 = vsel %vm1097_vm4, %v3113_v2, %v3939_v61 }
0x1ab7   : > { %v3116_v8 = vpack.c.bf16 %v3115_v7, %v3114_v5 }
0x1ab9   : > { %3218 = vmatmul.mubr.bf16.vlgmr.msra.gmra.mxu1 %v3116_v8 }
0x1b79   : > { %v3219_v10 = vpop.f32.mrf.mxu1 }
0x1b7a   : > { %v3220_v11 = vadd.f32 %v3518_v9, %v3219_v10 }
0x1b7b   : > { %v3221_v12 = vpop.f32.mrf.mxu1 }
0x1b7c   : > { %v3226_v18 = vadd.f32 %v3220_v11, %v4716_v0 }
0x1b7d   : > { %v3222_v13 = vpop.f32.mrf.mxu1 }
0x1b7e   : > { %v3223_v1 = vadd.f32 %v3518_v9, %v3222_v13  ;;  %3230 = vrot.lane.b32.xlu0 %v3226_v18, %s4119_s30 }
0x1b7f   : > { %v3224_v14 = vpop.f32.mrf.mxu1 }
0x1b80   : > { %v3227_v22 = vadd.f32 %v3223_v1, %v4720_v6 }
0x1b82   : > { %3232 = vrot.lane.b32.xlu1 %v3227_v22, %s4119_s30 }
0x1bf0   : > { %v3231_v16 = vpop.permute.xlu0 %3230 }
0x1bf1   : > { %v3236_v17 = vsel %vm2386_vm5, %v4716_v0, %v3231_v16 }
0x1bf2   : > { %v3238_v24 = vmul.f32 %v3236_v17, %v4355_v15 }
0x1bf4   : > { %3240 = vst.msk [vmem:[%s528_s17] sm:$0xff] %vm615_vm2, %v3238_v24  ;;  %v3233_v38 = vpop.permute.xlu1 %3232 }
0x1bf5   : > { %v3237_v19 = vsel %vm2386_vm5, %v4720_v6, %v3233_v38 }
0x1bf6   : > { %v3239_v21 = vmul.f32 %v3237_v19, %v4360_v20 }
0x1bf8   : > { %3241 = vst.msk [vmem:[%s528_s17 + $0x8] sm:$0xff] %vm615_vm2, %v3239_v21 }
0x1bf9 PF: > { %s25_s18 = sadd.s32 1, %s4107_s18  }
0x1bfa   : > { %p22_p4 = scmp.ge.s32.totalorder %s25_s18, 4  }
0x1bfc   :  { %24 = sbr.rel (!%p22_p4) target bundleno = 1 (0x1), region = 121 }

</bundles_post_ra>
